<compile_context>
chip_gen: v5e
topology: v5e:2x2
jax: 0.10.0
libtpu: 0.0.40
codegen_flags: <defaults>
</compile_context>

<pallas_src>
import functools

import jax
import jax.numpy as jnp
from jax import lax
from jax.experimental import pallas as pl
from jax.experimental.pallas import tpu as pltpu


def _focal_ori_kernel(x_ref, t_ref, cos_ref, sin_ref,        # inputs
                      bce_ref, coh_ref,                       # per-batch outputs
                      maps_ref,                               # VMEM scratch (4, H, W)
                      *, gamma, eps, th, hh, ww):
    h = pl.program_id(1)
    n_h = pl.num_programs(1)

    x = x_ref[0].astype(jnp.float32)          # (C, TH, W)
    t = t_ref[0].astype(jnp.float32)          # (C, TH, W)
    cosw = cos_ref[...]                       # (C, 1, W) -- broadcasts over sublanes
    sinw = sin_ref[...]                       # (C, 1, W)

    # --- fused softmax statistics: never materialize p or log_p -------------------
    m = jnp.max(x, axis=0, keepdims=True)     # (1, TH, W)
    z = x - m                                 # (C, TH, W)
    e = jnp.exp(z)                            # (C, TH, W)
    denom = jnp.sum(e, axis=0)                # (TH, W)
    inv_denom = 1.0 / denom                   # exact reciprocal (feeds pt / orientation)
    log_denom = jnp.log(denom)

    s_te = jnp.sum(t * e, axis=0)             # (TH, W)
    s_tz = jnp.sum(t * z, axis=0)             # (TH, W)
    s_t = jnp.sum(t, axis=0)                  # (TH, W)
    s_ce = jnp.sum(e * cosw, axis=0)          # (TH, W)
    s_se = jnp.sum(e * sinw, axis=0)          # (TH, W)

    pt = s_te * inv_denom
    log_pt = s_tz - s_t * log_denom
    # clamp ULP overshoot of pt beyond 1.0 (safe also for fractional gamma)
    one_m_pt = jnp.maximum(1.0 - pt, 0.0)
    bce = -(one_m_pt ** gamma) * log_pt       # (TH, W) focal term per pixel

    cos_ori = s_ce * inv_denom
    sin_ori = s_se * inv_denom
    mod_ori = jnp.sqrt(sin_ori * sin_ori + cos_ori * cos_ori)

    # --- stash per-pixel maps for this H tile --------------------------------------
    r0 = pl.multiple_of(h * th, th)
    maps_ref[0, pl.ds(r0, th), :] = cos_ori
    maps_ref[1, pl.ds(r0, th), :] = sin_ori
    maps_ref[2, pl.ds(r0, th), :] = mod_ori
    maps_ref[3, pl.ds(r0, th), :] = bce

    # --- last H tile of this batch: box conv + coherence + single reduction --------
    @pl.when(h == n_h - 1)
    def _():
        lane = lax.broadcasted_iota(jnp.int32, (hh, ww), 1)
        sub = lax.broadcasted_iota(jnp.int32, (hh, ww), 0)

        def box3(mm):
            # 3x3 all-ones/9 conv with zero padding == shift+add on XLU/VPU slots.
            left = jnp.where(lane >= 1, pltpu.roll(mm, 1, axis=1), 0.0)
            right = jnp.where(lane <= ww - 2, pltpu.roll(mm, ww - 1, axis=1), 0.0)
            s = left + mm + right
            up = jnp.where(sub >= 1, pltpu.roll(s, 1, axis=0), 0.0)
            down = jnp.where(sub <= hh - 2, pltpu.roll(s, hh - 1, axis=0), 0.0)
            return (up + s + down) * (1.0 / 9.0)

        cos_c = box3(maps_ref[0])
        sin_c = box3(maps_ref[1])
        mod_c = box3(maps_ref[2])
        coherence = jnp.sqrt(sin_c * sin_c + cos_c * cos_c) / jnp.maximum(mod_c, eps)

        bce_ref[0] = jnp.sum(maps_ref[3], keepdims=True)    # (1, 1)
        coh_ref[0] = jnp.sum(coherence, keepdims=True)      # (1, 1)


def _pick_tile_h(H, W, C, itemsize, max_block_bytes):
    """Largest H-tile dividing H (multiple of 8, or H itself) within the VMEM budget."""
    divs = [d for d in range(1, H + 1) if H % d == 0 and (d % 8 == 0 or d == H)]
    fitting = [d for d in divs if C * d * W * itemsize <= max_block_bytes]
    return max(fitting) if fitting else min(divs)


def focal_ori_loss(x_nchw, t_nchw, *, ang_stride=2, gamma=2, coh_weight=1.0,
                   eps=1e-6, max_block_bytes=2 << 20):
    N, C, H, W = x_nchw.shape
    assert t_nchw.shape == x_nchw.shape

    # deterministic "parameters" of CoherenceLoss (per-channel orientation weights)
    ang = (jnp.arange(ang_stride / 2, 180, ang_stride, dtype=jnp.float32)
           / 90.0) * jnp.float32(jnp.pi)
    assert ang.shape[0] == C, "channel count must match 180/ang_stride"
    cosw = jnp.broadcast_to(jnp.cos(ang).reshape(C, 1, 1), (C, 1, W)).astype(jnp.float32)
    sinw = jnp.broadcast_to(jnp.sin(ang).reshape(C, 1, 1), (C, 1, W)).astype(jnp.float32)

    itemsize = max(x_nchw.dtype.itemsize, t_nchw.dtype.itemsize)
    TH = _pick_tile_h(H, W, C, itemsize, max_block_bytes)
    n_h = H // TH

    kernel = functools.partial(_focal_ori_kernel, gamma=gamma, eps=float(eps),
                               th=TH, hh=H, ww=W)

    bce_sums, coh_sums = pl.pallas_call(
        kernel,
        out_shape=(jax.ShapeDtypeStruct((N, 1, 1), jnp.float32),
                   jax.ShapeDtypeStruct((N, 1, 1), jnp.float32)),
        grid_spec=pltpu.PrefetchScalarGridSpec(
            num_scalar_prefetch=0,
            grid=(N, n_h),
            in_specs=[
                pl.BlockSpec((1, C, TH, W), lambda b, h: (b, 0, h, 0)),   # x (NCHW)
                pl.BlockSpec((1, C, TH, W), lambda b, h: (b, 0, h, 0)),   # t (NCHW)
                pl.BlockSpec((C, 1, W), lambda b, h: (0, 0, 0)),          # cos weights
                pl.BlockSpec((C, 1, W), lambda b, h: (0, 0, 0)),          # sin weights
            ],
            out_specs=[
                pl.BlockSpec((1, 1, 1), lambda b, h: (b, 0, 0)),          # per-batch bce sum
                pl.BlockSpec((1, 1, 1), lambda b, h: (b, 0, 0)),          # per-batch coh sum
            ],
            scratch_shapes=[pltpu.VMEM((4, H, W), jnp.float32)],
        ),
        compiler_params=pltpu.CompilerParams(
            dimension_semantics=("parallel", "arbitrary")),
    )(x_nchw, t_nchw, cosw, sinw)

    # scalar epilogue in plain XLA (keeps the batch grid axis fully parallel)
    n_pix = float(N * H * W)
    bce_mean = jnp.sum(bce_sums) / n_pix
    coh_mean = jnp.sum(coh_sums) / n_pix
    loss_coh = 1.0 / jnp.maximum(coh_mean, eps) - 1.0
    return bce_mean + coh_weight * loss_coh


def focal_ori_loss_ref(x, t, *, ang_stride=2, gamma=2, coh_weight=1.0, eps=1e-6):
    """Pure-JAX reference mirroring the PyTorch module (NCHW, logits=True path)."""
    N, C, H, W = x.shape
    p = jax.nn.softmax(x, axis=1)
    pt = jnp.sum(t * p, axis=1, keepdims=True)
    log_pt = jnp.sum(t * jnp.log(p), axis=1, keepdims=True)
    loss_bce = jnp.mean(-((1.0 - pt) ** gamma) * log_pt)

    ang = (jnp.arange(ang_stride / 2, 180, ang_stride, dtype=jnp.float32)
           / 90.0) * jnp.float32(jnp.pi)
    cosw = jnp.cos(ang).reshape(1, C, 1, 1)
    sinw = jnp.sin(ang).reshape(1, C, 1, 1)
    cos_ori = jnp.sum(p * cosw, axis=1, keepdims=True)
    sin_ori = jnp.sum(p * sinw, axis=1, keepdims=True)
    mod_ori = jnp.sqrt(sin_ori ** 2 + cos_ori ** 2)

    k = jnp.ones((1, 1, 3, 3), jnp.float32) / 9.0
    conv = lambda z: lax.conv_general_dilated(
        z, k, (1, 1), 'SAME', dimension_numbers=('NCHW', 'OIHW', 'NCHW'))
    cos_c, sin_c, mod_c = conv(cos_ori), conv(sin_ori), conv(mod_ori)
    coherence = jnp.sqrt(sin_c ** 2 + cos_c ** 2) / jnp.maximum(mod_c, eps)
    loss_coh = 1.0 / jnp.maximum(jnp.mean(coherence), eps) - 1.0
    return loss_bce + coh_weight * loss_coh


if __name__ == "__main__":
    key = jax.random.PRNGKey(0)
    k1, k2 = jax.random.split(key)

    N, H, W = 2, 16, 16
    ang_stride = 2
    C = 180 // ang_stride  # 90 orientation bins

    x = jax.random.normal(k1, (N, C, H, W), dtype=jnp.float32)      # logits
    # target: valid per-pixel distribution over orientation channels
    t = jax.nn.softmax(4.0 * jax.random.normal(k2, (N, C, H, W),
                                               dtype=jnp.float32), axis=1)

    ref = focal_ori_loss_ref(x, t, ang_stride=ang_stride, gamma=2,
                             coh_weight=1.0, eps=1e-6)

    # full-height blocks (TH == H)
    loss = focal_ori_loss(x, t, ang_stride=ang_stride, gamma=2,
                          coh_weight=1.0, eps=1e-6)
    loss = jax.block_until_ready(loss)
    assert jnp.isfinite(loss), "non-finite loss"
    assert jnp.allclose(loss, ref, rtol=1e-3, atol=1e-4), (loss, ref)

    # also exercise the H-tiled path (budget forces TH = 8 -> two H tiles per batch)
    loss_tiled = focal_ori_loss(x, t, ang_stride=ang_stride, gamma=2,
                                coh_weight=1.0, eps=1e-6,
                                max_block_bytes=C * 8 * W * 4)
    loss_tiled = jax.block_until_ready(loss_tiled)
    assert jnp.allclose(loss_tiled, ref, rtol=1e-3, atol=1e-4), (loss_tiled, ref)

    print("KERNEL_OK")
</pallas_src>

<mosaic_0001>
module attributes {stable_mosaic.version = 11 : i64} {
  func.func @_focal_ori_kernel(%arg0: i32, %arg1: i32, %arg2: memref<1x90x16x16xf32, #tpu.memory_space<vmem>>, %arg3: memref<1x90x16x16xf32, #tpu.memory_space<vmem>>, %arg4: memref<90x1x16xf32, #tpu.memory_space<vmem>>, %arg5: memref<90x1x16xf32, #tpu.memory_space<vmem>>, %arg6: memref<1x1x1xf32, #tpu.memory_space<vmem>>, %arg7: memref<1x1x1xf32, #tpu.memory_space<vmem>>, %arg8: memref<4x16x16xf32, #tpu.memory_space<vmem>>) attributes {dimension_semantics = [#tpu.dimension_semantics<parallel>, #tpu.dimension_semantics<arbitrary>], iteration_bounds = array<i64: 2, 1>, scalar_prefetch = 0 : i64, scratch_operands = 1 : i64, tpu.core_type = #tpu.core_type<tc>, window_params = [{transform_indices = @transform_0, window_bounds = array<i64: 1, 90, 16, 16>}, {transform_indices = @transform_1, window_bounds = array<i64: 1, 90, 16, 16>}, {pipeline_mode = #tpu.pipeline_mode<synchronous>, transform_indices = @transform_2, window_bounds = array<i64: 90, 1, 16>}, {pipeline_mode = #tpu.pipeline_mode<synchronous>, transform_indices = @transform_3, window_bounds = array<i64: 90, 1, 16>}, {transform_indices = @transform_4, window_bounds = array<i64: 1, 1, 1>}, {transform_indices = @transform_5, window_bounds = array<i64: 1, 1, 1>}]} {
    %c0 = arith.constant 0 : index
    %c0_0 = arith.constant 0 : index
    %c0_1 = arith.constant 0 : index
    %c0_2 = arith.constant 0 : index
    %0 = vector.load %arg2[%c0, %c0_0, %c0_1, %c0_2] : memref<1x90x16x16xf32, #tpu.memory_space<vmem>>, vector<1x90x16x16xf32>
    %1 = vector.shape_cast %0 : vector<1x90x16x16xf32> to vector<90x16x16xf32>
    %c0_3 = arith.constant 0 : index
    %c0_4 = arith.constant 0 : index
    %c0_5 = arith.constant 0 : index
    %c0_6 = arith.constant 0 : index
    %2 = vector.load %arg3[%c0_3, %c0_4, %c0_5, %c0_6] : memref<1x90x16x16xf32, #tpu.memory_space<vmem>>, vector<1x90x16x16xf32>
    %3 = vector.shape_cast %2 : vector<1x90x16x16xf32> to vector<90x16x16xf32>
    %c0_7 = arith.constant 0 : index
    %c0_8 = arith.constant 0 : index
    %c0_9 = arith.constant 0 : index
    %4 = vector.load %arg4[%c0_7, %c0_8, %c0_9] : memref<90x1x16xf32, #tpu.memory_space<vmem>>, vector<90x1x16xf32>
    %c0_10 = arith.constant 0 : index
    %c0_11 = arith.constant 0 : index
    %c0_12 = arith.constant 0 : index
    %5 = vector.load %arg5[%c0_10, %c0_11, %c0_12] : memref<90x1x16xf32, #tpu.memory_space<vmem>>, vector<90x1x16xf32>
    %cst = arith.constant dense<0xFF800000> : vector<16x16xf32>
    %6 = vector.multi_reduction <maximumf>, %1, %cst [0] : vector<90x16x16xf32> to vector<16x16xf32>
    %7 = vector.shape_cast %6 : vector<16x16xf32> to vector<1x16x16xf32>
    %8 = vector.broadcast %7 : vector<1x16x16xf32> to vector<90x16x16xf32>
    %9 = arith.subf %1, %8 : vector<90x16x16xf32>
    %10 = math.exp %9 : vector<90x16x16xf32>
    %cst_13 = arith.constant dense<0.000000e+00> : vector<16x16xf32>
    %11 = vector.multi_reduction <add>, %10, %cst_13 [0] : vector<90x16x16xf32> to vector<16x16xf32>
    %cst_14 = arith.constant 1.000000e+00 : f32
    %12 = vector.broadcast %cst_14 : f32 to vector<16x16xf32>
    %13 = arith.divf %12, %11 : vector<16x16xf32>
    %14 = math.log %11 : vector<16x16xf32>
    %15 = arith.mulf %3, %10 : vector<90x16x16xf32>
    %cst_15 = arith.constant dense<0.000000e+00> : vector<16x16xf32>
    %16 = vector.multi_reduction <add>, %15, %cst_15 [0] : vector<90x16x16xf32> to vector<16x16xf32>
    %17 = arith.mulf %3, %9 : vector<90x16x16xf32>
    %cst_16 = arith.constant dense<0.000000e+00> : vector<16x16xf32>
    %18 = vector.multi_reduction <add>, %17, %cst_16 [0] : vector<90x16x16xf32> to vector<16x16xf32>
    %cst_17 = arith.constant dense<0.000000e+00> : vector<16x16xf32>
    %19 = vector.multi_reduction <add>, %3, %cst_17 [0] : vector<90x16x16xf32> to vector<16x16xf32>
    %20 = vector.broadcast %4 : vector<90x1x16xf32> to vector<90x16x16xf32>
    %21 = arith.mulf %10, %20 : vector<90x16x16xf32>
    %cst_18 = arith.constant dense<0.000000e+00> : vector<16x16xf32>
    %22 = vector.multi_reduction <add>, %21, %cst_18 [0] : vector<90x16x16xf32> to vector<16x16xf32>
    %23 = vector.broadcast %5 : vector<90x1x16xf32> to vector<90x16x16xf32>
    %24 = arith.mulf %10, %23 : vector<90x16x16xf32>
    %cst_19 = arith.constant dense<0.000000e+00> : vector<16x16xf32>
    %25 = vector.multi_reduction <add>, %24, %cst_19 [0] : vector<90x16x16xf32> to vector<16x16xf32>
    %26 = arith.mulf %16, %13 : vector<16x16xf32>
    %27 = arith.mulf %19, %14 : vector<16x16xf32>
    %28 = arith.subf %18, %27 : vector<16x16xf32>
    %cst_20 = arith.constant 1.000000e+00 : f32
    %29 = vector.broadcast %cst_20 : f32 to vector<16x16xf32>
    %30 = arith.subf %29, %26 : vector<16x16xf32>
    %cst_21 = arith.constant 0.000000e+00 : f32
    %31 = vector.broadcast %cst_21 : f32 to vector<16x16xf32>
    %32 = arith.maximumf %30, %31 : vector<16x16xf32>
    %33 = arith.mulf %32, %32 : vector<16x16xf32>
    %cst_22 = arith.constant 0.000000e+00 : f32
    %34 = vector.broadcast %cst_22 : f32 to vector<16x16xf32>
    %35 = arith.subf %34, %33 : vector<16x16xf32>
    %36 = arith.mulf %35, %28 : vector<16x16xf32>
    %37 = arith.mulf %22, %13 : vector<16x16xf32>
    %38 = arith.mulf %25, %13 : vector<16x16xf32>
    %39 = arith.mulf %38, %38 : vector<16x16xf32>
    %40 = arith.mulf %37, %37 : vector<16x16xf32>
    %41 = arith.addf %39, %40 : vector<16x16xf32>
    %42 = math.sqrt %41 : vector<16x16xf32>
    %c16_i32 = arith.constant 16 : i32
    %43 = arith.muli %arg1, %c16_i32 : i32
    %44 = tpu.assume_multiple %43, 16 : i32
    %c0_23 = arith.constant 0 : index
    %45 = arith.index_cast %44 : i32 to index
    %c0_24 = arith.constant 0 : index
    %46 = vector.load %arg8[%c0_23, %45, %c0_24] : memref<4x16x16xf32, #tpu.memory_space<vmem>>, vector<1x16x16xf32>
    %47 = vector.shape_cast %46 : vector<1x16x16xf32> to vector<16x16xf32>
    %48 = vector.shape_cast %37 : vector<16x16xf32> to vector<1x16x16xf32>
    tpu.vector_store %arg8[%c0_23, %45, %c0_24], %48 {strides = array<i32>} : memref<4x16x16xf32, #tpu.memory_space<vmem>>, vector<1x16x16xf32>,
    %c1 = arith.constant 1 : index
    %49 = arith.index_cast %44 : i32 to index
    %c0_25 = arith.constant 0 : index
    %50 = vector.load %arg8[%c1, %49, %c0_25] : memref<4x16x16xf32, #tpu.memory_space<vmem>>, vector<1x16x16xf32>
    %51 = vector.shape_cast %50 : vector<1x16x16xf32> to vector<16x16xf32>
    %52 = vector.shape_cast %38 : vector<16x16xf32> to vector<1x16x16xf32>
    tpu.vector_store %arg8[%c1, %49, %c0_25], %52 {strides = array<i32>} : memref<4x16x16xf32, #tpu.memory_space<vmem>>, vector<1x16x16xf32>,
    %c2 = arith.constant 2 : index
    %53 = arith.index_cast %44 : i32 to index
    %c0_26 = arith.constant 0 : index
    %54 = vector.load %arg8[%c2, %53, %c0_26] : memref<4x16x16xf32, #tpu.memory_space<vmem>>, vector<1x16x16xf32>
    %55 = vector.shape_cast %54 : vector<1x16x16xf32> to vector<16x16xf32>
    %56 = vector.shape_cast %42 : vector<16x16xf32> to vector<1x16x16xf32>
    tpu.vector_store %arg8[%c2, %53, %c0_26], %56 {strides = array<i32>} : memref<4x16x16xf32, #tpu.memory_space<vmem>>, vector<1x16x16xf32>,
    %c3 = arith.constant 3 : index
    %57 = arith.index_cast %44 : i32 to index
    %c0_27 = arith.constant 0 : index
    %58 = vector.load %arg8[%c3, %57, %c0_27] : memref<4x16x16xf32, #tpu.memory_space<vmem>>, vector<1x16x16xf32>
    %59 = vector.shape_cast %58 : vector<1x16x16xf32> to vector<16x16xf32>
    %60 = vector.shape_cast %36 : vector<16x16xf32> to vector<1x16x16xf32>
    tpu.vector_store %arg8[%c3, %57, %c0_27], %60 {strides = array<i32>} : memref<4x16x16xf32, #tpu.memory_space<vmem>>, vector<1x16x16xf32>,
    %c0_i32 = arith.constant 0 : i32
    %61 = arith.cmpi eq, %arg1, %c0_i32 : i32
    %62 = arith.extui %61 : i1 to i32
    %c0_i32_28 = arith.constant 0 : i32
    %63 = arith.cmpi ne, %62, %c0_i32_28 : i32
    scf.if %63 {
      %64 = tpu.iota {dimensions = array<i32: 1>} : vector<16x16xi32>
      %65 = tpu.iota {dimensions = array<i32: 0>} : vector<16x16xi32>
      %c0_29 = arith.constant 0 : index
      %c0_30 = arith.constant 0 : index
      %c0_31 = arith.constant 0 : index
      %66 = vector.load %arg8[%c0_29, %c0_30, %c0_31] : memref<4x16x16xf32, #tpu.memory_space<vmem>>, vector<1x16x16xf32>
      %67 = vector.shape_cast %66 : vector<1x16x16xf32> to vector<16x16xf32>
      %c1_i32 = arith.constant 1 : i32
      %68 = vector.broadcast %c1_i32 : i32 to vector<16x16xi32>
      %69 = arith.cmpi sge, %64, %68 : vector<16x16xi32>
      %c1_i32_32 = arith.constant 1 : i32
      %70 = tpu.dynamic_rotate %67 by %c1_i32_32 dim 1 : vector<16x16xf32>, i32 -> vector<16x16xf32>
      %cst_33 = arith.constant 0.000000e+00 : f32
      %71 = vector.broadcast %cst_33 : f32 to vector<16x16xf32>
      %72 = arith.select %69, %70, %71 : vector<16x16xi1>, vector<16x16xf32>
      %c14_i32 = arith.constant 14 : i32
      %73 = vector.broadcast %c14_i32 : i32 to vector<16x16xi32>
      %74 = arith.cmpi sle, %64, %73 : vector<16x16xi32>
      %c15_i32 = arith.constant 15 : i32
      %75 = tpu.dynamic_rotate %67 by %c15_i32 dim 1 : vector<16x16xf32>, i32 -> vector<16x16xf32>
      %cst_34 = arith.constant 0.000000e+00 : f32
      %76 = vector.broadcast %cst_34 : f32 to vector<16x16xf32>
      %77 = arith.select %74, %75, %76 : vector<16x16xi1>, vector<16x16xf32>
      %78 = arith.addf %72, %67 : vector<16x16xf32>
      %79 = arith.addf %78, %77 : vector<16x16xf32>
      %c1_i32_35 = arith.constant 1 : i32
      %80 = vector.broadcast %c1_i32_35 : i32 to vector<16x16xi32>
      %81 = arith.cmpi sge, %65, %80 : vector<16x16xi32>
      %c1_i32_36 = arith.constant 1 : i32
      %82 = tpu.dynamic_rotate %79 by %c1_i32_36 dim 0 : vector<16x16xf32>, i32 -> vector<16x16xf32>
      %cst_37 = arith.constant 0.000000e+00 : f32
      %83 = vector.broadcast %cst_37 : f32 to vector<16x16xf32>
      %84 = arith.select %81, %82, %83 : vector<16x16xi1>, vector<16x16xf32>
      %c14_i32_38 = arith.constant 14 : i32
      %85 = vector.broadcast %c14_i32_38 : i32 to vector<16x16xi32>
      %86 = arith.cmpi sle, %65, %85 : vector<16x16xi32>
      %c15_i32_39 = arith.constant 15 : i32
      %87 = tpu.dynamic_rotate %79 by %c15_i32_39 dim 0 : vector<16x16xf32>, i32 -> vector<16x16xf32>
      %cst_40 = arith.constant 0.000000e+00 : f32
      %88 = vector.broadcast %cst_40 : f32 to vector<16x16xf32>
      %89 = arith.select %86, %87, %88 : vector<16x16xi1>, vector<16x16xf32>
      %90 = arith.addf %84, %79 : vector<16x16xf32>
      %91 = arith.addf %90, %89 : vector<16x16xf32>
      %cst_41 = arith.constant 0.111111112 : f32
      %92 = vector.broadcast %cst_41 : f32 to vector<16x16xf32>
      %93 = arith.mulf %91, %92 : vector<16x16xf32>
      %c1_42 = arith.constant 1 : index
      %c0_43 = arith.constant 0 : index
      %c0_44 = arith.constant 0 : index
      %94 = vector.load %arg8[%c1_42, %c0_43, %c0_44] : memref<4x16x16xf32, #tpu.memory_space<vmem>>, vector<1x16x16xf32>
      %95 = vector.shape_cast %94 : vector<1x16x16xf32> to vector<16x16xf32>
      %c1_i32_45 = arith.constant 1 : i32
      %96 = vector.broadcast %c1_i32_45 : i32 to vector<16x16xi32>
      %97 = arith.cmpi sge, %64, %96 : vector<16x16xi32>
      %c1_i32_46 = arith.constant 1 : i32
      %98 = tpu.dynamic_rotate %95 by %c1_i32_46 dim 1 : vector<16x16xf32>, i32 -> vector<16x16xf32>
      %cst_47 = arith.constant 0.000000e+00 : f32
      %99 = vector.broadcast %cst_47 : f32 to vector<16x16xf32>
      %100 = arith.select %97, %98, %99 : vector<16x16xi1>, vector<16x16xf32>
      %c14_i32_48 = arith.constant 14 : i32
      %101 = vector.broadcast %c14_i32_48 : i32 to vector<16x16xi32>
      %102 = arith.cmpi sle, %64, %101 : vector<16x16xi32>
      %c15_i32_49 = arith.constant 15 : i32
      %103 = tpu.dynamic_rotate %95 by %c15_i32_49 dim 1 : vector<16x16xf32>, i32 -> vector<16x16xf32>
      %cst_50 = arith.constant 0.000000e+00 : f32
      %104 = vector.broadcast %cst_50 : f32 to vector<16x16xf32>
      %105 = arith.select %102, %103, %104 : vector<16x16xi1>, vector<16x16xf32>
      %106 = arith.addf %100, %95 : vector<16x16xf32>
      %107 = arith.addf %106, %105 : vector<16x16xf32>
      %c1_i32_51 = arith.constant 1 : i32
      %108 = vector.broadcast %c1_i32_51 : i32 to vector<16x16xi32>
      %109 = arith.cmpi sge, %65, %108 : vector<16x16xi32>
      %c1_i32_52 = arith.constant 1 : i32
      %110 = tpu.dynamic_rotate %107 by %c1_i32_52 dim 0 : vector<16x16xf32>, i32 -> vector<16x16xf32>
      %cst_53 = arith.constant 0.000000e+00 : f32
      %111 = vector.broadcast %cst_53 : f32 to vector<16x16xf32>
      %112 = arith.select %109, %110, %111 : vector<16x16xi1>, vector<16x16xf32>
      %c14_i32_54 = arith.constant 14 : i32
      %113 = vector.broadcast %c14_i32_54 : i32 to vector<16x16xi32>
      %114 = arith.cmpi sle, %65, %113 : vector<16x16xi32>
      %c15_i32_55 = arith.constant 15 : i32
      %115 = tpu.dynamic_rotate %107 by %c15_i32_55 dim 0 : vector<16x16xf32>, i32 -> vector<16x16xf32>
      %cst_56 = arith.constant 0.000000e+00 : f32
      %116 = vector.broadcast %cst_56 : f32 to vector<16x16xf32>
      %117 = arith.select %114, %115, %116 : vector<16x16xi1>, vector<16x16xf32>
      %118 = arith.addf %112, %107 : vector<16x16xf32>
      %119 = arith.addf %118, %117 : vector<16x16xf32>
      %cst_57 = arith.constant 0.111111112 : f32
      %120 = vector.broadcast %cst_57 : f32 to vector<16x16xf32>
      %121 = arith.mulf %119, %120 : vector<16x16xf32>
      %c2_58 = arith.constant 2 : index
      %c0_59 = arith.constant 0 : index
      %c0_60 = arith.constant 0 : index
      %122 = vector.load %arg8[%c2_58, %c0_59, %c0_60] : memref<4x16x16xf32, #tpu.memory_space<vmem>>, vector<1x16x16xf32>
      %123 = vector.shape_cast %122 : vector<1x16x16xf32> to vector<16x16xf32>
      %c1_i32_61 = arith.constant 1 : i32
      %124 = vector.broadcast %c1_i32_61 : i32 to vector<16x16xi32>
      %125 = arith.cmpi sge, %64, %124 : vector<16x16xi32>
      %c1_i32_62 = arith.constant 1 : i32
      %126 = tpu.dynamic_rotate %123 by %c1_i32_62 dim 1 : vector<16x16xf32>, i32 -> vector<16x16xf32>
      %cst_63 = arith.constant 0.000000e+00 : f32
      %127 = vector.broadcast %cst_63 : f32 to vector<16x16xf32>
      %128 = arith.select %125, %126, %127 : vector<16x16xi1>, vector<16x16xf32>
      %c14_i32_64 = arith.constant 14 : i32
      %129 = vector.broadcast %c14_i32_64 : i32 to vector<16x16xi32>
      %130 = arith.cmpi sle, %64, %129 : vector<16x16xi32>
      %c15_i32_65 = arith.constant 15 : i32
      %131 = tpu.dynamic_rotate %123 by %c15_i32_65 dim 1 : vector<16x16xf32>, i32 -> vector<16x16xf32>
      %cst_66 = arith.constant 0.000000e+00 : f32
      %132 = vector.broadcast %cst_66 : f32 to vector<16x16xf32>
      %133 = arith.select %130, %131, %132 : vector<16x16xi1>, vector<16x16xf32>
      %134 = arith.addf %128, %123 : vector<16x16xf32>
      %135 = arith.addf %134, %133 : vector<16x16xf32>
      %c1_i32_67 = arith.constant 1 : i32
      %136 = vector.broadcast %c1_i32_67 : i32 to vector<16x16xi32>
      %137 = arith.cmpi sge, %65, %136 : vector<16x16xi32>
      %c1_i32_68 = arith.constant 1 : i32
      %138 = tpu.dynamic_rotate %135 by %c1_i32_68 dim 0 : vector<16x16xf32>, i32 -> vector<16x16xf32>
      %cst_69 = arith.constant 0.000000e+00 : f32
      %139 = vector.broadcast %cst_69 : f32 to vector<16x16xf32>
      %140 = arith.select %137, %138, %139 : vector<16x16xi1>, vector<16x16xf32>
      %c14_i32_70 = arith.constant 14 : i32
      %141 = vector.broadcast %c14_i32_70 : i32 to vector<16x16xi32>
      %142 = arith.cmpi sle, %65, %141 : vector<16x16xi32>
      %c15_i32_71 = arith.constant 15 : i32
      %143 = tpu.dynamic_rotate %135 by %c15_i32_71 dim 0 : vector<16x16xf32>, i32 -> vector<16x16xf32>
      %cst_72 = arith.constant 0.000000e+00 : f32
      %144 = vector.broadcast %cst_72 : f32 to vector<16x16xf32>
      %145 = arith.select %142, %143, %144 : vector<16x16xi1>, vector<16x16xf32>
      %146 = arith.addf %140, %135 : vector<16x16xf32>
      %147 = arith.addf %146, %145 : vector<16x16xf32>
      %cst_73 = arith.constant 0.111111112 : f32
      %148 = vector.broadcast %cst_73 : f32 to vector<16x16xf32>
      %149 = arith.mulf %147, %148 : vector<16x16xf32>
      %150 = arith.mulf %121, %121 : vector<16x16xf32>
      %151 = arith.mulf %93, %93 : vector<16x16xf32>
      %152 = arith.addf %150, %151 : vector<16x16xf32>
      %153 = math.sqrt %152 : vector<16x16xf32>
      %cst_74 = arith.constant 9.99999997E-7 : f32
      %154 = vector.broadcast %cst_74 : f32 to vector<16x16xf32>
      %155 = arith.maximumf %149, %154 : vector<16x16xf32>
      %156 = arith.divf %153, %155 : vector<16x16xf32>
      %c3_75 = arith.constant 3 : index
      %c0_76 = arith.constant 0 : index
      %c0_77 = arith.constant 0 : index
      %157 = vector.load %arg8[%c3_75, %c0_76, %c0_77] : memref<4x16x16xf32, #tpu.memory_space<vmem>>, vector<1x16x16xf32>
      %158 = vector.shape_cast %157 : vector<1x16x16xf32> to vector<16x16xf32>
      %159 = vector.shape_cast %158 : vector<16x16xf32> to vector<1x16x16xf32>
      %cst_78 = arith.constant dense<0.000000e+00> : vector<1xf32>
      %160 = vector.multi_reduction <add>, %159, %cst_78 [1, 2] : vector<1x16x16xf32> to vector<1xf32>
      %161 = vector.shape_cast %160 : vector<1xf32> to vector<1x1x1xf32>
      %162 = vector.extract %161[0, 0, 0] : f32 from vector<1x1x1xf32>
      %163 = vector.broadcast %162 : f32 to vector<1x1xf32>
      %c0_79 = arith.constant 0 : index
      %c0_80 = arith.constant 0 : index
      %c0_81 = arith.constant 0 : index
      %164 = vector.load %arg6[%c0_79, %c0_80, %c0_81] : memref<1x1x1xf32, #tpu.memory_space<vmem>>, vector<1x1x1xf32>
      %165 = vector.shape_cast %164 : vector<1x1x1xf32> to vector<1x1xf32>
      %166 = vector.shape_cast %163 : vector<1x1xf32> to vector<1x1x1xf32>
      tpu.vector_store %arg6[%c0_79, %c0_80, %c0_81], %166 {strides = array<i32>} : memref<1x1x1xf32, #tpu.memory_space<vmem>>, vector<1x1x1xf32>,
      %167 = vector.shape_cast %156 : vector<16x16xf32> to vector<1x16x16xf32>
      %cst_82 = arith.constant dense<0.000000e+00> : vector<1xf32>
      %168 = vector.multi_reduction <add>, %167, %cst_82 [1, 2] : vector<1x16x16xf32> to vector<1xf32>
      %169 = vector.shape_cast %168 : vector<1xf32> to vector<1x1x1xf32>
      %170 = vector.extract %169[0, 0, 0] : f32 from vector<1x1x1xf32>
      %171 = vector.broadcast %170 : f32 to vector<1x1xf32>
      %c0_83 = arith.constant 0 : index
      %c0_84 = arith.constant 0 : index
      %c0_85 = arith.constant 0 : index
      %172 = vector.load %arg7[%c0_83, %c0_84, %c0_85] : memref<1x1x1xf32, #tpu.memory_space<vmem>>, vector<1x1x1xf32>
      %173 = vector.shape_cast %172 : vector<1x1x1xf32> to vector<1x1xf32>
      %174 = vector.shape_cast %171 : vector<1x1xf32> to vector<1x1x1xf32>
      tpu.vector_store %arg7[%c0_83, %c0_84, %c0_85], %174 {strides = array<i32>} : memref<1x1x1xf32, #tpu.memory_space<vmem>>, vector<1x1x1xf32>,
    } else {
    }
    return
  }
  func.func @transform_0(%arg0: i32, %arg1: i32) -> (i32, i32, i32, i32) {
    %c0_i32 = arith.constant 0 : i32
    %c0_i32_0 = arith.constant 0 : i32
    %c0_i32_1 = arith.constant 0 : i32
    return %arg0, %c0_i32, %arg1, %c0_i32_0 : i32, i32, i32, i32
  }
  func.func @transform_1(%arg0: i32, %arg1: i32) -> (i32, i32, i32, i32) {
    %c0_i32 = arith.constant 0 : i32
    %c0_i32_0 = arith.constant 0 : i32
    %c0_i32_1 = arith.constant 0 : i32
    return %arg0, %c0_i32, %arg1, %c0_i32_0 : i32, i32, i32, i32
  }
  func.func @transform_2(%arg0: i32, %arg1: i32) -> (i32, i32, i32) {
    %c0_i32 = arith.constant 0 : i32
    %c0_i32_0 = arith.constant 0 : i32
    %c0_i32_1 = arith.constant 0 : i32
    %c0_i32_2 = arith.constant 0 : i32
    return %c0_i32, %c0_i32_0, %c0_i32_1 : i32, i32, i32
  }
  func.func @transform_3(%arg0: i32, %arg1: i32) -> (i32, i32, i32) {
    %c0_i32 = arith.constant 0 : i32
    %c0_i32_0 = arith.constant 0 : i32
    %c0_i32_1 = arith.constant 0 : i32
    %c0_i32_2 = arith.constant 0 : i32
    return %c0_i32, %c0_i32_0, %c0_i32_1 : i32, i32, i32
  }
  func.func @transform_4(%arg0: i32, %arg1: i32) -> (i32, i32, i32) {
    %c0_i32 = arith.constant 0 : i32
    %c0_i32_0 = arith.constant 0 : i32
    %c0_i32_1 = arith.constant 0 : i32
    return %arg0, %c0_i32, %c0_i32_0 : i32, i32, i32
  }
  func.func @transform_5(%arg0: i32, %arg1: i32) -> (i32, i32, i32) {
    %c0_i32 = arith.constant 0 : i32
    %c0_i32_0 = arith.constant 0 : i32
    %c0_i32_1 = arith.constant 0 : i32
    return %arg0, %c0_i32, %c0_i32_0 : i32, i32, i32
  }
}

</mosaic_0001>

<bundles_post_ra>
// kernel: tpu_custom_call.1
= control target key start
LH: loop header
LB: loop body
LE: loop exit
PB: predicated region body
PF: predicated region fallthrough
CT: control target
= control target key end

     0   :  { %s6681_s18 = smov 0   ;;  %s6683_s19 = smov 0   ;;  %s15011_s0 = inlined_call_operand.vmem [shape: f32[2,90,16,16], index: 0, kind: input, shape index: {}]   ;;  %s15012_s1 = inlined_call_operand.vmem [shape: f32[2,90,16,16], index: 1, kind: input, shape index: {}]   ;;  %s15013_s2 = inlined_call_operand.vmem [shape: f32[90,1,16], index: 2, kind: input, shape index: {}]   ;;  %s15014_s3 = inlined_call_operand.vmem [shape: f32[90,1,16], index: 3, kind: input, shape index: {}]   ;;  %s15015_s4 = inlined_call_operand.vmem [shape: f32[2,1,1], index: 4, kind: output, shape index: {0}]   ;;  %s15016_s5 = inlined_call_operand.vmem [shape: f32[2,1,1], index: 5, kind: output, shape index: {1}]  }
   0x1   :  { %s6685_s20 = smov 0  }
   0x2 LB: > { %s28_s21 = sadd.s32 1, %s6642_s19  ;;  %p5636_p0 = scmp.ge.s32.totalorder %s6646_s20, 1  ;;  %s6646_s20 = sphi %s6685_s20, %s16_s20   ;;  %s6642_s19 = sphi %s6683_s19, %s17410_s19   ;;  %s6638_s18 = sphi %s6681_s18, %s17409_s18  }
   0x3   : > { %p30_p1 = scmp.ge.s32.totalorder %s28_s21, 2  ;;  %p226_p2 = scmp.lt.s32.totalorder %s6646_s20, 3 }
   0x5   : > { %s17412_s21 = smov (%p30_p1, %s28_s21), 0  ;;  %p227_p3 = pnand %p5636_p0, %p226_p2 }
   0x7   : > { %230 = sbr.rel (%p227_p3) target bundleno = 1738 (0x6ca), region = 36 }
   0xc   : > { %p269_p4 = scmp.lt.s32.totalorder %s6638_s18, 1  ;;  %vm834_vm0 = vcmask 130048   ;;  %s6648_s6 = smov 16   ;;  %vm5253_vm11 = vcmask 1047680  }
   0xd   : > { %s6649_s26 = smov 113  }
   0xe   : > { %s17414_s18 = smov (!%p269_p4, %s6638_s18), 1 }
   0xf   : > { %s5647_s22 = smul.u32 1440, %s17414_s18  ;;  %s290_s30 = scalar_lea.vmem %s15015_s4, %s17414_s18 }
  0x10   : > { %s293_s10 = scalar_lea.vmem %s15016_s5, %s17414_s18 }
  0x11   : > { %s6707_s25 = scalar_lea.vmem %s15011_s0, %s5647_s22  ;;  %s12240_s28 = scalar_lea.vmem %s15012_s1, %s5647_s22 }
  0x12   : > { %v6710_v0 = vld [vmem:[%s6707_s25] sm:$0xff]  ;;  %v6713_v1 = vld [vmem:[%s6707_s25 + $0x10] sm:$0xff]  ;;  %s6650_s22 = smov 127  }
  0x13   : > { %v6716_v2 = vld [vmem:[%s6707_s25 + $0x20] sm:$0xff]  ;;  %v6719_v3 = vld [vmem:[%s6707_s25 + $0x30] sm:$0xff]  ;;  %v835_v6 = vsel %vm834_vm0, %v6710_v0, -inf  ;;  %v836_v7 = vsel %vm834_vm0, %v6713_v1, -inf }
  0x14   : > { %v6722_v4 = vld [vmem:[%s6707_s25 + $0x40] sm:$0xff]  ;;  %v6725_v5 = vld [vmem:[%s6707_s25 + $0x50] sm:$0xff]  ;;  %v837_v8 = vsel %vm834_vm0, %v6716_v2, -inf  ;;  %v839_v13 = vsel %vm834_vm0, %v6719_v3, -inf }
  0x15   : > { %v6734_v9 = vld [vmem:[%s6707_s25 + $0x60] sm:$0xff]  ;;  %v6737_v10 = vld [vmem:[%s6707_s25 + $0x70] sm:$0xff]  ;;  %v838_v12 = vmax.f32 %v835_v6, %v837_v8  ;;  %v841_v14 = vsel %vm834_vm0, %v6722_v4, -inf  ;;  %v843_v15 = vsel %vm834_vm0, %v6725_v5, -inf  ;;  %v840_v17 = vmax.f32 %v836_v7, %v839_v13 }
  0x16   : > { %v6740_v11 = vld [vmem:[%s6707_s25 + $0x80] sm:$0xff]  ;;  %v6749_v16 = vld [vmem:[%s6707_s25 + $0x90] sm:$0xff]  ;;  %v845_v18 = vsel %vm834_vm0, %v6734_v9, -inf  ;;  %v847_v21 = vsel %vm834_vm0, %v6737_v10, -inf }
  0x17   : > { %v6754_v19 = vld [vmem:[%s6707_s25 + $0xa0] sm:$0xff]  ;;  %v842_v20 = vmax.f32 %v838_v12, %v841_v14  ;;  %v6759_v22 = vld [vmem:[%s6707_s25 + $0xb0] sm:$0xff]  ;;  %v844_v23 = vmax.f32 %v840_v17, %v843_v15  ;;  %v849_v24 = vsel %vm834_vm0, %v6740_v11, -inf  ;;  %v851_v27 = vsel %vm834_vm0, %v6749_v16, -inf }
  0x18   : > { %v6764_v25 = vld [vmem:[%s6707_s25 + $0xc0] sm:$0xff]  ;;  %v6769_v28 = vld [vmem:[%s6707_s25 + $0xd0] sm:$0xff]  ;;  %v853_v30 = vsel %vm834_vm0, %v6754_v19, -inf  ;;  %v855_v33 = vsel %vm834_vm0, %v6759_v22, -inf }
  0x19   : > { %v846_v26 = vmax.f32 %v842_v20, %v845_v18  ;;  %v848_v29 = vmax.f32 %v844_v23, %v847_v21  ;;  %v6774_v31 = vld [vmem:[%s6707_s25 + $0xe0] sm:$0xff]  ;;  %v6779_v34 = vld [vmem:[%s6707_s25 + $0xf0] sm:$0xff]  ;;  %v857_v36 = vsel %vm834_vm0, %v6764_v25, -inf  ;;  %v859_v39 = vsel %vm834_vm0, %v6769_v28, -inf }
  0x1a   : > { %v6784_v37 = vld [vmem:[%s6707_s25 + $0x100] sm:$0xff]  ;;  %v6789_v40 = vld [vmem:[%s6707_s25 + $0x110] sm:$0xff]  ;;  %v861_v42 = vsel %vm834_vm0, %v6774_v31, -inf  ;;  %v863_v45 = vsel %vm834_vm0, %v6779_v34, -inf }
  0x1b   : > { %v850_v32 = vmax.f32 %v846_v26, %v849_v24  ;;  %v852_v35 = vmax.f32 %v848_v29, %v851_v27  ;;  %15673 = vst [vmem:[#allocation3_spill] sm:$0xff] %v6784_v37  ;;  %v6794_v43 = vld [vmem:[%s6707_s25 + $0x120] sm:$0xff]  ;;  %v6799_v46 = vld [vmem:[%s6707_s25 + $0x130] sm:$0xff]  ;;  %v865_v50 = vsel %vm834_vm0, %v6784_v37, -inf  ;;  %v867_v55 = vsel %vm834_vm0, %v6789_v40, -inf }
  0x1c   : > { %15674 = vst [vmem:[#allocation4_spill] sm:$0xff] %v6789_v40  ;;  %v6802_v47 = vld [vmem:[%s6707_s25 + $0x140] sm:$0xff]  ;;  %v6805_v48 = vld [vmem:[%s6707_s25 + $0x150] sm:$0xff]  ;;  %v869_v60 = vsel %vm834_vm0, %v6794_v43, -inf  ;;  %v871_v7 = vsel %vm834_vm0, %v6799_v46, -inf }
  0x1d   : > { %v854_v38 = vmax.f32 %v850_v32, %v853_v30  ;;  %v856_v41 = vmax.f32 %v852_v35, %v855_v33  ;;  %15675 = vst [vmem:[#allocation5_spill] sm:$0xff] %v6794_v43  ;;  %v6810_v51 = vld [vmem:[%s6707_s25 + $0x160] sm:$0xff]  ;;  %v6813_v52 = vld [vmem:[%s6707_s25 + $0x170] sm:$0xff]  ;;  %v873_v8 = vsel %vm834_vm0, %v6802_v47, -inf  ;;  %v875_v12 = vsel %vm834_vm0, %v6805_v48, -inf }
  0x1e   : > { %15676 = vst [vmem:[#allocation6_spill] sm:$0xff] %v6799_v46  ;;  %v6816_v53 = vld [vmem:[%s6707_s25 + $0x180] sm:$0xff]  ;;  %v6821_v56 = vld [vmem:[%s6707_s25 + $0x190] sm:$0xff]  ;;  %v877_v18 = vsel %vm834_vm0, %v6810_v51, -inf  ;;  %v879_v20 = vsel %vm834_vm0, %v6813_v52, -inf }
  0x1f   : > { %v858_v44 = vmax.f32 %v854_v38, %v857_v36  ;;  %15677 = vst [vmem:[#allocation7_spill] sm:$0xff] %v6802_v47  ;;  %v860_v49 = vmax.f32 %v856_v41, %v859_v39  ;;  %v6824_v57 = vld [vmem:[%s6707_s25 + $0x1a0] sm:$0xff]  ;;  %v6827_v58 = vld [vmem:[%s6707_s25 + $0x1b0] sm:$0xff]  ;;  %v881_v21 = vsel %vm834_vm0, %v6816_v53, -inf  ;;  %v883_v29 = vsel %vm834_vm0, %v6821_v56, -inf }
  0x20   : > { %15678 = vst [vmem:[#allocation8_spill] sm:$0xff] %v6805_v48  ;;  %v6832_v61 = vld [vmem:[%s6707_s25 + $0x1c0] sm:$0xff]  ;;  %v6835_v62 = vld [vmem:[%s6707_s25 + $0x1d0] sm:$0xff]  ;;  %v6874_v30 = vsel %vm834_vm0, %v6824_v57, -inf  ;;  %v6878_v32 = vsel %vm834_vm0, %v6827_v58, -inf }
  0x21   : > { %15679 = vst [vmem:[#allocation9_spill] sm:$0xff] %v6810_v51  ;;  %v862_v54 = vmax.f32 %v858_v44, %v861_v42  ;;  %v864_v59 = vmax.f32 %v860_v49, %v863_v45  ;;  %v6838_v63 = vld [vmem:[%s6707_s25 + $0x1e0] sm:$0xff]  ;;  %v6847_v13 = vld [vmem:[%s6707_s25 + $0x1f0] sm:$0xff]  ;;  %v889_v39 = vsel %vm834_vm0, %v6832_v61, -inf  ;;  %v891_v41 = vsel %vm834_vm0, %v6835_v62, -inf }
  0x22   : > { %15680 = vst [vmem:[#allocation10_spill] sm:$0xff] %v6813_v52  ;;  %v6850_v14 = vld [vmem:[%s6707_s25 + $0x200] sm:$0xff]  ;;  %v6853_v15 = vld [vmem:[%s6707_s25 + $0x210] sm:$0xff]  ;;  %v6895_v42 = vsel %vm834_vm0, %v6838_v63, -inf }
  0x23   : > { %15681 = vst [vmem:[#allocation11_spill] sm:$0xff] %v6816_v53  ;;  %v866_v6 = vmax.f32 %v862_v54, %v865_v50  ;;  %v868_v17 = vmax.f32 %v864_v59, %v867_v55  ;;  %v6862_v23 = vld [vmem:[%s6707_s25 + $0x220] sm:$0xff]  ;;  %v6865_v24 = vld [vmem:[%s6707_s25 + $0x230] sm:$0xff]  ;;  %v895_v54 = vsel %vm834_vm0, %v6847_v13, -inf  ;;  %v897_v55 = vsel %vm834_vm0, %v6850_v14, -inf }
  0x24   : > { %15682 = vst [vmem:[#allocation12_spill] sm:$0xff] %v6821_v56  ;;  %v6868_v26 = vld [vmem:[%s6707_s25 + $0x240] sm:$0xff]  ;;  %v6881_v33 = vld [vmem:[%s6707_s25 + $0x250] sm:$0xff]  ;;  %v899_v59 = vsel %vm834_vm0, %v6853_v15, -inf }
  0x25   : > { %15683 = vst [vmem:[#allocation13_spill] sm:$0xff] %v6824_v57  ;;  %v870_v27 = vmax.f32 %v866_v6, %v869_v60  ;;  %v6884_v35 = vld [vmem:[%s6707_s25 + $0x260] sm:$0xff]  ;;  %v6887_v36 = vld [vmem:[%s6707_s25 + $0x270] sm:$0xff]  ;;  %v872_v38 = vmax.f32 %v868_v17, %v871_v7 }
  0x26   : > { %15684 = vst [vmem:[#allocation14_spill] sm:$0xff] %v6827_v58  ;;  %v6898_v44 = vld [vmem:[%s6707_s25 + $0x280] sm:$0xff]  ;;  %v6901_v45 = vld [vmem:[%s6707_s25 + $0x290] sm:$0xff] }
  0x27   : > { %15685 = vst [vmem:[#allocation15_spill] sm:$0xff] %v6832_v61  ;;  %v6904_v49 = vld [vmem:[%s6707_s25 + $0x2a0] sm:$0xff]  ;;  %v874_v50 = vmax.f32 %v870_v27, %v873_v8  ;;  %v6913_v60 = vld [vmem:[%s6707_s25 + $0x2b0] sm:$0xff]  ;;  %v876_v17 = vmax.f32 %v872_v38, %v875_v12  ;;  %v901_v8 = vsel %vm834_vm0, %v6862_v23, -inf  ;;  %v903_v27 = vsel %vm834_vm0, %v6865_v24, -inf }
  0x28   : > { %15686 = vst [vmem:[#allocation16_spill] sm:$0xff] %v6835_v62  ;;  %v6916_v6 = vld [vmem:[%s6707_s25 + $0x2c0] sm:$0xff]  ;;  %v6919_v7 = vld [vmem:[%s6707_s25 + $0x2d0] sm:$0xff]  ;;  %v907_v12 = vsel %vm834_vm0, %v6881_v33, -inf  ;;  %v909_v38 = vsel %vm834_vm0, %v6884_v35, -inf }
  0x29   : > { %15687 = vst [vmem:[#allocation17_spill] sm:$0xff] %v6838_v63  ;;  %v6934_v63 = vld [vmem:[%s6707_s25 + $0x300] sm:$0xff]  ;;  %v878_v62 = vmax.f32 %v874_v50, %v877_v18  ;;  %v6949_v61 = vld [vmem:[%s6707_s25 + $0x330] sm:$0xff]  ;;  %v880_v58 = vmax.f32 %v876_v17, %v879_v20  ;;  %v913_v18 = vsel %vm834_vm0, %v6898_v44, -inf  ;;  %v915_v50 = vsel %vm834_vm0, %v6901_v45, -inf }
  0x2a   : > { %15688 = vst [vmem:[#allocation18_spill] sm:$0xff] %v6847_v13  ;;  %v6931_v13 = vld [vmem:[%s6707_s25 + $0x2f0] sm:$0xff]  ;;  %v6964_v57 = vld [vmem:[%s6707_s25 + $0x360] sm:$0xff]  ;;  %v919_v20 = vsel %vm834_vm0, %v6913_v60, -inf  ;;  %v921_v17 = vsel %vm834_vm0, %v6916_v6, -inf }
  0x2b   : > { %15689 = vst [vmem:[#allocation19_spill] sm:$0xff] %v6850_v14  ;;  %v905_v14 = vsel %vm834_vm0, %v6868_v26, -inf  ;;  %v882_v56 = vmax.f32 %v878_v62, %v881_v21  ;;  %v6979_v53 = vld [vmem:[%s6707_s25 + $0x390] sm:$0xff]  ;;  %v884_v52 = vmax.f32 %v880_v58, %v883_v29  ;;  %v927_v62 = vsel %vm834_vm0, %v6931_v13, -inf }
  0x2c   : > { %15690 = vst [vmem:[#allocation20_spill] sm:$0xff] %v6853_v15  ;;  %v6928_v15 = vld [vmem:[%s6707_s25 + $0x2e0] sm:$0xff]  ;;  %v929_v21 = vsel %vm834_vm0, %v6934_v63, -inf }
  0x2d   : > { %15691 = vst [vmem:[#allocation21_spill] sm:$0xff] %v6862_v23  ;;  %v6946_v23 = vld [vmem:[%s6707_s25 + $0x320] sm:$0xff]  ;;  %v925_v51 = vsel %vm834_vm0, %v6928_v15, -inf  ;;  %v886_v48 = vmax.f32 %v882_v56, %v6874_v30  ;;  %v7010_v56 = vsel %vm834_vm0, %v6964_v57, -inf }
  0x2e   : > { %15692 = vst [vmem:[#allocation22_spill] sm:$0xff] %v6865_v24  ;;  %v911_v24 = vsel %vm834_vm0, %v6887_v36, -inf  ;;  %v933_v29 = vsel %vm834_vm0, %v6946_v23, -inf }
  0x2f   : > { %15693 = vst [vmem:[#allocation23_spill] sm:$0xff] %v6868_v26  ;;  %v6943_v26 = vld [vmem:[%s6707_s25 + $0x310] sm:$0xff]  ;;  %v890_v30 = vmax.f32 %v886_v48, %v889_v39 }
  0x30   : > { %15694 = vst [vmem:[#allocation24_spill] sm:$0xff] %v6881_v33  ;;  %v6961_v33 = vld [vmem:[%s6707_s25 + $0x350] sm:$0xff]  ;;  %v931_v58 = vsel %vm834_vm0, %v6943_v26, -inf }
  0x31   : > { %15695 = vst [vmem:[#allocation25_spill] sm:$0xff] %v6884_v35  ;;  %v917_v35 = vsel %vm834_vm0, %v6904_v49, -inf  ;;  %v939_v47 = vsel %vm834_vm0, %v6961_v33, -inf  ;;  %v894_v39 = vmax.f32 %v890_v30, %v6895_v42  ;;  %v7100_v30 = vld [vmem:[%s6707_s25 + $0x500] sm:$0xff] }
  0x32   : > { %15696 = vst [vmem:[#allocation26_spill] sm:$0xff] %v6887_v36  ;;  %v6958_v36 = vld [vmem:[%s6707_s25 + $0x340] sm:$0xff] }
  0x33   : > { %15697 = vst [vmem:[#allocation27_spill] sm:$0xff] %v6898_v44  ;;  %v6973_v44 = vld [vmem:[%s6707_s25 + $0x370] sm:$0xff] }
  0x34   : > { %15698 = vst [vmem:[#allocation28_spill] sm:$0xff] %v6901_v45  ;;  %v923_v45 = vsel %vm834_vm0, %v6919_v7, -inf }
  0x35   : > { %15699 = vst [vmem:[#allocation29_spill] sm:$0xff] %v6904_v49  ;;  %v6976_v49 = vld [vmem:[%s6707_s25 + $0x380] sm:$0xff] }
  0x36   : > { %15700 = vst [vmem:[#allocation30_spill] sm:$0xff] %v6913_v60  ;;  %v6991_v60 = vld [vmem:[%s6707_s25 + $0x3b0] sm:$0xff] }
  0x37   : > { %15701 = vst [vmem:[#allocation31_spill] sm:$0xff] %v6916_v6  ;;  %v6988_v6 = vld [vmem:[%s6707_s25 + $0x3a0] sm:$0xff] }
  0x38   : > { %15702 = vst [vmem:[#allocation32_spill] sm:$0xff] %v6919_v7  ;;  %v6994_v7 = vld [vmem:[%s6707_s25 + $0x3c0] sm:$0xff] }
  0x39   : > { %15703 = vst [vmem:[#allocation33_spill] sm:$0xff] %v6928_v15  ;;  %v888_v15 = vmax.f32 %v884_v52, %v6878_v32  ;;  %v7020_v52 = vsel %vm834_vm0, %v6979_v53, -inf  ;;  %v7032_v48 = vsel %vm834_vm0, %v6994_v7, -inf }
  0x3a   : > { %15704 = vst [vmem:[#allocation34_spill] sm:$0xff] %v6931_v13  ;;  %v935_v13 = vsel %vm834_vm0, %v6949_v61, -inf }
  0x3b   : > { %15705 = vst [vmem:[#allocation35_spill] sm:$0xff] %v6934_v63  ;;  %v937_v63 = vsel %vm834_vm0, %v6958_v36, -inf  ;;  %v892_v32 = vmax.f32 %v888_v15, %v891_v41 }
  0x3c   : > { %15706 = vst [vmem:[#allocation36_spill] sm:$0xff] %v6943_v26  ;;  %v7014_v26 = vsel %vm834_vm0, %v6973_v44, -inf }
  0x3d   : > { %15707 = vst [vmem:[#allocation37_spill] sm:$0xff] %v6946_v23 }
  0x3e   : > { %15708 = vst [vmem:[#allocation38_spill] sm:$0xff] %v6949_v61  ;;  %v945_v61 = vsel %vm834_vm0, %v6976_v49, -inf }
  0x3f   : > { %15709 = vst [vmem:[#allocation39_spill] sm:$0xff] %v6958_v36 }
  0x40   : > { %15710 = vst [vmem:[#allocation40_spill] sm:$0xff] %v6961_v33  ;;  %v7024_v33 = vsel %vm834_vm0, %v6988_v6, -inf }
  0x41   : > { %15711 = vst [vmem:[#allocation41_spill] sm:$0xff] %v6964_v57  ;;  %v7028_v57 = vsel %vm834_vm0, %v6991_v60, -inf }
  0x42   : > { %15712 = vst [vmem:[#allocation42_spill] sm:$0xff] %v6973_v44  ;;  %v898_v44 = vmax.f32 %v894_v39, %v897_v55  ;;  %v7054_v55 = vld [vmem:[%s6707_s25 + $0x430] sm:$0xff] }
  0x43   : > { %15713 = vst [vmem:[#allocation43_spill] sm:$0xff] %v6976_v49  ;;  %v896_v49 = vmax.f32 %v892_v32, %v895_v54  ;;  %v7103_v32 = vld [vmem:[%s6707_s25 + $0x510] sm:$0xff] }
  0x44   : > { %15714 = vst [vmem:[#allocation44_spill] sm:$0xff] %v6979_v53  ;;  %v902_v53 = vmax.f32 %v898_v44, %v901_v8  ;;  %v7066_v8 = vld [vmem:[%s6707_s25 + $0x470] sm:$0xff] }
  0x45   : > { %15715 = vst [vmem:[#allocation45_spill] sm:$0xff] %v6988_v6  ;;  %v900_v36 = vmax.f32 %v896_v49, %v899_v59  ;;  %v7057_v59 = vld [vmem:[%s6707_s25 + $0x440] sm:$0xff] }
  0x46   : > { %15716 = vst [vmem:[#allocation46_spill] sm:$0xff] %v6991_v60  ;;  %v906_v41 = vmax.f32 %v902_v53, %v905_v14  ;;  %v7036_v14 = vld [vmem:[%s6707_s25 + $0x3d0] sm:$0xff] }
  0x47   : > { %15717 = vst [vmem:[#allocation47_spill] sm:$0xff] %v6994_v7  ;;  %v904_v15 = vmax.f32 %v900_v36, %v903_v27  ;;  %v7069_v27 = vld [vmem:[%s6707_s25 + $0x480] sm:$0xff] }
  0x48   : > { %v910_v23 = vmax.f32 %v906_v41, %v909_v38  ;;  %15718 = vst [vmem:[#allocation48_spill] sm:$0xff] %v7036_v14  ;;  %v7072_v38 = vld [vmem:[%s6707_s25 + $0x490] sm:$0xff] }
  0x49   : > { %v908_v6 = vmax.f32 %v904_v15, %v907_v12  ;;  %15720 = vst [vmem:[#allocation50_spill] sm:$0xff] %v7054_v55 }
  0x4a   : > { %v914_v46 = vmax.f32 %v910_v23, %v913_v18  ;;  %v7042_v23 = vld [vmem:[%s6707_s25 + $0x3f0] sm:$0xff]  ;;  %15721 = vst [vmem:[#allocation51_spill] sm:$0xff] %v7057_v59  ;;  %v7075_v18 = vld [vmem:[%s6707_s25 + $0x4a0] sm:$0xff] }
  0x4b   : > { %v912_v60 = vmax.f32 %v908_v6, %v911_v24  ;;  %v7039_v24 = vld [vmem:[%s6707_s25 + $0x3e0] sm:$0xff]  ;;  %15724 = vst [vmem:[#allocation54_spill] sm:$0xff] %v7066_v8 }
  0x4c   : > { %v918_v43 = vmax.f32 %v914_v46, %v917_v35  ;;  %15719 = vst [vmem:[#allocation49_spill] sm:$0xff] %v7039_v24  ;;  %v7045_v35 = vld [vmem:[%s6707_s25 + $0x400] sm:$0xff] }
  0x4d   : > { %v916_v7 = vmax.f32 %v912_v60, %v915_v50  ;;  %v7060_v60 = vld [vmem:[%s6707_s25 + $0x450] sm:$0xff]  ;;  %15725 = vst [vmem:[#allocation55_spill] sm:$0xff] %v7069_v27 }
  0x4e   : > { %v922_v49 = vmax.f32 %v918_v43, %v921_v17  ;;  %v7048_v43 = vld [vmem:[%s6707_s25 + $0x410] sm:$0xff]  ;;  %15722 = vst [vmem:[#allocation52_spill] sm:$0xff] %v7060_v60 }
  0x4f   : > { %v920_v42 = vmax.f32 %v916_v7, %v919_v20  ;;  %v7063_v7 = vld [vmem:[%s6707_s25 + $0x460] sm:$0xff]  ;;  %15726 = vst [vmem:[#allocation56_spill] sm:$0xff] %v7072_v38  ;;  %v7078_v50 = vld [vmem:[%s6707_s25 + $0x4b0] sm:$0xff]  ;;  %v963_v15 = vsel %vm834_vm0, %v7048_v43, -inf }
  0x50   : > { %v926_v44 = vmax.f32 %v922_v49, %v925_v51  ;;  %v7051_v51 = vld [vmem:[%s6707_s25 + $0x420] sm:$0xff]  ;;  %15723 = vst [vmem:[#allocation53_spill] sm:$0xff] %v7063_v7  ;;  %v7084_v17 = vld [vmem:[%s6707_s25 + $0x4d0] sm:$0xff] }
  0x51   : > { %v924_v54 = vmax.f32 %v920_v42, %v923_v45  ;;  %15727 = vst [vmem:[#allocation57_spill] sm:$0xff] %v7075_v18  ;;  %v965_v41 = vsel %vm834_vm0, %v7051_v51, -inf  ;;  %v7113_v42 = vld [vmem:[%s6707_s25 + $0x520] sm:$0xff]  ;;  %v7116_v49 = vld [vmem:[%s6707_s25 + $0x530] sm:$0xff] }
  0x52   : > { %v930_v53 = vmax.f32 %v926_v44, %v929_v21  ;;  %15728 = vst [vmem:[#allocation58_spill] sm:$0xff] %v7078_v50 }
  0x53   : > { %v928_v36 = vmax.f32 %v924_v54, %v927_v62  ;;  %15730 = vst [vmem:[#allocation60_spill] sm:$0xff] %v7084_v17  ;;  %v7087_v62 = vld [vmem:[%s6707_s25 + $0x4e0] sm:$0xff] }
  0x54   : > { %v934_v45 = vmax.f32 %v930_v53, %v933_v29  ;;  %15731 = vst [vmem:[#allocation61_spill] sm:$0xff] %v7087_v62  ;;  %v7097_v29 = vld [vmem:[%s6707_s25 + $0x4f0] sm:$0xff]  ;;  %v7119_v54 = vld [vmem:[%s6707_s25 + $0x540] sm:$0xff]  ;;  %v971_v53 = vsel %vm834_vm0, %v7060_v60, -inf }
  0x55   : > { %v932_v46 = vmax.f32 %v928_v36, %v931_v58  ;;  %v957_v58 = vsel %vm834_vm0, %v7039_v24, -inf  ;;  %15732 = vst [vmem:[#allocation62_spill] sm:$0xff] %v7097_v29  ;;  %v969_v36 = vsel %vm834_vm0, %v7057_v59, -inf  ;;  %v979_v24 = vsel %vm834_vm0, %v7072_v38, -inf }
  0x56   : > { %v938_v12 = vmax.f32 %v934_v45, %v937_v63  ;;  %v955_v63 = vsel %vm834_vm0, %v7036_v14, -inf  ;;  %15733 = vst [vmem:[#allocation63_spill] sm:$0xff] %v7100_v30  ;;  %v981_v14 = vsel %vm834_vm0, %v7075_v18, -inf  ;;  %v991_v18 = vsel %vm834_vm0, %v7097_v29, -inf }
  0x57   : > { %v936_v6 = vmax.f32 %v932_v46, %v935_v13  ;;  %v7081_v13 = vld [vmem:[%s6707_s25 + $0x4c0] sm:$0xff]  ;;  %15734 = vst [vmem:[#allocation64_spill] sm:$0xff] %v7103_v32  ;;  %v7128_v46 = vld [vmem:[%s6707_s25 + $0x550] sm:$0xff] }
  0x58   : > { %15729 = vst [vmem:[#allocation59_spill] sm:$0xff] %v7081_v13  ;;  %v942_v21 = vmax.f32 %v938_v12, %v7010_v56  ;;  %v961_v56 = vsel %vm834_vm0, %v7045_v35, -inf  ;;  %v975_v12 = vsel %vm834_vm0, %v7066_v8, -inf  ;;  %v985_v37 = vsel %vm834_vm0, %v7081_v13, -inf }
  0x59   : > { %v940_v20 = vmax.f32 %v936_v6, %v939_v47  ;;  %v959_v47 = vsel %vm834_vm0, %v7042_v23, -inf  ;;  %15735 = vst [vmem:[#allocation65_spill] sm:$0xff] %v7113_v42  ;;  %v973_v6 = vsel %vm834_vm0, %v7063_v7, -inf  ;;  %v997_v13 = vsel %vm834_vm0, %v7113_v42, -inf }
  0x5a   : > { %15736 = vst [vmem:[#allocation66_spill] sm:$0xff] %v7116_v49  ;;  %v946_v44 = vmax.f32 %v942_v21, %v945_v61  ;;  %v977_v61 = vsel %vm834_vm0, %v7069_v27, -inf  ;;  %v987_v27 = vsel %vm834_vm0, %v7084_v17, -inf  ;;  %v999_v17 = vsel %vm834_vm0, %v7116_v49, -inf }
  0x5b   : > { %v944_v39 = vmax.f32 %v940_v20, %v7014_v26  ;;  %15737 = vst [vmem:[#allocation67_spill] sm:$0xff] %v7119_v54  ;;  %v967_v26 = vsel %vm834_vm0, %v7054_v55, -inf  ;;  %v7138_v20 = vld [vmem:[%s6707_s25 + $0x560] sm:$0xff] }
  0x5c   : > { %15738 = vst [vmem:[#allocation68_spill] sm:$0xff] %v7128_v46  ;;  %v950_v21 = vmax.f32 %v946_v44, %v7024_v33  ;;  %v989_v33 = vsel %vm834_vm0, %v7087_v62, -inf  ;;  %v1001_v62 = vsel %vm834_vm0, %v7119_v54, -inf }
  0x5d   : > { %v948_v45 = vmax.f32 %v944_v39, %v7020_v52  ;;  %15739 = vst [vmem:[#allocation69_spill] sm:$0xff] %v7138_v20  ;;  %v983_v52 = vsel %vm834_vm0, %v7078_v50, -inf  ;;  %v7148_v39 = vld [vmem:[%s6707_s25 + $0x570] sm:$0xff]  ;;  %v993_v50 = vsel %vm834_vm0, %v7100_v30, -inf  ;;  %v1005_v30 = vsel %vm834_vm0, %v7138_v20, -inf }
  0x5e   : > { %15740 = vst [vmem:[#allocation70_spill] sm:$0xff] %v7148_v39  ;;  %v954_v44 = vmax.f32 %v950_v21, %v7032_v48  ;;  %v1003_v21 = vsel %vm834_vm0, %v7128_v46, -inf }
  0x5f   : > { %v952_v40 = vmax.f32 %v948_v45, %v7028_v57  ;;  %v995_v57 = vsel %vm834_vm0, %v7103_v32, -inf  ;;  %v1007_v32 = vsel %vm834_vm0, %v7148_v39, -inf }
  0x60   : > { %v958_v48 = vmax.f32 %v954_v44, %v957_v58 }
  0x61   : > { %v956_v45 = vmax.f32 %v952_v40, %v955_v63 }
  0x62   : > { %v962_v63 = vmax.f32 %v958_v48, %v961_v56  ;;  %v15778_v48 = vld [vmem:[#allocation56_spill] sm:$0xff] }
  0x63   : > { %v960_v40 = vmax.f32 %v956_v45, %v959_v47 }
  0x64   : > { %v966_v42 = vmax.f32 %v962_v63, %v965_v41  ;;  %v7177_v41 = vld [vmem:[%s6707_s25 + $0x580] sm:$0xff] }
  0x65   : > { %v964_v29 = vmax.f32 %v960_v40, %v963_v15  ;;  %v15780_v40 = vld [vmem:[#allocation57_spill] sm:$0xff] }
  0x66   : > { %v970_v8 = vmax.f32 %v966_v42, %v969_v36 }
  0x67   : > { %v968_v38 = vmax.f32 %v964_v29, %v967_v26 }
  0x68   : > { %v974_v7 = vmax.f32 %v970_v8, %v973_v6 }
  0x69   : > { %v972_v49 = vmax.f32 %v968_v38, %v971_v53 }
  0x6a   : > { %v978_v58 = vmax.f32 %v974_v7, %v977_v61  ;;  %v15766_v61 = vld [vmem:[#allocation50_spill] sm:$0xff] }
  0x6b   : > { %v976_v54 = vmax.f32 %v972_v49, %v975_v12 }
  0x6c   : > { %v982_v46 = vmax.f32 %v978_v58, %v981_v14  ;;  %v15782_v58 = vld [vmem:[#allocation58_spill] sm:$0xff] }
  0x6d   : > { %v980_v44 = vmax.f32 %v976_v54, %v979_v24  ;;  %v7180_v24 = vld [vmem:[%s6707_s25 + $0x590] sm:$0xff] }
  0x6e   : > { %v986_v59 = vmax.f32 %v982_v46, %v985_v37 }
  0x6f   : > { %v984_v60 = vmax.f32 %v980_v44, %v983_v52  ;;  %v15770_v52 = vld [vmem:[#allocation52_spill] sm:$0xff] }
  0x70   : > { %v990_v55 = vmax.f32 %v986_v59, %v989_v33  ;;  %v1009_v59 = vsel %vm834_vm0, %v7177_v41, -inf  ;;  %v15774_v33 = vld [vmem:[#allocation54_spill] sm:$0xff] }
  0x71   : > { %v988_v20 = vmax.f32 %v984_v60, %v987_v27  ;;  %v295_v27 = vld [vmem:[%s6707_s25 + $0x8] sm:$0xff] }
  0x72   : > { %v994_v47 = vmax.f32 %v990_v55, %v993_v50  ;;  %v1011_v55 = vsel %vm834_vm0, %v7180_v24, -inf  ;;  %v7194_v42 = vsel %vm834_vm0, %v295_v27, -inf  ;;  %v15796_v27 = vld [vmem:[#allocation65_spill] sm:$0xff] }
  0x73   : > { %v992_v39 = vmax.f32 %v988_v20, %v991_v18  ;;  %v299_v18 = vld [vmem:[%s6707_s25 + $0x28] sm:$0xff]  ;;  %15741 = vst [vmem:[#allocation71_spill] sm:$0xff] %v7194_v42  ;;  %v15768_v20 = vld [vmem:[#allocation51_spill] sm:$0xff] }
  0x74   : > { %v998_v29 = vmax.f32 %v994_v47, %v997_v13  ;;  %v297_v13 = vld [vmem:[%s6707_s25 + $0x18] sm:$0xff]  ;;  %v15784_v47 = vld [vmem:[#allocation59_spill] sm:$0xff] }
  0x75   : > { %v996_v56 = vmax.f32 %v992_v39, %v995_v57  ;;  %v15772_v39 = vld [vmem:[#allocation53_spill] sm:$0xff]  ;;  %v15776_v57 = vld [vmem:[#allocation55_spill] sm:$0xff] }
  0x76   : > { %v1002_v8 = vmax.f32 %v998_v29, %v1001_v62  ;;  %v303_v62 = vld [vmem:[%s6707_s25 + $0x48] sm:$0xff] }
  0x77   : > { %v1000_v38 = vmax.f32 %v996_v56, %v999_v17  ;;  %v301_v17 = vld [vmem:[%s6707_s25 + $0x38] sm:$0xff]  ;;  %v7212_v36 = vsel %vm834_vm0, %v303_v62, -inf  ;;  %v15786_v29 = vld [vmem:[#allocation60_spill] sm:$0xff]  ;;  %v15800_v62 = vld [vmem:[#allocation67_spill] sm:$0xff] }
  0x78   : > { %v1006_v14 = vmax.f32 %v1002_v8, %v1005_v30  ;;  %v7197_v30 = vsel %vm834_vm0, %v299_v18, -inf  ;;  %v7209_v26 = vsel %vm834_vm0, %v301_v17, -inf  ;;  %15746 = vst [vmem:[#allocation76_spill] sm:$0xff] %v7212_v36  ;;  %v15788_v8 = vld [vmem:[#allocation61_spill] sm:$0xff] }
  0x79   : > { %v1004_v15 = vmax.f32 %v1000_v38, %v1003_v21  ;;  %15742 = vst [vmem:[#allocation72_spill] sm:$0xff] %v7197_v30 }
  0x7a   : > { %v1010_v60 = vmax.f32 %v1006_v14, %v1009_v59  ;;  %15745 = vst [vmem:[#allocation75_spill] sm:$0xff] %v7209_v26  ;;  %v15790_v14 = vld [vmem:[#allocation62_spill] sm:$0xff]  ;;  %v15792_v59 = vld [vmem:[#allocation63_spill] sm:$0xff] }
  0x7b   : > { %v1008_v37 = vmax.f32 %v1004_v15, %v1007_v32  ;;  %v7200_v32 = vsel %vm834_vm0, %v297_v13, -inf  ;;  %v15798_v13 = vld [vmem:[#allocation66_spill] sm:$0xff] }
  0x7c   : > { %15743 = vst [vmem:[#allocation73_spill] sm:$0xff] %v7200_v32 }
  0x7d   : > { %v1012_v7 = vmax.f32 %v1008_v37, %v1011_v55 }
  0x7f   : > { %v7188_v50 = vmax.f32 %v1010_v60, %v1012_v7  ;;  %v15794_v60 = vld [vmem:[#allocation64_spill] sm:$0xff] }
  0x81   : > { %v7204_v49 = vsub.f32 %v6710_v0, %v7188_v50  ;;  %v7216_v53 = vsub.f32 %v6713_v1, %v7188_v50  ;;  %v7220_v46 = vsub.f32 %v6716_v2, %v7188_v50  ;;  %v7224_v0 = vsub.f32 %v6719_v3, %v7188_v50 }
  0x82   : > { %v7228_v6 = vsub.f32 %v6722_v4, %v7188_v50  ;;  %v7232_v12 = vsub.f32 %v6725_v5, %v7188_v50  ;;  %v7236_v1 = vsub.f32 %v6734_v9, %v7188_v50  ;;  %v7240_v2 = vsub.f32 %v6737_v10, %v7188_v50 }
  0x83   : > { %15744 = vst [vmem:[#allocation74_spill] sm:$0xff] %v7204_v49  ;;  %v7244_v3 = vsub.f32 %v6740_v11, %v7188_v50  ;;  %v7248_v4 = vsub.f32 %v6749_v16, %v7188_v50  ;;  %v7252_v5 = vsub.f32 %v6754_v19, %v7188_v50  ;;  %v7256_v9 = vsub.f32 %v6759_v22, %v7188_v50 }
  0x84   : > { %15747 = vst [vmem:[#allocation77_spill] sm:$0xff] %v7216_v53  ;;  %v7260_v10 = vsub.f32 %v6764_v25, %v7188_v50  ;;  %v7264_v11 = vsub.f32 %v6769_v28, %v7188_v50  ;;  %v7268_v16 = vsub.f32 %v6774_v31, %v7188_v50  ;;  %v7272_v19 = vsub.f32 %v6779_v34, %v7188_v50 }
  0x85   : > { %15748 = vst [vmem:[#allocation78_spill] sm:$0xff] %v7220_v46  ;;  %v7276_v22 = vsub.f32 %v7042_v23, %v7188_v50  ;;  %v7280_v25 = vsub.f32 %v7045_v35, %v7188_v50  ;;  %v7284_v28 = vsub.f32 %v7048_v43, %v7188_v50  ;;  %v7288_v31 = vsub.f32 %v7051_v51, %v7188_v50 }
  0x86   : > { %15749 = vst [vmem:[#allocation79_spill] sm:$0xff] %v7224_v0  ;;  %v7292_v34 = vsub.f32 %v15766_v61, %v7188_v50  ;;  %v7296_v23 = vsub.f32 %v15768_v20, %v7188_v50  ;;  %v7300_v35 = vsub.f32 %v15770_v52, %v7188_v50  ;;  %v7304_v43 = vsub.f32 %v15772_v39, %v7188_v50  ;;  %v15802_v20 = vld [vmem:[#allocation68_spill] sm:$0xff]  ;;  %v15804_v39 = vld [vmem:[#allocation69_spill] sm:$0xff] }
  0x87   : > { %15750 = vst [vmem:[#allocation80_spill] sm:$0xff] %v7228_v6  ;;  %v7308_v51 = vsub.f32 %v15774_v33, %v7188_v50  ;;  %v7312_v45 = vsub.f32 %v15776_v57, %v7188_v50  ;;  %v7316_v21 = vsub.f32 %v15778_v48, %v7188_v50  ;;  %v7320_v63 = vsub.f32 %v15780_v40, %v7188_v50  ;;  %v15806_v57 = vld [vmem:[#allocation70_spill] sm:$0xff]  ;;  %v15808_v40 = vld [vmem:[#allocation3_spill] sm:$0xff] }
  0x88   : > { %15751 = vst [vmem:[#allocation81_spill] sm:$0xff] %v7232_v12  ;;  %v7324_v44 = vsub.f32 %v15782_v58, %v7188_v50  ;;  %v7328_v56 = vsub.f32 %v15784_v47, %v7188_v50  ;;  %v7332_v38 = vsub.f32 %v15786_v29, %v7188_v50  ;;  %v7336_v15 = vsub.f32 %v15788_v8, %v7188_v50  ;;  %v15810_v47 = vld [vmem:[#allocation4_spill] sm:$0xff] }
  0x89   : > { %15752 = vst [vmem:[#allocation82_spill] sm:$0xff] %v7236_v1  ;;  %v7340_v37 = vsub.f32 %v15790_v14, %v7188_v50  ;;  %v7344_v55 = vsub.f32 %v15792_v59, %v7188_v50  ;;  %v7348_v7 = vsub.f32 %v15794_v60, %v7188_v50  ;;  %v7352_v18 = vsub.f32 %v15796_v27, %v7188_v50  ;;  %v15814_v59 = vld [vmem:[#allocation5_spill] sm:$0xff]  ;;  %v15816_v27 = vld [vmem:[#allocation6_spill] sm:$0xff] }
  0x8a   : > { %15753 = vst [vmem:[#allocation83_spill] sm:$0xff] %v7240_v2  ;;  %v7356_v17 = vsub.f32 %v15798_v13, %v7188_v50  ;;  %v7360_v61 = vsub.f32 %v15800_v62, %v7188_v50  ;;  %v7364_v52 = vsub.f32 %v15802_v20, %v7188_v50  ;;  %v7368_v33 = vsub.f32 %v15804_v39, %v7188_v50  ;;  %v15818_v62 = vld [vmem:[#allocation7_spill] sm:$0xff]  ;;  %v15820_v39 = vld [vmem:[#allocation8_spill] sm:$0xff] }
  0x8b   : > { %15754 = vst [vmem:[#allocation84_spill] sm:$0xff] %v7244_v3  ;;  %v7372_v48 = vsub.f32 %v15806_v57, %v7188_v50  ;;  %v7376_v58 = vsub.f32 %v15808_v40, %v7188_v50  ;;  %v7380_v29 = vsub.f32 %v15810_v47, %v7188_v50  ;;  %v7384_v8 = vsub.f32 %v7177_v41, %v7188_v50  ;;  %v15822_v57 = vld [vmem:[#allocation9_spill] sm:$0xff]  ;;  %v15824_v40 = vld [vmem:[#allocation10_spill] sm:$0xff] }
  0x8c   : > { %15755 = vst [vmem:[#allocation85_spill] sm:$0xff] %v7248_v4  ;;  %v7388_v14 = vsub.f32 %v7180_v24, %v7188_v50  ;;  %v7392_v60 = vsub.f32 %v15814_v59, %v7188_v50  ;;  %v7396_v13 = vsub.f32 %v15816_v27, %v7188_v50  ;;  %v7400_v20 = vsub.f32 %v15818_v62, %v7188_v50  ;;  %v15826_v59 = vld [vmem:[#allocation11_spill] sm:$0xff]  ;;  %v15828_v62 = vld [vmem:[#allocation12_spill] sm:$0xff] }
  0x8d   : > { %15756 = vst [vmem:[#allocation86_spill] sm:$0xff] %v7252_v5  ;;  %v7404_v41 = vsub.f32 %v15820_v39, %v7188_v50  ;;  %v7408_v24 = vsub.f32 %v15822_v57, %v7188_v50  ;;  %v7412_v47 = vsub.f32 %v15824_v40, %v7188_v50  ;;  %v7416_v27 = vsub.f32 %v15826_v59, %v7188_v50  ;;  %v15830_v39 = vld [vmem:[#allocation13_spill] sm:$0xff]  ;;  %v15832_v57 = vld [vmem:[#allocation14_spill] sm:$0xff] }
  0x8e   : > { %15757 = vst [vmem:[#allocation87_spill] sm:$0xff] %v7256_v9  ;;  %v1373_v54 = vmul.f32 1.442695, %v7204_v49  ;;  %v7421_v30 = vsub.f32 %v15828_v62, %v7188_v50  ;;  %v7425_v42 = vsub.f32 %v15830_v39, %v7188_v50  ;;  %v7429_v36 = vsub.f32 %v15832_v57, %v7188_v50  ;;  %v15836_v49 = vld [vmem:[#allocation16_spill] sm:$0xff]  ;;  %v15838_v62 = vld [vmem:[#allocation17_spill] sm:$0xff] }
  0x8f   : > { %15758 = vst [vmem:[#allocation88_spill] sm:$0xff] %v7260_v10  ;;  %v1377_v40 = vmul.f32 1.442695, %v7216_v53  ;;  %v1381_v39 = vmul.f32 1.442695, %v7220_v46  ;;  %v15842_v53 = vld [vmem:[#allocation19_spill] sm:$0xff] }
  0x90   : > { %15759 = vst [vmem:[#allocation89_spill] sm:$0xff] %v7264_v11  ;;  %v15848_v46 = vld [vmem:[#allocation22_spill] sm:$0xff]  ;;  %5859 = vpow2.f32 %v1373_v54  ;;  %v15860_v54 = vld [vmem:[#allocation28_spill] sm:$0xff] }
  0x91   : > { %15760 = vst [vmem:[#allocation90_spill] sm:$0xff] %v7268_v16  ;;  %5861 = vpow2.f32 %v1377_v40  ;;  %v15864_v40 = vld [vmem:[#allocation30_spill] sm:$0xff] }
  0x92   : > { %15761 = vst [vmem:[#allocation91_spill] sm:$0xff] %v7272_v19  ;;  %5863 = vpow2.f32 %v1381_v39  ;;  %v15870_v39 = vld [vmem:[#allocation33_spill] sm:$0xff] }
  0x93   : > { %15762 = vst [vmem:[#allocation92_spill] sm:$0xff] %v7276_v22 }
  0x94   : > { %15763 = vst [vmem:[#allocation93_spill] sm:$0xff] %v7280_v25 }
  0x95   : > { %15764 = vst [vmem:[#allocation94_spill] sm:$0xff] %v7284_v28 }
  0x96   : > { %15765 = vst [vmem:[#allocation95_spill] sm:$0xff] %v7288_v31 }
  0x97   : > { %15767 = vst [vmem:[#allocation50_spill] sm:$0xff] %v7292_v34 }
  0x98   : > { %15769 = vst [vmem:[#allocation51_spill] sm:$0xff] %v7296_v23 }
  0x99   : > { %15771 = vst [vmem:[#allocation52_spill] sm:$0xff] %v7300_v35 }
  0x9a   : > { %15773 = vst [vmem:[#allocation53_spill] sm:$0xff] %v7304_v43 }
  0x9b   : > { %15775 = vst [vmem:[#allocation54_spill] sm:$0xff] %v7308_v51 }
  0x9c   : > { %15777 = vst [vmem:[#allocation55_spill] sm:$0xff] %v7312_v45  ;;  %v7525_v45 = vpop.eup %5859 }
  0x9d   : > { %15779 = vst [vmem:[#allocation56_spill] sm:$0xff] %v7316_v21 }
  0x9e   : > { %15781 = vst [vmem:[#allocation57_spill] sm:$0xff] %v7320_v63  ;;  %v7510_v63 = vsub.f32 %v15870_v39, %v7188_v50  ;;  %v15879_v39 = vld [vmem:[#allocation37_spill] sm:$0xff] }
  0x9f   : > { %15783 = vst [vmem:[#allocation58_spill] sm:$0xff] %v7324_v44  ;;  %v15868_v44 = vld [vmem:[#allocation32_spill] sm:$0xff]  ;;  %v7529_v51 = vsub.f32 %v15879_v39, %v7188_v50  ;;  %v15890_v39 = vld [vmem:[#allocation42_spill] sm:$0xff] }
  0xa0   : > { %15785 = vst [vmem:[#allocation59_spill] sm:$0xff] %v7328_v56  ;;  %v15866_v56 = vld [vmem:[#allocation31_spill] sm:$0xff]  ;;  %v7551_v31 = vsub.f32 %v15890_v39, %v7188_v50  ;;  %v15899_v39 = vld [vmem:[#allocation46_spill] sm:$0xff] }
  0xa1   : > { %15787 = vst [vmem:[#allocation60_spill] sm:$0xff] %v7332_v38  ;;  %v7489_v38 = vsub.f32 %v15860_v54, %v7188_v50  ;;  %v7506_v54 = vsub.f32 %v15868_v44, %v7188_v50  ;;  %v1397_v44 = vmul.f32 1.442695, %v7236_v1  ;;  %v15888_v1 = vld [vmem:[#allocation41_spill] sm:$0xff] }
  0xa2   : > { %15789 = vst [vmem:[#allocation61_spill] sm:$0xff] %v7336_v15  ;;  %v15858_v15 = vld [vmem:[#allocation27_spill] sm:$0xff]  ;;  %v7547_v34 = vsub.f32 %v15888_v1, %v7188_v50  ;;  %v15897_v1 = vld [vmem:[#allocation45_spill] sm:$0xff] }
  0xa3   : > { %15791 = vst [vmem:[#allocation62_spill] sm:$0xff] %v7340_v37  ;;  %v15856_v37 = vld [vmem:[#allocation26_spill] sm:$0xff] }
  0xa4   : > { %15793 = vst [vmem:[#allocation63_spill] sm:$0xff] %v7344_v55 }
  0xa5   : > { %15795 = vst [vmem:[#allocation64_spill] sm:$0xff] %v7348_v7 }
  0xa6   : > { %15797 = vst [vmem:[#allocation65_spill] sm:$0xff] %v7352_v18  ;;  %v7464_v18 = vsub.f32 %v15848_v46, %v7188_v50  ;;  %v7481_v46 = vsub.f32 %v15856_v37, %v7188_v50  ;;  %v1393_v37 = vmul.f32 1.442695, %v7232_v12  ;;  %v15876_v12 = vld [vmem:[#allocation36_spill] sm:$0xff] }
  0xa7   : > { %15799 = vst [vmem:[#allocation66_spill] sm:$0xff] %v7356_v17  ;;  %v15846_v17 = vld [vmem:[#allocation21_spill] sm:$0xff] }
  0xa8   : > { %15801 = vst [vmem:[#allocation67_spill] sm:$0xff] %v7360_v61 }
  0xa9   : > { %15803 = vst [vmem:[#allocation68_spill] sm:$0xff] %v7364_v52  ;;  %v7451_v52 = vsub.f32 %v15842_v53, %v7188_v50  ;;  %v15852_v53 = vld [vmem:[#allocation24_spill] sm:$0xff] }
  0xaa   : > { %15805 = vst [vmem:[#allocation69_spill] sm:$0xff] %v7368_v33  ;;  %v15840_v33 = vld [vmem:[#allocation18_spill] sm:$0xff]  ;;  %v7472_v55 = vsub.f32 %v15852_v53, %v7188_v50  ;;  %v15862_v53 = vld [vmem:[#allocation29_spill] sm:$0xff] }
  0xab   : > { %15807 = vst [vmem:[#allocation70_spill] sm:$0xff] %v7372_v48  ;;  %v7442_v48 = vsub.f32 %v15838_v62, %v7188_v50  ;;  %v7447_v57 = vsub.f32 %v15840_v33, %v7188_v50  ;;  %v7460_v62 = vsub.f32 %v15846_v17, %v7188_v50  ;;  %v15850_v33 = vld [vmem:[#allocation23_spill] sm:$0xff]  ;;  %v1389_v17 = vmul.f32 1.442695, %v7228_v6 }
  0xac   : > { %15809 = vst [vmem:[#allocation3_spill] sm:$0xff] %v7376_v58  ;;  %v7468_v7 = vsub.f32 %v15850_v33, %v7188_v50  ;;  %v7485_v33 = vsub.f32 %v15858_v15, %v7188_v50  ;;  %v7497_v6 = vsub.f32 %v15864_v40, %v7188_v50  ;;  %v7502_v15 = vsub.f32 %v15866_v56, %v7188_v50 }
  0xad   : > { %15811 = vst [vmem:[#allocation4_spill] sm:$0xff] %v7380_v29  ;;  %v7522_v56 = vsub.f32 %v15876_v12, %v7188_v50  ;;  %v15885_v12 = vld [vmem:[#allocation40_spill] sm:$0xff] }
  0xae   : > { %15812 = vst [vmem:[#allocation96_spill] sm:$0xff] %v7384_v8  ;;  %v7438_v8 = vsub.f32 %v15836_v49, %v7188_v50  ;;  %v1385_v49 = vmul.f32 1.442695, %v7224_v0  ;;  %v7541_v23 = vsub.f32 %v15885_v12, %v7188_v50  ;;  %v15895_v12 = vld [vmem:[#allocation44_spill] sm:$0xff] }
  0xaf   : > { %15813 = vst [vmem:[#allocation97_spill] sm:$0xff] %v7388_v14  ;;  %v15834_v14 = vld [vmem:[#allocation15_spill] sm:$0xff]  ;;  %v7562_v22 = vsub.f32 %v15895_v12, %v7188_v50  ;;  %v1417_v12 = vmul.f32 1.442695, %v7256_v9 }
  0xb0   : > { %15815 = vst [vmem:[#allocation5_spill] sm:$0xff] %v7392_v60  ;;  %v7434_v59 = vsub.f32 %v15834_v14, %v7188_v50  ;;  %v15844_v14 = vld [vmem:[#allocation20_spill] sm:$0xff]  ;;  %5865 = vpow2.f32 %v1385_v49  ;;  %v15874_v49 = vld [vmem:[#allocation35_spill] sm:$0xff] }
  0xb1   : > { %15817 = vst [vmem:[#allocation6_spill] sm:$0xff] %v7396_v13  ;;  %v7455_v61 = vsub.f32 %v15844_v14, %v7188_v50  ;;  %v15854_v14 = vld [vmem:[#allocation25_spill] sm:$0xff]  ;;  %v7518_v40 = vsub.f32 %v15874_v49, %v7188_v50  ;;  %5867 = vpow2.f32 %v1389_v17  ;;  %v15883_v49 = vld [vmem:[#allocation39_spill] sm:$0xff]  ;;  %v7543_v17 = vpop.eup %5861 }
  0xb2   : > { %15819 = vst [vmem:[#allocation7_spill] sm:$0xff] %v7400_v20  ;;  %v7476_v0 = vsub.f32 %v15854_v14, %v7188_v50  ;;  %v7493_v14 = vsub.f32 %v15862_v53, %v7188_v50  ;;  %v15872_v53 = vld [vmem:[#allocation34_spill] sm:$0xff]  ;;  %v7537_v35 = vsub.f32 %v15883_v49, %v7188_v50  ;;  %5869 = vpow2.f32 %v1393_v37  ;;  %v7554_v28 = vpop.eup %5863  ;;  %v15893_v49 = vld [vmem:[#allocation43_spill] sm:$0xff] }
  0xb3   : > { %15821 = vst [vmem:[#allocation8_spill] sm:$0xff] %v7404_v41  ;;  %v7514_v21 = vsub.f32 %v15872_v53, %v7188_v50  ;;  %v15881_v53 = vld [vmem:[#allocation38_spill] sm:$0xff]  ;;  %v7558_v25 = vsub.f32 %v15893_v49, %v7188_v50  ;;  %5871 = vpow2.f32 %v1397_v44  ;;  %v1409_v49 = vmul.f32 1.442695, %v7248_v4 }
  0xb4   : > { %15823 = vst [vmem:[#allocation9_spill] sm:$0xff] %v7408_v24  ;;  %v7533_v43 = vsub.f32 %v15881_v53, %v7188_v50  ;;  %v1401_v53 = vmul.f32 1.442695, %v7240_v2  ;;  %v1405_v2 = vmul.f32 1.442695, %v7244_v3  ;;  %v1736_v4 = vsel %vm834_vm0, %v7554_v28, 0.0 }
  0xb5   : > { %15825 = vst [vmem:[#allocation10_spill] sm:$0xff] %v7412_v47  ;;  %v1425_v44 = vmul.f32 1.442695, %v7264_v11  ;;  %v15906_v11 = vld [vmem:[#allocation48_spill] sm:$0xff] }
  0xb6   : > { %15827 = vst [vmem:[#allocation11_spill] sm:$0xff] %v7416_v27  ;;  %v7572_v37 = vpop.eup %5865  ;;  %5873 = vpow2.f32 %v1401_v53  ;;  %v1437_v53 = vmul.f32 1.442695, %v7376_v58  ;;  %v1457_v58 = vmul.f32 1.442695, %v7404_v41 }
  0xb7   : > { %15829 = vst [vmem:[#allocation12_spill] sm:$0xff] %v7421_v30  ;;  %5875 = vpow2.f32 %v1405_v2  ;;  %v1453_v2 = vmul.f32 1.442695, %v7400_v20  ;;  %v5680_v20 = vld [vmem:[%s15014_s3 + $0x1] ss:$0 sm:$0xff] }
  0xb8   : > { %15831 = vst [vmem:[#allocation13_spill] sm:$0xff] %v7425_v42  ;;  %5877 = vpow2.f32 %v1409_v49  ;;  %v7627_v49 = vmul.f32 1.442695, %v7416_v27  ;;  %v7645_v27 = vmul.f32 1.442695, %v7434_v59 }
  0xb9   : > { %15833 = vst [vmem:[#allocation14_spill] sm:$0xff] %v7429_v36 }
  0xba   : > { %15835 = vst [vmem:[#allocation15_spill] sm:$0xff] %v7434_v59 }
  0xbb   : > { %15837 = vst [vmem:[#allocation16_spill] sm:$0xff] %v7438_v8 }
  0xbc   : > { %15839 = vst [vmem:[#allocation17_spill] sm:$0xff] %v7442_v48 }
  0xbd   : > { %15841 = vst [vmem:[#allocation18_spill] sm:$0xff] %v7447_v57 }
  0xbe   : > { %15843 = vst [vmem:[#allocation19_spill] sm:$0xff] %v7451_v52 }
  0xbf   : > { %15845 = vst [vmem:[#allocation20_spill] sm:$0xff] %v7455_v61 }
  0xc0   : > { %15847 = vst [vmem:[#allocation21_spill] sm:$0xff] %v7460_v62 }
  0xc1   : > { %15849 = vst [vmem:[#allocation22_spill] sm:$0xff] %v7464_v18 }
  0xc2   : > { %15851 = vst [vmem:[#allocation23_spill] sm:$0xff] %v7468_v7 }
  0xc3   : > { %15853 = vst [vmem:[#allocation24_spill] sm:$0xff] %v7472_v55 }
  0xc4   : > { %15855 = vst [vmem:[#allocation25_spill] sm:$0xff] %v7476_v0 }
  0xc5   : > { %15857 = vst [vmem:[#allocation26_spill] sm:$0xff] %v7481_v46 }
  0xc6   : > { %15859 = vst [vmem:[#allocation27_spill] sm:$0xff] %v7485_v33 }
  0xc7   : > { %15861 = vst [vmem:[#allocation28_spill] sm:$0xff] %v7489_v38 }
  0xc8   : > { %15863 = vst [vmem:[#allocation29_spill] sm:$0xff] %v7493_v14 }
  0xc9   : > { %15865 = vst [vmem:[#allocation30_spill] sm:$0xff] %v7497_v6 }
  0xca   : > { %15867 = vst [vmem:[#allocation31_spill] sm:$0xff] %v7502_v15 }
  0xcb   : > { %15869 = vst [vmem:[#allocation32_spill] sm:$0xff] %v7506_v54 }
  0xcc   : > { %15871 = vst [vmem:[#allocation33_spill] sm:$0xff] %v7510_v63 }
  0xcd   : > { %15873 = vst [vmem:[#allocation34_spill] sm:$0xff] %v7514_v21 }
  0xce   : > { %15875 = vst [vmem:[#allocation35_spill] sm:$0xff] %v7518_v40 }
  0xcf   : > { %15877 = vst [vmem:[#allocation36_spill] sm:$0xff] %v7522_v56 }
  0xd0   : > { %15878 = vst [vmem:[#allocation98_spill] sm:$0xff] %v7525_v45 }
  0xd1   : > { %15880 = vst [vmem:[#allocation37_spill] sm:$0xff] %v7529_v51 }
  0xd2   : > { %15882 = vst [vmem:[#allocation38_spill] sm:$0xff] %v7533_v43 }
  0xd3   : > { %15884 = vst [vmem:[#allocation39_spill] sm:$0xff] %v7537_v35 }
  0xd4   : > { %15886 = vst [vmem:[#allocation40_spill] sm:$0xff] %v7541_v23 }
  0xd5   : > { %15887 = vst [vmem:[#allocation99_spill] sm:$0xff] %v7543_v17 }
  0xd6   : > { %15889 = vst [vmem:[#allocation41_spill] sm:$0xff] %v7547_v34  ;;  %v7566_v34 = vsub.f32 %v15897_v1, %v7188_v50  ;;  %v1733_v1 = vsel %vm834_vm0, %v7525_v45, 0.0  ;;  %v1433_v45 = vmul.f32 1.442695, %v7272_v19 }
  0xd7   : > { %15891 = vst [vmem:[#allocation42_spill] sm:$0xff] %v7551_v31  ;;  %v7570_v31 = vsub.f32 %v15899_v39, %v7188_v50  ;;  %v1734_v39 = vsel %vm834_vm0, %v7543_v17, 0.0  ;;  %v1738_v17 = vsel %vm834_vm0, %v7572_v37, 0.0 }
  0xd8   : > { %15892 = vst [vmem:[#allocation100_spill] sm:$0xff] %v7554_v28  ;;  %v1735_v3 = vadd.f32 %v1734_v39, %v1733_v1  ;;  %v1441_v1 = vmul.f32 1.442695, %v7380_v29  ;;  %v7602_v28 = vsub.f32 %v15906_v11, %v7188_v50  ;;  %v7617_v11 = vmul.f32 1.442695, %v7408_v24 }
  0xd9   : > { %15894 = vst [vmem:[#allocation43_spill] sm:$0xff] %v7558_v25  ;;  %v1413_v25 = vmul.f32 1.442695, %v7252_v5  ;;  %v15903_v5 = vld [vmem:[#allocation47_spill] sm:$0xff] }
  0xda   : > { %15896 = vst [vmem:[#allocation44_spill] sm:$0xff] %v7562_v22  ;;  %v1421_v22 = vmul.f32 1.442695, %v7260_v10  ;;  %v7590_v9 = vsub.f32 %v15903_v5, %v7188_v50  ;;  %v1429_v10 = vmul.f32 1.442695, %v7268_v16  ;;  %v1737_v39 = vadd.f32 %v1736_v4, %v1735_v3  ;;  %v15909_v3 = vld [vmem:[#allocation49_spill] sm:$0xff] }
  0xdb   : > { %15898 = vst [vmem:[#allocation45_spill] sm:$0xff] %v7566_v34  ;;  %v1445_v5 = vmul.f32 1.442695, %v7392_v60  ;;  %v1449_v16 = vmul.f32 1.442695, %v7396_v13  ;;  %v7614_v4 = vsub.f32 %v15909_v3, %v7188_v50  ;;  %5879 = vpow2.f32 %v1413_v25 }
  0xdc   : > { %15900 = vst [vmem:[#allocation46_spill] sm:$0xff] %v7570_v31  ;;  %v7583_v31 = vpop.eup %5867  ;;  %v1739_v29 = vadd.f32 %v1738_v17, %v1737_v39  ;;  %v7620_v13 = vmul.f32 1.442695, %v7412_v47  ;;  %v7630_v17 = vmul.f32 1.442695, %v7421_v30  ;;  %5881 = vpow2.f32 %v1417_v12 }
  0xdd   : > { %15901 = vst [vmem:[#allocation101_spill] sm:$0xff] %v7572_v37  ;;  %v7596_v34 = vpop.eup %5869  ;;  %v1740_v19 = vsel %vm834_vm0, %v7583_v31, 0.0  ;;  %v7633_v39 = vmul.f32 1.442695, %v7425_v42  ;;  %v7636_v3 = vmul.f32 1.442695, %v7429_v36  ;;  %5883 = vpow2.f32 %v1421_v22 }
  0xde   : > { %15902 = vst [vmem:[#allocation102_spill] sm:$0xff] %v7583_v31  ;;  %v7608_v37 = vpop.eup %5871  ;;  %v1742_v60 = vsel %vm834_vm0, %v7596_v34, 0.0  ;;  %v1741_v50 = vadd.f32 %v1740_v19, %v1739_v29  ;;  %v7648_v19 = vmul.f32 1.442695, %v7438_v8  ;;  %v7651_v36 = vmul.f32 1.442695, %v7442_v48 }
  0xdf   : > { %15904 = vst [vmem:[#allocation47_spill] sm:$0xff] %v7590_v9  ;;  %v7624_v31 = vpop.eup %5873  ;;  %v1744_v47 = vsel %vm834_vm0, %v7608_v37, 0.0  ;;  %v7654_v42 = vmul.f32 1.442695, %v7447_v57  ;;  %5885 = vpow2.f32 %v1425_v44  ;;  %v7661_v12 = vmul.f32 1.442695, %v7451_v52 }
  0xe0   : > { %15905 = vst [vmem:[#allocation103_spill] sm:$0xff] %v7596_v34  ;;  %v7642_v25 = vpop.eup %5875  ;;  %v1743_v29 = vadd.f32 %v1742_v60, %v1741_v50  ;;  %v1746_v24 = vsel %vm834_vm0, %v7624_v31, 0.0  ;;  %v7664_v8 = vmul.f32 1.442695, %v7455_v61  ;;  %5887 = vpow2.f32 %v1429_v10 }
  0xe1   : > { %15907 = vst [vmem:[#allocation48_spill] sm:$0xff] %v7602_v28  ;;  %v7658_v30 = vpop.eup %5877  ;;  %v7667_v22 = vmul.f32 1.442695, %v7460_v62  ;;  %v7670_v50 = vmul.f32 1.442695, %v7464_v18  ;;  %v1748_v57 = vsel %vm834_vm0, %v7642_v25, 0.0  ;;  %5889 = vpow2.f32 %v1433_v45 }
  0xe2   : > { %15908 = vst [vmem:[#allocation104_spill] sm:$0xff] %v7608_v37  ;;  %v1745_v60 = vadd.f32 %v1744_v47, %v1743_v29  ;;  %v7674_v48 = vpop.eup %5879  ;;  %v7677_v44 = vmul.f32 1.442695, %v7468_v7  ;;  %v7680_v61 = vmul.f32 1.442695, %v7472_v55  ;;  %5891 = vpow2.f32 %v1437_v53 }
  0xe3   : > { %15910 = vst [vmem:[#allocation49_spill] sm:$0xff] %v7614_v4  ;;  %v7683_v10 = vmul.f32 1.442695, %v7476_v0  ;;  %v7686_v29 = vmul.f32 1.442695, %v7481_v46  ;;  %v1750_v18 = vsel %vm834_vm0, %v7658_v30, 0.0  ;;  %v7690_v62 = vpop.eup %5881  ;;  %5893 = vpow2.f32 %v1441_v1 }
  0xe4   : > { %15911 = vst [vmem:[#allocation105_spill] sm:$0xff] %v7624_v31  ;;  %v1747_v47 = vadd.f32 %v1746_v24, %v1745_v60  ;;  %v7693_v45 = vmul.f32 1.442695, %v7485_v33  ;;  %v7696_v55 = vmul.f32 1.442695, %v7489_v38  ;;  %v7698_v53 = vpop.eup %5883  ;;  %5895 = vpow2.f32 %v1445_v5  ;;  %v15937_v32 = vld [vmem:[#allocation46_spill] sm:$0xff] }
  0xe5   : > { %15912 = vst [vmem:[#allocation106_spill] sm:$0xff] %v7642_v25  ;;  %v7701_v60 = vmul.f32 1.442695, %v7493_v14  ;;  %v7704_v46 = vmul.f32 1.442695, %v7497_v6  ;;  %v1752_v0 = vsel %vm834_vm0, %v7674_v48, 0.0  ;;  %v7708_v1 = vpop.eup %5885  ;;  %5897 = vpow2.f32 %v1449_v16 }
  0xe6   : > { %15913 = vst [vmem:[#allocation107_spill] sm:$0xff] %v7658_v30  ;;  %v1749_v24 = vadd.f32 %v1748_v57, %v1747_v47  ;;  %v7711_v33 = vmul.f32 1.442695, %v7502_v15  ;;  %v7714_v57 = vmul.f32 1.442695, %v7506_v54  ;;  %v7716_v5 = vpop.eup %5887  ;;  %5899 = vpow2.f32 %v1453_v2 }
  0xe7   : > { %15914 = vst [vmem:[#allocation108_spill] sm:$0xff] %v7674_v48  ;;  %v7719_v14 = vmul.f32 1.442695, %v7510_v63  ;;  %v7722_v6 = vmul.f32 1.442695, %v7514_v21  ;;  %v1754_v38 = vsel %vm834_vm0, %v7690_v62, 0.0  ;;  %v7726_v16 = vpop.eup %5889  ;;  %5901 = vpow2.f32 %v1457_v58 }
  0xe8   : > { %15915 = vst [vmem:[#allocation109_spill] sm:$0xff] %v7690_v62  ;;  %v1751_v47 = vadd.f32 %v1750_v18, %v1749_v24  ;;  %v7729_v15 = vmul.f32 1.442695, %v7518_v40  ;;  %v7732_v18 = vmul.f32 1.442695, %v7522_v56  ;;  %v7734_v2 = vpop.eup %5891  ;;  %5903 = vpow2.f32 %v7617_v11  ;;  %v15925_v40 = vld [vmem:[#allocation42_spill] sm:$0xff] }
  0xe9   : > { %15916 = vst [vmem:[#allocation110_spill] sm:$0xff] %v7698_v53  ;;  %v7738_v21 = vmul.f32 1.442695, %v7529_v51  ;;  %v7741_v63 = vmul.f32 1.442695, %v7533_v43  ;;  %v1756_v58 = vsel %vm834_vm0, %v7698_v53, 0.0  ;;  %v7745_v54 = vpop.eup %5893  ;;  %5905 = vpow2.f32 %v7620_v13 }
  0xea   : > { %15917 = vst [vmem:[#allocation111_spill] sm:$0xff] %v7708_v1  ;;  %v1753_v24 = vadd.f32 %v1752_v0, %v1751_v47  ;;  %v7749_v56 = vmul.f32 1.442695, %v7537_v35  ;;  %v7752_v0 = vmul.f32 1.442695, %v7541_v23  ;;  %v7754_v47 = vpop.eup %5895  ;;  %5907 = vpow2.f32 %v7627_v49  ;;  %v15923_v43 = vld [vmem:[#allocation41_spill] sm:$0xff] }
  0xeb   : > { %15918 = vst [vmem:[#allocation112_spill] sm:$0xff] %v7716_v5  ;;  %v7758_v51 = vmul.f32 1.442695, %v15923_v43  ;;  %v7761_v7 = vmul.f32 1.442695, %v15925_v40  ;;  %v1758_v13 = vsel %vm834_vm0, %v7708_v1, 0.0  ;;  %v7765_v52 = vpop.eup %5897  ;;  %5909 = vpow2.f32 %v7630_v17 }
  0xec   : > { %15919 = vst [vmem:[#allocation113_spill] sm:$0xff] %v7726_v16  ;;  %v1755_v11 = vadd.f32 %v1754_v38, %v1753_v24  ;;  %v15928_v23 = vld [vmem:[#allocation43_spill] sm:$0xff]  ;;  %v1760_v49 = vsel %vm834_vm0, %v7716_v5, 0.0  ;;  %v7773_v24 = vpop.eup %5899  ;;  %5911 = vpow2.f32 %v7633_v39  ;;  %v15931_v40 = vld [vmem:[#allocation44_spill] sm:$0xff]  ;;  %v1762_v59 = vsel %vm834_vm0, %v7726_v16, 0.0 }
  0xed   : > { %15920 = vst [vmem:[#allocation114_spill] sm:$0xff] %v7734_v2  ;;  %v7769_v35 = vmul.f32 1.442695, %v15928_v23  ;;  %v7777_v43 = vmul.f32 1.442695, %v15931_v40  ;;  %v1764_v17 = vsel %vm834_vm0, %v7734_v2, 0.0  ;;  %5913 = vpow2.f32 %v7636_v3 }
  0xee   : > { %15921 = vst [vmem:[#allocation115_spill] sm:$0xff] %v7745_v54  ;;  %v1757_v38 = vadd.f32 %v1756_v58, %v1755_v11  ;;  %v5679_v58 = vld [vmem:[%s15014_s3] ss:$0 sm:$0xff]  ;;  %v7786_v11 = vpop.eup %5901  ;;  %v15934_v23 = vld [vmem:[#allocation45_spill] sm:$0xff]  ;;  %v1766_v40 = vsel %vm834_vm0, %v7745_v54, 0.0  ;;  %v1768_v3 = vsel %vm834_vm0, %v7754_v47, 0.0  ;;  %5915 = vpow2.f32 %v7645_v27 }
  0xef   : > { %15922 = vst [vmem:[#allocation116_spill] sm:$0xff] %v7754_v47  ;;  %v7790_v41 = vmul.f32 1.442695, %v15934_v23  ;;  %v7797_v26 = vpop.eup %5903  ;;  %v7813_v23 = vmul.f32 1.442695, %v7602_v28  ;;  %5917 = vpow2.f32 %v7648_v19 }
  0xf0   : > { %15924 = vst [vmem:[#allocation117_spill] sm:$0xff] %v7758_v51  ;;  %v1759_v39 = vadd.f32 %v1758_v13, %v1757_v38  ;;  %v1770_v13 = vsel %vm834_vm0, %v7765_v52, 0.0  ;;  %v7809_v38 = vpop.eup %5905  ;;  %v5681_v27 = vld [vmem:[%s15014_s3 + $0x2] ss:$0 sm:$0xff]  ;;  %5919 = vpow2.f32 %v7651_v36  ;;  %v5682_v36 = vld [vmem:[%s15014_s3 + $0x3] ss:$0 sm:$0xff] }
  0xf1   : > { %15926 = vst [vmem:[#allocation118_spill] sm:$0xff] %v7761_v7  ;;  %5921 = vpow2.f32 %v7654_v42  ;;  %v15949_v7 = vld [vmem:[#allocation93_spill] sm:$0xff] }
  0xf2   : > { %15927 = vst [vmem:[#allocation119_spill] sm:$0xff] %v7765_v52  ;;  %v7849_v51 = vmul.f32 1.442695, %v15949_v7  ;;  %5923 = vpow2.f32 %v7661_v12 }
  0xf3   : > { %15929 = vst [vmem:[#allocation120_spill] sm:$0xff] %v7769_v35  ;;  %v7803_v35 = vmul.f32 1.442695, %v7590_v9  ;;  %v7819_v9 = vpop.eup %5907  ;;  %5925 = vpow2.f32 %v7664_v8 }
  0xf4   : > { %15930 = vst [vmem:[#allocation121_spill] sm:$0xff] %v7773_v24  ;;  %v7835_v28 = vpop.eup %5909  ;;  %5927 = vpow2.f32 %v7667_v22 }
  0xf5   : > { %15932 = vst [vmem:[#allocation122_spill] sm:$0xff] %v7777_v43  ;;  %v7800_v43 = vmul.f32 1.442695, %v15937_v32  ;;  %v7817_v32 = vsel %vm834_vm0, %v7773_v24, 0.0  ;;  %v7880_v12 = vsel %vm834_vm0, %v7835_v28, 0.0  ;;  %5929 = vpow2.f32 %v7670_v50 }
  0xf6   : > { %15933 = vst [vmem:[#allocation123_spill] sm:$0xff] %v7786_v11  ;;  %5931 = vpow2.f32 %v7677_v44 }
  0xf7   : > { %15935 = vst [vmem:[#allocation124_spill] sm:$0xff] %v7790_v41  ;;  %v1761_v41 = vadd.f32 %v1760_v49, %v1759_v39  ;;  %v15944_v49 = vld [vmem:[#allocation98_spill] sm:$0xff]  ;;  %5933 = vpow2.f32 %v7680_v61 }
  0xf8   : > { %15936 = vst [vmem:[#allocation125_spill] sm:$0xff] %v7797_v26  ;;  %v7833_v39 = vmul.f32 %v15944_v49, %v5679_v58  ;;  %v7853_v58 = vsel %vm834_vm0, %v7809_v38, 0.0  ;;  %v15953_v49 = vld [vmem:[#allocation94_spill] sm:$0xff]  ;;  %5935 = vpow2.f32 %v7683_v10 }
  0xf9   : > { %15938 = vst [vmem:[#allocation126_spill] sm:$0xff] %v7800_v43  ;;  %v7827_v43 = vsel %vm834_vm0, %v7786_v11, 0.0  ;;  %v7845_v11 = vpop.eup %5911  ;;  %v7865_v42 = vmul.f32 1.442695, %v15953_v49  ;;  %5937 = vpow2.f32 %v7686_v29 }
  0xfa   : > { %15939 = vst [vmem:[#allocation127_spill] sm:$0xff] %v7803_v35  ;;  %v7823_v35 = vmul.f32 1.442695, %v7614_v4  ;;  %v1763_v4 = vadd.f32 %v1762_v59, %v1761_v41  ;;  %v15951_v41 = vld [vmem:[#allocation99_spill] sm:$0xff]  ;;  %5939 = vpow2.f32 %v7693_v45 }
  0xfb   : > { %15940 = vst [vmem:[#allocation128_spill] sm:$0xff] %v7809_v38  ;;  %v7859_v59 = vmul.f32 %v15951_v41, %v5680_v20  ;;  %v15955_v20 = vld [vmem:[#allocation95_spill] sm:$0xff]  ;;  %5941 = vpow2.f32 %v7696_v55 }
  0xfc   : > { %15941 = vst [vmem:[#allocation129_spill] sm:$0xff] %v7813_v23  ;;  %v15946_v23 = vld [vmem:[#allocation92_spill] sm:$0xff]  ;;  %v1765_v7 = vadd.f32 %v1764_v17, %v1763_v4  ;;  %v7876_v41 = vmul.f32 1.442695, %v15955_v20  ;;  %v5684_v4 = vld [vmem:[%s15014_s3 + $0x5] ss:$0 sm:$0xff]  ;;  %5943 = vpow2.f32 %v7701_v60 }
  0xfd   : > { %15942 = vst [vmem:[#allocation130_spill] sm:$0xff] %v7819_v9  ;;  %v7839_v19 = vmul.f32 1.442695, %v15946_v23  ;;  %v7861_v23 = vpop.eup %5913  ;;  %v15957_v17 = vld [vmem:[#allocation100_spill] sm:$0xff]  ;;  %5945 = vpow2.f32 %v7704_v46 }
  0xfe   : > { %15943 = vst [vmem:[#allocation131_spill] sm:$0xff] %v7823_v35  ;;  %v7843_v35 = vsel %vm834_vm0, %v7797_v26, 0.0  ;;  %v7886_v49 = vmul.f32 %v15957_v17, %v5681_v27  ;;  %v1767_v20 = vadd.f32 %v1766_v40, %v1765_v7  ;;  %v15962_v27 = vld [vmem:[#allocation51_spill] sm:$0xff]  ;;  %v7909_v22 = vsel %vm834_vm0, %v7861_v23, 0.0  ;;  %v15964_v40 = vld [vmem:[#allocation101_spill] sm:$0xff] }
  0xff   : > { %15945 = vst [vmem:[#allocation132_spill] sm:$0xff] %v7835_v28  ;;  %v5685_v28 = vld [vmem:[%s15014_s3 + $0x6] ss:$0 sm:$0xff]  ;;  %v7905_v17 = vmul.f32 1.442695, %v15962_v27 }
 0x100   : > { %15947 = vst [vmem:[#allocation133_spill] sm:$0xff] %v7839_v19  ;;  %v5683_v19 = vld [vmem:[%s15014_s3 + $0x4] ss:$0 sm:$0xff]  ;;  %v5686_v7 = vld [vmem:[%s15014_s3 + $0x7] ss:$0 sm:$0xff]  ;;  %v1769_v27 = vadd.f32 %v1768_v3, %v1767_v20  ;;  %v7943_v20 = vmul.f32 %v7596_v34, %v5684_v4 }
 0x101   : > { %15948 = vst [vmem:[#allocation134_spill] sm:$0xff] %v7845_v11  ;;  %v5688_v3 = vld [vmem:[%s15014_s3 + $0x9] ss:$0 sm:$0xff]  ;;  %v15976_v4 = vld [vmem:[#allocation55_spill] sm:$0xff] }
 0x102   : > { %15950 = vst [vmem:[#allocation135_spill] sm:$0xff] %v7849_v51  ;;  %v7869_v51 = vsel %vm834_vm0, %v7819_v9, 0.0  ;;  %v15959_v9 = vld [vmem:[#allocation50_spill] sm:$0xff]  ;;  %v7961_v34 = vmul.f32 1.442695, %v15976_v4 }
 0x103   : > { %15952 = vst [vmem:[#allocation136_spill] sm:$0xff] %v7861_v23  ;;  %v7892_v8 = vmul.f32 1.442695, %v15959_v9  ;;  %v7915_v9 = vmul.f32 %v15964_v40, %v5682_v36  ;;  %v15968_v23 = vld [vmem:[#allocation102_spill] sm:$0xff]  ;;  %v15970_v36 = vld [vmem:[#allocation53_spill] sm:$0xff] }
 0x104   : > { %15954 = vst [vmem:[#allocation137_spill] sm:$0xff] %v7865_v42  ;;  %v7888_v42 = vpop.eup %5915  ;;  %v7927_v26 = vmul.f32 %v15968_v23, %v5683_v19  ;;  %v7933_v40 = vmul.f32 1.442695, %v15970_v36  ;;  %v1771_v36 = vadd.f32 %v1770_v13, %v1769_v27  ;;  %v5689_v23 = vld [vmem:[%s15014_s3 + $0xa] ss:$0 sm:$0xff]  ;;  %v7971_v27 = vmul.f32 %v7624_v31, %v5686_v7  ;;  %v15982_v7 = vld [vmem:[#allocation57_spill] sm:$0xff] }
 0x105   : > { %15956 = vst [vmem:[#allocation138_spill] sm:$0xff] %v7876_v41  ;;  %v7896_v41 = vsel %vm834_vm0, %v7845_v11, 0.0  ;;  %v7901_v38 = vpop.eup %5917  ;;  %v15966_v11 = vld [vmem:[#allocation52_spill] sm:$0xff]  ;;  %v7937_v44 = vsel %vm834_vm0, %v7888_v42, 0.0  ;;  %v7990_v31 = vmul.f32 1.442695, %v15982_v7  ;;  %5947 = vpow2.f32 %v7711_v33 }
 0x106   : > { %15958 = vst [vmem:[#allocation139_spill] sm:$0xff] %v7888_v42  ;;  %v7921_v50 = vmul.f32 1.442695, %v15966_v11  ;;  %v15973_v11 = vld [vmem:[#allocation54_spill] sm:$0xff]  ;;  %v7965_v10 = vsel %vm834_vm0, %v7901_v38, 0.0  ;;  %v1773_v4 = vadd.f32 %v7817_v32, %v1771_v36  ;;  %v8000_v36 = vmul.f32 %v7658_v30, %v5688_v3  ;;  %v15988_v3 = vld [vmem:[#allocation59_spill] sm:$0xff] }
 0x107   : > { %15960 = vst [vmem:[#allocation140_spill] sm:$0xff] %v7892_v8  ;;  %v7917_v8 = vpop.eup %5919  ;;  %v7949_v61 = vmul.f32 1.442695, %v15973_v11  ;;  %v5690_v13 = vld [vmem:[%s15014_s3 + $0xb] ss:$0 sm:$0xff]  ;;  %5949 = vpow2.f32 %v7714_v57 }
 0x108   : > { %15961 = vst [vmem:[#allocation141_spill] sm:$0xff] %v7901_v38  ;;  %v7929_v24 = vpop.eup %5921  ;;  %v15979_v11 = vld [vmem:[#allocation56_spill] sm:$0xff]  ;;  %v7994_v45 = vsel %vm834_vm0, %v7917_v8, 0.0  ;;  %v1775_v7 = vadd.f32 %v7827_v43, %v1773_v4  ;;  %v8019_v30 = vmul.f32 1.442695, %v15988_v3  ;;  %v8029_v4 = vmul.f32 %v7690_v62, %v5690_v13  ;;  %v15994_v13 = vld [vmem:[#allocation61_spill] sm:$0xff] }
 0x109   : > { %15963 = vst [vmem:[#allocation142_spill] sm:$0xff] %v7905_v17  ;;  %v5687_v17 = vld [vmem:[%s15014_s3 + $0x8] ss:$0 sm:$0xff]  ;;  %v7945_v19 = vpop.eup %5923  ;;  %v7977_v29 = vmul.f32 1.442695, %v15979_v11  ;;  %v15985_v11 = vld [vmem:[#allocation58_spill] sm:$0xff]  ;;  %5951 = vpow2.f32 %v7719_v14 }
 0x10a   : > { %15965 = vst [vmem:[#allocation143_spill] sm:$0xff] %v7917_v8  ;;  %v5692_v32 = vld [vmem:[%s15014_s3 + $0xd] ss:$0 sm:$0xff]  ;;  %v8006_v55 = vmul.f32 1.442695, %v15985_v11  ;;  %v8023_v60 = vsel %vm834_vm0, %v7929_v24, 0.0  ;;  %v1777_v3 = vadd.f32 %v7843_v35, %v1775_v7  ;;  %5953 = vpow2.f32 %v7722_v6 }
 0x10b   : > { %15967 = vst [vmem:[#allocation144_spill] sm:$0xff] %v7921_v50  ;;  %v7957_v50 = vpop.eup %5925  ;;  %v5694_v43 = vld [vmem:[%s15014_s3 + $0xf] ss:$0 sm:$0xff]  ;;  %v8048_v62 = vmul.f32 1.442695, %v15994_v13  ;;  %v8052_v33 = vsel %vm834_vm0, %v7945_v19, 0.0  ;;  %v8055_v35 = vmul.f32 %v7708_v1, %v5692_v32  ;;  %5955 = vpow2.f32 %v7729_v15 }
 0x10c   : > { %15969 = vst [vmem:[#allocation145_spill] sm:$0xff] %v7929_v24  ;;  %v15991_v11 = vld [vmem:[#allocation60_spill] sm:$0xff]  ;;  %v5696_v57 = vld [vmem:[%s15014_s3 + $0x11] ss:$0 sm:$0xff]  ;;  %v8075_v32 = vsel %vm834_vm0, %v7957_v50, 0.0  ;;  %5957 = vpow2.f32 %v7732_v18 }
 0x10d   : > { %15971 = vst [vmem:[#allocation146_spill] sm:$0xff] %v7933_v40  ;;  %v7955_v40 = vmul.f32 %v7608_v37, %v5685_v28  ;;  %v7973_v28 = vpop.eup %5927  ;;  %v5691_v37 = vld [vmem:[%s15014_s3 + $0xc] ss:$0 sm:$0xff]  ;;  %v8035_v46 = vmul.f32 1.442695, %v15991_v11  ;;  %v8115_v15 = vmul.f32 %v7745_v54, %v5696_v57  ;;  %5959 = vpow2.f32 %v7738_v21 }
 0x10e   : > { %15972 = vst [vmem:[#allocation147_spill] sm:$0xff] %v7945_v19  ;;  %v5697_v14 = vld [vmem:[%s15014_s3 + $0x12] ss:$0 sm:$0xff]  ;;  %v5700_v21 = vld [vmem:[%s15014_s3 + $0x15] ss:$0 sm:$0xff] }
 0x10f   : > { %15974 = vst [vmem:[#allocation148_spill] sm:$0xff] %v7949_v61  ;;  %v7986_v61 = vpop.eup %5929  ;;  %5961 = vpow2.f32 %v7741_v63  ;;  %v5701_v63 = vld [vmem:[%s15014_s3 + $0x16] ss:$0 sm:$0xff] }
 0x110   : > { %15975 = vst [vmem:[#allocation149_spill] sm:$0xff] %v7957_v50 }
 0x111   : > { %15977 = vst [vmem:[#allocation150_spill] sm:$0xff] %v7961_v34  ;;  %v7984_v34 = vmul.f32 %v7642_v25, %v5687_v17  ;;  %v8002_v17 = vpop.eup %5931  ;;  %v5693_v25 = vld [vmem:[%s15014_s3 + $0xe] ss:$0 sm:$0xff]  ;;  %5963 = vpow2.f32 %v7749_v56  ;;  %v16018_v56 = vld [vmem:[#allocation121_spill] sm:$0xff] }
 0x112   : > { %15978 = vst [vmem:[#allocation151_spill] sm:$0xff] %v7973_v28  ;;  %v8068_v13 = vmul.f32 %v7716_v5, %v5693_v25 }
 0x113   : > { %15980 = vst [vmem:[#allocation152_spill] sm:$0xff] %v7977_v29  ;;  %v8015_v29 = vpop.eup %5933  ;;  %5965 = vpow2.f32 %v7752_v0  ;;  %v4828_v0 = vsel %vm834_vm0, %v7955_v40, 0.0 }
 0x114   : > { %15981 = vst [vmem:[#allocation153_spill] sm:$0xff] %v7986_v61 }
 0x115   : > { %15983 = vst [vmem:[#allocation154_spill] sm:$0xff] %v7990_v31  ;;  %v8013_v31 = vmul.f32 %v7674_v48, %v5689_v23  ;;  %v8031_v23 = vpop.eup %5935  ;;  %v5695_v48 = vld [vmem:[%s15014_s3 + $0x10] ss:$0 sm:$0xff] }
 0x116   : > { %15984 = vst [vmem:[#allocation155_spill] sm:$0xff] %v8002_v17  ;;  %v8092_v1 = vmul.f32 %v7734_v2, %v5695_v48 }
 0x117   : > { %15986 = vst [vmem:[#allocation156_spill] sm:$0xff] %v8006_v55  ;;  %v8044_v55 = vpop.eup %5937 }
 0x118   : > { %15987 = vst [vmem:[#allocation157_spill] sm:$0xff] %v8015_v29  ;;  %v8057_v7 = vpop.eup %5939 }
 0x119   : > { %15989 = vst [vmem:[#allocation158_spill] sm:$0xff] %v8019_v30  ;;  %v8042_v30 = vmul.f32 %v7698_v53, %v5691_v37  ;;  %v15997_v37 = vld [vmem:[#allocation62_spill] sm:$0xff]  ;;  %v1779_v53 = vadd.f32 %v7853_v58, %v1777_v3  ;;  %v8081_v58 = vmul.f32 %v7726_v16, %v5694_v43  ;;  %v4817_v3 = vsel %vm834_vm0, %v7833_v39, 0.0  ;;  %v16003_v43 = vld [vmem:[#allocation64_spill] sm:$0xff]  ;;  %v5698_v39 = vld [vmem:[%s15014_s3 + $0x13] ss:$0 sm:$0xff] }
 0x11a   : > { %15990 = vst [vmem:[#allocation159_spill] sm:$0xff] %v8031_v23  ;;  %v8061_v11 = vmul.f32 1.442695, %v15997_v37  ;;  %v16001_v37 = vld [vmem:[#allocation63_spill] sm:$0xff]  ;;  %v8100_v16 = vmul.f32 1.442695, %v16003_v43 }
 0x11b   : > { %15992 = vst [vmem:[#allocation160_spill] sm:$0xff] %v8035_v46  ;;  %v8088_v5 = vmul.f32 1.442695, %v16001_v37  ;;  %v1781_v6 = vadd.f32 %v7869_v51, %v1779_v53  ;;  %v4820_v51 = vsel %vm834_vm0, %v7886_v49, 0.0  ;;  %v4822_v43 = vsel %vm834_vm0, %v7915_v9, 0.0  ;;  %v16010_v9 = vld [vmem:[#allocation66_spill] sm:$0xff] }
 0x11c   : > { %15993 = vst [vmem:[#allocation161_spill] sm:$0xff] %v8044_v55  ;;  %v8135_v54 = vmul.f32 1.442695, %v16010_v9  ;;  %v4826_v9 = vsel %vm834_vm0, %v7943_v20, 0.0  ;;  %v5702_v20 = vld [vmem:[%s15014_s3 + $0x17] ss:$0 sm:$0xff] }
 0x11d   : > { %15995 = vst [vmem:[#allocation162_spill] sm:$0xff] %v8048_v62  ;;  %v8070_v62 = vpop.eup %5941  ;;  %v1783_v53 = vadd.f32 %v7880_v12, %v1781_v6  ;;  %v5699_v12 = vld [vmem:[%s15014_s3 + $0x14] ss:$0 sm:$0xff] }
 0x11e   : > { %15996 = vst [vmem:[#allocation163_spill] sm:$0xff] %v8057_v7  ;;  %v8085_v25 = vpop.eup %5943 }
 0x11f   : > { %15998 = vst [vmem:[#allocation164_spill] sm:$0xff] %v8061_v11  ;;  %v4818_v11 = vsel %vm834_vm0, %v7859_v59, 0.0  ;;  %v8096_v46 = vpop.eup %5945  ;;  %v8112_v59 = vsel %vm834_vm0, %v7973_v28, 0.0  ;;  %v1785_v18 = vadd.f32 %v7896_v41, %v1783_v53  ;;  %v16013_v41 = vld [vmem:[#allocation67_spill] sm:$0xff] }
 0x120   : > { %15999 = vst [vmem:[#allocation165_spill] sm:$0xff] %v8070_v62  ;;  %v4819_v37 = vadd.f32 %v4818_v11, %v4817_v3  ;;  %v8107_v48 = vpop.eup %5947  ;;  %v16007_v11 = vld [vmem:[#allocation65_spill] sm:$0xff]  ;;  %v8129_v3 = vmul.f32 %v7754_v47, %v5697_v14  ;;  %v8145_v14 = vsel %vm834_vm0, %v7986_v61, 0.0 }
 0x121   : > { %16000 = vst [vmem:[#allocation166_spill] sm:$0xff] %v8085_v25  ;;  %v8119_v2 = vpop.eup %5949  ;;  %v8123_v49 = vmul.f32 1.442695, %v16007_v11  ;;  %v4824_v11 = vsel %vm834_vm0, %v7927_v26, 0.0  ;;  %v8155_v26 = vmul.f32 1.442695, %v16013_v41  ;;  %v1787_v53 = vadd.f32 %v7909_v22, %v1785_v18 }
 0x122   : > { %16002 = vst [vmem:[#allocation167_spill] sm:$0xff] %v8096_v46  ;;  %v4821_v6 = vadd.f32 %v4820_v51, %v4819_v37  ;;  %v8131_v57 = vpop.eup %5951  ;;  %v8151_v37 = vmul.f32 %v7765_v52, %v5698_v39  ;;  %v16016_v39 = vld [vmem:[#allocation68_spill] sm:$0xff]  ;;  %v16020_v52 = vld [vmem:[#allocation117_spill] sm:$0xff]  ;;  %v8176_v18 = vsel %vm834_vm0, %v8002_v17, 0.0 }
 0x123   : > { %16004 = vst [vmem:[#allocation168_spill] sm:$0xff] %v8100_v16  ;;  %5967 = vpow2.f32 %v16020_v52  ;;  %v1789_v22 = vadd.f32 %v7937_v44, %v1787_v53  ;;  %v5703_v52 = vld [vmem:[%s15014_s3 + $0x18] ss:$0 sm:$0xff]  ;;  %v16025_v44 = vld [vmem:[#allocation123_spill] sm:$0xff] }
 0x124   : > { %16005 = vst [vmem:[#allocation169_spill] sm:$0xff] %v8107_v48  ;;  %v4823_v51 = vadd.f32 %v4822_v43, %v4821_v6  ;;  %v8167_v43 = vmul.f32 1.442695, %v16016_v39  ;;  %v8170_v6 = vmul.f32 %v16018_v56, %v5699_v12  ;;  %v16022_v12 = vld [vmem:[#allocation118_spill] sm:$0xff]  ;;  %v8193_v53 = vmul.f32 %v16025_v44, %v5700_v21 }
 0x125   : > { %16006 = vst [vmem:[#allocation170_spill] sm:$0xff] %v8119_v2  ;;  %5969 = vpow2.f32 %v16022_v12  ;;  %v1791_v40 = vadd.f32 %v7965_v10, %v1789_v22  ;;  %v4830_v12 = vsel %vm834_vm0, %v7971_v27, 0.0  ;;  %v16032_v16 = vld [vmem:[#allocation70_spill] sm:$0xff]  ;;  %v16036_v22 = vld [vmem:[#allocation128_spill] sm:$0xff] }
 0x126   : > { %16008 = vst [vmem:[#allocation171_spill] sm:$0xff] %v8123_v49  ;;  %v8140_v49 = vpop.eup %5953  ;;  %v4825_v41 = vadd.f32 %v4824_v11, %v4823_v51  ;;  %v16023_v11 = vld [vmem:[#allocation69_spill] sm:$0xff]  ;;  %v8208_v21 = vmul.f32 1.442695, %v16032_v16  ;;  %v5704_v10 = vld [vmem:[%s15014_s3 + $0x19] ss:$0 sm:$0xff] }
 0x127   : > { %16009 = vst [vmem:[#allocation172_spill] sm:$0xff] %v8131_v57  ;;  %v8163_v47 = vpop.eup %5955  ;;  %v8187_v51 = vmul.f32 1.442695, %v16023_v11  ;;  %v1793_v27 = vadd.f32 %v7994_v45, %v1791_v40  ;;  %v4832_v16 = vsel %vm834_vm0, %v7984_v34, 0.0  ;;  %v16039_v44 = vld [vmem:[#allocation126_spill] sm:$0xff] }
 0x128   : > { %16011 = vst [vmem:[#allocation173_spill] sm:$0xff] %v8135_v54  ;;  %v8183_v39 = vpop.eup %5957  ;;  %v4827_v56 = vadd.f32 %v4826_v9, %v4825_v41  ;;  %v16028_v54 = vld [vmem:[#allocation125_spill] sm:$0xff]  ;;  %v8212_v9 = vsel %vm834_vm0, %v8015_v29, 0.0  ;;  %v5706_v45 = vld [vmem:[%s15014_s3 + $0x1b] ss:$0 sm:$0xff] }
 0x129   : > { %16012 = vst [vmem:[#allocation174_spill] sm:$0xff] %v8140_v49 }
 0x12a   : > { %16014 = vst [vmem:[#allocation175_spill] sm:$0xff] %v8155_v26  ;;  %v16027_v26 = vld [vmem:[#allocation120_spill] sm:$0xff]  ;;  %v4829_v41 = vadd.f32 %v4828_v0, %v4827_v56  ;;  %v5705_v56 = vld [vmem:[%s15014_s3 + $0x1a] ss:$0 sm:$0xff] }
 0x12b   : > { %16015 = vst [vmem:[#allocation176_spill] sm:$0xff] %v8163_v47  ;;  %5971 = vpow2.f32 %v16027_v26 }
 0x12c   : > { %16017 = vst [vmem:[#allocation177_spill] sm:$0xff] %v8167_v43  ;;  %v8195_v43 = vpop.eup %5959  ;;  %v4831_v40 = vadd.f32 %v4830_v12, %v4829_v41  ;;  %v8258_v12 = vsel %vm834_vm0, %v8031_v23, 0.0  ;;  %v5708_v41 = vld [vmem:[%s15014_s3 + $0x1d] ss:$0 sm:$0xff] }
 0x12d   : > { %16019 = vst [vmem:[#allocation178_spill] sm:$0xff] %v8170_v6  ;;  %v8200_v6 = vmul.f32 %v16028_v54, %v5701_v63  ;;  %v8204_v11 = vpop.eup %5961  ;;  %v16035_v63 = vld [vmem:[#allocation124_spill] sm:$0xff] }
 0x12e   : > { %16021 = vst [vmem:[#allocation117_spill] sm:$0xff] %v8183_v39  ;;  %v8217_v26 = vpop.eup %5963 }
 0x12f   : > { %16024 = vst [vmem:[#allocation118_spill] sm:$0xff] %v8187_v51  ;;  %v16031_v51 = vld [vmem:[#allocation122_spill] sm:$0xff]  ;;  %v8226_v54 = vpop.eup %5965 }
 0x130   : > { %16026 = vst [vmem:[#allocation179_spill] sm:$0xff] %v8195_v43  ;;  %5973 = vpow2.f32 %v16031_v51  ;;  %v8222_v51 = vmul.f32 %v16036_v22, %v5702_v20  ;;  %v16042_v20 = vld [vmem:[#allocation130_spill] sm:$0xff]  ;;  %v8241_v34 = vpop.eup %5967 }
 0x131   : > { %16029 = vst [vmem:[#allocation120_spill] sm:$0xff] %v8200_v6  ;;  %5975 = vpow2.f32 %v16035_v63  ;;  %v8239_v0 = vmul.f32 %v16042_v20, %v5703_v52  ;;  %v16045_v63 = vld [vmem:[#allocation127_spill] sm:$0xff]  ;;  %v16049_v52 = vld [vmem:[#allocation129_spill] sm:$0xff] }
 0x132   : > { %16030 = vst [vmem:[#allocation180_spill] sm:$0xff] %v8204_v11  ;;  %5977 = vpow2.f32 %v16039_v44  ;;  %v16046_v44 = vld [vmem:[#allocation97_spill] sm:$0xff]  ;;  %v16053_v20 = vld [vmem:[#allocation131_spill] sm:$0xff] }
 0x133   : > { %16033 = vst [vmem:[#allocation122_spill] sm:$0xff] %v8208_v21  ;;  %v16040_v21 = vld [vmem:[#allocation96_spill] sm:$0xff]  ;;  %5979 = vpow2.f32 %v16045_v63  ;;  %v8245_v22 = vmul.f32 1.442695, %v16046_v44  ;;  %v4833_v63 = vadd.f32 %v4832_v16, %v4831_v40  ;;  %v16055_v16 = vld [vmem:[#allocation133_spill] sm:$0xff] }
 0x134   : > { %16034 = vst [vmem:[#allocation181_spill] sm:$0xff] %v8217_v26  ;;  %v8230_v6 = vmul.f32 1.442695, %v16040_v21  ;;  %v1795_v21 = vadd.f32 %v8023_v60, %v1793_v27  ;;  %5981 = vpow2.f32 %v16049_v52  ;;  %v16050_v60 = vld [vmem:[#allocation132_spill] sm:$0xff]  ;;  %v8272_v52 = vsel %vm834_vm0, %v8044_v55, 0.0 }
 0x135   : > { %16037 = vst [vmem:[#allocation124_spill] sm:$0xff] %v8222_v51  ;;  %v8253_v51 = vpop.eup %5969  ;;  %v8264_v27 = vmul.f32 %v16050_v60, %v5704_v10  ;;  %5983 = vpow2.f32 %v16053_v20  ;;  %v5710_v20 = vld [vmem:[%s15014_s3 + $0x1f] ss:$0 sm:$0xff]  ;;  %v16057_v60 = vld [vmem:[#allocation136_spill] sm:$0xff] }
 0x136   : > { %16038 = vst [vmem:[#allocation182_spill] sm:$0xff] %v8226_v54  ;;  %v4834_v54 = vsel %vm834_vm0, %v8000_v36, 0.0  ;;  %v8266_v44 = vpop.eup %5971  ;;  %v1797_v36 = vadd.f32 %v8052_v33, %v1795_v21  ;;  %5985 = vpow2.f32 %v16055_v16  ;;  %v5711_v33 = vld [vmem:[%s15014_s3 + $0x20] ss:$0 sm:$0xff]  ;;  %v16056_v21 = vld [vmem:[#allocation134_spill] sm:$0xff] }
 0x137   : > { %16041 = vst [vmem:[#allocation126_spill] sm:$0xff] %v8230_v6  ;;  %v5707_v6 = vld [vmem:[%s15014_s3 + $0x1c] ss:$0 sm:$0xff]  ;;  %v8279_v10 = vpop.eup %5973  ;;  %v8289_v40 = vmul.f32 %v16056_v21, %v5705_v56  ;;  %v16061_v56 = vld [vmem:[#allocation137_spill] sm:$0xff] }
 0x138   : > { %16043 = vst [vmem:[#allocation183_spill] sm:$0xff] %v8239_v0  ;;  %v1799_v16 = vadd.f32 %v8075_v32, %v1797_v36  ;;  %v4838_v0 = vsel %vm834_vm0, %v8029_v4, 0.0  ;;  %v8314_v32 = vmul.f32 %v7901_v38, %v5708_v41  ;;  %v16063_v36 = vld [vmem:[#allocation138_spill] sm:$0xff]  ;;  %v16065_v41 = vld [vmem:[#allocation140_spill] sm:$0xff] }
 0x139   : > { %16044 = vst [vmem:[#allocation184_spill] sm:$0xff] %v8241_v34  ;;  %v4835_v34 = vadd.f32 %v4834_v54, %v4833_v63  ;;  %v5712_v54 = vld [vmem:[%s15014_s3 + $0x21] ss:$0 sm:$0xff] }
 0x13a   : > { %16047 = vst [vmem:[#allocation127_spill] sm:$0xff] %v8245_v22  ;;  %v4836_v22 = vsel %vm834_vm0, %v8013_v31, 0.0  ;;  %v8294_v31 = vpop.eup %5975  ;;  %v1801_v4 = vadd.f32 %v8112_v59, %v1799_v16  ;;  %v8335_v59 = vmul.f32 %v7929_v24, %v5710_v20  ;;  %v16069_v20 = vld [vmem:[#allocation144_spill] sm:$0xff]  ;;  %v4844_v24 = vsel %vm834_vm0, %v8068_v13, 0.0 }
 0x13b   : > { %16048 = vst [vmem:[#allocation185_spill] sm:$0xff] %v8253_v51  ;;  %v5709_v51 = vld [vmem:[%s15014_s3 + $0x1e] ss:$0 sm:$0xff]  ;;  %v8303_v26 = vpop.eup %5977 }
 0x13c   : > { %16051 = vst [vmem:[#allocation129_spill] sm:$0xff] %v8264_v27  ;;  %v8299_v27 = vmul.f32 %v7888_v42, %v5707_v6  ;;  %v4837_v6 = vadd.f32 %v4836_v22, %v4835_v34  ;;  %v8316_v63 = vpop.eup %5979  ;;  %v4840_v42 = vsel %vm834_vm0, %v8042_v30, 0.0  ;;  %v5714_v22 = vld [vmem:[%s15014_s3 + $0x23] ss:$0 sm:$0xff]  ;;  %v8338_v34 = vmul.f32 %v7945_v19, %v5711_v33  ;;  %v5715_v33 = vld [vmem:[%s15014_s3 + $0x24] ss:$0 sm:$0xff] }
 0x13d   : > { %16052 = vst [vmem:[#allocation186_spill] sm:$0xff] %v8266_v44  ;;  %v8292_v44 = vmul.f32 %v16057_v60, %v5706_v45  ;;  %v8308_v45 = vsel %vm834_vm0, %v8057_v7, 0.0  ;;  %v8328_v60 = vpop.eup %5981  ;;  %v1803_v30 = vadd.f32 %v8145_v14, %v1801_v4  ;;  %v8361_v14 = vmul.f32 %v7957_v50, %v5712_v54  ;;  %v16073_v54 = vld [vmem:[#allocation148_spill] sm:$0xff] }
 0x13e   : > { %16054 = vst [vmem:[#allocation131_spill] sm:$0xff] %v8279_v10  ;;  %v16059_v10 = vld [vmem:[#allocation135_spill] sm:$0xff]  ;;  %v4839_v16 = vadd.f32 %v4838_v0, %v4837_v6  ;;  %v8355_v0 = vsel %vm834_vm0, %v8085_v25, 0.0 }
 0x13f   : > { %16058 = vst [vmem:[#allocation133_spill] sm:$0xff] %v8294_v31  ;;  %5987 = vpow2.f32 %v16059_v10  ;;  %v5713_v10 = vld [vmem:[%s15014_s3 + $0x22] ss:$0 sm:$0xff] }
 0x140   : > { %16060 = vst [vmem:[#allocation135_spill] sm:$0xff] %v8303_v26  ;;  %5989 = vpow2.f32 %v16061_v56  ;;  %v8324_v56 = vmul.f32 %v7917_v8, %v5709_v51  ;;  %v8340_v51 = vpop.eup %5983  ;;  %v4842_v8 = vsel %vm834_vm0, %v8055_v35, 0.0  ;;  %v4841_v6 = vadd.f32 %v4840_v42, %v4839_v16 }
 0x141   : > { %16062 = vst [vmem:[#allocation137_spill] sm:$0xff] %v8316_v63  ;;  %5991 = vpow2.f32 %v16063_v36  ;;  %v16067_v36 = vld [vmem:[#allocation142_spill] sm:$0xff]  ;;  %v8350_v38 = vpop.eup %5985  ;;  %v1805_v35 = vadd.f32 %v8176_v18, %v1803_v30  ;;  %v8371_v19 = vmul.f32 %v7973_v28, %v5713_v10  ;;  %v8380_v42 = vsel %vm834_vm0, %v8096_v46, 0.0  ;;  %v5717_v18 = vld [vmem:[%s15014_s3 + $0x26] ss:$0 sm:$0xff] }
 0x142   : > { %16064 = vst [vmem:[#allocation138_spill] sm:$0xff] %v8328_v60  ;;  %5993 = vpow2.f32 %v16065_v41  ;;  %v8346_v41 = vsel %vm834_vm0, %v8070_v62, 0.0  ;;  %v8386_v16 = vmul.f32 %v7986_v61, %v5714_v22  ;;  %v4843_v10 = vadd.f32 %v4842_v8, %v4841_v6  ;;  %v5718_v22 = vld [vmem:[%s15014_s3 + $0x27] ss:$0 sm:$0xff] }
 0x143   : > { %16066 = vst [vmem:[#allocation140_spill] sm:$0xff] %v8340_v51  ;;  %5995 = vpow2.f32 %v16067_v36  ;;  %v16071_v36 = vld [vmem:[#allocation146_spill] sm:$0xff]  ;;  %v1807_v13 = vadd.f32 %v8212_v9, %v1805_v35  ;;  %v4846_v28 = vsel %vm834_vm0, %v8081_v58, 0.0  ;;  %v8403_v8 = vsel %vm834_vm0, %v8119_v2, 0.0 }
 0x144   : > { %16068 = vst [vmem:[#allocation142_spill] sm:$0xff] %v8350_v38  ;;  %5997 = vpow2.f32 %v16069_v20  ;;  %v5716_v20 = vld [vmem:[%s15014_s3 + $0x25] ss:$0 sm:$0xff]  ;;  %v8409_v9 = vmul.f32 %v8002_v17, %v5715_v33  ;;  %v4845_v6 = vadd.f32 %v4844_v24, %v4843_v10  ;;  %v16081_v33 = vld [vmem:[#allocation156_spill] sm:$0xff]  ;;  %v8428_v24 = vsel %vm834_vm0, %v8131_v57, 0.0 }
 0x145   : > { %v8363_v4 = vpop.eup %5987  ;;  %5999 = vpow2.f32 %v16071_v36  ;;  %v16075_v36 = vld [vmem:[#allocation150_spill] sm:$0xff]  ;;  %v1809_v58 = vadd.f32 %v8258_v12, %v1807_v13  ;;  %v8419_v61 = vmul.f32 %v8015_v29, %v5716_v20  ;;  %v5720_v12 = vld [vmem:[%s15014_s3 + $0x29] ss:$0 sm:$0xff]  ;;  %v8434_v10 = vmul.f32 %v8031_v23, %v5717_v18  ;;  %v5721_v18 = vld [vmem:[%s15014_s3 + $0x2a] ss:$0 sm:$0xff] }
 0x146   : > { %16070 = vst [vmem:[#allocation144_spill] sm:$0xff] %v8363_v4  ;;  %v8375_v21 = vpop.eup %5989  ;;  %6001 = vpow2.f32 %v16073_v54  ;;  %v8394_v54 = vsel %vm834_vm0, %v8107_v48, 0.0  ;;  %v4847_v20 = vadd.f32 %v4846_v28, %v4845_v6  ;;  %v4850_v29 = vsel %vm834_vm0, %v8115_v15, 0.0 }
 0x147   : > { %16072 = vst [vmem:[#allocation146_spill] sm:$0xff] %v8375_v21  ;;  %v8388_v30 = vpop.eup %5991  ;;  %6003 = vpow2.f32 %v16075_v36  ;;  %v16077_v21 = vld [vmem:[#allocation152_spill] sm:$0xff]  ;;  %v16079_v36 = vld [vmem:[#allocation154_spill] sm:$0xff]  ;;  %v8451_v28 = vsel %vm834_vm0, %v8163_v47, 0.0  ;;  %v4852_v23 = vsel %vm834_vm0, %v8129_v3, 0.0 }
 0x148   : > { %16074 = vst [vmem:[#allocation148_spill] sm:$0xff] %v8388_v30  ;;  %v8398_v50 = vpop.eup %5993  ;;  %6005 = vpow2.f32 %v16077_v21  ;;  %v5719_v21 = vld [vmem:[%s15014_s3 + $0x28] ss:$0 sm:$0xff] }
 0x149   : > { %16076 = vst [vmem:[#allocation150_spill] sm:$0xff] %v8398_v50  ;;  %v8411_v35 = vpop.eup %5995  ;;  %6007 = vpow2.f32 %v16079_v36  ;;  %v4848_v50 = vsel %vm834_vm0, %v8092_v1, 0.0  ;;  %v16083_v36 = vld [vmem:[#allocation158_spill] sm:$0xff]  ;;  %v1811_v1 = vadd.f32 %v8272_v52, %v1809_v58  ;;  %v8457_v52 = vmul.f32 %v8044_v55, %v5718_v22 }
 0x14a   : > { %16078 = vst [vmem:[#allocation152_spill] sm:$0xff] %v8411_v35  ;;  %v8423_v30 = vpop.eup %5997  ;;  %6009 = vpow2.f32 %v16081_v33  ;;  %v8442_v33 = vsel %vm834_vm0, %v8140_v49, 0.0  ;;  %v4849_v6 = vadd.f32 %v4848_v50, %v4847_v20  ;;  %v8473_v22 = vsel %vm834_vm0, %v8183_v39, 0.0  ;;  %v5722_v50 = vld [vmem:[%s15014_s3 + $0x2b] ss:$0 sm:$0xff]  ;;  %v16124_v35 = vld [vmem:[#allocation185_spill] sm:$0xff] }
 0x14b   : > { %16080 = vst [vmem:[#allocation154_spill] sm:$0xff] %v8423_v30  ;;  %v8436_v13 = vpop.eup %5999  ;;  %6011 = vpow2.f32 %v16083_v36  ;;  %v16085_v30 = vld [vmem:[#allocation160_spill] sm:$0xff]  ;;  %v16087_v36 = vld [vmem:[#allocation162_spill] sm:$0xff]  ;;  %v1813_v15 = vadd.f32 %v8308_v45, %v1811_v1  ;;  %v8479_v45 = vmul.f32 %v8070_v62, %v5720_v12  ;;  %v4854_v1 = vsel %vm834_vm0, %v8151_v37, 0.0  ;;  %v16096_v62 = vld [vmem:[#allocation171_spill] sm:$0xff] }
 0x14c   : > { %16082 = vst [vmem:[#allocation156_spill] sm:$0xff] %v8436_v13  ;;  %v8446_v17 = vpop.eup %6001  ;;  %6013 = vpow2.f32 %v16085_v30  ;;  %v8464_v30 = vmul.f32 %v8057_v7, %v5719_v21  ;;  %v16089_v13 = vld [vmem:[#allocation164_spill] sm:$0xff]  ;;  %v4851_v21 = vadd.f32 %v4850_v29, %v4849_v6  ;;  %v8498_v12 = vmul.f32 %v8085_v25, %v5721_v18  ;;  %v16098_v18 = vld [vmem:[#allocation173_spill] sm:$0xff]  ;;  %v16102_v25 = vld [vmem:[#allocation175_spill] sm:$0xff] }
 0x14d   : > { %16084 = vst [vmem:[#allocation158_spill] sm:$0xff] %v8446_v17  ;;  %v8459_v58 = vpop.eup %6003  ;;  %6015 = vpow2.f32 %v16087_v36  ;;  %v1815_v3 = vadd.f32 %v8346_v41, %v1813_v15  ;;  %v16092_v7 = vld [vmem:[#allocation168_spill] sm:$0xff]  ;;  %v16094_v41 = vld [vmem:[#allocation178_spill] sm:$0xff]  ;;  %v4858_v55 = vsel %vm834_vm0, %v8193_v53, 0.0 }
 0x14e   : > { %16086 = vst [vmem:[#allocation160_spill] sm:$0xff] %v8459_v58  ;;  %v8468_v17 = vpop.eup %6005  ;;  %6017 = vpow2.f32 %v16089_v13  ;;  %v8487_v13 = vsel %vm834_vm0, %v8195_v43, 0.0  ;;  %v5723_v29 = vld [vmem:[%s15014_s3 + $0x2c] ss:$0 sm:$0xff]  ;;  %v4856_v6 = vsel %vm834_vm0, %v16094_v41, 0.0 }
 0x14f   : > { %16088 = vst [vmem:[#allocation162_spill] sm:$0xff] %v8468_v17  ;;  %v8481_v20 = vpop.eup %6007  ;;  %6019 = vpow2.f32 %v8088_v5  ;;  %v4853_v5 = vadd.f32 %v4852_v23, %v4851_v21  ;;  %v1817_v37 = vadd.f32 %v8355_v0, %v1815_v3  ;;  %v5724_v23 = vld [vmem:[%s15014_s3 + $0x2d] ss:$0 sm:$0xff]  ;;  %v8519_v21 = vmul.f32 %v8096_v46, %v5722_v50  ;;  %v16106_v50 = vld [vmem:[#allocation177_spill] sm:$0xff]  ;;  %v16110_v46 = vld [vmem:[#allocation118_spill] sm:$0xff] }
 0x150   : > { %16090 = vst [vmem:[#allocation164_spill] sm:$0xff] %v8481_v20  ;;  %v8491_v36 = vpop.eup %6009  ;;  %6021 = vpow2.f32 %v16092_v7  ;;  %v8508_v7 = vsel %vm834_vm0, %v8204_v11, 0.0  ;;  %v16100_v0 = vld [vmem:[#allocation120_spill] sm:$0xff] }
 0x151   : > { %16091 = vst [vmem:[#allocation187_spill] sm:$0xff] %v8491_v36  ;;  %v8502_v15 = vpop.eup %6011  ;;  %6023 = vpow2.f32 %v16096_v62  ;;  %v4855_v62 = vadd.f32 %v4854_v1, %v4853_v5  ;;  %v4860_v3 = vsel %vm834_vm0, %v16100_v0, 0.0  ;;  %v1819_v53 = vadd.f32 %v8380_v42, %v1817_v37  ;;  %v5725_v1 = vld [vmem:[%s15014_s3 + $0x2e] ss:$0 sm:$0xff]  ;;  %v16108_v42 = vld [vmem:[#allocation183_spill] sm:$0xff] }
 0x152   : > { %16093 = vst [vmem:[#allocation168_spill] sm:$0xff] %v8498_v12  ;;  %v8512_v36 = vpop.eup %6013  ;;  %6025 = vpow2.f32 %v16098_v18  ;;  %v8540_v5 = vmul.f32 %v8107_v48, %v5723_v29  ;;  %v4864_v37 = vsel %vm834_vm0, %v16108_v42, 0.0  ;;  %v5769_v0 = vld [vmem:[%s15013_s2] ss:$0 sm:$0xff]  ;;  %v16112_v29 = vld [vmem:[#allocation129_spill] sm:$0xff]  ;;  %v16114_v42 = vld [vmem:[#allocation122_spill] sm:$0xff] }
 0x153   : > { %16095 = vst [vmem:[#allocation178_spill] sm:$0xff] %v8502_v15  ;;  %v8523_v41 = vpop.eup %6015  ;;  %6027 = vpow2.f32 %v16102_v25  ;;  %v16104_v15 = vld [vmem:[#allocation124_spill] sm:$0xff]  ;;  %v4857_v25 = vadd.f32 %v4856_v6, %v4855_v62  ;;  %v4866_v6 = vsel %vm834_vm0, %v16112_v29, 0.0 }
 0x154   : > { %16097 = vst [vmem:[#allocation171_spill] sm:$0xff] %v8512_v36  ;;  %v16103_v36 = vld [vmem:[#allocation181_spill] sm:$0xff]  ;;  %v4862_v20 = vsel %vm834_vm0, %v16104_v15, 0.0  ;;  %v8533_v17 = vpop.eup %6017  ;;  %6029 = vpow2.f32 %v16106_v50  ;;  %v1821_v50 = vadd.f32 %v8394_v54, %v1819_v53  ;;  %v5726_v48 = vld [vmem:[%s15014_s3 + $0x2f] ss:$0 sm:$0xff]  ;;  %v4868_v54 = vsel %vm834_vm0, %v8289_v40, 0.0 }
 0x155   : > { %16099 = vst [vmem:[#allocation173_spill] sm:$0xff] %v8519_v21  ;;  %v8529_v18 = vsel %vm834_vm0, %v16103_v36, 0.0  ;;  %v8547_v15 = vpop.eup %6019  ;;  %6031 = vpow2.f32 %v16110_v46  ;;  %v4859_v46 = vadd.f32 %v4858_v55, %v4857_v25  ;;  %v5770_v53 = vld [vmem:[%s15013_s2 + $0x1] ss:$0 sm:$0xff]  ;;  %v16118_v58 = vld [vmem:[#allocation184_spill] sm:$0xff]  ;;  %v8581_v55 = vsel %vm834_vm0, %v8292_v44, 0.0 }
 0x156   : > { %16101 = vst [vmem:[#allocation120_spill] sm:$0xff] %v8523_v41  ;;  %v8557_v62 = vpop.eup %6021  ;;  %6033 = vpow2.f32 %v16114_v42  ;;  %v1823_v42 = vadd.f32 %v8403_v8, %v1821_v50  ;;  %v5727_v40 = vld [vmem:[%s15014_s3 + $0x30] ss:$0 sm:$0xff]  ;;  %v8589_v25 = vmul.f32 %v8131_v57, %v5725_v1  ;;  %v8593_v8 = vsel %vm834_vm0, %v8299_v27, 0.0  ;;  %v5771_v50 = vld [vmem:[%s15013_s2 + $0x2] ss:$0 sm:$0xff] }
 0x157   : > { %16105 = vst [vmem:[#allocation175_spill] sm:$0xff] %v8533_v17  ;;  %v16111_v17 = vld [vmem:[#allocation182_spill] sm:$0xff]  ;;  %v8571_v29 = vpop.eup %6023  ;;  %v8605_v1 = vsel %vm834_vm0, %v16124_v35, 0.0  ;;  %v8609_v27 = vsel %vm834_vm0, %v8314_v32, 0.0  ;;  %v5773_v32 = vld [vmem:[%s15013_s2 + $0x4] ss:$0 sm:$0xff] }
 0x158   : > { %16107 = vst [vmem:[#allocation124_spill] sm:$0xff] %v8540_v5  ;;  %v8553_v41 = vsel %vm834_vm0, %v16111_v17, 0.0  ;;  %v8577_v5 = vsel %vm834_vm0, %v16118_v58, 0.0  ;;  %v16121_v44 = vld [vmem:[#allocation98_spill] sm:$0xff] }
 0x159   : > { %16109 = vst [vmem:[#allocation177_spill] sm:$0xff] %v8547_v15  ;;  %v8564_v15 = vmul.f32 %v8119_v2, %v5724_v23  ;;  %v8583_v23 = vpop.eup %6025  ;;  %v3829_v2 = vmul.f32 %v16121_v44, %v5769_v0  ;;  %v5728_v0 = vld [vmem:[%s15014_s3 + $0x31] ss:$0 sm:$0xff]  ;;  %v16127_v44 = vld [vmem:[#allocation99_spill] sm:$0xff] }
 0x15a   : > { %16113 = vst [vmem:[#allocation183_spill] sm:$0xff] %v8557_v62  ;;  %v16117_v62 = vld [vmem:[#allocation126_spill] sm:$0xff]  ;;  %v3831_v57 = vmul.f32 %v16127_v44, %v5770_v53 }
 0x15b   : > { %16115 = vst [vmem:[#allocation118_spill] sm:$0xff] %v8564_v15  ;;  %6035 = vpow2.f32 %v16117_v62  ;;  %v4861_v62 = vadd.f32 %v4860_v3, %v4859_v46  ;;  %v1825_v15 = vadd.f32 %v8428_v24, %v1823_v42  ;;  %v5772_v3 = vld [vmem:[%s15013_s2 + $0x3] ss:$0 sm:$0xff]  ;;  %v8620_v24 = vmul.f32 %v8140_v49, %v5726_v48 }
 0x15c   : > { %16116 = vst [vmem:[#allocation129_spill] sm:$0xff] %v8571_v29  ;;  %v8599_v29 = vpop.eup %6027  ;;  %v8639_v48 = vsel %vm834_vm0, %v8335_v59, 0.0  ;;  %v16132_v59 = vld [vmem:[#allocation100_spill] sm:$0xff]  ;;  %v4009_v49 = vsel %vm834_vm0, %v3829_v2, 0.0  ;;  %v5776_v2 = vld [vmem:[%s15013_s2 + $0x7] ss:$0 sm:$0xff] }
 0x15d   : > { %16119 = vst [vmem:[#allocation122_spill] sm:$0xff] %v8583_v23  ;;  %v16123_v23 = vld [vmem:[#allocation127_spill] sm:$0xff]  ;;  %v8614_v46 = vpop.eup %6029  ;;  %v4863_v42 = vadd.f32 %v4862_v20, %v4861_v62  ;;  %v3833_v44 = vmul.f32 %v16132_v59, %v5771_v50  ;;  %v16135_v50 = vld [vmem:[#allocation101_spill] sm:$0xff]  ;;  %v5777_v59 = vld [vmem:[%s15013_s2 + $0x8] ss:$0 sm:$0xff] }
 0x15e   : > { %16120 = vst [vmem:[#allocation126_spill] sm:$0xff] %v8589_v25  ;;  %6037 = vpow2.f32 %v16123_v23  ;;  %v8624_v23 = vsel %vm834_vm0, %v8324_v56, 0.0  ;;  %v16129_v25 = vld [vmem:[#allocation186_spill] sm:$0xff]  ;;  %v8643_v56 = vsel %vm834_vm0, %v8338_v34, 0.0  ;;  %v5774_v20 = vld [vmem:[%s15013_s2 + $0x5] ss:$0 sm:$0xff] }
 0x15f   : > { %16122 = vst [vmem:[#allocation188_spill] sm:$0xff] %v8599_v29  ;;  %v8630_v29 = vpop.eup %6031  ;;  %v8635_v21 = vsel %vm834_vm0, %v16129_v25, 0.0  ;;  %v5775_v62 = vld [vmem:[%s15013_s2 + $0x6] ss:$0 sm:$0xff] }
 0x160   : > { %16125 = vst [vmem:[#allocation127_spill] sm:$0xff] %v8614_v46  ;;  %v1827_v46 = vadd.f32 %v8442_v33, %v1825_v15  ;;  %v8648_v53 = vpop.eup %6033  ;;  %v8651_v33 = vmul.f32 %v8163_v47, %v5727_v40  ;;  %v4865_v15 = vadd.f32 %v4864_v37, %v4863_v42  ;;  %v5729_v37 = vld [vmem:[%s15014_s3 + $0x32] ss:$0 sm:$0xff]  ;;  %v8670_v40 = vsel %vm834_vm0, %v8361_v14, 0.0 }
 0x161   : > { %16126 = vst [vmem:[#allocation189_spill] sm:$0xff] %v8620_v24  ;;  %v8658_v34 = vpop.eup %6035  ;;  %v16134_v24 = vld [vmem:[#allocation131_spill] sm:$0xff]  ;;  %v3835_v42 = vmul.f32 %v16135_v50, %v5772_v3 }
 0x162   : > { %16128 = vst [vmem:[#allocation190_spill] sm:$0xff] %v8630_v29  ;;  %v1829_v29 = vadd.f32 %v8451_v28, %v1827_v46  ;;  %v8663_v12 = vsel %vm834_vm0, %v16134_v24, 0.0  ;;  %v8677_v28 = vmul.f32 %v8183_v39, %v5728_v0  ;;  %v4867_v46 = vadd.f32 %v4866_v6, %v4865_v15  ;;  %v5778_v6 = vld [vmem:[%s15013_s2 + $0x9] ss:$0 sm:$0xff]  ;;  %v16138_v3 = vld [vmem:[#allocation103_spill] sm:$0xff] }
 0x163   : > { %16130 = vst [vmem:[#allocation191_spill] sm:$0xff] %v8648_v53  ;;  %v4010_v53 = vsel %vm834_vm0, %v3831_v57, 0.0  ;;  %v8689_v24 = vsel %vm834_vm0, %v8294_v31, 0.0  ;;  %v3839_v0 = vmul.f32 %v16138_v3, %v5774_v20  ;;  %v8717_v3 = vsel %vm834_vm0, %v8303_v26, 0.0 }
 0x164   : > { %16131 = vst [vmem:[#allocation192_spill] sm:$0xff] %v8651_v33  ;;  %v8684_v14 = vpop.eup %6037  ;;  %v1831_v33 = vadd.f32 %v8473_v22, %v1829_v29  ;;  %v4011_v15 = vadd.f32 %v4010_v53, %v4009_v49  ;;  %v4869_v57 = vadd.f32 %v4868_v54, %v4867_v46  ;;  %v5779_v22 = vld [vmem:[%s15013_s2 + $0xa] ss:$0 sm:$0xff]  ;;  %v8709_v49 = vmul.f32 %v8195_v43, %v5729_v37  ;;  %v5780_v54 = vld [vmem:[%s15013_s2 + $0xb] ss:$0 sm:$0xff]  ;;  %v16140_v53 = vld [vmem:[#allocation105_spill] sm:$0xff] }
 0x165   : > { %16133 = vst [vmem:[#allocation193_spill] sm:$0xff] %v8658_v34  ;;  %v16136_v34 = vld [vmem:[#allocation102_spill] sm:$0xff]  ;;  %v16139_v29 = vld [vmem:[#allocation104_spill] sm:$0xff]  ;;  %v4014_v37 = vsel %vm834_vm0, %v3835_v42, 0.0 }
 0x166   : > { %v3837_v47 = vmul.f32 %v16136_v34, %v5773_v32  ;;  %16137 = vst [vmem:[#allocation194_spill] sm:$0xff] %v8684_v14  ;;  %v5730_v32 = vld [vmem:[%s15014_s3 + $0x33] ss:$0 sm:$0xff]  ;;  %v8700_v34 = vsel %vm834_vm0, %v8371_v19, 0.0  ;;  %v3841_v50 = vmul.f32 %v16139_v29, %v5775_v62  ;;  %v4012_v14 = vsel %vm834_vm0, %v3833_v44, 0.0  ;;  %v16141_v44 = vld [vmem:[#allocation106_spill] sm:$0xff] }
 0x167   : > { %v1833_v20 = vadd.f32 %v8487_v13, %v1831_v33  ;;  %v3843_v19 = vmul.f32 %v16140_v53, %v5776_v2  ;;  %v4013_v46 = vadd.f32 %v4012_v14, %v4011_v15  ;;  %v4871_v62 = vadd.f32 %v8581_v55, %v4869_v57  ;;  %v5781_v13 = vld [vmem:[%s15013_s2 + $0xc] ss:$0 sm:$0xff]  ;;  %v5731_v2 = vld [vmem:[%s15014_s3 + $0x34] ss:$0 sm:$0xff]  ;;  %v5782_v55 = vld [vmem:[%s15013_s2 + $0xd] ss:$0 sm:$0xff] }
 0x168   : > { %v3845_v33 = vmul.f32 %v16141_v44, %v5777_v59  ;;  %v8731_v14 = vsel %vm834_vm0, %v8386_v16, 0.0  ;;  %v16142_v15 = vld [vmem:[#allocation107_spill] sm:$0xff]  ;;  %v8738_v59 = vmul.f32 %v8204_v11, %v5730_v32  ;;  %v5783_v42 = vld [vmem:[%s15013_s2 + $0xe] ss:$0 sm:$0xff]  ;;  %v4016_v16 = vsel %vm834_vm0, %v3837_v47, 0.0 }
 0x169   : > { %v1835_v29 = vadd.f32 %v8508_v7, %v1833_v20  ;;  %v3847_v57 = vmul.f32 %v16142_v15, %v5778_v6  ;;  %v4015_v53 = vadd.f32 %v4014_v37, %v4013_v46  ;;  %v4873_v7 = vadd.f32 %v8593_v8, %v4871_v62  ;;  %v16143_v20 = vld [vmem:[#allocation108_spill] sm:$0xff]  ;;  %v16144_v8 = vld [vmem:[#allocation109_spill] sm:$0xff]  ;;  %v16145_v37 = vld [vmem:[#allocation110_spill] sm:$0xff] }
 0x16a   : > { %v8745_v44 = vmul.f32 %v16143_v20, %v5779_v22  ;;  %v8751_v6 = vsel %vm834_vm0, %v8316_v63, 0.0  ;;  %v5784_v32 = vld [vmem:[%s15013_s2 + $0xf] ss:$0 sm:$0xff]  ;;  %v8757_v46 = vmul.f32 %v16144_v8, %v5780_v54  ;;  %v5732_v22 = vld [vmem:[%s15014_s3 + $0x35] ss:$0 sm:$0xff]  ;;  %v8771_v20 = vmul.f32 %v16145_v37, %v5781_v13 }
 0x16b   : > { %v1837_v43 = vadd.f32 %v8529_v18, %v1835_v29  ;;  %v4017_v62 = vadd.f32 %v4016_v16, %v4015_v53  ;;  %v4875_v47 = vadd.f32 %v8609_v27, %v4873_v7  ;;  %v8765_v18 = vsel %vm834_vm0, %v8409_v9, 0.0  ;;  %v5785_v29 = vld [vmem:[%s15013_s2 + $0x10] ss:$0 sm:$0xff]  ;;  %v5786_v27 = vld [vmem:[%s15013_s2 + $0x11] ss:$0 sm:$0xff]  ;;  %v16146_v9 = vld [vmem:[#allocation111_spill] sm:$0xff] }
 0x16c   : > { %v4018_v54 = vsel %vm834_vm0, %v3839_v0, 0.0  ;;  %v8776_v16 = vmul.f32 %v16103_v36, %v5731_v2  ;;  %v8782_v7 = vmul.f32 %v16146_v9, %v5782_v55  ;;  %v8786_v15 = vsel %vm834_vm0, %v8328_v60, 0.0  ;;  %v5733_v55 = vld [vmem:[%s15014_s3 + $0x36] ss:$0 sm:$0xff] }
 0x16d   : > { %v1839_v53 = vadd.f32 %v8553_v41, %v1837_v43  ;;  %v4019_v8 = vadd.f32 %v4018_v54, %v4017_v62  ;;  %v4877_v13 = vadd.f32 %v8624_v23, %v4875_v47  ;;  %v5787_v43 = vld [vmem:[%s15013_s2 + $0x12] ss:$0 sm:$0xff]  ;;  %v16147_v41 = vld [vmem:[#allocation112_spill] sm:$0xff]  ;;  %v4020_v2 = vsel %vm834_vm0, %v3841_v50, 0.0  ;;  %v5788_v23 = vld [vmem:[%s15013_s2 + $0x13] ss:$0 sm:$0xff] }
 0x16e   : > { %v8793_v0 = vmul.f32 %v16147_v41, %v5783_v42  ;;  %v8802_v62 = vsel %vm834_vm0, %v8419_v61, 0.0  ;;  %v16148_v47 = vld [vmem:[#allocation113_spill] sm:$0xff]  ;;  %v8811_v50 = vmul.f32 %v16111_v17, %v5732_v22  ;;  %v16149_v41 = vld [vmem:[#allocation114_spill] sm:$0xff]  ;;  %v4022_v9 = vsel %vm834_vm0, %v3843_v19, 0.0 }
 0x16f   : > { %v1841_v37 = vadd.f32 %v8577_v5, %v1839_v53  ;;  %v8808_v54 = vmul.f32 %v16148_v47, %v5784_v32  ;;  %v4021_v42 = vadd.f32 %v4020_v2, %v4019_v8  ;;  %v4879_v5 = vadd.f32 %v8639_v48, %v4877_v13  ;;  %v5789_v53 = vld [vmem:[%s15013_s2 + $0x14] ss:$0 sm:$0xff]  ;;  %v5790_v8 = vld [vmem:[%s15013_s2 + $0x15] ss:$0 sm:$0xff]  ;;  %v16150_v48 = vld [vmem:[#allocation115_spill] sm:$0xff] }
 0x170   : > { %v8818_v61 = vmul.f32 %v16149_v41, %v5785_v29  ;;  %v8824_v32 = vsel %vm834_vm0, %v8340_v51, 0.0  ;;  %v8830_v22 = vmul.f32 %v16150_v48, %v5786_v27  ;;  %v5734_v29 = vld [vmem:[%s15014_s3 + $0x37] ss:$0 sm:$0xff]  ;;  %v16151_v2 = vld [vmem:[#allocation116_spill] sm:$0xff]  ;;  %v4024_v27 = vsel %vm834_vm0, %v3845_v33, 0.0 }
 0x171   : > { %v1843_v36 = vadd.f32 %v8605_v1, %v1841_v37  ;;  %v4023_v13 = vadd.f32 %v4022_v9, %v4021_v42  ;;  %v4881_v19 = vadd.f32 %v8643_v56, %v4879_v5  ;;  %v4892_v1 = vsel %vm834_vm0, %v8434_v10, 0.0  ;;  %v5791_v37 = vld [vmem:[%s15013_s2 + $0x16] ss:$0 sm:$0xff]  ;;  %v5792_v56 = vld [vmem:[%s15013_s2 + $0x17] ss:$0 sm:$0xff]  ;;  %v16152_v5 = vld [vmem:[#allocation119_spill] sm:$0xff] }
 0x172   : > { %v8842_v41 = vmul.f32 %v16151_v2, %v5787_v43  ;;  %v8847_v42 = vmul.f32 %v16118_v58, %v5733_v55  ;;  %v8853_v10 = vmul.f32 %v16152_v5, %v5788_v23  ;;  %v8857_v47 = vsel %vm834_vm0, %v8350_v38, 0.0  ;;  %v5735_v23 = vld [vmem:[%s15014_s3 + $0x38] ss:$0 sm:$0xff] }
 0x173   : > { %v1845_v9 = vadd.f32 %v8635_v21, %v1843_v36  ;;  %v4025_v48 = vadd.f32 %v4024_v27, %v4023_v13  ;;  %v4883_v43 = vadd.f32 %v8670_v40, %v4881_v19  ;;  %v5793_v36 = vld [vmem:[%s15013_s2 + $0x18] ss:$0 sm:$0xff]  ;;  %v16153_v21 = vld [vmem:[#allocation121_spill] sm:$0xff]  ;;  %v4026_v55 = vsel %vm834_vm0, %v3847_v57, 0.0  ;;  %v5794_v40 = vld [vmem:[%s15013_s2 + $0x19] ss:$0 sm:$0xff] }
 0x174   : > { %v8864_v33 = vmul.f32 %v16153_v21, %v5789_v53  ;;  %v4894_v13 = vsel %vm834_vm0, %v8457_v52, 0.0  ;;  %v16154_v19 = vld [vmem:[#allocation123_spill] sm:$0xff]  ;;  %v8880_v21 = vmul.f32 %v16124_v35, %v5734_v29  ;;  %v16155_v57 = vld [vmem:[#allocation125_spill] sm:$0xff]  ;;  %v4028_v5 = vsel %vm834_vm0, %v8745_v44, 0.0  ;;  %v16157_v44 = vld [vmem:[#allocation130_spill] sm:$0xff] }
 0x175   : > { %v1847_v2 = vadd.f32 %v8663_v12, %v1845_v9  ;;  %v8877_v27 = vmul.f32 %v16154_v19, %v5790_v8  ;;  %v4027_v53 = vadd.f32 %v4026_v55, %v4025_v48  ;;  %v4885_v12 = vadd.f32 %v8700_v34, %v4883_v43  ;;  %v5736_v8 = vld [vmem:[%s15014_s3 + $0x39] ss:$0 sm:$0xff]  ;;  %v16156_v48 = vld [vmem:[#allocation128_spill] sm:$0xff] }
 0x176   : > { %v8884_v9 = vmul.f32 %v16155_v57, %v5791_v37  ;;  %v1860_v58 = vsel %vm834_vm0, %v8363_v4, 0.0  ;;  %v8895_v29 = vmul.f32 %v16156_v48, %v5792_v56  ;;  %v4896_v37 = vsel %vm834_vm0, %v8464_v30, 0.0  ;;  %v5737_v56 = vld [vmem:[%s15014_s3 + $0x3a] ss:$0 sm:$0xff]  ;;  %v16158_v30 = vld [vmem:[#allocation132_spill] sm:$0xff] }
 0x177   : > { %v1849_v52 = vadd.f32 %v8689_v24, %v1847_v2  ;;  %v4029_v55 = vadd.f32 %v4028_v5, %v4027_v53  ;;  %v4887_v34 = vadd.f32 %v8731_v14, %v4885_v12  ;;  %v5795_v24 = vld [vmem:[%s15013_s2 + $0x1a] ss:$0 sm:$0xff]  ;;  %v8904_v2 = vmul.f32 %v16157_v44, %v5793_v36 }
 0x178   : > { %v4030_v43 = vsel %vm834_vm0, %v8757_v46, 0.0  ;;  %v8913_v14 = vmul.f32 %v16129_v25, %v5735_v23  ;;  %v8916_v5 = vmul.f32 %v16158_v30, %v5794_v40  ;;  %v16159_v12 = vld [vmem:[#allocation146_spill] sm:$0xff]  ;;  %v4898_v46 = vsel %vm834_vm0, %v8479_v45, 0.0  ;;  %v16162_v30 = vld [vmem:[#allocation71_spill] sm:$0xff]  ;;  %v16163_v45 = vld [vmem:[#allocation72_spill] sm:$0xff] }
 0x179   : > { %v1851_v57 = vadd.f32 %v8717_v3, %v1849_v52  ;;  %v4031_v53 = vadd.f32 %v4030_v43, %v4029_v55  ;;  %v1862_v36 = vsel %vm834_vm0, %v16159_v12, 0.0  ;;  %v4889_v44 = vadd.f32 %v8765_v18, %v4887_v34  ;;  %v5796_v3 = vld [vmem:[%s15013_s2 + $0x1b] ss:$0 sm:$0xff]  ;;  %v16160_v55 = vld [vmem:[#allocation131_spill] sm:$0xff]  ;;  %v16161_v34 = vld [vmem:[#allocation76_spill] sm:$0xff] }
 0x17a   : > { %v4032_v23 = vsel %vm834_vm0, %v8771_v20, 0.0  ;;  %v5738_v40 = vld [vmem:[%s15014_s3 + $0x3b] ss:$0 sm:$0xff]  ;;  %v8933_v43 = vmul.f32 %v16160_v55, %v5736_v8  ;;  %v16164_v48 = vmax.f32 %v16162_v30, %v16163_v45  ;;  %v16166_v25 = vld [vmem:[#allocation148_spill] sm:$0xff]  ;;  %v4034_v8 = vsel %vm834_vm0, %v8782_v7, 0.0 }
 0x17b   : > { %v1853_v52 = vadd.f32 %v8751_v6, %v1851_v57  ;;  %v4033_v18 = vadd.f32 %v4032_v23, %v4031_v53  ;;  %v1864_v35 = vsel %vm834_vm0, %v16166_v25, 0.0  ;;  %v4891_v20 = vadd.f32 %v8802_v62, %v4889_v44  ;;  %v5797_v6 = vld [vmem:[%s15013_s2 + $0x1c] ss:$0 sm:$0xff]  ;;  %v16168_v62 = vld [vmem:[#allocation168_spill] sm:$0xff]  ;;  %v5798_v7 = vld [vmem:[%s15013_s2 + $0x1d] ss:$0 sm:$0xff] }
 0x17c   : > { %v8939_v19 = vmax.f32 %v16164_v48, %v16161_v34  ;;  %v16167_v57 = vld [vmem:[#allocation134_spill] sm:$0xff]  ;;  %v8957_v30 = vmul.f32 %v8294_v31, %v5737_v56  ;;  %v4900_v44 = vsel %vm834_vm0, %v16168_v62, 0.0  ;;  %v16172_v31 = vld [vmem:[#allocation152_spill] sm:$0xff]  ;;  %v4038_v55 = vsel %vm834_vm0, %v8808_v54, 0.0 }
 0x17d   : > { %v8948_v17 = vmul.f32 %v16167_v57, %v5795_v24  ;;  %v1855_v53 = vadd.f32 %v8786_v15, %v1853_v52  ;;  %v5739_v48 = vld [vmem:[%s15014_s3 + $0x3c] ss:$0 sm:$0xff]  ;;  %v4035_v23 = vadd.f32 %v4034_v8, %v4033_v18  ;;  %v4893_v45 = vadd.f32 %v4892_v1, %v4891_v20  ;;  %v16170_v15 = vld [vmem:[#allocation136_spill] sm:$0xff]  ;;  %v5740_v18 = vld [vmem:[%s15014_s3 + $0x3d] ss:$0 sm:$0xff] }
 0x17e   : > { %16165 = vst [vmem:[#allocation76_spill] sm:$0xff] %v8939_v19  ;;  %v16169_v34 = vld [vmem:[#allocation150_spill] sm:$0xff]  ;;  %v8967_v52 = vmul.f32 %v16170_v15, %v5796_v3  ;;  %v4036_v57 = vsel %vm834_vm0, %v8793_v0, 0.0  ;;  %v8976_v8 = vmul.f32 %v8303_v26, %v5738_v40  ;;  %v16171_v1 = vld [vmem:[#allocation173_spill] sm:$0xff]  ;;  %v1868_v3 = vsel %vm834_vm0, %v16172_v31, 0.0 }
 0x17f   : > { %v1866_v24 = vsel %vm834_vm0, %v16169_v34, 0.0  ;;  %v1857_v56 = vadd.f32 %v8824_v32, %v1855_v53  ;;  %v4902_v20 = vsel %vm834_vm0, %v16171_v1, 0.0  ;;  %v4037_v62 = vadd.f32 %v4036_v57, %v4035_v23  ;;  %v5799_v0 = vld [vmem:[%s15013_s2 + $0x1e] ss:$0 sm:$0xff]  ;;  %v16173_v32 = vld [vmem:[#allocation139_spill] sm:$0xff] }
 0x180   : > { %v4895_v15 = vadd.f32 %v4894_v13, %v4893_v45  ;;  %v8986_v53 = vmul.f32 %v16173_v32, %v5797_v6  ;;  %v5741_v57 = vld [vmem:[%s15014_s3 + $0x3e] ss:$0 sm:$0xff]  ;;  %v8995_v23 = vmul.f32 %v8316_v63, %v5739_v48  ;;  %v16174_v13 = vld [vmem:[#allocation124_spill] sm:$0xff]  ;;  %v5800_v54 = vld [vmem:[%s15013_s2 + $0x1f] ss:$0 sm:$0xff]  ;;  %v4040_v19 = vsel %vm834_vm0, %v8818_v61, 0.0 }
 0x181   : > { %v1859_v40 = vadd.f32 %v8857_v47, %v1857_v56  ;;  %v4904_v45 = vsel %vm834_vm0, %v16174_v13, 0.0  ;;  %v4039_v1 = vadd.f32 %v4038_v55, %v4037_v62  ;;  %v16175_v26 = vld [vmem:[#allocation154_spill] sm:$0xff]  ;;  %v16176_v47 = vld [vmem:[#allocation141_spill] sm:$0xff]  ;;  %v9013_v55 = vmul.f32 %v8328_v60, %v5740_v18  ;;  %v16178_v63 = vld [vmem:[#allocation156_spill] sm:$0xff] }
 0x182   : > { %v1870_v6 = vsel %vm834_vm0, %v16175_v26, 0.0  ;;  %v4897_v32 = vadd.f32 %v4896_v37, %v4895_v15  ;;  %v9005_v56 = vmul.f32 %v16176_v47, %v5798_v7  ;;  %v5742_v13 = vld [vmem:[%s15014_s3 + $0x3f] ss:$0 sm:$0xff]  ;;  %v1872_v11 = vsel %vm834_vm0, %v16178_v63, 0.0  ;;  %v5801_v61 = vld [vmem:[%s15013_s2 + $0x20] ss:$0 sm:$0xff] }
 0x183   : > { %v1861_v48 = vadd.f32 %v1860_v58, %v1859_v40  ;;  %v16177_v62 = vld [vmem:[#allocation118_spill] sm:$0xff]  ;;  %v4041_v15 = vadd.f32 %v4040_v19, %v4039_v1  ;;  %v16179_v58 = vld [vmem:[#allocation143_spill] sm:$0xff]  ;;  %v4042_v47 = vsel %vm834_vm0, %v8830_v22, 0.0  ;;  %v9031_v19 = vmul.f32 %v8340_v51, %v5741_v57  ;;  %v16186_v51 = vld [vmem:[#allocation160_spill] sm:$0xff] }
 0x184   : > { %v4906_v37 = vsel %vm834_vm0, %v16177_v62, 0.0  ;;  %v4899_v7 = vadd.f32 %v4898_v46, %v4897_v32  ;;  %v9023_v40 = vmul.f32 %v16179_v58, %v5799_v0  ;;  %v5743_v62 = vld [vmem:[%s15014_s3 + $0x40] ss:$0 sm:$0xff]  ;;  %v16181_v1 = vld [vmem:[#allocation126_spill] sm:$0xff]  ;;  %v5802_v22 = vld [vmem:[%s15013_s2 + $0x21] ss:$0 sm:$0xff] }
 0x185   : > { %v1863_v18 = vadd.f32 %v1862_v36, %v1861_v48  ;;  %16180 = vst [vmem:[#allocation71_spill] sm:$0xff] %v9031_v19  ;;  %v4908_v46 = vsel %vm834_vm0, %v16181_v1, 0.0  ;;  %v4043_v32 = vadd.f32 %v4042_v47, %v4041_v15  ;;  %v16182_v60 = vld [vmem:[#allocation158_spill] sm:$0xff]  ;;  %v16183_v36 = vld [vmem:[#allocation145_spill] sm:$0xff]  ;;  %v4044_v58 = vsel %vm834_vm0, %v8842_v41, 0.0 }
 0x186   : > { %v1874_v39 = vsel %vm834_vm0, %v16182_v60, 0.0  ;;  %v4901_v0 = vadd.f32 %v4900_v44, %v4899_v7  ;;  %v9041_v48 = vmul.f32 %v16183_v36, %v5800_v54  ;;  %v5744_v1 = vld [vmem:[%s15014_s3 + $0x41] ss:$0 sm:$0xff]  ;;  %v9049_v47 = vmul.f32 %v8350_v38, %v5742_v13  ;;  %v16185_v15 = vld [vmem:[#allocation189_spill] sm:$0xff]  ;;  %v5803_v41 = vld [vmem:[%s15013_s2 + $0x22] ss:$0 sm:$0xff] }
 0x187   : > { %v1865_v57 = vadd.f32 %v1864_v35, %v1863_v18  ;;  %v4910_v44 = vsel %vm834_vm0, %v16185_v15, 0.0  ;;  %v4045_v7 = vadd.f32 %v4044_v58, %v4043_v32  ;;  %v1876_v19 = vsel %vm834_vm0, %v16186_v51, 0.0  ;;  %v16187_v35 = vld [vmem:[#allocation147_spill] sm:$0xff]  ;;  %v16188_v32 = vld [vmem:[#allocation192_spill] sm:$0xff]  ;;  %v16189_v38 = vld [vmem:[#allocation162_spill] sm:$0xff] }
 0x188   : > { %16184 = vst [vmem:[#allocation72_spill] sm:$0xff] %v9049_v47  ;;  %v4903_v54 = vadd.f32 %v4902_v20, %v4901_v0  ;;  %v9059_v18 = vmul.f32 %v16187_v35, %v5801_v61  ;;  %v4046_v36 = vsel %vm834_vm0, %v8853_v10, 0.0  ;;  %v5745_v15 = vld [vmem:[%s15014_s3 + $0x42] ss:$0 sm:$0xff]  ;;  %v9067_v58 = vmul.f32 %v8363_v4, %v5743_v62  ;;  %v5804_v10 = vld [vmem:[%s15013_s2 + $0x23] ss:$0 sm:$0xff] }
 0x189   : > { %v1867_v13 = vadd.f32 %v1866_v24, %v1865_v57  ;;  %v4912_v20 = vsel %vm834_vm0, %v16188_v32, 0.0  ;;  %v4047_v0 = vadd.f32 %v4046_v36, %v4045_v7  ;;  %v1878_v47 = vsel %vm834_vm0, %v16189_v38, 0.0  ;;  %v16190_v24 = vld [vmem:[#allocation149_spill] sm:$0xff]  ;;  %v5746_v32 = vld [vmem:[%s15014_s3 + $0x43] ss:$0 sm:$0xff] }
 0x18a   : > { %v4905_v61 = vadd.f32 %v4904_v45, %v4903_v54  ;;  %v9077_v57 = vmul.f32 %v16190_v24, %v5802_v22  ;;  %v4048_v35 = vsel %vm834_vm0, %v8864_v33, 0.0  ;;  %v9085_v36 = vmul.f32 %v16159_v12, %v5744_v1  ;;  %v16191_v54 = vld [vmem:[#allocation164_spill] sm:$0xff]  ;;  %v5805_v33 = vld [vmem:[%s15013_s2 + $0x24] ss:$0 sm:$0xff] }
 0x18b   : > { %v1869_v62 = vadd.f32 %v1868_v3, %v1867_v13  ;;  %v4914_v45 = vsel %vm834_vm0, %v8677_v28, 0.0  ;;  %v4049_v7 = vadd.f32 %v4048_v35, %v4047_v0  ;;  %v1880_v4 = vsel %vm834_vm0, %v16191_v54, 0.0  ;;  %v16192_v3 = vld [vmem:[#allocation151_spill] sm:$0xff] }
 0x18c   : > { %v4907_v22 = vadd.f32 %v4906_v37, %v4905_v61  ;;  %v9095_v13 = vmul.f32 %v16192_v3, %v5803_v41  ;;  %v4050_v24 = vsel %vm834_vm0, %v8877_v27, 0.0  ;;  %v5747_v28 = vld [vmem:[%s15014_s3 + $0x44] ss:$0 sm:$0xff]  ;;  %v9103_v35 = vmul.f32 %v16166_v25, %v5745_v15  ;;  %v5806_v27 = vld [vmem:[%s15013_s2 + $0x25] ss:$0 sm:$0xff] }
 0x18d   : > { %v1871_v1 = vadd.f32 %v1870_v6, %v1869_v62  ;;  %v4916_v37 = vsel %vm834_vm0, %v8709_v49, 0.0  ;;  %v4051_v0 = vadd.f32 %v4050_v24, %v4049_v7  ;;  %v16193_v61 = vld [vmem:[#allocation187_spill] sm:$0xff]  ;;  %v16194_v6 = vld [vmem:[#allocation153_spill] sm:$0xff]  ;;  %v4052_v3 = vsel %vm834_vm0, %v8884_v9, 0.0 }
 0x18e   : > { %v1882_v12 = vsel %vm834_vm0, %v16193_v61, 0.0  ;;  %v4909_v41 = vadd.f32 %v4908_v46, %v4907_v22  ;;  %v9113_v62 = vmul.f32 %v16194_v6, %v5804_v10  ;;  %v5748_v49 = vld [vmem:[%s15014_s3 + $0x45] ss:$0 sm:$0xff]  ;;  %v9121_v24 = vmul.f32 %v16169_v34, %v5746_v32  ;;  %v16195_v22 = vld [vmem:[#allocation178_spill] sm:$0xff]  ;;  %v5807_v9 = vld [vmem:[%s15013_s2 + $0x26] ss:$0 sm:$0xff] }
 0x18f   : > { %v1873_v15 = vadd.f32 %v1872_v11, %v1871_v1  ;;  %v4918_v46 = vsel %vm834_vm0, %v8738_v59, 0.0  ;;  %v4053_v7 = vadd.f32 %v4052_v3, %v4051_v0  ;;  %v1884_v25 = vsel %vm834_vm0, %v16195_v22, 0.0  ;;  %v16196_v11 = vld [vmem:[#allocation155_spill] sm:$0xff] }
 0x190   : > { %v4911_v10 = vadd.f32 %v4910_v44, %v4909_v41  ;;  %v9131_v1 = vmul.f32 %v16196_v11, %v5805_v33  ;;  %v4054_v6 = vsel %vm834_vm0, %v8895_v29, 0.0  ;;  %v9136_v34 = vmul.f32 %v16172_v31, %v5747_v28  ;;  %v16197_v0 = vld [vmem:[#allocation171_spill] sm:$0xff]  ;;  %v16199_v31 = vld [vmem:[#allocation120_spill] sm:$0xff] }
 0x191   : > { %v1875_v32 = vadd.f32 %v1874_v39, %v1873_v15  ;;  %v4920_v59 = vsel %vm834_vm0, %v8776_v16, 0.0  ;;  %v4055_v3 = vadd.f32 %v4054_v6, %v4053_v7  ;;  %v1886_v44 = vsel %vm834_vm0, %v16197_v0, 0.0  ;;  %v5749_v41 = vld [vmem:[%s15014_s3 + $0x46] ss:$0 sm:$0xff]  ;;  %v5808_v29 = vld [vmem:[%s15013_s2 + $0x27] ss:$0 sm:$0xff] }
 0x192   : > { %v4913_v33 = vadd.f32 %v4912_v20, %v4911_v10  ;;  %v16198_v39 = vld [vmem:[#allocation157_spill] sm:$0xff]  ;;  %v4056_v28 = vsel %vm834_vm0, %v8904_v2, 0.0  ;;  %v9154_v6 = vmul.f32 %v16175_v26, %v5748_v49  ;;  %v4922_v7 = vsel %vm834_vm0, %v8811_v50, 0.0  ;;  %v5750_v10 = vld [vmem:[%s15014_s3 + $0x47] ss:$0 sm:$0xff] }
 0x193   : > { %v9149_v15 = vmul.f32 %v16198_v39, %v5806_v27  ;;  %v1877_v16 = vadd.f32 %v1876_v19, %v1875_v32  ;;  %v4057_v11 = vadd.f32 %v4056_v28, %v4055_v3  ;;  %v1888_v20 = vsel %vm834_vm0, %v16199_v31, 0.0  ;;  %v5809_v2 = vld [vmem:[%s15013_s2 + $0x28] ss:$0 sm:$0xff]  ;;  %v16200_v19 = vld [vmem:[#allocation159_spill] sm:$0xff] }
 0x194   : > { %v4915_v27 = vadd.f32 %v4914_v45, %v4913_v33  ;;  %v9167_v32 = vmul.f32 %v16200_v19, %v5807_v9  ;;  %v4058_v49 = vsel %vm834_vm0, %v8916_v5, 0.0  ;;  %v4924_v3 = vsel %vm834_vm0, %v8847_v42, 0.0  ;;  %v5751_v45 = vld [vmem:[%s15014_s3 + $0x48] ss:$0 sm:$0xff]  ;;  %v5810_v5 = vld [vmem:[%s15013_s2 + $0x29] ss:$0 sm:$0xff] }
 0x195   : > { %v1879_v50 = vadd.f32 %v1878_v47, %v1877_v16  ;;  %v4059_v28 = vadd.f32 %v4058_v49, %v4057_v11  ;;  %v4060_v39 = vsel %vm834_vm0, %v8948_v17, 0.0  ;;  %v9179_v33 = vmul.f32 %v16178_v63, %v5749_v41  ;;  %v16201_v47 = vld [vmem:[#allocation161_spill] sm:$0xff]  ;;  %v16202_v17 = vld [vmem:[#allocation175_spill] sm:$0xff] }
 0x196   : > { %v4917_v9 = vadd.f32 %v4916_v37, %v4915_v27  ;;  %v9185_v16 = vmul.f32 %v16201_v47, %v5808_v29  ;;  %v4062_v42 = vsel %vm834_vm0, %v8967_v52, 0.0  ;;  %v1890_v49 = vsel %vm834_vm0, %v16202_v17, 0.0  ;;  %v5752_v37 = vld [vmem:[%s15014_s3 + $0x49] ss:$0 sm:$0xff]  ;;  %v5811_v52 = vld [vmem:[%s15013_s2 + $0x2a] ss:$0 sm:$0xff] }
 0x197   : > { %v1881_v11 = vadd.f32 %v1880_v4, %v1879_v50  ;;  %v4926_v19 = vsel %vm834_vm0, %v8880_v21, 0.0  ;;  %v4061_v41 = vadd.f32 %v4060_v39, %v4059_v28  ;;  %v9197_v27 = vmul.f32 %v16182_v60, %v5750_v10  ;;  %v16203_v4 = vld [vmem:[#allocation163_spill] sm:$0xff]  ;;  %v16204_v39 = vld [vmem:[#allocation177_spill] sm:$0xff] }
 0x198   : > { %v4919_v29 = vadd.f32 %v4918_v46, %v4917_v9  ;;  %v9203_v50 = vmul.f32 %v16203_v4, %v5809_v2  ;;  %v4064_v47 = vsel %vm834_vm0, %v8986_v53, 0.0  ;;  %v1892_v28 = vsel %vm834_vm0, %v16204_v39, 0.0  ;;  %v5753_v46 = vld [vmem:[%s15014_s3 + $0x4a] ss:$0 sm:$0xff]  ;;  %v5812_v53 = vld [vmem:[%s15013_s2 + $0x2b] ss:$0 sm:$0xff] }
 0x199   : > { %v1883_v21 = vadd.f32 %v1882_v12, %v1881_v11  ;;  %v4928_v63 = vsel %vm834_vm0, %v8913_v14, 0.0  ;;  %v4063_v10 = vadd.f32 %v4062_v42, %v4061_v41  ;;  %v9215_v9 = vmul.f32 %v16186_v51, %v5751_v45  ;;  %v16205_v12 = vld [vmem:[#allocation165_spill] sm:$0xff]  ;;  %v16206_v42 = vld [vmem:[#allocation183_spill] sm:$0xff] }
 0x19a   : > { %v4921_v2 = vadd.f32 %v4920_v59, %v4919_v29  ;;  %v9221_v11 = vmul.f32 %v16205_v12, %v5810_v5  ;;  %v4066_v4 = vsel %vm834_vm0, %v9005_v56, 0.0  ;;  %v1894_v41 = vsel %vm834_vm0, %v16206_v42, 0.0  ;;  %v5754_v59 = vld [vmem:[%s15014_s3 + $0x4b] ss:$0 sm:$0xff]  ;;  %v5813_v56 = vld [vmem:[%s15013_s2 + $0x2c] ss:$0 sm:$0xff] }
 0x19b   : > { %v1885_v14 = vadd.f32 %v1884_v25, %v1883_v21  ;;  %v4930_v60 = vsel %vm834_vm0, %v8933_v43, 0.0  ;;  %v4065_v45 = vadd.f32 %v4064_v47, %v4063_v10  ;;  %v9233_v29 = vmul.f32 %v16189_v38, %v5752_v37  ;;  %v16207_v25 = vld [vmem:[#allocation166_spill] sm:$0xff]  ;;  %v16208_v47 = vld [vmem:[#allocation129_spill] sm:$0xff] }
 0x19c   : > { %v4923_v5 = vadd.f32 %v4922_v7, %v4921_v2  ;;  %v9239_v21 = vmul.f32 %v16207_v25, %v5811_v52  ;;  %v4068_v12 = vsel %vm834_vm0, %v9023_v40, 0.0  ;;  %v1896_v10 = vsel %vm834_vm0, %v16208_v47, 0.0  ;;  %v5755_v7 = vld [vmem:[%s15014_s3 + $0x4c] ss:$0 sm:$0xff]  ;;  %v5814_v40 = vld [vmem:[%s15013_s2 + $0x2d] ss:$0 sm:$0xff] }
 0x19d   : > { %v1887_v43 = vadd.f32 %v1886_v44, %v1885_v14  ;;  %v4932_v51 = vsel %vm834_vm0, %v8957_v30, 0.0  ;;  %v4067_v37 = vadd.f32 %v4066_v4, %v4065_v45  ;;  %v9251_v2 = vmul.f32 %v16191_v54, %v5753_v46  ;;  %v16209_v44 = vld [vmem:[#allocation167_spill] sm:$0xff]  ;;  %v16210_v4 = vld [vmem:[#allocation122_spill] sm:$0xff] }
 0x19e   : > { %v4925_v52 = vadd.f32 %v4924_v3, %v4923_v5  ;;  %v9257_v14 = vmul.f32 %v16209_v44, %v5812_v53  ;;  %v4070_v25 = vsel %vm834_vm0, %v9041_v48, 0.0  ;;  %v1898_v45 = vsel %vm834_vm0, %v16210_v4, 0.0  ;;  %v5756_v3 = vld [vmem:[%s15014_s3 + $0x4d] ss:$0 sm:$0xff]  ;;  %v5815_v48 = vld [vmem:[%s15013_s2 + $0x2e] ss:$0 sm:$0xff] }
 0x19f   : > { %v1889_v30 = vadd.f32 %v1888_v20, %v1887_v43  ;;  %v4934_v38 = vsel %vm834_vm0, %v8976_v8, 0.0  ;;  %v4069_v46 = vadd.f32 %v4068_v12, %v4067_v37  ;;  %v9269_v5 = vmul.f32 %v16193_v61, %v5754_v59  ;;  %v16211_v20 = vld [vmem:[#allocation169_spill] sm:$0xff]  ;;  %v16212_v12 = vld [vmem:[#allocation188_spill] sm:$0xff] }
 0x1a0   : > { %v4927_v53 = vadd.f32 %v4926_v19, %v4925_v52  ;;  %v9275_v43 = vmul.f32 %v16211_v20, %v5813_v56  ;;  %v4072_v44 = vsel %vm834_vm0, %v9059_v18, 0.0  ;;  %v9281_v37 = vsel %vm834_vm0, %v16212_v12, 0.0  ;;  %v5757_v19 = vld [vmem:[%s15014_s3 + $0x4e] ss:$0 sm:$0xff]  ;;  %v5816_v18 = vld [vmem:[%s15013_s2 + $0x2f] ss:$0 sm:$0xff] }
 0x1a1   : > { %v1891_v8 = vadd.f32 %v1890_v49, %v1889_v30  ;;  %v4936_v59 = vsel %vm834_vm0, %v8995_v23, 0.0  ;;  %v4071_v61 = vadd.f32 %v4070_v25, %v4069_v46  ;;  %v9289_v52 = vmul.f32 %v16195_v22, %v5755_v7  ;;  %v16214_v49 = vld [vmem:[#allocation170_spill] sm:$0xff]  ;;  %v16215_v25 = vld [vmem:[#allocation127_spill] sm:$0xff] }
 0x1a2   : > { %v4929_v56 = vadd.f32 %v4928_v63, %v4927_v53  ;;  %v9295_v30 = vmul.f32 %v16214_v49, %v5814_v40  ;;  %v4074_v20 = vsel %vm834_vm0, %v9077_v57, 0.0  ;;  %v9301_v46 = vsel %vm834_vm0, %v16215_v25, 0.0  ;;  %v5758_v63 = vld [vmem:[%s15014_s3 + $0x4f] ss:$0 sm:$0xff]  ;;  %v5817_v57 = vld [vmem:[%s15013_s2 + $0x30] ss:$0 sm:$0xff] }
 0x1a3   : > { %16213 = vst [vmem:[#allocation168_spill] sm:$0xff] %v9289_v52  ;;  %v1893_v23 = vadd.f32 %v1892_v28, %v1891_v8  ;;  %v4938_v7 = vsel %vm834_vm0, %v9013_v55, 0.0  ;;  %v4073_v22 = vadd.f32 %v4072_v44, %v4071_v61  ;;  %v9309_v53 = vmul.f32 %v16197_v0, %v5756_v3  ;;  %v16217_v28 = vld [vmem:[#allocation172_spill] sm:$0xff]  ;;  %v16218_v61 = vld [vmem:[#allocation190_spill] sm:$0xff]  ;;  %v5759_v3 = vld [vmem:[%s15014_s3 + $0x50] ss:$0 sm:$0xff] }
 0x1a4   : > { %v4931_v40 = vadd.f32 %v4930_v60, %v4929_v56  ;;  %v9315_v8 = vmul.f32 %v16217_v28, %v5815_v48  ;;  %v4076_v49 = vsel %vm834_vm0, %v9095_v13, 0.0  ;;  %v9321_v44 = vsel %vm834_vm0, %v16218_v61, 0.0  ;;  %v16219_v60 = vld [vmem:[#allocation71_spill] sm:$0xff]  ;;  %v5818_v13 = vld [vmem:[%s15013_s2 + $0x31] ss:$0 sm:$0xff] }
 0x1a5   : > { %16216 = vst [vmem:[#allocation173_spill] sm:$0xff] %v9309_v53  ;;  %v1895_v55 = vadd.f32 %v1894_v41, %v1893_v23  ;;  %v4940_v56 = vsel %vm834_vm0, %v16219_v60, 0.0  ;;  %v4075_v0 = vadd.f32 %v4074_v20, %v4073_v22  ;;  %v9329_v54 = vmul.f32 %v16199_v31, %v5757_v19  ;;  %v16221_v41 = vld [vmem:[#allocation174_spill] sm:$0xff]  ;;  %v16222_v53 = vld [vmem:[#allocation191_spill] sm:$0xff]  ;;  %v5760_v22 = vld [vmem:[%s15014_s3 + $0x51] ss:$0 sm:$0xff] }
 0x1a6   : > { %v4933_v48 = vadd.f32 %v4932_v51, %v4931_v40  ;;  %v9335_v23 = vmul.f32 %v16221_v41, %v5816_v18  ;;  %v4078_v28 = vsel %vm834_vm0, %v9113_v62, 0.0  ;;  %v9341_v52 = vsel %vm834_vm0, %v16222_v53, 0.0  ;;  %v16223_v51 = vld [vmem:[#allocation72_spill] sm:$0xff]  ;;  %v5819_v62 = vld [vmem:[%s15013_s2 + $0x32] ss:$0 sm:$0xff] }
 0x1a7   : > { %16220 = vst [vmem:[#allocation124_spill] sm:$0xff] %v9329_v54  ;;  %v1897_v26 = vadd.f32 %v1896_v10, %v1895_v55  ;;  %v4942_v20 = vsel %vm834_vm0, %v16223_v51, 0.0  ;;  %v4077_v19 = vadd.f32 %v4076_v49, %v4075_v0  ;;  %v9349_v18 = vmul.f32 %v16202_v17, %v5758_v63  ;;  %v16225_v10 = vld [vmem:[#allocation176_spill] sm:$0xff]  ;;  %v16226_v41 = vld [vmem:[#allocation193_spill] sm:$0xff] }
 0x1a8   : > { %v4935_v40 = vadd.f32 %v4934_v38, %v4933_v48  ;;  %v9355_v55 = vmul.f32 %v16225_v10, %v5817_v57  ;;  %v4080_v60 = vsel %vm834_vm0, %v9131_v1, 0.0  ;;  %v9361_v51 = vsel %vm834_vm0, %v16226_v41, 0.0  ;;  %v5761_v0 = vld [vmem:[%s15014_s3 + $0x52] ss:$0 sm:$0xff]  ;;  %v5820_v63 = vld [vmem:[%s15013_s2 + $0x33] ss:$0 sm:$0xff] }
 0x1a9   : > { %16224 = vst [vmem:[#allocation118_spill] sm:$0xff] %v9349_v18  ;;  %v9367_v38 = vmul.f32 %v16204_v39, %v5759_v3  ;;  %v4944_v49 = vsel %vm834_vm0, %v9067_v58, 0.0  ;;  %v4079_v57 = vadd.f32 %v4078_v28, %v4077_v19  ;;  %v1899_v1 = vadd.f32 %v1898_v45, %v1897_v26  ;;  %v16227_v10 = vld [vmem:[#allocation117_spill] sm:$0xff]  ;;  %v305_v18 = vld [vmem:[%s6707_s25 + $0x58] sm:$0xff]  ;;  %v307_v54 = vld [vmem:[%s6707_s25 + $0x68] sm:$0xff] }
 0x1aa   : > { %v4937_v48 = vadd.f32 %v4936_v59, %v4935_v40  ;;  %v9375_v17 = vmul.f32 %v16227_v10, %v5818_v13  ;;  %v4082_v31 = vsel %vm834_vm0, %v9149_v15, 0.0  ;;  %v16228_v3 = vld [vmem:[#allocation194_spill] sm:$0xff]  ;;  %v5762_v58 = vld [vmem:[%s15014_s3 + $0x53] ss:$0 sm:$0xff]  ;;  %v9389_v26 = vmul.f32 %v16206_v42, %v5760_v22  ;;  %v5821_v15 = vld [vmem:[%s15013_s2 + $0x34] ss:$0 sm:$0xff] }
 0x1ab   : > { %v9383_v39 = vsel %vm834_vm0, %v16228_v3, 0.0  ;;  %v4946_v45 = vsel %vm834_vm0, %v9085_v36, 0.0  ;;  %v4081_v59 = vadd.f32 %v4080_v60, %v4079_v57  ;;  %v5763_v28 = vld [vmem:[%s15014_s3 + $0x54] ss:$0 sm:$0xff]  ;;  %v4948_v19 = vsel %vm834_vm0, %v9103_v35, 0.0  ;;  %v16230_v40 = vld [vmem:[#allocation179_spill] sm:$0xff] }
 0x1ac   : > { %16229 = vst [vmem:[#allocation126_spill] sm:$0xff] %v9389_v26  ;;  %v4939_v13 = vadd.f32 %v4938_v7, %v4937_v48  ;;  %v9402_v10 = vmul.f32 %v16230_v40, %v5819_v62  ;;  %v4084_v22 = vsel %vm834_vm0, %v9167_v32, 0.0  ;;  %v9407_v36 = vmul.f32 %v16208_v47, %v5761_v0  ;;  %v16231_v42 = vld [vmem:[#allocation180_spill] sm:$0xff]  ;;  %v309_v26 = vld [vmem:[%s6707_s25 + $0x78] sm:$0xff]  ;;  %v5764_v32 = vld [vmem:[%s15014_s3 + $0x55] ss:$0 sm:$0xff] }
 0x1ad   : > { %v9410_v60 = vmul.f32 %v16231_v42, %v5820_v63  ;;  %v4083_v57 = vadd.f32 %v4082_v31, %v4081_v59  ;;  %v4086_v7 = vsel %vm834_vm0, %v9185_v16, 0.0  ;;  %v1901_v48 = vadd.f32 %v9281_v37, %v1899_v1  ;;  %v5822_v16 = vld [vmem:[%s15013_s2 + $0x35] ss:$0 sm:$0xff]  ;;  %v5765_v63 = vld [vmem:[%s15014_s3 + $0x56] ss:$0 sm:$0xff] }
 0x1ae   : > { %v4941_v35 = vadd.f32 %v4940_v56, %v4939_v13  ;;  %v1022_v62 = vsel %vm834_vm0, %v305_v18, -inf  ;;  %v1024_v40 = vsel %vm834_vm0, %v307_v54, -inf  ;;  %v9422_v0 = vmul.f32 %v16210_v4, %v5762_v58  ;;  %v16232_v37 = vld [vmem:[#allocation181_spill] sm:$0xff]  ;;  %v311_v54 = vld [vmem:[%s6707_s25 + $0x88] sm:$0xff]  ;;  %v313_v4 = vld [vmem:[%s6707_s25 + $0x98] sm:$0xff] }
 0x1af   : > { %v4950_v31 = vsel %vm834_vm0, %v9121_v24, 0.0  ;;  %v9430_v56 = vmul.f32 %v16232_v37, %v5821_v15  ;;  %v4085_v18 = vadd.f32 %v4084_v22, %v4083_v57  ;;  %v9437_v1 = vmul.f32 %v16212_v12, %v5763_v28  ;;  %v5823_v59 = vld [vmem:[%s15013_s2 + $0x36] ss:$0 sm:$0xff]  ;;  %v16235_v37 = vld [vmem:[#allocation75_spill] sm:$0xff] }
 0x1b0   : > { %v4943_v58 = vadd.f32 %v4942_v20, %v4941_v35  ;;  %v4952_v24 = vsel %vm834_vm0, %v9136_v34, 0.0  ;;  %v4088_v15 = vsel %vm834_vm0, %v9203_v50, 0.0  ;;  %v4090_v22 = vsel %vm834_vm0, %v9221_v11, 0.0  ;;  %v16234_v57 = vld [vmem:[#allocation73_spill] sm:$0xff]  ;;  %v16237_v20 = vld [vmem:[#allocation76_spill] sm:$0xff] }
 0x1b1   : > { %16233 = vst [vmem:[#allocation189_spill] sm:$0xff] %v9437_v1  ;;  %v4087_v13 = vadd.f32 %v4086_v7, %v4085_v18  ;;  %v16236_v28 = vmax.f32 %v16234_v57, %v16235_v37  ;;  %v1025_v35 = vmax.f32 %v16237_v20, %v1024_v40  ;;  %v1903_v34 = vadd.f32 %v9301_v46, %v1901_v48  ;;  %v5766_v50 = vld [vmem:[%s15014_s3 + $0x57] ss:$0 sm:$0xff]  ;;  %v315_v48 = vld [vmem:[%s6707_s25 + $0xa8] sm:$0xff] }
 0x1b2   : > { %v4945_v12 = vadd.f32 %v4944_v49, %v4943_v58  ;;  %v1026_v47 = vsel %vm834_vm0, %v309_v26, -inf  ;;  %v1028_v1 = vsel %vm834_vm0, %v311_v54, -inf  ;;  %v9460_v11 = vmul.f32 %v16215_v25, %v5764_v32  ;;  %v5824_v46 = vld [vmem:[%s15013_s2 + $0x37] ss:$0 sm:$0xff]  ;;  %v16238_v49 = vld [vmem:[#allocation182_spill] sm:$0xff]  ;;  %v16239_v18 = vld [vmem:[#allocation184_spill] sm:$0xff] }
 0x1b3   : > { %v1023_v42 = vmax.f32 %v16236_v28, %v1022_v62  ;;  %v4954_v7 = vsel %vm834_vm0, %v9154_v6, 0.0  ;;  %v9468_v40 = vmul.f32 %v16238_v49, %v5822_v16  ;;  %v4089_v26 = vadd.f32 %v4088_v15, %v4087_v13  ;;  %v5825_v6 = vld [vmem:[%s15013_s2 + $0x38] ss:$0 sm:$0xff] }
 0x1b4   : > { %v9472_v62 = vmul.f32 %v16218_v61, %v5765_v63  ;;  %v4947_v37 = vadd.f32 %v4946_v45, %v4945_v12  ;;  %v4956_v32 = vsel %vm834_vm0, %v9179_v33, 0.0  ;;  %v9480_v54 = vmul.f32 %v16239_v18, %v5823_v59  ;;  %v5767_v16 = vld [vmem:[%s15014_s3 + $0x58] ss:$0 sm:$0xff]  ;;  %v5826_v59 = vld [vmem:[%s15013_s2 + $0x39] ss:$0 sm:$0xff] }
 0x1b5   : > { %v4091_v58 = vadd.f32 %v4090_v22, %v4089_v26  ;;  %v4092_v63 = vsel %vm834_vm0, %v9239_v21, 0.0  ;;  %v1027_v15 = vmax.f32 %v1023_v42, %v1026_v47  ;;  %v1029_v12 = vmax.f32 %v1025_v35, %v1028_v1  ;;  %v5768_v21 = vld [vmem:[%s15014_s3 + $0x59] ss:$0 sm:$0xff] }
 0x1b6   : > { %v1905_v33 = vadd.f32 %v9321_v44, %v1903_v34  ;;  %v4949_v45 = vadd.f32 %v4948_v19, %v4947_v37  ;;  %v1030_v13 = vsel %vm834_vm0, %v313_v4, -inf  ;;  %v1032_v57 = vsel %vm834_vm0, %v315_v48, -inf  ;;  %v16240_v44 = vld [vmem:[#allocation185_spill] sm:$0xff]  ;;  %v16241_v28 = vld [vmem:[#allocation186_spill] sm:$0xff] }
 0x1b7   : > { %v9497_v42 = vmul.f32 %v16222_v53, %v5766_v50  ;;  %v4958_v47 = vsel %vm834_vm0, %v9197_v27, 0.0  ;;  %v9502_v19 = vmul.f32 %v16240_v44, %v5824_v46  ;;  %v4094_v1 = vsel %vm834_vm0, %v9257_v14, 0.0  ;;  %v317_v34 = vld [vmem:[%s6707_s25 + $0xb8] sm:$0xff]  ;;  %v319_v50 = vld [vmem:[%s6707_s25 + $0xc8] sm:$0xff] }
 0x1b8   : > { %v4951_v4 = vadd.f32 %v4950_v31, %v4949_v45  ;;  %v4960_v22 = vsel %vm834_vm0, %v9215_v9, 0.0  ;;  %v9509_v20 = vmul.f32 %v16241_v28, %v5825_v6  ;;  %v4093_v35 = vadd.f32 %v4092_v63, %v4091_v58  ;;  %v5827_v27 = vld [vmem:[%s15013_s2 + $0x3a] ss:$0 sm:$0xff]  ;;  %v16242_v6 = vld [vmem:[#allocation131_spill] sm:$0xff]  ;;  %v323_v28 = vld [vmem:[%s6707_s25 + $0xe8] sm:$0xff] }
 0x1b9   : > { %v9514_v26 = vmul.f32 %v16226_v41, %v5767_v16  ;;  %v4096_v14 = vsel %vm834_vm0, %v9275_v43, 0.0  ;;  %v321_v31 = vld [vmem:[%s6707_s25 + $0xd8] sm:$0xff]  ;;  %v1031_v46 = vmax.f32 %v1027_v15, %v1030_v13  ;;  %v1033_v9 = vmax.f32 %v1029_v12, %v1032_v57  ;;  %v16243_v57 = vld [vmem:[#allocation133_spill] sm:$0xff] }
 0x1ba   : > { %v1907_v48 = vadd.f32 %v9341_v52, %v1905_v33  ;;  %v4953_v37 = vadd.f32 %v4952_v24, %v4951_v4  ;;  %v9524_v58 = vmul.f32 %v16242_v6, %v5826_v59  ;;  %v4095_v63 = vadd.f32 %v4094_v1, %v4093_v35  ;;  %v5828_v43 = vld [vmem:[%s15013_s2 + $0x3b] ss:$0 sm:$0xff]  ;;  %v5829_v12 = vld [vmem:[%s15013_s2 + $0x3c] ss:$0 sm:$0xff] }
 0x1bb   : > { %v9527_v16 = vmul.f32 %v16228_v3, %v5768_v21  ;;  %v4962_v45 = vsel %vm834_vm0, %v9233_v29, 0.0  ;;  %v1034_v15 = vsel %vm834_vm0, %v317_v34, -inf  ;;  %v1036_v52 = vsel %vm834_vm0, %v319_v50, -inf  ;;  %v5830_v34 = vld [vmem:[%s15013_s2 + $0x3d] ss:$0 sm:$0xff] }
 0x1bc   : > { %v4955_v24 = vadd.f32 %v4954_v7, %v4953_v37  ;;  %v4097_v33 = vadd.f32 %v4096_v14, %v4095_v63  ;;  %v4098_v59 = vsel %vm834_vm0, %v9295_v30, 0.0  ;;  %v1038_v29 = vsel %vm834_vm0, %v321_v31, -inf  ;;  %v325_v50 = vld [vmem:[%s6707_s25 + $0xf8] sm:$0xff]  ;;  %v16246_v37 = vld [vmem:[#allocation137_spill] sm:$0xff] }
 0x1bd   : > { %v4964_v13 = vsel %vm834_vm0, %v9251_v2, 0.0  ;;  %v9546_v21 = vmul.f32 %v16243_v57, %v5827_v27  ;;  %v1035_v1 = vmax.f32 %v1031_v46, %v1034_v15  ;;  %v1037_v4 = vmax.f32 %v1033_v9, %v1036_v52  ;;  %v16244_v27 = vld [vmem:[#allocation135_spill] sm:$0xff]  ;;  %v16245_v9 = vld [vmem:[#allocation168_spill] sm:$0xff]  ;;  %v9774_v49 = vld [vmem:[%s6707_s25 + $0x278] sm:$0xff] }
 0x1be   : > { %v1909_v7 = vadd.f32 %v9361_v51, %v1907_v48  ;;  %v4957_v35 = vadd.f32 %v4956_v32, %v4955_v24  ;;  %v4100_v30 = vsel %vm834_vm0, %v9315_v8, 0.0  ;;  %v1040_v14 = vsel %vm834_vm0, %v323_v28, -inf  ;;  %v327_v28 = vld [vmem:[%s6707_s25 + $0x108] sm:$0xff]  ;;  %16283 = vst [vmem:[#allocation206_spill] sm:$0xff] %v9774_v49 }
 0x1bf   : > { %v4966_v2 = vsel %vm834_vm0, %v9269_v5, 0.0  ;;  %v9559_v31 = vmul.f32 %v16244_v27, %v5828_v43  ;;  %v4099_v46 = vadd.f32 %v4098_v59, %v4097_v33  ;;  %v1039_v51 = vmax.f32 %v1035_v1, %v1038_v29  ;;  %v16248_v33 = vld [vmem:[#allocation173_spill] sm:$0xff]  ;;  %v16249_v59 = vld [vmem:[#allocation138_spill] sm:$0xff] }
 0x1c0   : > { %v4959_v32 = vadd.f32 %v4958_v47, %v4957_v35  ;;  %v4968_v48 = vsel %vm834_vm0, %v16245_v9, 0.0  ;;  %v9564_v63 = vmul.f32 %v16246_v37, %v5829_v12  ;;  %v4102_v8 = vsel %vm834_vm0, %v9335_v23, 0.0  ;;  %v5831_v23 = vld [vmem:[%s15013_s2 + $0x3e] ss:$0 sm:$0xff] }
 0x1c1   : > { %v4101_v15 = vadd.f32 %v4100_v30, %v4099_v46  ;;  %v4104_v5 = vsel %vm834_vm0, %v9355_v55, 0.0  ;;  %v1041_v43 = vmax.f32 %v1037_v4, %v1040_v14  ;;  %v1042_v52 = vsel %vm834_vm0, %v325_v50, -inf  ;;  %v9584_v1 = vld [vmem:[%s6707_s25 + $0x118] sm:$0xff]  ;;  %v9587_v55 = vld [vmem:[%s6707_s25 + $0x128] sm:$0xff] }
 0x1c2   : > { %v9573_v24 = vadd.f32 %v9383_v39, %v1909_v7  ;;  %v4961_v47 = vadd.f32 %v4960_v22, %v4959_v32  ;;  %v4970_v12 = vsel %vm834_vm0, %v16248_v33, 0.0  ;;  %v9581_v29 = vmul.f32 %v16249_v59, %v5830_v34  ;;  %16250 = vst [vmem:[#allocation71_spill] sm:$0xff] %v9584_v1  ;;  %v16252_v30 = vld [vmem:[#allocation124_spill] sm:$0xff]  ;;  %v5832_v34 = vld [vmem:[%s15013_s2 + $0x3f] ss:$0 sm:$0xff] }
 0x1c3   : > { %16251 = vst [vmem:[#allocation72_spill] sm:$0xff] %v9587_v55  ;;  %v4103_v4 = vadd.f32 %v4102_v8, %v4101_v15  ;;  %v4106_v39 = vsel %vm834_vm0, %v9375_v17, 0.0  ;;  %v1043_v22 = vmax.f32 %v1039_v51, %v1042_v52  ;;  %v1044_v7 = vsel %vm834_vm0, %v327_v28, -inf  ;;  %v9602_v51 = vld [vmem:[%s6707_s25 + $0x138] sm:$0xff] }
 0x1c4   : > { %16247 = vst [vmem:[#allocation192_spill] sm:$0xff] %v9573_v24  ;;  %v4963_v35 = vadd.f32 %v4962_v45, %v4961_v47  ;;  %v4972_v50 = vsel %vm834_vm0, %v16252_v30, 0.0  ;;  %v4108_v14 = vsel %vm834_vm0, %v9402_v10, 0.0  ;;  %v4110_v46 = vsel %vm834_vm0, %v9410_v60, 0.0  ;;  %v5833_v10 = vld [vmem:[%s15013_s2 + $0x40] ss:$0 sm:$0xff] }
 0x1c5   : > { %v4105_v17 = vadd.f32 %v4104_v5, %v4103_v4  ;;  %16253 = vst [vmem:[#allocation73_spill] sm:$0xff] %v9602_v51  ;;  %v1045_v32 = vmax.f32 %v1041_v43, %v1044_v7  ;;  %v1046_v45 = vsel %vm834_vm0, %v9584_v1, -inf  ;;  %v1048_v9 = vsel %vm834_vm0, %v9587_v55, -inf  ;;  %v16254_v60 = vld [vmem:[#allocation140_spill] sm:$0xff]  ;;  %v9621_v43 = vld [vmem:[%s6707_s25 + $0x158] sm:$0xff] }
 0x1c6   : > { %6039 = vrcp.f32 %v9573_v24  ;;  %v4965_v8 = vadd.f32 %v4964_v13, %v4963_v35  ;;  %v9613_v28 = vmul.f32 %v16254_v60, %v5831_v23  ;;  %v4112_v15 = vsel %vm834_vm0, %v9430_v56, 0.0  ;;  %v9618_v5 = vld [vmem:[%s6707_s25 + $0x148] sm:$0xff]  ;;  %16256 = vst [vmem:[#allocation76_spill] sm:$0xff] %v9621_v43  ;;  %v16257_v52 = vld [vmem:[#allocation118_spill] sm:$0xff] }
 0x1c7   : > { %16255 = vst [vmem:[#allocation75_spill] sm:$0xff] %v9618_v5  ;;  %v4974_v47 = vsel %vm834_vm0, %v16257_v52, 0.0  ;;  %v4107_v33 = vadd.f32 %v4106_v39, %v4105_v17  ;;  %v1047_v4 = vmax.f32 %v1043_v22, %v1046_v45  ;;  %v1049_v13 = vmax.f32 %v1045_v32, %v1048_v9  ;;  %v16258_v35 = vld [vmem:[#allocation142_spill] sm:$0xff]  ;;  %v9631_v56 = vld [vmem:[%s6707_s25 + $0x168] sm:$0xff] }
 0x1c8   : > { %v4967_v7 = vadd.f32 %v4966_v2, %v4965_v8  ;;  %v9626_v30 = vmul.f32 %v16258_v35, %v5832_v34  ;;  %v4114_v23 = vsel %vm834_vm0, %v9468_v40, 0.0  ;;  %16259 = vst [vmem:[#allocation168_spill] sm:$0xff] %v9631_v56  ;;  %v9634_v60 = vld [vmem:[%s6707_s25 + $0x178] sm:$0xff]  ;;  %v1050_v59 = vsel %vm834_vm0, %v9602_v51, -inf  ;;  %v5834_v40 = vld [vmem:[%s15013_s2 + $0x41] ss:$0 sm:$0xff] }
 0x1c9   : > { %16260 = vst [vmem:[#allocation173_spill] sm:$0xff] %v9634_v60  ;;  %v4109_v52 = vadd.f32 %v4108_v14, %v4107_v33  ;;  %v1051_v39 = vmax.f32 %v1047_v4, %v1050_v59  ;;  %v1052_v22 = vsel %vm834_vm0, %v9618_v5, -inf  ;;  %v1054_v2 = vsel %vm834_vm0, %v9621_v43, -inf  ;;  %v16261_v32 = vld [vmem:[#allocation144_spill] sm:$0xff]  ;;  %v9654_v59 = vld [vmem:[%s6707_s25 + $0x198] sm:$0xff] }
 0x1ca   : > { %v4969_v34 = vadd.f32 %v4968_v48, %v4967_v7  ;;  %v4976_v17 = vsel %vm834_vm0, %v9367_v38, 0.0  ;;  %v9648_v45 = vmul.f32 %v16261_v32, %v5833_v10  ;;  %v9651_v9 = vld [vmem:[%s6707_s25 + $0x188] sm:$0xff]  ;;  %16263 = vst [vmem:[#allocation118_spill] sm:$0xff] %v9654_v59  ;;  %v1053_v14 = vmax.f32 %v1049_v13, %v1052_v22  ;;  %v5835_v8 = vld [vmem:[%s15013_s2 + $0x42] ss:$0 sm:$0xff]  ;;  %v16264_v32 = vld [vmem:[#allocation126_spill] sm:$0xff] }
 0x1cb   : > { %16262 = vst [vmem:[#allocation124_spill] sm:$0xff] %v9651_v9  ;;  %v4111_v48 = vadd.f32 %v4110_v46, %v4109_v52  ;;  %v1055_v33 = vmax.f32 %v1051_v39, %v1054_v2  ;;  %v1056_v38 = vsel %vm834_vm0, %v9631_v56, -inf  ;;  %v1058_v10 = vsel %vm834_vm0, %v9634_v60, -inf  ;;  %v5853_v60 = vld [vmem:[%s15013_s2 + $0x54] ss:$0 sm:$0xff]  ;;  %v10106_v56 = vld [vmem:[%s6707_s25 + $0x508] sm:$0xff] }
 0x1cc   : > { %v9663_v4 = vpop.eup %6039  ;;  %v4971_v7 = vadd.f32 %v4970_v12, %v4969_v34  ;;  %v4978_v13 = vsel %vm834_vm0, %v16264_v32, 0.0  ;;  %v4116_v22 = vsel %vm834_vm0, %v9480_v54, 0.0  ;;  %v1057_v35 = vmax.f32 %v1053_v14, %v1056_v38  ;;  %v16265_v34 = vld [vmem:[#allocation146_spill] sm:$0xff]  ;;  %v9680_v54 = vld [vmem:[%s6707_s25 + $0x1a8] sm:$0xff] }
 0x1cd   : > { %v4113_v46 = vadd.f32 %v4112_v15, %v4111_v48  ;;  %v1059_v52 = vmax.f32 %v1055_v33, %v1058_v10  ;;  %v1060_v39 = vsel %vm834_vm0, %v9651_v9, -inf  ;;  %v1062_v2 = vsel %vm834_vm0, %v9654_v59, -inf  ;;  %16266 = vst [vmem:[#allocation126_spill] sm:$0xff] %v9680_v54  ;;  %v9683_v15 = vld [vmem:[%s6707_s25 + $0x1b8] sm:$0xff]  ;;  %v16268_v48 = vld [vmem:[#allocation148_spill] sm:$0xff] }
 0x1ce   : > { %v2102_v37 = vand.u32 2147483648, %v9573_v24  ;;  %v4973_v27 = vadd.f32 %v4972_v50, %v4971_v7  ;;  %v4980_v12 = vsel %vm834_vm0, %v9407_v36, 0.0  ;;  %v9677_v32 = vmul.f32 %v16265_v34, %v5834_v40  ;;  %16267 = vst [vmem:[#allocation195_spill] sm:$0xff] %v9683_v15  ;;  %v10091_v9 = vld [vmem:[%s6707_s25 + $0x4e8] sm:$0xff]  ;;  %v10109_v43 = vld [vmem:[%s6707_s25 + $0x518] sm:$0xff] }
 0x1cf   : > { %v2092_v14 = vmul.f32 %v9663_v4, %v9573_v24  ;;  %v9688_v33 = vmul.f32 %v16268_v48, %v5835_v8  ;;  %v4115_v38 = vadd.f32 %v4114_v23, %v4113_v46  ;;  %v4118_v50 = vsel %vm834_vm0, %v9502_v19, 0.0  ;;  %v9698_v8 = vld [vmem:[%s6707_s25 + $0x1c8] sm:$0xff]  ;;  %v9712_v46 = vld [vmem:[%s6707_s25 + $0x1d8] sm:$0xff] }
 0x1d0   : > { %v4975_v36 = vadd.f32 %v4974_v47, %v4973_v27  ;;  %v4982_v40 = vsel %vm834_vm0, %v9422_v0, 0.0  ;;  %v1061_v10 = vmax.f32 %v1057_v35, %v1060_v39  ;;  %v1063_v7 = vmax.f32 %v1059_v52, %v1062_v2  ;;  %16269 = vst [vmem:[#allocation196_spill] sm:$0xff] %v9698_v8  ;;  %v16270_v47 = vld [vmem:[#allocation189_spill] sm:$0xff]  ;;  %v9715_v52 = vld [vmem:[%s6707_s25 + $0x1e8] sm:$0xff] }
 0x1d1   : > { %v2100_v34 = vand.u32 2147483647, %v9573_v24  ;;  %v4120_v57 = vsel %vm834_vm0, %v9509_v20, 0.0  ;;  %v1064_v23 = vsel %vm834_vm0, %v9680_v54, -inf  ;;  %v1066_v19 = vsel %vm834_vm0, %v9683_v15, -inf  ;;  %16271 = vst [vmem:[#allocation189_spill] sm:$0xff] %v9712_v46 }
 0x1d2   : > { %vm2096_vm1 = vweird.f32 %v9573_v24  ;;  %v9705_v0 = vor.u32 1.1754944e-38, %v2102_v37  ;;  %v4977_v27 = vadd.f32 %v4976_v17, %v4975_v36  ;;  %v4984_v35 = vsel %vm834_vm0, %v16270_v47, 0.0  ;;  %16272 = vst [vmem:[#allocation197_spill] sm:$0xff] %v9715_v52  ;;  %v9722_v17 = vld [vmem:[%s6707_s25 + $0x1f8] sm:$0xff]  ;;  %v9725_v47 = vld [vmem:[%s6707_s25 + $0x208] sm:$0xff] }
 0x1d3   : > { %v4122_v20 = vsel %vm834_vm0, %v9524_v58, 0.0  ;;  %v2093_v39 = vsub.f32 1.0, %v2092_v14  ;;  %v4986_v2 = vsel %vm834_vm0, %v9460_v11, 0.0  ;;  %v4117_v48 = vadd.f32 %v4116_v22, %v4115_v38  ;;  %16273 = vst [vmem:[#allocation198_spill] sm:$0xff] %v9722_v17  ;;  %v9728_v58 = vld [vmem:[%s6707_s25 + $0x218] sm:$0xff]  ;;  %v9739_v38 = vld [vmem:[%s6707_s25 + $0x228] sm:$0xff] }
 0x1d4   : > { %v4124_v37 = vsel %vm834_vm0, %v9546_v21, 0.0  ;;  %v4979_v36 = vadd.f32 %v4978_v13, %v4977_v27  ;;  %16274 = vst [vmem:[#allocation199_spill] sm:$0xff] %v9725_v47  ;;  %v1065_v6 = vmax.f32 %v1061_v10, %v1064_v23  ;;  %v1067_v44 = vmax.f32 %v1063_v7, %v1066_v19  ;;  %v9742_v10 = vld [vmem:[%s6707_s25 + $0x238] sm:$0xff]  ;;  %v10076_v54 = vld [vmem:[%s6707_s25 + $0x4c8] sm:$0xff] }
 0x1d5   : > { %16275 = vst [vmem:[#allocation200_spill] sm:$0xff] %v9728_v58  ;;  %v1068_v14 = vsel %vm834_vm0, %v9698_v8, -inf  ;;  %v4988_v11 = vsel %vm834_vm0, %v9472_v62, 0.0  ;;  %v4119_v18 = vadd.f32 %v4118_v50, %v4117_v48  ;;  %v1070_v21 = vsel %vm834_vm0, %v9712_v46, -inf  ;;  %v10061_v8 = vld [vmem:[%s6707_s25 + $0x4a8] sm:$0xff] }
 0x1d6   : > { %v1072_v13 = vsel %vm834_vm0, %v9715_v52, -inf  ;;  %v4981_v22 = vadd.f32 %v4980_v12, %v4979_v36  ;;  %16276 = vst [vmem:[#allocation201_spill] sm:$0xff] %v9739_v38  ;;  %v1069_v7 = vmax.f32 %v1065_v6, %v1068_v14  ;;  %v1071_v23 = vmax.f32 %v1067_v44, %v1070_v21  ;;  %v9758_v36 = vld [vmem:[%s6707_s25 + $0x248] sm:$0xff] }
 0x1d7   : > { %16277 = vst [vmem:[#allocation202_spill] sm:$0xff] %v9742_v10  ;;  %v1074_v19 = vsel %vm834_vm0, %v9722_v17, -inf  ;;  %v4121_v62 = vadd.f32 %v4120_v57, %v4119_v18  ;;  %v4126_v48 = vsel %vm834_vm0, %v9559_v31, 0.0  ;;  %v1076_v50 = vsel %vm834_vm0, %v9725_v47, -inf  ;;  %v9761_v18 = vld [vmem:[%s6707_s25 + $0x258] sm:$0xff]  ;;  %v9858_v6 = vld [vmem:[%s6707_s25 + $0x308] sm:$0xff] }
 0x1d8   : > { %v1078_v12 = vsel %vm834_vm0, %v9728_v58, -inf  ;;  %v2094_v27 = vmul.f32 %v9663_v4, %v2093_v39  ;;  %vm9753_vm2 = vcmp.eq.f32.partialorder %v2100_v34, 8.507059e+37  ;;  %v4983_v44 = vadd.f32 %v4982_v40, %v4981_v22  ;;  %16280 = vst [vmem:[#allocation203_spill] sm:$0xff] %v9758_v36  ;;  %v9771_v22 = vld [vmem:[%s6707_s25 + $0x268] sm:$0xff] }
 0x1d9   : > { %16281 = vst [vmem:[#allocation204_spill] sm:$0xff] %v9761_v18  ;;  %v1073_v57 = vmax.f32 %v1069_v7, %v1072_v13  ;;  %v1075_v31 = vmax.f32 %v1071_v23, %v1074_v19  ;;  %vm2097_vm3 = vweird.f32 %v9663_v4  ;;  %v4123_v14 = vadd.f32 %v4122_v20, %v4121_v62  ;;  %v10031_v47 = vld [vmem:[%s6707_s25 + $0x468] sm:$0xff] }
 0x1da   : > { %v1080_v21 = vsel %vm834_vm0, %v9739_v38, -inf  ;;  %v1082_v34 = vsel %vm834_vm0, %v9742_v10, -inf  ;;  %v4985_v39 = vadd.f32 %v4984_v35, %v4983_v44  ;;  %v4990_v40 = vsel %vm834_vm0, %v9497_v42, 0.0  ;;  %16282 = vst [vmem:[#allocation205_spill] sm:$0xff] %v9771_v22  ;;  %v9784_v44 = vld [vmem:[%s6707_s25 + $0x288] sm:$0xff]  ;;  %v9787_v10 = vld [vmem:[%s6707_s25 + $0x298] sm:$0xff]  ;;  %vm9793_vm4 = vmor %vm2096_vm1, %vm2097_vm3 }
 0x1db   : > { %v1077_v13 = vmax.f32 %v1073_v57, %v1076_v50  ;;  %v1079_v7 = vmax.f32 %v1075_v31, %v1078_v12  ;;  %v4125_v23 = vadd.f32 %v4124_v37, %v4123_v14  ;;  %v4128_v20 = vsel %vm834_vm0, %v9564_v63, 0.0  ;;  %16284 = vst [vmem:[#allocation207_spill] sm:$0xff] %v9784_v44  ;;  %v10016_v38 = vld [vmem:[%s6707_s25 + $0x448] sm:$0xff] }
 0x1dc   : > { %v1084_v19 = vsel %vm834_vm0, %v9758_v36, -inf  ;;  %v1086_v35 = vsel %vm834_vm0, %v9761_v18, -inf  ;;  %v2095_v42 = vadd.f32 %v9663_v4, %v2094_v27  ;;  %v4987_v62 = vadd.f32 %v4986_v2, %v4985_v39  ;;  %16285 = vst [vmem:[#allocation208_spill] sm:$0xff] %v9787_v10  ;;  %v10001_v18 = vld [vmem:[%s6707_s25 + $0x428] sm:$0xff] }
 0x1dd   : > { %v1081_v50 = vmax.f32 %v1077_v13, %v1080_v21  ;;  %v1083_v37 = vmax.f32 %v1079_v7, %v1082_v34  ;;  %v4992_v12 = vsel %vm834_vm0, %v9514_v26, 0.0  ;;  %v4127_v27 = vadd.f32 %v4126_v48, %v4125_v23  ;;  %v9806_v21 = vld [vmem:[%s6707_s25 + $0x2a8] sm:$0xff]  ;;  %v9809_v34 = vld [vmem:[%s6707_s25 + $0x2b8] sm:$0xff]  ;;  %16295 = vst [vmem:[#allocation216_spill] sm:$0xff] %v9858_v6 }
 0x1de   : > { %v1088_v2 = vsel %vm834_vm0, %v9771_v22, -inf  ;;  %v1090_v57 = vsel %vm834_vm0, %v9774_v49, -inf  ;;  %v4989_v31 = vadd.f32 %v4988_v11, %v4987_v62  ;;  %v4130_v14 = vsel %vm834_vm0, %v9581_v29, 0.0  ;;  %16288 = vst [vmem:[#allocation209_spill] sm:$0xff] %v9806_v21  ;;  %v9821_v62 = vld [vmem:[%s6707_s25 + $0x2c8] sm:$0xff] }
 0x1df   : > { %16289 = vst [vmem:[#allocation210_spill] sm:$0xff] %v9809_v34  ;;  %v1085_v39 = vmax.f32 %v1081_v50, %v1084_v19  ;;  %v1087_v13 = vmax.f32 %v1083_v37, %v1086_v35  ;;  %v4129_v26 = vadd.f32 %v4128_v20, %v4127_v27  ;;  %v4132_v48 = vsel %vm834_vm0, %v9613_v28, 0.0  ;;  %v9824_v19 = vld [vmem:[%s6707_s25 + $0x2d8] sm:$0xff]  ;;  %v5836_v50 = vld [vmem:[%s15013_s2 + $0x43] ss:$0 sm:$0xff]  ;;  %v9838_v27 = vld [vmem:[%s6707_s25 + $0x2e8] sm:$0xff] }
 0x1e0   : > { %v1092_v7 = vsel %vm834_vm0, %v9784_v44, -inf  ;;  %v1094_v11 = vsel %vm834_vm0, %v9787_v10, -inf  ;;  %v2099_v29 = vsel %vm9793_vm4, %v9663_v4, %v2095_v42  ;;  %v4991_v23 = vadd.f32 %v4990_v40, %v4989_v31  ;;  %16290 = vst [vmem:[#allocation211_spill] sm:$0xff] %v9821_v62  ;;  %v9971_v10 = vld [vmem:[%s6707_s25 + $0x3e8] sm:$0xff] }
 0x1e1   : > { %16291 = vst [vmem:[#allocation212_spill] sm:$0xff] %v9824_v19  ;;  %v1089_v20 = vmax.f32 %v1085_v39, %v1088_v2  ;;  %v1091_v35 = vmax.f32 %v1087_v13, %v1090_v57  ;;  %v4994_v28 = vsel %vm834_vm0, %v9527_v16, 0.0  ;;  %v4131_v37 = vadd.f32 %v4130_v14, %v4129_v26  ;;  %v9841_v16 = vld [vmem:[%s6707_s25 + $0x2f8] sm:$0xff]  ;;  %v5837_v13 = vld [vmem:[%s15013_s2 + $0x44] ss:$0 sm:$0xff]  ;;  %v9986_v49 = vld [vmem:[%s6707_s25 + $0x408] sm:$0xff] }
 0x1e2   : > { %v1096_v63 = vsel %vm834_vm0, %v9806_v21, -inf  ;;  %v1098_v4 = vsel %vm834_vm0, %v9809_v34, -inf  ;;  %v4993_v40 = vadd.f32 %v4992_v12, %v4991_v23  ;;  %v4134_v42 = vsel %vm834_vm0, %v9626_v30, 0.0  ;;  %16292 = vst [vmem:[#allocation213_spill] sm:$0xff] %v9838_v27  ;;  %v10046_v52 = vld [vmem:[%s6707_s25 + $0x488] sm:$0xff] }
 0x1e3   : > { %16293 = vst [vmem:[#allocation214_spill] sm:$0xff] %v9841_v16  ;;  %v1093_v2 = vmax.f32 %v1089_v20, %v1092_v7  ;;  %v1095_v57 = vmax.f32 %v1091_v35, %v1094_v11  ;;  %v9846_v31 = vsel %vm9753_vm2, %v9705_v0, %v2099_v29  ;;  %v4133_v14 = vadd.f32 %v4132_v48, %v4131_v37  ;;  %v9861_v0 = vld [vmem:[%s6707_s25 + $0x318] sm:$0xff] }
 0x1e4   : > { %16294 = vst [vmem:[#allocation215_spill] sm:$0xff] %v9846_v31  ;;  %v1100_v39 = vsel %vm834_vm0, %v9821_v62, -inf  ;;  %v1102_v12 = vsel %vm834_vm0, %v9824_v19, -inf  ;;  %v4995_v30 = vadd.f32 %v4994_v28, %v4993_v40  ;;  %v4136_v26 = vsel %vm834_vm0, %v9648_v45, 0.0  ;;  %v16297_v11 = vld [vmem:[#allocation150_spill] sm:$0xff]  ;;  %v9940_v19 = vld [vmem:[%s6707_s25 + $0x3a8] sm:$0xff] }
 0x1e5   : > { %16296 = vst [vmem:[#allocation217_spill] sm:$0xff] %v9861_v0  ;;  %v1097_v48 = vmax.f32 %v1093_v2, %v1096_v63  ;;  %v1099_v7 = vmax.f32 %v1095_v57, %v1098_v4  ;;  %v3963_v29 = vmul.f32 %v16297_v11, %v5836_v50  ;;  %v4135_v23 = vadd.f32 %v4134_v42, %v4133_v14  ;;  %v5838_v45 = vld [vmem:[%s15013_s2 + $0x45] ss:$0 sm:$0xff]  ;;  %v9877_v50 = vld [vmem:[%s6707_s25 + $0x328] sm:$0xff]  ;;  %v9880_v63 = vld [vmem:[%s6707_s25 + $0x338] sm:$0xff] }
 0x1e6   : > { %v1104_v20 = vsel %vm834_vm0, %v9838_v27, -inf  ;;  %v1106_v35 = vsel %vm834_vm0, %v9841_v16, -inf  ;;  %v9869_v28 = vmul.f32 %v4995_v30, %v9846_v31  ;;  %v4138_v37 = vsel %vm834_vm0, %v9677_v32, 0.0  ;;  %v5839_v32 = vld [vmem:[%s15013_s2 + $0x46] ss:$0 sm:$0xff]  ;;  %v16299_v14 = vld [vmem:[#allocation152_spill] sm:$0xff] }
 0x1e7   : > { %v1101_v4 = vmax.f32 %v1097_v48, %v1100_v39  ;;  %v1103_v40 = vmax.f32 %v1099_v7, %v1102_v12  ;;  %v4137_v42 = vadd.f32 %v4136_v26, %v4135_v23  ;;  %v1108_v2 = vsel %vm834_vm0, %v9858_v6, -inf  ;;  %v9895_v12 = vld [vmem:[%s6707_s25 + $0x348] sm:$0xff]  ;;  %v9898_v26 = vld [vmem:[%s6707_s25 + $0x358] sm:$0xff] }
 0x1e8   : > { %16298 = vst [vmem:[#allocation218_spill] sm:$0xff] %v9869_v28  ;;  %v1110_v57 = vsel %vm834_vm0, %v9861_v0, -inf  ;;  %v3965_v30 = vmul.f32 %v16299_v14, %v5837_v13  ;;  %v4140_v39 = vsel %vm834_vm0, %v9688_v33, 0.0  ;;  %v1112_v24 = vsel %vm834_vm0, %v9877_v50, -inf  ;;  %v5840_v13 = vld [vmem:[%s15013_s2 + $0x47] ss:$0 sm:$0xff] }
 0x1e9   : > { %5639 = vst.msk [vmem:[#allocation2 + $0x10] sm:$0xff] %vm834_vm0, %v9869_v28  ;;  %v1105_v48 = vmax.f32 %v1101_v4, %v1104_v20  ;;  %v1107_v7 = vmax.f32 %v1103_v40, %v1106_v35  ;;  %v4139_v23 = vadd.f32 %v4138_v37, %v4137_v42  ;;  %v1114_v11 = vsel %vm834_vm0, %v9880_v63, -inf  ;;  %v16300_v33 = vld [vmem:[#allocation154_spill] sm:$0xff]  ;;  %v9910_v0 = vld [vmem:[%s6707_s25 + $0x368] sm:$0xff] }
 0x1ea   : > { %v3967_v14 = vmul.f32 %v16300_v33, %v5838_v45  ;;  %v4142_v28 = vsel %vm834_vm0, %v3963_v29, 0.0  ;;  %v9913_v20 = vld [vmem:[%s6707_s25 + $0x378] sm:$0xff]  ;;  %v1116_v40 = vsel %vm834_vm0, %v9895_v12, -inf  ;;  %v1118_v42 = vsel %vm834_vm0, %v9898_v26, -inf  ;;  %v5841_v45 = vld [vmem:[%s15013_s2 + $0x48] ss:$0 sm:$0xff] }
 0x1eb   : > { %v1109_v35 = vmax.f32 %v1105_v48, %v1108_v2  ;;  %v1111_v37 = vmax.f32 %v1107_v7, %v1110_v57  ;;  %v4141_v4 = vadd.f32 %v4140_v39, %v4139_v23  ;;  %v16301_v29 = vld [vmem:[#allocation156_spill] sm:$0xff]  ;;  %v4144_v6 = vsel %vm834_vm0, %v3965_v30, 0.0  ;;  %v9928_v2 = vld [vmem:[%s6707_s25 + $0x398] sm:$0xff] }
 0x1ec   : > { %v3969_v33 = vmul.f32 %v16301_v29, %v5839_v32  ;;  %v9925_v16 = vld [vmem:[%s6707_s25 + $0x388] sm:$0xff]  ;;  %v1120_v7 = vsel %vm834_vm0, %v9910_v0, -inf  ;;  %v1122_v23 = vsel %vm834_vm0, %v9913_v20, -inf  ;;  %v16302_v32 = vld [vmem:[#allocation158_spill] sm:$0xff]  ;;  %v4146_v29 = vsel %vm834_vm0, %v3967_v14, 0.0 }
 0x1ed   : > { %v1113_v57 = vmax.f32 %v1109_v35, %v1112_v24  ;;  %v1115_v39 = vmax.f32 %v1111_v37, %v1114_v11  ;;  %v4143_v48 = vadd.f32 %v4142_v28, %v4141_v4  ;;  %v5842_v27 = vld [vmem:[%s15013_s2 + $0x49] ss:$0 sm:$0xff]  ;;  %v3971_v30 = vmul.f32 %v16302_v32, %v5840_v13  ;;  %v9943_v24 = vld [vmem:[%s6707_s25 + $0x3b8] sm:$0xff]  ;;  %v5843_v14 = vld [vmem:[%s15013_s2 + $0x4a] ss:$0 sm:$0xff] }
 0x1ee   : > { %v1124_v4 = vsel %vm834_vm0, %v9925_v16, -inf  ;;  %v1126_v62 = vsel %vm834_vm0, %v9928_v2, -inf  ;;  %v16303_v13 = vld [vmem:[#allocation160_spill] sm:$0xff]  ;;  %v1128_v34 = vsel %vm834_vm0, %v9940_v19, -inf }
 0x1ef   : > { %v1117_v11 = vmax.f32 %v1113_v57, %v1116_v40  ;;  %v1119_v28 = vmax.f32 %v1115_v39, %v1118_v42  ;;  %v4145_v37 = vadd.f32 %v4144_v6, %v4143_v48  ;;  %v3973_v40 = vmul.f32 %v16303_v13, %v5841_v45  ;;  %v9956_v6 = vld [vmem:[%s6707_s25 + $0x3c8] sm:$0xff]  ;;  %v9959_v57 = vld [vmem:[%s6707_s25 + $0x3d8] sm:$0xff] }
 0x1f0   : > { %v5314_v35 = vld [vmem:[#allocation2 + $0x10] sm:$0xff]  ;;  %v4148_v42 = vsel %vm834_vm0, %v3969_v33, 0.0  ;;  %v5844_v45 = vld [vmem:[%s15013_s2 + $0x4b] ss:$0 sm:$0xff]  ;;  %v16304_v33 = vld [vmem:[#allocation162_spill] sm:$0xff]  ;;  %v4150_v21 = vsel %vm834_vm0, %v3971_v30, 0.0 }
 0x1f1   : > { %5316 = vrot.lane.b32.xlu1 %v5314_v35, %s6648_s6  ;;  %v1121_v39 = vmax.f32 %v1117_v11, %v1120_v7  ;;  %v1123_v48 = vmax.f32 %v1119_v28, %v1122_v23  ;;  %v4147_v32 = vadd.f32 %v4146_v29, %v4145_v37  ;;  %v1130_v35 = vsel %vm834_vm0, %v9943_v24, -inf  ;;  %v9974_v7 = vld [vmem:[%s6707_s25 + $0x3f8] sm:$0xff]  ;;  %v16305_v30 = vld [vmem:[#allocation164_spill] sm:$0xff] }
 0x1f2   : > { %v3975_v13 = vmul.f32 %v16304_v33, %v5842_v27  ;;  %v1132_v28 = vsel %vm834_vm0, %v9956_v6, -inf  ;;  %v1134_v37 = vsel %vm834_vm0, %v9959_v57, -inf  ;;  %v5845_v27 = vld [vmem:[%s15013_s2 + $0x4c] ss:$0 sm:$0xff]  ;;  %v3977_v33 = vmul.f32 %v16305_v30, %v5843_v14  ;;  %v5846_v14 = vld [vmem:[%s15013_s2 + $0x4d] ss:$0 sm:$0xff] }
 0x1f3   : > { %v1125_v29 = vmax.f32 %v1121_v39, %v1124_v4  ;;  %v1127_v23 = vmax.f32 %v1123_v48, %v1126_v62  ;;  %v4149_v11 = vadd.f32 %v4148_v42, %v4147_v32  ;;  %v4152_v44 = vsel %vm834_vm0, %v3973_v40, 0.0  ;;  %v9989_v62 = vld [vmem:[%s6707_s25 + $0x418] sm:$0xff]  ;;  %v16306_v40 = vld [vmem:[#allocation187_spill] sm:$0xff] }
 0x1f4   : > { %v1136_v39 = vsel %vm834_vm0, %v9971_v10, -inf  ;;  %v1138_v48 = vsel %vm834_vm0, %v9974_v7, -inf  ;;  %v3979_v30 = vmul.f32 %v16306_v40, %v5844_v45  ;;  %v4154_v22 = vsel %vm834_vm0, %v3975_v13, 0.0  ;;  %v5847_v45 = vld [vmem:[%s15013_s2 + $0x4e] ss:$0 sm:$0xff]  ;;  %v16307_v13 = vld [vmem:[#allocation178_spill] sm:$0xff] }
 0x1f5   : > { %v1129_v32 = vmax.f32 %v1125_v29, %v1128_v34  ;;  %v1131_v4 = vmax.f32 %v1127_v23, %v1130_v35  ;;  %v4151_v42 = vadd.f32 %v4150_v21, %v4149_v11  ;;  %v10004_v34 = vld [vmem:[%s6707_s25 + $0x438] sm:$0xff]  ;;  %v1140_v23 = vsel %vm834_vm0, %v9986_v49, -inf }
 0x1f6   : > { %v1142_v11 = vsel %vm834_vm0, %v9989_v62, -inf  ;;  %v3981_v40 = vmul.f32 %v16307_v13, %v5845_v27  ;;  %v4156_v36 = vsel %vm834_vm0, %v3977_v33, 0.0  ;;  %v5848_v27 = vld [vmem:[%s15013_s2 + $0x4f] ss:$0 sm:$0xff]  ;;  %v16308_v33 = vld [vmem:[#allocation171_spill] sm:$0xff]  ;;  %v4158_v58 = vsel %vm834_vm0, %v3979_v30, 0.0 }
 0x1f7   : > { %v1133_v21 = vmax.f32 %v1129_v32, %v1132_v28  ;;  %v1135_v35 = vmax.f32 %v1131_v4, %v1134_v37  ;;  %v4153_v29 = vadd.f32 %v4152_v44, %v4151_v42  ;;  %v10019_v28 = vld [vmem:[%s6707_s25 + $0x458] sm:$0xff]  ;;  %v1144_v4 = vsel %vm834_vm0, %v10001_v18, -inf  ;;  %v16309_v30 = vld [vmem:[#allocation120_spill] sm:$0xff] }
 0x1f8   : > { %v1146_v42 = vsel %vm834_vm0, %v10004_v34, -inf  ;;  %v3983_v13 = vmul.f32 %v16308_v33, %v5846_v14  ;;  %v5849_v14 = vld [vmem:[%s15013_s2 + $0x50] ss:$0 sm:$0xff]  ;;  %v3985_v33 = vmul.f32 %v16309_v30, %v5847_v45  ;;  %v4160_v17 = vsel %vm834_vm0, %v3981_v40, 0.0  ;;  %v5850_v45 = vld [vmem:[%s15013_s2 + $0x51] ss:$0 sm:$0xff] }
 0x1f9   : > { %v1137_v44 = vmax.f32 %v1133_v21, %v1136_v39  ;;  %v1139_v37 = vmax.f32 %v1135_v35, %v1138_v48  ;;  %v4155_v32 = vadd.f32 %v4154_v22, %v4153_v29  ;;  %v10034_v39 = vld [vmem:[%s6707_s25 + $0x478] sm:$0xff]  ;;  %v1148_v35 = vsel %vm834_vm0, %v10016_v38, -inf  ;;  %v16310_v40 = vld [vmem:[#allocation175_spill] sm:$0xff] }
 0x1fa   : > { %v1150_v29 = vsel %vm834_vm0, %v10019_v28, -inf  ;;  %v3987_v30 = vmul.f32 %v16310_v40, %v5848_v27  ;;  %v4162_v46 = vsel %vm834_vm0, %v3983_v13, 0.0  ;;  %v5851_v27 = vld [vmem:[%s15013_s2 + $0x52] ss:$0 sm:$0xff]  ;;  %v4164_v15 = vsel %vm834_vm0, %v3985_v33, 0.0  ;;  %v16312_v33 = vld [vmem:[#allocation183_spill] sm:$0xff] }
 0x1fb   : > { %v1141_v22 = vmax.f32 %v1137_v44, %v1140_v23  ;;  %v1143_v48 = vmax.f32 %v1139_v37, %v1142_v11  ;;  %v4157_v21 = vadd.f32 %v4156_v36, %v4155_v32  ;;  %v10049_v23 = vld [vmem:[%s6707_s25 + $0x498] sm:$0xff]  ;;  %v1152_v37 = vsel %vm834_vm0, %v10031_v47, -inf  ;;  %v16311_v13 = vld [vmem:[#allocation177_spill] sm:$0xff] }
 0x1fc   : > { %v1154_v32 = vsel %vm834_vm0, %v10034_v39, -inf  ;;  %v3989_v40 = vmul.f32 %v16311_v13, %v5849_v14  ;;  %v5852_v14 = vld [vmem:[%s15013_s2 + $0x53] ss:$0 sm:$0xff]  ;;  %v3991_v13 = vmul.f32 %v16312_v33, %v5850_v45  ;;  %v4166_v59 = vsel %vm834_vm0, %v3987_v30, 0.0 }
 0x1fd   : > { %v1145_v36 = vmax.f32 %v1141_v22, %v1144_v4  ;;  %v1147_v11 = vmax.f32 %v1143_v48, %v1146_v42  ;;  %v4159_v44 = vadd.f32 %v4158_v58, %v4157_v21  ;;  %v10064_v4 = vld [vmem:[%s6707_s25 + $0x4b8] sm:$0xff]  ;;  %v1156_v48 = vsel %vm834_vm0, %v10046_v52, -inf  ;;  %v16313_v45 = vld [vmem:[#allocation129_spill] sm:$0xff] }
 0x1fe   : > { %v1158_v21 = vsel %vm834_vm0, %v10049_v23, -inf  ;;  %v3993_v33 = vmul.f32 %v16313_v45, %v5851_v27  ;;  %v4168_v30 = vsel %vm834_vm0, %v3989_v40, 0.0  ;;  %v5854_v27 = vld [vmem:[%s15013_s2 + $0x55] ss:$0 sm:$0xff]  ;;  %v16314_v40 = vld [vmem:[#allocation122_spill] sm:$0xff]  ;;  %v4170_v45 = vsel %vm834_vm0, %v3991_v13, 0.0 }
 0x1ff   : > { %v1149_v58 = vmax.f32 %v1145_v36, %v1148_v35  ;;  %v1151_v42 = vmax.f32 %v1147_v11, %v1150_v29  ;;  %v4161_v22 = vadd.f32 %v4160_v17, %v4159_v44  ;;  %v10079_v35 = vld [vmem:[%s6707_s25 + $0x4d8] sm:$0xff]  ;;  %v1160_v11 = vsel %vm834_vm0, %v10061_v8, -inf }
 0x200   : > { %v1162_v44 = vsel %vm834_vm0, %v10064_v4, -inf  ;;  %v4172_v55 = vsel %vm834_vm0, %v3993_v33, 0.0  ;;  %v10133_v13 = vld [vmem:[%s6707_s25 + $0x538] sm:$0xff] }
 0x201   : > { %v1153_v17 = vmax.f32 %v1149_v58, %v1152_v37  ;;  %v1155_v29 = vmax.f32 %v1151_v42, %v1154_v32  ;;  %v4163_v36 = vadd.f32 %v4162_v46, %v4161_v22  ;;  %v10094_v37 = vld [vmem:[%s6707_s25 + $0x4f8] sm:$0xff]  ;;  %v1164_v42 = vsel %vm834_vm0, %v10076_v54, -inf }
 0x202   : > { %v1166_v22 = vsel %vm834_vm0, %v10079_v35, -inf  ;;  %v1178_v1 = vsel %vm834_vm0, %v10133_v13, -inf }
 0x203   : > { %v1157_v46 = vmax.f32 %v1153_v17, %v1156_v48  ;;  %v1159_v32 = vmax.f32 %v1155_v29, %v1158_v21  ;;  %v4165_v58 = vadd.f32 %v4164_v15, %v4163_v36  ;;  %v1168_v17 = vsel %vm834_vm0, %v10091_v9, -inf }
 0x204   : > { %v1170_v29 = vsel %vm834_vm0, %v10094_v37, -inf  ;;  %v3995_v36 = vmul.f32 %v16314_v40, %v5852_v14  ;;  %v10130_v14 = vld [vmem:[%s6707_s25 + $0x528] sm:$0xff] }
 0x205   : > { %v1161_v48 = vmax.f32 %v1157_v46, %v1160_v11  ;;  %v1163_v15 = vmax.f32 %v1159_v32, %v1162_v44  ;;  %v4167_v21 = vadd.f32 %v4166_v59, %v4165_v58  ;;  %v1172_v59 = vsel %vm834_vm0, %v10106_v56, -inf  ;;  %v5855_v32 = vld [vmem:[%s15013_s2 + $0x56] ss:$0 sm:$0xff]  ;;  %v16315_v58 = vld [vmem:[#allocation188_spill] sm:$0xff] }
 0x206   : > { %v1174_v44 = vsel %vm834_vm0, %v10109_v43, -inf  ;;  %v3997_v51 = vmul.f32 %v16315_v58, %v5853_v60  ;;  %v1176_v40 = vsel %vm834_vm0, %v10130_v14, -inf }
 0x207   : > { %v1165_v5 = vmax.f32 %v1161_v48, %v1164_v42  ;;  %v1167_v11 = vmax.f32 %v1163_v15, %v1166_v22  ;;  %v4169_v46 = vadd.f32 %v4168_v30, %v4167_v21  ;;  %v5856_v48 = vld [vmem:[%s15013_s2 + $0x57] ss:$0 sm:$0xff]  ;;  %v3999_v15 = vmul.f32 %v16215_v25, %v5854_v27  ;;  %v10153_v27 = vld [vmem:[%s6707_s25 + $0x558] sm:$0xff] }
 0x208   : > { %v4174_v21 = vsel %vm834_vm0, %v3995_v36, 0.0  ;;  %v5858_v36 = vld [vmem:[%s15013_s2 + $0x59] ss:$0 sm:$0xff] }
 0x209   : > { %v1169_v42 = vmax.f32 %v1165_v5, %v1168_v17  ;;  %v1171_v22 = vmax.f32 %v1167_v11, %v1170_v29  ;;  %v4171_v30 = vadd.f32 %v4170_v45, %v4169_v46  ;;  %v5857_v5 = vld [vmem:[%s15013_s2 + $0x58] ss:$0 sm:$0xff]  ;;  %v4001_v45 = vmul.f32 %v16218_v61, %v5855_v32  ;;  %v10150_v29 = vld [vmem:[%s6707_s25 + $0x548] sm:$0xff] }
 0x20a   : > { %v4176_v17 = vsel %vm834_vm0, %v3997_v51, 0.0  ;;  %v4003_v11 = vmul.f32 %v16222_v53, %v5856_v48  ;;  %v4178_v46 = vsel %vm834_vm0, %v3999_v15, 0.0  ;;  %v1180_v51 = vsel %vm834_vm0, %v10150_v29, -inf  ;;  %v10170_v48 = vld [vmem:[%s6707_s25 + $0x578] sm:$0xff] }
 0x20b   : > { %v1173_v60 = vmax.f32 %v1169_v42, %v1172_v59  ;;  %v1175_v58 = vmax.f32 %v1171_v22, %v1174_v44  ;;  %v4173_v33 = vadd.f32 %v4172_v55, %v4171_v30  ;;  %v1182_v32 = vsel %vm834_vm0, %v10153_v27, -inf }
 0x20c   : > { %v4005_v22 = vmul.f32 %v16226_v41, %v5857_v5  ;;  %v4180_v30 = vsel %vm834_vm0, %v4001_v45, 0.0  ;;  %v1186_v5 = vsel %vm834_vm0, %v10170_v48, -inf  ;;  %v473_v41 = vld [vmem:[%s6707_s25 + $0x598] sm:$0xff] }
 0x20d   : > { %v4175_v55 = vadd.f32 %v4174_v21, %v4173_v33  ;;  %v1177_v59 = vmax.f32 %v1173_v60, %v1176_v40  ;;  %v1179_v44 = vmax.f32 %v1175_v58, %v1178_v1  ;;  %v10167_v21 = vld [vmem:[%s6707_s25 + $0x568] sm:$0xff]  ;;  %v4007_v1 = vmul.f32 %v16228_v3, %v5858_v36  ;;  %v6248_v3 = vld [vmem:[%s6707_s25 + $0x98] sm:$0xff] }
 0x20e   : > { %v4182_v40 = vsel %vm834_vm0, %v4003_v11, 0.0  ;;  %v4184_v45 = vsel %vm834_vm0, %v4005_v22, 0.0 }
 0x20f   : > { %v4177_v42 = vadd.f32 %v4176_v17, %v4175_v55  ;;  %v1181_v58 = vmax.f32 %v1177_v59, %v1180_v51  ;;  %v1183_v60 = vmax.f32 %v1179_v44, %v1182_v32  ;;  %v1184_v17 = vsel %vm834_vm0, %v10167_v21, -inf  ;;  %v471_v55 = vld [vmem:[%s6707_s25 + $0x588] sm:$0xff] }
 0x210   : > { %v4186_v36 = vsel %vm834_vm0, %v4007_v1, 0.0  ;;  %v1190_v51 = vsel %vm834_vm0, %v473_v41, -inf  ;;  %v6239_v1 = vld [vmem:[%s6707_s25 + $0x8] sm:$0xff] }
 0x211   : > { %v4179_v15 = vadd.f32 %v4178_v46, %v4177_v42  ;;  %v1185_v11 = vmax.f32 %v1181_v58, %v1184_v17  ;;  %v1187_v59 = vmax.f32 %v1183_v60, %v1186_v5  ;;  %v1188_v42 = vsel %vm834_vm0, %v471_v55, -inf  ;;  %v6240_v60 = vld [vmem:[%s6707_s25 + $0x18] sm:$0xff]  ;;  %v6241_v17 = vld [vmem:[%s6707_s25 + $0x28] sm:$0xff] }
 0x213   : > { %v4181_v33 = vadd.f32 %v4180_v30, %v4179_v15  ;;  %v1189_v30 = vmax.f32 %v1185_v11, %v1188_v42  ;;  %v1191_v15 = vmax.f32 %v1187_v59, %v1190_v51 }
 0x215   : > { %v4183_v46 = vadd.f32 %v4182_v40, %v4181_v33  ;;  %v10189_v40 = vmax.f32 %v1189_v30, %v1191_v15 }
 0x217   : > { %v4185_v44 = vadd.f32 %v4184_v45, %v4183_v46  ;;  %v10193_v58 = vsub.f32 %v6239_v1, %v10189_v40  ;;  %v10197_v33 = vsub.f32 %v6240_v60, %v10189_v40  ;;  %v10201_v5 = vsub.f32 %v6241_v17, %v10189_v40  ;;  %v6245_v1 = vld [vmem:[%s6707_s25 + $0x68] sm:$0xff] }
 0x218   : > { %v10205_v45 = vsub.f32 %v9877_v50, %v10189_v40  ;;  %v10209_v46 = vsub.f32 %v9880_v63, %v10189_v40  ;;  %v10217_v59 = vsub.f32 %v9898_v26, %v10189_v40  ;;  %v10225_v50 = vsub.f32 %v9913_v20, %v10189_v40 }
 0x219   : > { %v4187_v32 = vadd.f32 %v4186_v36, %v4185_v44  ;;  %16317 = vst [vmem:[#allocation220_spill] sm:$0xff] %v10193_v58  ;;  %v10213_v36 = vsub.f32 %v9895_v12, %v10189_v40  ;;  %v10221_v44 = vsub.f32 %v9910_v0, %v10189_v40  ;;  %v10229_v63 = vsub.f32 %v9925_v16, %v10189_v40 }
 0x21a   : > { %16318 = vst [vmem:[#allocation221_spill] sm:$0xff] %v10197_v33  ;;  %v10234_v12 = vsub.f32 %v9928_v2, %v10189_v40  ;;  %v10238_v26 = vsub.f32 %v9940_v19, %v10189_v40  ;;  %v10242_v0 = vsub.f32 %v9943_v24, %v10189_v40  ;;  %v10246_v20 = vsub.f32 %v9956_v6, %v10189_v40 }
 0x21b   : > { %v10185_v22 = vmul.f32 %v4187_v32, %v9846_v31  ;;  %16319 = vst [vmem:[#allocation222_spill] sm:$0xff] %v10201_v5  ;;  %v10250_v16 = vsub.f32 %v9959_v57, %v10189_v40  ;;  %v10254_v2 = vsub.f32 %v9971_v10, %v10189_v40  ;;  %v10258_v19 = vsub.f32 %v9974_v7, %v10189_v40  ;;  %v6243_v32 = vld [vmem:[%s6707_s25 + $0x48] sm:$0xff] }
 0x21c   : > { %16320 = vst [vmem:[#allocation223_spill] sm:$0xff] %v10205_v45  ;;  %v10262_v24 = vsub.f32 %v9986_v49, %v10189_v40  ;;  %v10266_v6 = vsub.f32 %v9989_v62, %v10189_v40  ;;  %v10270_v57 = vsub.f32 %v10001_v18, %v10189_v40  ;;  %v10274_v10 = vsub.f32 %v10004_v34, %v10189_v40 }
 0x21d   : > { %16316 = vst [vmem:[#allocation219_spill] sm:$0xff] %v10185_v22  ;;  %v10278_v7 = vsub.f32 %v10016_v38, %v10189_v40  ;;  %v10282_v49 = vsub.f32 %v10019_v28, %v10189_v40  ;;  %v10286_v62 = vsub.f32 %v10031_v47, %v10189_v40  ;;  %v10290_v18 = vsub.f32 %v10034_v39, %v10189_v40 }
 0x21e   : > { %5227 = vst.msk [vmem:[#allocation2] sm:$0xff] %vm834_vm0, %v10185_v22  ;;  %v10294_v34 = vsub.f32 %v10046_v52, %v10189_v40  ;;  %v10298_v38 = vsub.f32 %v10049_v23, %v10189_v40  ;;  %v10302_v28 = vsub.f32 %v10061_v8, %v10189_v40  ;;  %v10306_v47 = vsub.f32 %v10064_v4, %v10189_v40  ;;  %v6253_v22 = vld [vmem:[%s6707_s25 + $0xe8] sm:$0xff] }
 0x21f   : > { %16321 = vst [vmem:[#allocation224_spill] sm:$0xff] %v10209_v46  ;;  %v10310_v39 = vsub.f32 %v10076_v54, %v10189_v40  ;;  %v10314_v52 = vsub.f32 %v10079_v35, %v10189_v40  ;;  %v10318_v23 = vsub.f32 %v10091_v9, %v10189_v40  ;;  %v10322_v8 = vsub.f32 %v10094_v37, %v10189_v40 }
 0x220   : > { %16322 = vst [vmem:[#allocation225_spill] sm:$0xff] %v10213_v36  ;;  %v10326_v4 = vsub.f32 %v10106_v56, %v10189_v40  ;;  %v10330_v54 = vsub.f32 %v10109_v43, %v10189_v40  ;;  %v10334_v35 = vsub.f32 %v10130_v14, %v10189_v40  ;;  %v10338_v9 = vsub.f32 %v10133_v13, %v10189_v40 }
 0x221   : > { %16323 = vst [vmem:[#allocation226_spill] sm:$0xff] %v10217_v59  ;;  %v10342_v37 = vsub.f32 %v10150_v29, %v10189_v40  ;;  %v10346_v56 = vsub.f32 %v10153_v27, %v10189_v40  ;;  %v10350_v43 = vsub.f32 %v10167_v21, %v10189_v40  ;;  %v10354_v14 = vsub.f32 %v10170_v48, %v10189_v40  ;;  %v6242_v29 = vld [vmem:[%s6707_s25 + $0x38] sm:$0xff] }
 0x222   : > { %16324 = vst [vmem:[#allocation227_spill] sm:$0xff] %v10221_v44  ;;  %v10357_v13 = vsub.f32 %v471_v55, %v10189_v40  ;;  %v10360_v42 = vsub.f32 %v473_v41, %v10189_v40  ;;  %v10364_v27 = vsub.f32 %v6242_v29, %v10189_v40  ;;  %v1375_v51 = vmul.f32 1.442695, %v10193_v58  ;;  %v6244_v55 = vld [vmem:[%s6707_s25 + $0x58] sm:$0xff] }
 0x223   : > { %16325 = vst [vmem:[#allocation228_spill] sm:$0xff] %v10225_v50  ;;  %v1379_v21 = vmul.f32 1.442695, %v10197_v33  ;;  %v10370_v30 = vsub.f32 %v6243_v32, %v10189_v40  ;;  %v1383_v48 = vmul.f32 1.442695, %v10201_v5  ;;  %v10375_v41 = vsub.f32 %v6244_v55, %v10189_v40  ;;  %v6247_v55 = vld [vmem:[%s6707_s25 + $0x88] sm:$0xff] }
 0x224   : > { %16326 = vst [vmem:[#allocation229_spill] sm:$0xff] %v10229_v63  ;;  %6041 = vpow2.f32 %v1375_v51  ;;  %v1387_v15 = vmul.f32 1.442695, %v10364_v27  ;;  %v10380_v60 = vsub.f32 %v6245_v1, %v10189_v40  ;;  %v6252_v33 = vld [vmem:[%s6707_s25 + $0xd8] sm:$0xff] }
 0x225   : > { %v5250_v11 = vld [vmem:[#allocation2] sm:$0xff]  ;;  %16327 = vst [vmem:[#allocation230_spill] sm:$0xff] %v10234_v12  ;;  %6043 = vpow2.f32 %v1379_v21  ;;  %v1391_v17 = vmul.f32 1.442695, %v10370_v30  ;;  %v1395_v32 = vmul.f32 1.442695, %v10375_v41  ;;  %v10392_v21 = vsub.f32 %v6247_v55, %v10189_v40 }
 0x226   : > { %5254 = vrot.lane.b32.xlu0 %v5250_v11, %s6648_s6  ;;  %16328 = vst [vmem:[#allocation231_spill] sm:$0xff] %v10238_v26  ;;  %6045 = vpow2.f32 %v1383_v48  ;;  %v6246_v11 = vld [vmem:[%s6707_s25 + $0x78] sm:$0xff]  ;;  %v1399_v1 = vmul.f32 1.442695, %v10380_v60  ;;  %v6249_v55 = vld [vmem:[%s6707_s25 + $0xa8] sm:$0xff]  ;;  %v10434_v58 = vsub.f32 %v6252_v33, %v10189_v40 }
 0x227   : > { %16329 = vst [vmem:[#allocation232_spill] sm:$0xff] %v10242_v0  ;;  %v10385_v29 = vsub.f32 %v6246_v11, %v10189_v40  ;;  %6047 = vpow2.f32 %v1387_v15  ;;  %v10401_v11 = vsub.f32 %v6248_v3, %v10189_v40  ;;  %v1407_v61 = vmul.f32 1.442695, %v10392_v21 }
 0x228   : > { %16330 = vst [vmem:[#allocation233_spill] sm:$0xff] %v10246_v20  ;;  %6049 = vpow2.f32 %v1391_v17  ;;  %v10408_v17 = vsub.f32 %v6249_v55, %v10189_v40 }
 0x229   : > { %16331 = vst [vmem:[#allocation234_spill] sm:$0xff] %v10250_v16  ;;  %6051 = vpow2.f32 %v1395_v32  ;;  %v1403_v15 = vmul.f32 1.442695, %v10385_v29 }
 0x22a   : > { %16332 = vst [vmem:[#allocation235_spill] sm:$0xff] %v10254_v2  ;;  %v10388_v51 = vpop.eup %6041  ;;  %6053 = vpow2.f32 %v1399_v1  ;;  %v1411_v1 = vmul.f32 1.442695, %v10401_v11 }
 0x22b   : > { %16333 = vst [vmem:[#allocation236_spill] sm:$0xff] %v10258_v19  ;;  %v10395_v48 = vpop.eup %6043  ;;  %v1912_v25 = vsel %vm834_vm0, %v10388_v51, 0.0  ;;  %6055 = vpow2.f32 %v1403_v15 }
 0x22c   : > { %16334 = vst [vmem:[#allocation237_spill] sm:$0xff] %v10262_v24  ;;  %v10397_v31 = vpop.eup %6045  ;;  %v1913_v3 = vsel %vm834_vm0, %v10395_v48, 0.0  ;;  %6057 = vpow2.f32 %v1407_v61  ;;  %v16381_v61 = vld [vmem:[#allocation71_spill] sm:$0xff] }
 0x22d   : > { %16335 = vst [vmem:[#allocation238_spill] sm:$0xff] %v10266_v6  ;;  %v10404_v53 = vpop.eup %6047  ;;  %v1915_v32 = vsel %vm834_vm0, %v10397_v31, 0.0  ;;  %6059 = vpow2.f32 %v1411_v1  ;;  %v16390_v1 = vld [vmem:[#allocation76_spill] sm:$0xff] }
 0x22e   : > { %16336 = vst [vmem:[#allocation239_spill] sm:$0xff] %v10270_v57 }
 0x22f   : > { %16337 = vst [vmem:[#allocation240_spill] sm:$0xff] %v10274_v10 }
 0x230   : > { %16338 = vst [vmem:[#allocation241_spill] sm:$0xff] %v10278_v7 }
 0x231   : > { %16339 = vst [vmem:[#allocation242_spill] sm:$0xff] %v10282_v49 }
 0x232   : > { %16340 = vst [vmem:[#allocation243_spill] sm:$0xff] %v10286_v62 }
 0x233   : > { %16341 = vst [vmem:[#allocation244_spill] sm:$0xff] %v10290_v18 }
 0x234   : > { %16342 = vst [vmem:[#allocation245_spill] sm:$0xff] %v10294_v34 }
 0x235   : > { %16343 = vst [vmem:[#allocation246_spill] sm:$0xff] %v10298_v38 }
 0x236   : > { %16344 = vst [vmem:[#allocation247_spill] sm:$0xff] %v10302_v28  ;;  %v16414_v28 = vld [vmem:[#allocation199_spill] sm:$0xff] }
 0x237   : > { %16345 = vst [vmem:[#allocation248_spill] sm:$0xff] %v10306_v47  ;;  %v10531_v38 = vsub.f32 %v16414_v28, %v10189_v40  ;;  %v16421_v28 = vld [vmem:[#allocation202_spill] sm:$0xff] }
 0x238   : > { %16346 = vst [vmem:[#allocation249_spill] sm:$0xff] %v10310_v39  ;;  %v10548_v18 = vsub.f32 %v16421_v28, %v10189_v40  ;;  %v16428_v28 = vld [vmem:[#allocation205_spill] sm:$0xff] }
 0x239   : > { %16347 = vst [vmem:[#allocation250_spill] sm:$0xff] %v10314_v52 }
 0x23a   : > { %16348 = vst [vmem:[#allocation251_spill] sm:$0xff] %v10318_v23  ;;  %v16405_v23 = vld [vmem:[#allocation196_spill] sm:$0xff] }
 0x23b   : > { %16349 = vst [vmem:[#allocation252_spill] sm:$0xff] %v10322_v8  ;;  %v10510_v52 = vsub.f32 %v16405_v23, %v10189_v40  ;;  %v16412_v23 = vld [vmem:[#allocation198_spill] sm:$0xff] }
 0x23c   : > { %16350 = vst [vmem:[#allocation253_spill] sm:$0xff] %v10326_v4  ;;  %v10527_v47 = vsub.f32 %v16412_v23, %v10189_v40  ;;  %v16419_v23 = vld [vmem:[#allocation201_spill] sm:$0xff] }
 0x23d   : > { %16351 = vst [vmem:[#allocation254_spill] sm:$0xff] %v10330_v54 }
 0x23e   : > { %16352 = vst [vmem:[#allocation255_spill] sm:$0xff] %v10334_v35  ;;  %v16396_v35 = vld [vmem:[#allocation124_spill] sm:$0xff] }
 0x23f   : > { %16353 = vst [vmem:[#allocation256_spill] sm:$0xff] %v10338_v9  ;;  %v10489_v54 = vsub.f32 %v16396_v35, %v10189_v40  ;;  %v16403_v35 = vld [vmem:[#allocation195_spill] sm:$0xff] }
 0x240   : > { %16354 = vst [vmem:[#allocation257_spill] sm:$0xff] %v10342_v37  ;;  %v10506_v8 = vsub.f32 %v16403_v35, %v10189_v40  ;;  %v16410_v35 = vld [vmem:[#allocation197_spill] sm:$0xff] }
 0x241   : > { %16355 = vst [vmem:[#allocation258_spill] sm:$0xff] %v10346_v56 }
 0x242   : > { %16356 = vst [vmem:[#allocation259_spill] sm:$0xff] %v10350_v43  ;;  %v16387_v43 = vld [vmem:[#allocation75_spill] sm:$0xff] }
 0x243   : > { %16357 = vst [vmem:[#allocation260_spill] sm:$0xff] %v10354_v14  ;;  %v10468_v56 = vsub.f32 %v16387_v43, %v10189_v40  ;;  %v16394_v43 = vld [vmem:[#allocation173_spill] sm:$0xff] }
 0x244   : > { %16358 = vst [vmem:[#allocation261_spill] sm:$0xff] %v10357_v13  ;;  %v10485_v9 = vsub.f32 %v16394_v43, %v10189_v40  ;;  %v16401_v43 = vld [vmem:[#allocation126_spill] sm:$0xff] }
 0x245   : > { %16359 = vst [vmem:[#allocation262_spill] sm:$0xff] %v10360_v42 }
 0x246   : > { %16360 = vst [vmem:[#allocation263_spill] sm:$0xff] %v10364_v27  ;;  %v1917_v27 = vsel %vm834_vm0, %v10404_v53, 0.0 }
 0x247   : > { %16361 = vst [vmem:[#allocation264_spill] sm:$0xff] %v10370_v30 }
 0x248   : > { %16362 = vst [vmem:[#allocation265_spill] sm:$0xff] %v10375_v41  ;;  %v6251_v41 = vld [vmem:[%s6707_s25 + $0xc8] sm:$0xff] }
 0x249   : > { %16363 = vst [vmem:[#allocation266_spill] sm:$0xff] %v10380_v60  ;;  %v6250_v60 = vld [vmem:[%s6707_s25 + $0xb8] sm:$0xff]  ;;  %v10426_v30 = vsub.f32 %v6251_v41, %v10189_v40 }
 0x24a   : > { %16364 = vst [vmem:[#allocation267_spill] sm:$0xff] %v10385_v29  ;;  %v10417_v29 = vpop.eup %6049  ;;  %v10421_v55 = vsub.f32 %v6250_v60, %v10189_v40  ;;  %v1415_v60 = vmul.f32 1.442695, %v10408_v17 }
 0x24b   : > { %16365 = vst [vmem:[#allocation268_spill] sm:$0xff] %v10388_v51  ;;  %v10430_v5 = vpop.eup %6051  ;;  %v1919_v33 = vsel %vm834_vm0, %v10417_v29, 0.0 }
 0x24c   : > { %16366 = vst [vmem:[#allocation269_spill] sm:$0xff] %v10392_v21  ;;  %v1914_v21 = vadd.f32 %v1913_v3, %v1912_v25  ;;  %v10439_v25 = vsub.f32 %v6253_v22, %v10189_v40  ;;  %v6254_v3 = vld [vmem:[%s6707_s25 + $0xf8] sm:$0xff]  ;;  %v10451_v13 = vpop.eup %6053  ;;  %v1419_v22 = vmul.f32 1.442695, %v10421_v55  ;;  %6061 = vpow2.f32 %v1415_v60 }
 0x24d   : > { %16367 = vst [vmem:[#allocation270_spill] sm:$0xff] %v10395_v48  ;;  %v10443_v41 = vsub.f32 %v6254_v3, %v10189_v40  ;;  %v16383_v3 = vld [vmem:[#allocation72_spill] sm:$0xff]  ;;  %v10472_v37 = vpop.eup %6055  ;;  %v16399_v60 = vld [vmem:[#allocation118_spill] sm:$0xff] }
 0x24e   : > { %16368 = vst [vmem:[#allocation271_spill] sm:$0xff] %v10397_v31  ;;  %v1916_v15 = vadd.f32 %v1915_v32, %v1914_v21  ;;  %v10455_v21 = vsub.f32 %v16381_v61, %v10189_v40  ;;  %v1921_v61 = vsel %vm834_vm0, %v10430_v5, 0.0  ;;  %v10493_v4 = vpop.eup %6057  ;;  %6063 = vpow2.f32 %v1419_v22  ;;  %v16408_v22 = vld [vmem:[#allocation189_spill] sm:$0xff] }
 0x24f   : > { %16369 = vst [vmem:[#allocation272_spill] sm:$0xff] %v10401_v11  ;;  %v6255_v11 = vld [vmem:[%s6707_s25 + $0x108] sm:$0xff]  ;;  %v10514_v39 = vpop.eup %6059 }
 0x250   : > { %16370 = vst [vmem:[#allocation273_spill] sm:$0xff] %v10404_v53  ;;  %v10447_v42 = vsub.f32 %v6255_v11, %v10189_v40  ;;  %v1918_v32 = vadd.f32 %v1917_v27, %v1916_v15  ;;  %v16385_v11 = vld [vmem:[#allocation73_spill] sm:$0xff]  ;;  %v10476_v27 = vsub.f32 %v16390_v1, %v10189_v40  ;;  %v1423_v15 = vmul.f32 1.442695, %v10426_v30 }
 0x251   : > { %16371 = vst [vmem:[#allocation274_spill] sm:$0xff] %v10408_v17  ;;  %v10460_v17 = vsub.f32 %v16383_v3, %v10189_v40  ;;  %v10464_v14 = vsub.f32 %v16385_v11, %v10189_v40  ;;  %v16392_v11 = vld [vmem:[#allocation168_spill] sm:$0xff]  ;;  %v1923_v1 = vsel %vm834_vm0, %v10451_v13, 0.0 }
 0x252   : > { %16372 = vst [vmem:[#allocation275_spill] sm:$0xff] %v10417_v29  ;;  %v1920_v3 = vadd.f32 %v1919_v33, %v1918_v32  ;;  %v10497_v33 = vsub.f32 %v16399_v60, %v10189_v40  ;;  %v1427_v32 = vmul.f32 1.442695, %v10434_v58  ;;  %v1925_v60 = vsel %vm834_vm0, %v10472_v37, 0.0  ;;  %v10535_v34 = vpop.eup %6061 }
 0x253   : > { %16373 = vst [vmem:[#allocation276_spill] sm:$0xff] %v10421_v55  ;;  %v10481_v55 = vsub.f32 %v16392_v11, %v10189_v40  ;;  %6065 = vpow2.f32 %v1423_v15  ;;  %v16417_v15 = vld [vmem:[#allocation200_spill] sm:$0xff] }
 0x254   : > { %16374 = vst [vmem:[#allocation277_spill] sm:$0xff] %v10426_v30  ;;  %v1922_v11 = vadd.f32 %v1921_v61, %v1920_v3  ;;  %v10502_v30 = vsub.f32 %v16401_v43, %v10189_v40  ;;  %v10518_v61 = vsub.f32 %v16408_v22, %v10189_v40  ;;  %v1431_v3 = vmul.f32 1.442695, %v10439_v25  ;;  %v10556_v62 = vpop.eup %6063 }
 0x255   : > { %16375 = vst [vmem:[#allocation278_spill] sm:$0xff] %v10430_v5  ;;  %v1927_v22 = vsel %vm834_vm0, %v10493_v4, 0.0  ;;  %6067 = vpow2.f32 %v1427_v32  ;;  %v16426_v32 = vld [vmem:[#allocation204_spill] sm:$0xff]  ;;  %v1933_v29 = vsel %vm834_vm0, %v10556_v62, 0.0 }
 0x256   : > { %16376 = vst [vmem:[#allocation279_spill] sm:$0xff] %v10434_v58  ;;  %v1924_v43 = vadd.f32 %v1923_v1, %v1922_v11  ;;  %v10523_v58 = vsub.f32 %v16410_v35, %v10189_v40  ;;  %v10539_v1 = vsub.f32 %v16417_v15, %v10189_v40  ;;  %v1435_v11 = vmul.f32 1.442695, %v10443_v41 }
 0x257   : > { %16377 = vst [vmem:[#allocation280_spill] sm:$0xff] %v10439_v25  ;;  %v10544_v25 = vsub.f32 %v16419_v23, %v10189_v40  ;;  %v1929_v15 = vsel %vm834_vm0, %v10514_v39, 0.0  ;;  %6069 = vpow2.f32 %v1431_v3  ;;  %v16435_v3 = vld [vmem:[#allocation208_spill] sm:$0xff] }
 0x258   : > { %16378 = vst [vmem:[#allocation281_spill] sm:$0xff] %v10443_v41  ;;  %v1926_v35 = vadd.f32 %v1925_v60, %v1924_v43  ;;  %v10560_v60 = vsub.f32 %v16426_v32, %v10189_v40  ;;  %v1439_v43 = vmul.f32 1.442695, %v10447_v42  ;;  %v10565_v41 = vsub.f32 %v16428_v28, %v10189_v40 }
 0x259   : > { %16379 = vst [vmem:[#allocation282_spill] sm:$0xff] %v10447_v42  ;;  %v1931_v32 = vsel %vm834_vm0, %v10535_v34, 0.0  ;;  %v10577_v5 = vpop.eup %6065  ;;  %6071 = vpow2.f32 %v1435_v11  ;;  %v1451_v11 = vmul.f32 1.442695, %v10464_v14 }
 0x25a   : > { %16380 = vst [vmem:[#allocation283_spill] sm:$0xff] %v10451_v13  ;;  %v1928_v23 = vadd.f32 %v1927_v22, %v1926_v35  ;;  %v10581_v22 = vsub.f32 %v16435_v3, %v10189_v40  ;;  %v1443_v35 = vmul.f32 1.442695, %v10455_v21  ;;  %6073 = vpow2.f32 %v1439_v43  ;;  %v16442_v3 = vld [vmem:[#allocation211_spill] sm:$0xff] }
 0x25b   : > { %16382 = vst [vmem:[#allocation71_spill] sm:$0xff] %v10455_v21  ;;  %v10595_v10 = vpop.eup %6067  ;;  %v1463_v21 = vmul.f32 1.442695, %v10481_v55  ;;  %v1467_v43 = vmul.f32 1.442695, %v10485_v9 }
 0x25c   : > { %16384 = vst [vmem:[#allocation72_spill] sm:$0xff] %v10460_v17  ;;  %v1930_v28 = vadd.f32 %v1929_v15, %v1928_v23  ;;  %v1455_v15 = vmul.f32 1.442695, %v10468_v56  ;;  %6075 = vpow2.f32 %v1443_v35  ;;  %v1483_v35 = vmul.f32 1.442695, %v10506_v8 }
 0x25d   : > { %16386 = vst [vmem:[#allocation73_spill] sm:$0xff] %v10464_v14  ;;  %v1471_v14 = vmul.f32 1.442695, %v10489_v54 }
 0x25e   : > { %16388 = vst [vmem:[#allocation75_spill] sm:$0xff] %v10468_v56  ;;  %v1932_v23 = vadd.f32 %v1931_v32, %v1930_v28  ;;  %v16445_v32 = vld [vmem:[#allocation212_spill] sm:$0xff] }
 0x25f   : > { %16389 = vst [vmem:[#allocation284_spill] sm:$0xff] %v10472_v37  ;;  %v10613_v28 = vsub.f32 %v16445_v32, %v10189_v40 }
 0x260   : > { %16391 = vst [vmem:[#allocation76_spill] sm:$0xff] %v10476_v27  ;;  %v1934_v56 = vadd.f32 %v1933_v29, %v1932_v23  ;;  %v16448_v23 = vld [vmem:[#allocation213_spill] sm:$0xff] }
 0x261   : > { %16393 = vst [vmem:[#allocation168_spill] sm:$0xff] %v10481_v55  ;;  %v1937_v55 = vsel %vm834_vm0, %v10595_v10, 0.0  ;;  %v10627_v32 = vsub.f32 %v16448_v23, %v10189_v40  ;;  %v16451_v23 = vld [vmem:[#allocation214_spill] sm:$0xff] }
 0x262   : > { %16395 = vst [vmem:[#allocation173_spill] sm:$0xff] %v10485_v9  ;;  %v10623_v9 = vmul.f32 1.442695, %v10510_v52 }
 0x263   : > { %16397 = vst [vmem:[#allocation124_spill] sm:$0xff] %v10489_v54 }
 0x264   : > { %16398 = vst [vmem:[#allocation285_spill] sm:$0xff] %v10493_v4  ;;  %v16423_v4 = vld [vmem:[#allocation203_spill] sm:$0xff] }
 0x265   : > { %16400 = vst [vmem:[#allocation118_spill] sm:$0xff] %v10497_v33  ;;  %v10552_v37 = vsub.f32 %v16423_v4, %v10189_v40  ;;  %v16430_v4 = vld [vmem:[#allocation206_spill] sm:$0xff] }
 0x266   : > { %16402 = vst [vmem:[#allocation126_spill] sm:$0xff] %v10502_v30  ;;  %v10569_v13 = vsub.f32 %v16430_v4, %v10189_v40  ;;  %v16437_v4 = vld [vmem:[#allocation209_spill] sm:$0xff] }
 0x267   : > { %16404 = vst [vmem:[#allocation195_spill] sm:$0xff] %v10506_v8  ;;  %v10586_v42 = vsub.f32 %v16437_v4, %v10189_v40  ;;  %v10601_v4 = vsub.f32 %v16442_v3, %v10189_v40  ;;  %v1475_v3 = vmul.f32 1.442695, %v10497_v33  ;;  %v10630_v33 = vmul.f32 1.442695, %v10518_v61 }
 0x268   : > { %16406 = vst [vmem:[#allocation196_spill] sm:$0xff] %v10510_v52  ;;  %v10640_v52 = vmul.f32 1.442695, %v10527_v47  ;;  %v10653_v8 = vmul.f32 1.442695, %v10544_v25 }
 0x269   : > { %16407 = vst [vmem:[#allocation286_spill] sm:$0xff] %v10514_v39  ;;  %v16432_v39 = vld [vmem:[#allocation207_spill] sm:$0xff] }
 0x26a   : > { %16409 = vst [vmem:[#allocation189_spill] sm:$0xff] %v10518_v61  ;;  %v10573_v49 = vsub.f32 %v16432_v39, %v10189_v40  ;;  %v16439_v39 = vld [vmem:[#allocation210_spill] sm:$0xff]  ;;  %v10647_v61 = vsub.f32 %v16451_v23, %v10189_v40  ;;  %v16454_v23 = vld [vmem:[#allocation216_spill] sm:$0xff] }
 0x26b   : > { %16411 = vst [vmem:[#allocation197_spill] sm:$0xff] %v10523_v58  ;;  %v10590_v7 = vsub.f32 %v16439_v39, %v10189_v40  ;;  %v1459_v39 = vmul.f32 1.442695, %v10476_v27  ;;  %v1479_v27 = vmul.f32 1.442695, %v10502_v30 }
 0x26c   : > { %16413 = vst [vmem:[#allocation198_spill] sm:$0xff] %v10527_v47  ;;  %v10633_v30 = vmul.f32 1.442695, %v10523_v58  ;;  %v10650_v58 = vmul.f32 1.442695, %v10539_v1 }
 0x26d   : > { %16415 = vst [vmem:[#allocation199_spill] sm:$0xff] %v10531_v38  ;;  %v10673_v47 = vmul.f32 1.442695, %v10565_v41 }
 0x26e   : > { %16416 = vst [vmem:[#allocation287_spill] sm:$0xff] %v10535_v34  ;;  %v1447_v34 = vmul.f32 1.442695, %v10460_v17  ;;  %v1935_v17 = vsel %vm834_vm0, %v10577_v5, 0.0 }
 0x26f   : > { %16418 = vst [vmem:[#allocation200_spill] sm:$0xff] %v10539_v1  ;;  %v1936_v29 = vadd.f32 %v1935_v17, %v1934_v56  ;;  %v10643_v56 = vmul.f32 1.442695, %v10531_v38  ;;  %v10660_v38 = vmul.f32 1.442695, %v10548_v18  ;;  %v10667_v1 = vsub.f32 %v16454_v23, %v10189_v40  ;;  %v16457_v23 = vld [vmem:[#allocation217_spill] sm:$0xff] }
 0x270   : > { %16420 = vst [vmem:[#allocation201_spill] sm:$0xff] %v10544_v25  ;;  %6077 = vpow2.f32 %v1447_v34  ;;  %v10670_v25 = vmul.f32 1.442695, %v10560_v60 }
 0x271   : > { %16422 = vst [vmem:[#allocation202_spill] sm:$0xff] %v10548_v18  ;;  %6079 = vpow2.f32 %v1451_v11  ;;  %v1938_v17 = vadd.f32 %v1937_v55, %v1936_v29  ;;  %v10663_v55 = vmul.f32 1.442695, %v10552_v37  ;;  %v10693_v18 = vmul.f32 1.442695, %v10586_v42 }
 0x272   : > { %16424 = vst [vmem:[#allocation203_spill] sm:$0xff] %v10552_v37  ;;  %6081 = vpow2.f32 %v1455_v15  ;;  %v10680_v37 = vmul.f32 1.442695, %v10569_v13 }
 0x273   : > { %16425 = vst [vmem:[#allocation288_spill] sm:$0xff] %v10556_v62  ;;  %v10607_v62 = vpop.eup %6069  ;;  %6083 = vpow2.f32 %v1459_v39 }
 0x274   : > { %16427 = vst [vmem:[#allocation204_spill] sm:$0xff] %v10560_v60  ;;  %v1939_v54 = vsel %vm834_vm0, %v10607_v62, 0.0  ;;  %v10687_v60 = vsub.f32 %v16457_v23, %v10189_v40  ;;  %6085 = vpow2.f32 %v1463_v21  ;;  %v10709_v23 = vmul.f32 1.442695, %v10627_v32 }
 0x275   : > { %16429 = vst [vmem:[#allocation205_spill] sm:$0xff] %v10565_v41  ;;  %v1940_v29 = vadd.f32 %v1939_v54, %v1938_v17  ;;  %v10683_v54 = vmul.f32 1.442695, %v10573_v49  ;;  %v10690_v41 = vmul.f32 1.442695, %v10581_v22  ;;  %6087 = vpow2.f32 %v1467_v43 }
 0x276   : > { %16431 = vst [vmem:[#allocation206_spill] sm:$0xff] %v10569_v13  ;;  %6089 = vpow2.f32 %v1471_v14  ;;  %v10716_v21 = vmul.f32 1.442695, %v10647_v61  ;;  %v10722_v43 = vmul.f32 1.442695, %v10687_v60 }
 0x277   : > { %16433 = vst [vmem:[#allocation207_spill] sm:$0xff] %v10573_v49  ;;  %v10700_v49 = vmul.f32 1.442695, %v10590_v7  ;;  %6091 = vpow2.f32 %v1475_v3  ;;  %v10732_v14 = vmul.f32 1.442695, %v10209_v46 }
 0x278   : > { %16434 = vst [vmem:[#allocation289_spill] sm:$0xff] %v10577_v5  ;;  %v10619_v5 = vpop.eup %6071  ;;  %6093 = vpow2.f32 %v1479_v27  ;;  %v10738_v3 = vmul.f32 1.442695, %v10217_v59  ;;  %v10748_v27 = vmul.f32 1.442695, %v10225_v50 }
 0x279   : > { %16436 = vst [vmem:[#allocation208_spill] sm:$0xff] %v10581_v22  ;;  %v10637_v34 = vpop.eup %6073  ;;  %v1941_v11 = vsel %vm834_vm0, %v10619_v5, 0.0  ;;  %6095 = vpow2.f32 %v1483_v35  ;;  %v10751_v46 = vmul.f32 1.442695, %v10229_v63  ;;  %v10762_v59 = vmul.f32 1.442695, %v10242_v0 }
 0x27a   : > { %16438 = vst [vmem:[#allocation209_spill] sm:$0xff] %v10586_v42  ;;  %v1943_v15 = vsel %vm834_vm0, %v10637_v34, 0.0  ;;  %v1942_v17 = vadd.f32 %v1941_v11, %v1940_v29  ;;  %v10703_v11 = vmul.f32 1.442695, %v10601_v4  ;;  %v10706_v29 = vmul.f32 1.442695, %v10613_v28 }
 0x27b   : > { %16440 = vst [vmem:[#allocation210_spill] sm:$0xff] %v10590_v7  ;;  %v6256_v63 = vld [vmem:[%s15014_s3] ss:$0 sm:$0xff]  ;;  %6097 = vpow2.f32 %v10623_v9  ;;  %v6257_v9 = vld [vmem:[%s15014_s3 + $0x1] ss:$0 sm:$0xff] }
 0x27c   : > { %16441 = vst [vmem:[#allocation290_spill] sm:$0xff] %v10595_v10  ;;  %v1944_v40 = vadd.f32 %v1943_v15, %v1942_v17  ;;  %v10725_v17 = vmul.f32 1.442695, %v10205_v45  ;;  %v4638_v50 = vmul.f32 %v6256_v63, %v10388_v51  ;;  %6099 = vpow2.f32 %v10630_v33 }
 0x27d   : > { %16443 = vst [vmem:[#allocation211_spill] sm:$0xff] %v10601_v4  ;;  %v10719_v4 = vmul.f32 1.442695, %v10667_v1  ;;  %6101 = vpow2.f32 %v10633_v30  ;;  %v6258_v30 = vld [vmem:[%s15014_s3 + $0x2] ss:$0 sm:$0xff] }
 0x27e   : > { %16444 = vst [vmem:[#allocation291_spill] sm:$0xff] %v10607_v62  ;;  %v10657_v62 = vpop.eup %6075  ;;  %6103 = vpow2.f32 %v10640_v52  ;;  %v4996_v51 = vsel %vm834_vm0, %v4638_v50, 0.0 }
 0x27f   : > { %16446 = vst [vmem:[#allocation212_spill] sm:$0xff] %v10613_v28  ;;  %v1945_v39 = vsel %vm834_vm0, %v10657_v62, 0.0  ;;  %6105 = vpow2.f32 %v10643_v56 }
 0x280   : > { %16447 = vst [vmem:[#allocation292_spill] sm:$0xff] %v10619_v5  ;;  %v10677_v5 = vpop.eup %6077  ;;  %v1946_v15 = vadd.f32 %v1945_v39, %v1944_v40  ;;  %v10741_v40 = vmul.f32 1.442695, %v10221_v44  ;;  %v10759_v44 = vmul.f32 1.442695, %v10238_v26  ;;  %6107 = vpow2.f32 %v10650_v58 }
 0x281   : > { %16449 = vst [vmem:[#allocation213_spill] sm:$0xff] %v10627_v32  ;;  %v1947_v42 = vsel %vm834_vm0, %v10677_v5, 0.0  ;;  %6109 = vpow2.f32 %v10653_v8 }
 0x282   : > { %16450 = vst [vmem:[#allocation293_spill] sm:$0xff] %v10637_v34  ;;  %v10697_v34 = vpop.eup %6079  ;;  %v1948_v39 = vadd.f32 %v1947_v42, %v1946_v15  ;;  %v10754_v42 = vmul.f32 1.442695, %v10234_v12  ;;  %6111 = vpow2.f32 %v10660_v38  ;;  %v6261_v38 = vld [vmem:[%s15014_s3 + $0x5] ss:$0 sm:$0xff] }
 0x283   : > { %16452 = vst [vmem:[#allocation214_spill] sm:$0xff] %v10647_v61  ;;  %v10713_v22 = vpop.eup %6081  ;;  %v1949_v32 = vsel %vm834_vm0, %v10697_v34, 0.0  ;;  %v10783_v61 = vmul.f32 1.442695, %v10254_v2  ;;  %6113 = vpow2.f32 %v10663_v55 }
 0x284   : > { %16453 = vst [vmem:[#allocation294_spill] sm:$0xff] %v10657_v62  ;;  %v10729_v28 = vpop.eup %6083  ;;  %v1951_v45 = vsel %vm834_vm0, %v10713_v22, 0.0  ;;  %v1950_v35 = vadd.f32 %v1949_v32, %v1948_v39  ;;  %v10774_v32 = vmul.f32 1.442695, %v10246_v20  ;;  %v10777_v39 = vmul.f32 1.442695, %v10250_v16 }
 0x285   : > { %16455 = vst [vmem:[#allocation216_spill] sm:$0xff] %v10667_v1  ;;  %v10735_v1 = vmul.f32 1.442695, %v10213_v36  ;;  %v1953_v36 = vsel %vm834_vm0, %v10729_v28, 0.0  ;;  %v4640_v20 = vmul.f32 %v6257_v9, %v10395_v48  ;;  %v10803_v16 = vmul.f32 1.442695, %v10262_v24 }
 0x286   : > { %16456 = vst [vmem:[#allocation295_spill] sm:$0xff] %v10677_v5  ;;  %v1952_v0 = vadd.f32 %v1951_v45, %v1950_v35  ;;  %v10795_v45 = vmul.f32 1.442695, %v10258_v19  ;;  %v4642_v19 = vmul.f32 %v6258_v30, %v10397_v31  ;;  %v10819_v24 = vmul.f32 1.442695, %v10270_v57 }
 0x287   : > { %16458 = vst [vmem:[#allocation217_spill] sm:$0xff] %v10687_v60  ;;  %v10745_v60 = vpop.eup %6085  ;;  %v6259_v30 = vld [vmem:[%s15014_s3 + $0x3] ss:$0 sm:$0xff]  ;;  %v6260_v48 = vld [vmem:[%s15014_s3 + $0x4] ss:$0 sm:$0xff]  ;;  %v4997_v8 = vsel %vm834_vm0, %v4640_v20, 0.0  ;;  %6115 = vpow2.f32 %v10670_v25 }
 0x288   : > { %16459 = vst [vmem:[#allocation296_spill] sm:$0xff] %v10697_v34  ;;  %v10756_v15 = vpop.eup %6087  ;;  %v1955_v63 = vsel %vm834_vm0, %v10745_v60, 0.0  ;;  %v1954_v33 = vadd.f32 %v1953_v36, %v1952_v0  ;;  %v10813_v36 = vmul.f32 1.442695, %v10266_v6  ;;  %v4644_v56 = vmul.f32 %v6259_v30, %v10404_v53  ;;  %v16476_v30 = vld [vmem:[#allocation275_spill] sm:$0xff]  ;;  %v16489_v25 = vld [vmem:[#allocation284_spill] sm:$0xff] }
 0x289   : > { %16460 = vst [vmem:[#allocation297_spill] sm:$0xff] %v10713_v22  ;;  %v10770_v12 = vpop.eup %6089  ;;  %v1957_v35 = vsel %vm834_vm0, %v10756_v15, 0.0  ;;  %v4646_v53 = vmul.f32 %v6260_v48, %v16476_v30  ;;  %v16482_v48 = vld [vmem:[#allocation242_spill] sm:$0xff]  ;;  %v4998_v30 = vadd.f32 %v4997_v8, %v4996_v51  ;;  %v4999_v55 = vsel %vm834_vm0, %v4642_v19, 0.0  ;;  %v16487_v51 = vld [vmem:[#allocation243_spill] sm:$0xff] }
 0x28a   : > { %16461 = vst [vmem:[#allocation298_spill] sm:$0xff] %v10729_v28  ;;  %v10779_v26 = vpop.eup %6091  ;;  %v1959_v9 = vsel %vm834_vm0, %v10770_v12, 0.0  ;;  %v1956_v0 = vadd.f32 %v1955_v63, %v1954_v33  ;;  %v16473_v63 = vld [vmem:[#allocation240_spill] sm:$0xff]  ;;  %v10857_v50 = vmul.f32 1.442695, %v16482_v48  ;;  %v5001_v48 = vsel %vm834_vm0, %v4644_v56, 0.0 }
 0x28b   : > { %16462 = vst [vmem:[#allocation299_spill] sm:$0xff] %v10745_v60  ;;  %v10791_v7 = vpop.eup %6093  ;;  %v1961_v52 = vsel %vm834_vm0, %v10779_v26, 0.0  ;;  %v10831_v33 = vmul.f32 1.442695, %v16473_v63  ;;  %6117 = vpow2.f32 %v10673_v47  ;;  %v10874_v8 = vmul.f32 1.442695, %v16487_v51 }
 0x28c   : > { %16463 = vst [vmem:[#allocation300_spill] sm:$0xff] %v10756_v15  ;;  %v10799_v2 = vpop.eup %6095  ;;  %v1963_v13 = vsel %vm834_vm0, %v10791_v7, 0.0  ;;  %v1958_v58 = vadd.f32 %v1957_v35, %v1956_v0  ;;  %v16478_v35 = vld [vmem:[#allocation241_spill] sm:$0xff]  ;;  %v6263_v19 = vld [vmem:[%s15014_s3 + $0x7] ss:$0 sm:$0xff]  ;;  %v5003_v47 = vsel %vm834_vm0, %v4646_v53, 0.0  ;;  %6119 = vpow2.f32 %v10680_v37 }
 0x28d   : > { %16464 = vst [vmem:[#allocation301_spill] sm:$0xff] %v10770_v12  ;;  %v10827_v6 = vpop.eup %6097  ;;  %v1965_v57 = vsel %vm834_vm0, %v10799_v2, 0.0  ;;  %v10848_v0 = vmul.f32 1.442695, %v16478_v35  ;;  %6121 = vpow2.f32 %v10683_v54  ;;  %v6265_v53 = vld [vmem:[%s15014_s3 + $0x9] ss:$0 sm:$0xff] }
 0x28e   : > { %16465 = vst [vmem:[#allocation302_spill] sm:$0xff] %v10779_v26  ;;  %v10835_v31 = vpop.eup %6099  ;;  %v1967_v20 = vsel %vm834_vm0, %v10827_v6, 0.0  ;;  %v16498_v37 = vld [vmem:[#allocation286_spill] sm:$0xff]  ;;  %v16501_v54 = vld [vmem:[#allocation287_spill] sm:$0xff]  ;;  %6123 = vpow2.f32 %v10690_v41 }
 0x28f   : > { %16466 = vst [vmem:[#allocation303_spill] sm:$0xff] %v10791_v7  ;;  %v10844_v63 = vpop.eup %6101  ;;  %6125 = vpow2.f32 %v10693_v18 }
 0x290   : > { %16467 = vst [vmem:[#allocation304_spill] sm:$0xff] %v10795_v45  ;;  %v16491_v45 = vld [vmem:[#allocation244_spill] sm:$0xff]  ;;  %6127 = vpow2.f32 %v10700_v49 }
 0x291   : > { %16468 = vst [vmem:[#allocation305_spill] sm:$0xff] %v10799_v2  ;;  %6129 = vpow2.f32 %v10703_v11  ;;  %v16516_v11 = vld [vmem:[#allocation251_spill] sm:$0xff] }
 0x292   : > { %16469 = vst [vmem:[#allocation306_spill] sm:$0xff] %v10803_v16  ;;  %v10854_v16 = vpop.eup %6103  ;;  %6131 = vpow2.f32 %v10706_v29  ;;  %v6271_v29 = vld [vmem:[%s15014_s3 + $0xf] ss:$0 sm:$0xff] }
 0x293   : > { %16470 = vst [vmem:[#allocation307_spill] sm:$0xff] %v10813_v36  ;;  %v10862_v35 = vpop.eup %6105  ;;  %6133 = vpow2.f32 %v10709_v23 }
 0x294   : > { %16471 = vst [vmem:[#allocation308_spill] sm:$0xff] %v10819_v24  ;;  %v16480_v24 = vld [vmem:[#allocation278_spill] sm:$0xff]  ;;  %6135 = vpow2.f32 %v10716_v21  ;;  %v6273_v21 = vld [vmem:[%s15014_s3 + $0x11] ss:$0 sm:$0xff] }
 0x295   : > { %16472 = vst [vmem:[#allocation309_spill] sm:$0xff] %v10827_v6  ;;  %v4648_v36 = vmul.f32 %v6261_v38, %v16480_v24  ;;  %v16485_v38 = vld [vmem:[#allocation283_spill] sm:$0xff]  ;;  %6137 = vpow2.f32 %v10719_v4 }
 0x296   : > { %16474 = vst [vmem:[#allocation310_spill] sm:$0xff] %v10831_v33  ;;  %v1960_v33 = vadd.f32 %v1959_v9, %v1958_v58  ;;  %v6262_v58 = vld [vmem:[%s15014_s3 + $0x6] ss:$0 sm:$0xff] }
 0x297   : > { %16475 = vst [vmem:[#allocation311_spill] sm:$0xff] %v10835_v31  ;;  %v4650_v24 = vmul.f32 %v6262_v58, %v16485_v38  ;;  %v10883_v58 = vmul.f32 1.442695, %v16491_v45  ;;  %v1969_v38 = vsel %vm834_vm0, %v10835_v31, 0.0 }
 0x298   : > { %16477 = vst [vmem:[#allocation312_spill] sm:$0xff] %v10844_v63  ;;  %v1962_v9 = vadd.f32 %v1961_v52, %v1960_v33  ;;  %v4652_v52 = vmul.f32 %v6263_v19, %v16489_v25  ;;  %v5000_v33 = vadd.f32 %v4999_v55, %v4998_v30  ;;  %v6264_v30 = vld [vmem:[%s15014_s3 + $0x8] ss:$0 sm:$0xff]  ;;  %v16496_v55 = vld [vmem:[#allocation285_spill] sm:$0xff]  ;;  %v4656_v25 = vmul.f32 %v6265_v53, %v16498_v37  ;;  %v16503_v53 = vld [vmem:[#allocation247_spill] sm:$0xff] }
 0x299   : > { %16479 = vst [vmem:[#allocation313_spill] sm:$0xff] %v10848_v0  ;;  %v4654_v19 = vmul.f32 %v6264_v30, %v16496_v55  ;;  %v1971_v30 = vsel %vm834_vm0, %v10844_v63, 0.0  ;;  %v10919_v37 = vmul.f32 1.442695, %v16503_v53 }
 0x29a   : > { %16481 = vst [vmem:[#allocation314_spill] sm:$0xff] %v10854_v16  ;;  %v1964_v56 = vadd.f32 %v1963_v13, %v1962_v9  ;;  %v5002_v45 = vadd.f32 %v5001_v48, %v5000_v33  ;;  %v6266_v48 = vld [vmem:[%s15014_s3 + $0xa] ss:$0 sm:$0xff] }
 0x29b   : > { %16483 = vst [vmem:[#allocation315_spill] sm:$0xff] %v10857_v50  ;;  %v10870_v50 = vpop.eup %6107  ;;  %v5011_v49 = vsel %vm834_vm0, %v4654_v19, 0.0  ;;  %v16517_v19 = vld [vmem:[#allocation292_spill] sm:$0xff]  ;;  %6139 = vpow2.f32 %v10722_v43 }
 0x29c   : > { %16484 = vst [vmem:[#allocation316_spill] sm:$0xff] %v10862_v35  ;;  %v10880_v0 = vpop.eup %6109  ;;  %v1966_v9 = vadd.f32 %v1965_v57, %v1964_v56  ;;  %v4658_v57 = vmul.f32 %v6266_v48, %v16501_v54  ;;  %v5004_v33 = vadd.f32 %v5003_v47, %v5002_v45  ;;  %v6267_v45 = vld [vmem:[%s15014_s3 + $0xb] ss:$0 sm:$0xff]  ;;  %6141 = vpow2.f32 %v10725_v17 }
 0x29d   : > { %16486 = vst [vmem:[#allocation317_spill] sm:$0xff] %v10870_v50  ;;  %v10888_v51 = vpop.eup %6111  ;;  %v16508_v47 = vld [vmem:[#allocation288_spill] sm:$0xff]  ;;  %6143 = vpow2.f32 %v10732_v14 }
 0x29e   : > { %16488 = vst [vmem:[#allocation318_spill] sm:$0xff] %v10874_v8  ;;  %v16494_v8 = vld [vmem:[#allocation245_spill] sm:$0xff]  ;;  %v10898_v13 = vpop.eup %6113  ;;  %v4660_v48 = vmul.f32 %v6267_v45, %v16508_v47  ;;  %v16512_v45 = vld [vmem:[#allocation250_spill] sm:$0xff]  ;;  %v5013_v47 = vsel %vm834_vm0, %v4656_v25, 0.0  ;;  %6145 = vpow2.f32 %v10735_v1 }
 0x29f   : > { %16490 = vst [vmem:[#allocation319_spill] sm:$0xff] %v10880_v0  ;;  %v10892_v6 = vmul.f32 1.442695, %v16494_v8  ;;  %v5005_v8 = vsel %vm834_vm0, %v4648_v36, 0.0  ;;  %v10915_v56 = vpop.eup %6115  ;;  %v1968_v36 = vadd.f32 %v1967_v20, %v1966_v9  ;;  %v1973_v20 = vsel %vm834_vm0, %v10854_v16, 0.0  ;;  %v16509_v9 = vld [vmem:[#allocation289_spill] sm:$0xff] }
 0x2a0   : > { %16492 = vst [vmem:[#allocation320_spill] sm:$0xff] %v10883_v58  ;;  %v10922_v55 = vpop.eup %6117  ;;  %v5006_v41 = vadd.f32 %v5005_v8, %v5004_v33  ;;  %6147 = vpow2.f32 %v10738_v3 }
 0x2a1   : > { %16493 = vst [vmem:[#allocation321_spill] sm:$0xff] %v10888_v51  ;;  %v1970_v54 = vadd.f32 %v1969_v38, %v1968_v36  ;;  %v10939_v53 = vpop.eup %6119  ;;  %v6269_v38 = vld [vmem:[%s15014_s3 + $0xd] ss:$0 sm:$0xff]  ;;  %6149 = vpow2.f32 %v10741_v40  ;;  %v1987_v3 = vsel %vm834_vm0, %v10922_v55, 0.0 }
 0x2a2   : > { %16495 = vst [vmem:[#allocation322_spill] sm:$0xff] %v10892_v6  ;;  %v16499_v6 = vld [vmem:[#allocation246_spill] sm:$0xff]  ;;  %v4664_v8 = vmul.f32 %v6269_v38, %v10595_v10  ;;  %v10949_v36 = vpop.eup %6121  ;;  %v6270_v38 = vld [vmem:[%s15014_s3 + $0xe] ss:$0 sm:$0xff]  ;;  %6151 = vpow2.f32 %v10748_v27  ;;  %v1989_v27 = vsel %vm834_vm0, %v10939_v53, 0.0 }
 0x2a3   : > { %16497 = vst [vmem:[#allocation323_spill] sm:$0xff] %v10898_v13  ;;  %v10907_v58 = vmul.f32 1.442695, %v16499_v6  ;;  %v5007_v6 = vsel %vm834_vm0, %v4650_v24, 0.0  ;;  %v6268_v24 = vld [vmem:[%s15014_s3 + $0xc] ss:$0 sm:$0xff]  ;;  %6153 = vpow2.f32 %v10751_v46 }
 0x2a4   : > { %16502 = vst [vmem:[#allocation325_spill] sm:$0xff] %v10915_v56  ;;  %v4662_v18 = vmul.f32 %v6268_v24, %v16509_v9  ;;  %v5008_v33 = vadd.f32 %v5007_v6, %v5006_v41  ;;  %v1972_v24 = vadd.f32 %v1971_v30, %v1970_v54  ;;  %v16514_v6 = vld [vmem:[#allocation291_spill] sm:$0xff]  ;;  %v10963_v9 = vpop.eup %6123  ;;  %v10972_v54 = vmul.f32 %v6271_v29, %v16517_v19  ;;  %v6272_v29 = vld [vmem:[%s15014_s3 + $0x10] ss:$0 sm:$0xff] }
 0x2a5   : > { %16500 = vst [vmem:[#allocation324_spill] sm:$0xff] %v10907_v58  ;;  %v16506_v58 = vld [vmem:[#allocation248_spill] sm:$0xff]  ;;  %v4666_v41 = vmul.f32 %v6270_v38, %v16514_v6  ;;  %v1977_v38 = vsel %vm834_vm0, %v10870_v50, 0.0  ;;  %v5015_v19 = vsel %vm834_vm0, %v4658_v57, 0.0  ;;  %v16524_v57 = vld [vmem:[#allocation254_spill] sm:$0xff]  ;;  %v5021_v17 = vsel %vm834_vm0, %v4664_v8, 0.0 }
 0x2a6   : > { %16504 = vst [vmem:[#allocation326_spill] sm:$0xff] %v10919_v37  ;;  %v10926_v63 = vmul.f32 1.442695, %v16506_v58  ;;  %v5009_v58 = vsel %vm834_vm0, %v4652_v52, 0.0  ;;  %v10953_v52 = vmul.f32 1.442695, %v16512_v45  ;;  %v1974_v30 = vadd.f32 %v1973_v20, %v1972_v24 }
 0x2a7   : > { %16505 = vst [vmem:[#allocation327_spill] sm:$0xff] %v10922_v55  ;;  %v5010_v10 = vadd.f32 %v5009_v58, %v5008_v33  ;;  %v10966_v45 = vmul.f32 1.442695, %v16516_v11  ;;  %v16518_v58 = vld [vmem:[#allocation252_spill] sm:$0xff]  ;;  %v16520_v11 = vld [vmem:[#allocation293_spill] sm:$0xff]  ;;  %v5023_v1 = vsel %vm834_vm0, %v4666_v41, 0.0  ;;  %6155 = vpow2.f32 %v10754_v42 }
 0x2a8   : > { %16507 = vst [vmem:[#allocation328_spill] sm:$0xff] %v10926_v63  ;;  %v16511_v63 = vld [vmem:[#allocation249_spill] sm:$0xff]  ;;  %v10979_v33 = vmul.f32 1.442695, %v16518_v58  ;;  %v10988_v25 = vmul.f32 %v6272_v29, %v16520_v11  ;;  %v11008_v29 = vmul.f32 1.442695, %v16524_v57 }
 0x2a9   : > { %16510 = vst [vmem:[#allocation329_spill] sm:$0xff] %v10939_v53  ;;  %v10943_v37 = vmul.f32 1.442695, %v16511_v63  ;;  %v1975_v63 = vsel %vm834_vm0, %v10862_v35, 0.0  ;;  %v5012_v20 = vadd.f32 %v5011_v49, %v5010_v10  ;;  %v16522_v58 = vld [vmem:[#allocation253_spill] sm:$0xff]  ;;  %v1979_v10 = vsel %vm834_vm0, %v10880_v0, 0.0 }
 0x2aa   : > { %16513 = vst [vmem:[#allocation330_spill] sm:$0xff] %v10953_v52  ;;  %v10975_v52 = vpop.eup %6125  ;;  %v1976_v24 = vadd.f32 %v1975_v63, %v1974_v30  ;;  %v10994_v6 = vmul.f32 1.442695, %v16522_v58  ;;  %v11002_v63 = vmul.f32 %v6273_v21, %v10657_v62  ;;  %v5017_v11 = vsel %vm834_vm0, %v4660_v48, 0.0  ;;  %v16526_v21 = vld [vmem:[#allocation255_spill] sm:$0xff] }
 0x2ab   : > { %16515 = vst [vmem:[#allocation331_spill] sm:$0xff] %v10963_v9  ;;  %v10991_v23 = vpop.eup %6127  ;;  %v5014_v49 = vadd.f32 %v5013_v47, %v5012_v20  ;;  %v6274_v47 = vld [vmem:[%s15014_s3 + $0x12] ss:$0 sm:$0xff]  ;;  %v11023_v57 = vmul.f32 1.442695, %v16526_v21  ;;  %v5025_v40 = vsel %vm834_vm0, %v10972_v54, 0.0  ;;  %6157 = vpow2.f32 %v10759_v44 }
 0x2ac   : > { %16519 = vst [vmem:[#allocation332_spill] sm:$0xff] %v10979_v33  ;;  %v11004_v30 = vpop.eup %6129  ;;  %v1978_v58 = vadd.f32 %v1977_v38, %v1976_v24  ;;  %v1981_v33 = vsel %vm834_vm0, %v10888_v51, 0.0  ;;  %v11020_v20 = vmul.f32 %v6274_v47, %v10677_v5  ;;  %v6275_v48 = vld [vmem:[%s15014_s3 + $0x13] ss:$0 sm:$0xff]  ;;  %v5019_v24 = vsel %vm834_vm0, %v4662_v18, 0.0  ;;  %v16528_v47 = vld [vmem:[#allocation256_spill] sm:$0xff] }
 0x2ad   : > { %16521 = vst [vmem:[#allocation333_spill] sm:$0xff] %v10991_v23  ;;  %v5016_v4 = vadd.f32 %v5015_v19, %v5014_v49  ;;  %v11029_v43 = vmul.f32 %v6275_v48, %v10697_v34  ;;  %v11036_v5 = vmul.f32 1.442695, %v16528_v47  ;;  %v1983_v19 = vsel %vm834_vm0, %v10898_v13, 0.0  ;;  %v6276_v18 = vld [vmem:[%s15014_s3 + $0x14] ss:$0 sm:$0xff] }
 0x2ae   : > { %16523 = vst [vmem:[#allocation334_spill] sm:$0xff] %v10994_v6  ;;  %v11011_v6 = vpop.eup %6131  ;;  %v1980_v38 = vadd.f32 %v1979_v10, %v1978_v58  ;;  %v11047_v48 = vmul.f32 %v6276_v18, %v10713_v22  ;;  %v16530_v47 = vld [vmem:[#allocation257_spill] sm:$0xff]  ;;  %v5027_v46 = vsel %vm834_vm0, %v10988_v25, 0.0  ;;  %v6280_v42 = vld [vmem:[%s15014_s3 + $0x18] ss:$0 sm:$0xff]  ;;  %6159 = vpow2.f32 %v10762_v59 }
 0x2af   : > { %16525 = vst [vmem:[#allocation335_spill] sm:$0xff] %v11011_v6  ;;  %v11032_v62 = vpop.eup %6133  ;;  %v5018_v58 = vadd.f32 %v5017_v11, %v5016_v4  ;;  %v11052_v21 = vmul.f32 1.442695, %v16530_v47  ;;  %v1985_v11 = vsel %vm834_vm0, %v10915_v56, 0.0  ;;  %v16533_v47 = vld [vmem:[#allocation258_spill] sm:$0xff]  ;;  %6161 = vpow2.f32 %v10774_v32 }
 0x2b0   : > { %16527 = vst [vmem:[#allocation336_spill] sm:$0xff] %v11032_v62  ;;  %v11040_v10 = vpop.eup %6135  ;;  %v1982_v49 = vadd.f32 %v1981_v33, %v1980_v38  ;;  %v6277_v38 = vld [vmem:[%s15014_s3 + $0x15] ss:$0 sm:$0xff]  ;;  %v6279_v54 = vld [vmem:[%s15014_s3 + $0x17] ss:$0 sm:$0xff]  ;;  %6163 = vpow2.f32 %v10777_v39 }
 0x2b1   : > { %16529 = vst [vmem:[#allocation337_spill] sm:$0xff] %v11040_v10  ;;  %v5020_v4 = vadd.f32 %v5019_v24, %v5018_v58  ;;  %v11056_v14 = vpop.eup %6137  ;;  %v11063_v8 = vmul.f32 %v6277_v38, %v10729_v28  ;;  %v11070_v24 = vmul.f32 1.442695, %v16533_v47  ;;  %v16536_v47 = vld [vmem:[#allocation259_spill] sm:$0xff]  ;;  %v6281_v44 = vld [vmem:[%s15014_s3 + $0x19] ss:$0 sm:$0xff]  ;;  %6165 = vpow2.f32 %v10783_v61 }
 0x2b2   : > { %16531 = vst [vmem:[#allocation338_spill] sm:$0xff] %v11056_v14  ;;  %v1984_v33 = vadd.f32 %v1983_v19, %v1982_v49  ;;  %v11066_v18 = vpop.eup %6139  ;;  %v6278_v49 = vld [vmem:[%s15014_s3 + $0x16] ss:$0 sm:$0xff]  ;;  %v6282_v59 = vld [vmem:[%s15014_s3 + $0x1a] ss:$0 sm:$0xff] }
 0x2b3   : > { %16532 = vst [vmem:[#allocation339_spill] sm:$0xff] %v11066_v18  ;;  %v5022_v19 = vadd.f32 %v5021_v17, %v5020_v4  ;;  %v11079_v41 = vmul.f32 %v6278_v49, %v10745_v60  ;;  %v11083_v38 = vpop.eup %6141  ;;  %v6283_v32 = vld [vmem:[%s15014_s3 + $0x1b] ss:$0 sm:$0xff]  ;;  %v6284_v39 = vld [vmem:[%s15014_s3 + $0x1c] ss:$0 sm:$0xff] }
 0x2b4   : > { %16534 = vst [vmem:[#allocation340_spill] sm:$0xff] %v11070_v24  ;;  %v1986_v58 = vadd.f32 %v1985_v11, %v1984_v33  ;;  %v11087_v24 = vmul.f32 1.442695, %v16536_v47  ;;  %v11091_v11 = vpop.eup %6143  ;;  %v11098_v33 = vmul.f32 %v6279_v54, %v10756_v15  ;;  %v11120_v54 = vmul.f32 %v6281_v44, %v10779_v26  ;;  %v6285_v61 = vld [vmem:[%s15014_s3 + $0x1d] ss:$0 sm:$0xff] }
 0x2b5   : > { %16535 = vst [vmem:[#allocation341_spill] sm:$0xff] %v11083_v38  ;;  %v5024_v17 = vadd.f32 %v5023_v1, %v5022_v19  ;;  %v11102_v49 = vpop.eup %6145  ;;  %v1991_v1 = vsel %vm834_vm0, %v10949_v36, 0.0  ;;  %v5029_v47 = vsel %vm834_vm0, %v11002_v63, 0.0  ;;  %v5031_v44 = vsel %vm834_vm0, %v11020_v20, 0.0 }
 0x2b6   : > { %16537 = vst [vmem:[#allocation342_spill] sm:$0xff] %v11087_v24  ;;  %v1988_v4 = vadd.f32 %v1987_v3, %v1986_v58  ;;  %v11111_v3 = vmul.f32 %v6280_v42, %v10770_v12  ;;  %v11113_v58 = vpop.eup %6147  ;;  %v11142_v42 = vmul.f32 %v6283_v32, %v10799_v2  ;;  %v16546_v32 = vld [vmem:[#allocation304_spill] sm:$0xff]  ;;  %v11164_v2 = vmul.f32 %v6285_v61, %v10835_v31  ;;  %v16551_v31 = vld [vmem:[#allocation307_spill] sm:$0xff] }
 0x2b7   : > { %16538 = vst [vmem:[#allocation343_spill] sm:$0xff] %v11091_v11  ;;  %v5026_v19 = vadd.f32 %v5025_v40, %v5024_v17  ;;  %v11124_v24 = vpop.eup %6149  ;;  %v1993_v40 = vsel %vm834_vm0, %v10963_v9, 0.0  ;;  %6167 = vpow2.f32 %v16546_v32  ;;  %v5035_v15 = vsel %vm834_vm0, %v11047_v48, 0.0 }
 0x2b8   : > { %16539 = vst [vmem:[#allocation344_spill] sm:$0xff] %v11102_v49  ;;  %v1990_v25 = vadd.f32 %v1989_v27, %v1988_v4  ;;  %v11133_v27 = vmul.f32 %v6282_v59, %v10791_v7  ;;  %v11135_v4 = vpop.eup %6151  ;;  %v5033_v7 = vsel %vm834_vm0, %v11029_v43, 0.0 }
 0x2b9   : > { %16540 = vst [vmem:[#allocation345_spill] sm:$0xff] %v11113_v58  ;;  %v5028_v17 = vadd.f32 %v5027_v46, %v5026_v19  ;;  %v11146_v26 = vpop.eup %6153  ;;  %v1995_v46 = vsel %vm834_vm0, %v10975_v52, 0.0 }
 0x2ba   : > { %16541 = vst [vmem:[#allocation346_spill] sm:$0xff] %v11124_v24  ;;  %v1992_v63 = vadd.f32 %v1991_v1, %v1990_v25  ;;  %v16544_v1 = vld [vmem:[#allocation309_spill] sm:$0xff]  ;;  %v11157_v59 = vpop.eup %6155 }
 0x2bb   : > { %16542 = vst [vmem:[#allocation347_spill] sm:$0xff] %v11135_v4  ;;  %v11155_v19 = vmul.f32 %v6284_v39, %v16544_v1  ;;  %v5030_v25 = vadd.f32 %v5029_v47, %v5028_v17  ;;  %v11168_v12 = vpop.eup %6157  ;;  %v16548_v39 = vld [vmem:[#allocation306_spill] sm:$0xff]  ;;  %v1997_v47 = vsel %vm834_vm0, %v10991_v23, 0.0  ;;  %v16549_v17 = vld [vmem:[#allocation312_spill] sm:$0xff] }
 0x2bc   : > { %16543 = vst [vmem:[#allocation348_spill] sm:$0xff] %v11146_v26  ;;  %v1994_v20 = vadd.f32 %v1993_v40, %v1992_v63  ;;  %6169 = vpow2.f32 %v16548_v39  ;;  %v6286_v40 = vld [vmem:[%s15014_s3 + $0x1e] ss:$0 sm:$0xff]  ;;  %v11179_v61 = vpop.eup %6159  ;;  %v6287_v39 = vld [vmem:[%s15014_s3 + $0x1f] ss:$0 sm:$0xff] }
 0x2bd   : > { %16545 = vst [vmem:[#allocation349_spill] sm:$0xff] %v11157_v59  ;;  %v11177_v63 = vmul.f32 %v6286_v40, %v16549_v17  ;;  %v5032_v32 = vadd.f32 %v5031_v44, %v5030_v25  ;;  %6171 = vpow2.f32 %v16551_v31  ;;  %v11186_v1 = vmul.f32 %v6287_v39, %v10854_v16  ;;  %v11190_v60 = vpop.eup %6161  ;;  %v16553_v40 = vld [vmem:[#allocation308_spill] sm:$0xff]  ;;  %v6288_v31 = vld [vmem:[%s15014_s3 + $0x20] ss:$0 sm:$0xff]  ;;  %v16555_v39 = vld [vmem:[#allocation310_spill] sm:$0xff] }
 0x2be   : > { %16547 = vst [vmem:[#allocation304_spill] sm:$0xff] %v11168_v12  ;;  %v1996_v43 = vadd.f32 %v1995_v46, %v1994_v20  ;;  %6173 = vpow2.f32 %v16553_v40  ;;  %v1999_v44 = vsel %vm834_vm0, %v11004_v30, 0.0  ;;  %v11199_v46 = vmul.f32 %v6288_v31, %v10862_v35  ;;  %v11201_v20 = vpop.eup %6163  ;;  %v6289_v40 = vld [vmem:[%s15014_s3 + $0x21] ss:$0 sm:$0xff]  ;;  %v16557_v31 = vld [vmem:[#allocation313_spill] sm:$0xff] }
 0x2bf   : > { %16550 = vst [vmem:[#allocation306_spill] sm:$0xff] %v11179_v61  ;;  %v5034_v25 = vadd.f32 %v5033_v7, %v5032_v32  ;;  %6175 = vpow2.f32 %v16555_v39  ;;  %v11208_v16 = vmul.f32 %v6289_v40, %v10870_v50  ;;  %v5037_v17 = vsel %vm834_vm0, %v11063_v8, 0.0  ;;  %v11212_v28 = vpop.eup %6165  ;;  %v16559_v40 = vld [vmem:[#allocation315_spill] sm:$0xff] }
 0x2c0   : > { %16552 = vst [vmem:[#allocation307_spill] sm:$0xff] %v11190_v60  ;;  %v1998_v48 = vadd.f32 %v1997_v47, %v1996_v43  ;;  %6177 = vpow2.f32 %v16557_v31  ;;  %v2001_v7 = vsel %vm834_vm0, %v11011_v6, 0.0  ;;  %v6290_v47 = vld [vmem:[%s15014_s3 + $0x22] ss:$0 sm:$0xff]  ;;  %v11223_v39 = vpop.eup %6167  ;;  %v6291_v31 = vld [vmem:[%s15014_s3 + $0x23] ss:$0 sm:$0xff] }
 0x2c1   : > { %16554 = vst [vmem:[#allocation308_spill] sm:$0xff] %v11201_v20  ;;  %v11221_v32 = vmul.f32 %v6290_v47, %v10880_v0  ;;  %v5036_v43 = vadd.f32 %v5035_v15, %v5034_v25  ;;  %6179 = vpow2.f32 %v16559_v40  ;;  %v11230_v50 = vmul.f32 %v6291_v31, %v10888_v51  ;;  %v16561_v47 = vld [vmem:[#allocation318_spill] sm:$0xff]  ;;  %v16563_v31 = vld [vmem:[#allocation320_spill] sm:$0xff] }
 0x2c2   : > { %16556 = vst [vmem:[#allocation310_spill] sm:$0xff] %v11212_v28  ;;  %v2000_v8 = vadd.f32 %v1999_v44, %v1998_v48  ;;  %v5039_v35 = vsel %vm834_vm0, %v11079_v41, 0.0  ;;  %v11234_v22 = vpop.eup %6169  ;;  %6181 = vpow2.f32 %v16561_v47  ;;  %v2003_v15 = vsel %vm834_vm0, %v11032_v62, 0.0  ;;  %v6292_v44 = vld [vmem:[%s15014_s3 + $0x24] ss:$0 sm:$0xff] }
 0x2c3   : > { %16558 = vst [vmem:[#allocation313_spill] sm:$0xff] %v11223_v39  ;;  %v11243_v25 = vmul.f32 %v6292_v44, %v10898_v13  ;;  %v5038_v48 = vadd.f32 %v5037_v17, %v5036_v43  ;;  %v11245_v40 = vpop.eup %6171  ;;  %6183 = vpow2.f32 %v16563_v31  ;;  %v6293_v47 = vld [vmem:[%s15014_s3 + $0x25] ss:$0 sm:$0xff]  ;;  %v5041_v0 = vsel %vm834_vm0, %v11098_v33, 0.0  ;;  %v6295_v31 = vld [vmem:[%s15013_s2 + $0x1] ss:$0 sm:$0xff] }
 0x2c4   : > { %16560 = vst [vmem:[#allocation315_spill] sm:$0xff] %v11234_v22  ;;  %v2002_v41 = vadd.f32 %v2001_v7, %v2000_v8  ;;  %v11252_v51 = vmul.f32 %v6293_v47, %v10915_v56  ;;  %v11256_v62 = vpop.eup %6173  ;;  %v2005_v17 = vsel %vm834_vm0, %v11040_v10, 0.0  ;;  %v6294_v7 = vld [vmem:[%s15013_s2] ss:$0 sm:$0xff]  ;;  %v16565_v8 = vld [vmem:[#allocation268_spill] sm:$0xff]  ;;  %v16566_v47 = vld [vmem:[#allocation270_spill] sm:$0xff] }
 0x2c5   : > { %16562 = vst [vmem:[#allocation318_spill] sm:$0xff] %v11245_v40  ;;  %v5040_v43 = vadd.f32 %v5039_v35, %v5038_v48  ;;  %v3830_v44 = vmul.f32 %v6294_v7, %v16565_v8  ;;  %v3832_v56 = vmul.f32 %v6295_v31, %v16566_v47  ;;  %v11268_v13 = vpop.eup %6175  ;;  %v16568_v33 = vld [vmem:[#allocation322_spill] sm:$0xff]  ;;  %v6296_v35 = vld [vmem:[%s15014_s3 + $0x26] ss:$0 sm:$0xff]  ;;  %v5043_v7 = vsel %vm834_vm0, %v11111_v3, 0.0  ;;  %v16570_v10 = vld [vmem:[#allocation324_spill] sm:$0xff] }
 0x2c6   : > { %16564 = vst [vmem:[#allocation320_spill] sm:$0xff] %v11256_v62  ;;  %6185 = vpow2.f32 %v16568_v33  ;;  %v2004_v62 = vadd.f32 %v2003_v15, %v2002_v41  ;;  %v11275_v48 = vmul.f32 %v6296_v35, %v10922_v55  ;;  %v11279_v8 = vpop.eup %6177  ;;  %v2007_v31 = vsel %vm834_vm0, %v11056_v14, 0.0  ;;  %v6297_v15 = vld [vmem:[%s15013_s2 + $0x2] ss:$0 sm:$0xff] }
 0x2c7   : > { %16567 = vst [vmem:[#allocation350_spill] sm:$0xff] %v11268_v13  ;;  %6187 = vpow2.f32 %v16570_v10  ;;  %v5042_v47 = vadd.f32 %v5041_v0, %v5040_v43  ;;  %v16571_v41 = vld [vmem:[#allocation271_spill] sm:$0xff]  ;;  %v11288_v13 = vpop.eup %6179  ;;  %v2009_v3 = vsel %vm834_vm0, %v11066_v18, 0.0  ;;  %v5045_v0 = vsel %vm834_vm0, %v11120_v54, 0.0 }
 0x2c8   : > { %16569 = vst [vmem:[#allocation322_spill] sm:$0xff] %v11279_v8  ;;  %v3834_v33 = vmul.f32 %v6297_v15, %v16571_v41  ;;  %v2006_v35 = vadd.f32 %v2005_v17, %v2004_v62  ;;  %v6298_v10 = vld [vmem:[%s15014_s3 + $0x27] ss:$0 sm:$0xff]  ;;  %v11300_v43 = vpop.eup %6181  ;;  %v6299_v62 = vld [vmem:[%s15013_s2 + $0x3] ss:$0 sm:$0xff]  ;;  %v16574_v17 = vld [vmem:[#allocation273_spill] sm:$0xff] }
 0x2c9   : > { %16572 = vst [vmem:[#allocation324_spill] sm:$0xff] %v11288_v13  ;;  %v11296_v55 = vmul.f32 %v6298_v10, %v10939_v53  ;;  %v5044_v14 = vadd.f32 %v5043_v7, %v5042_v47  ;;  %v3836_v15 = vmul.f32 %v6299_v62, %v16574_v17  ;;  %v4188_v41 = vsel %vm834_vm0, %v3830_v44, 0.0  ;;  %v11308_v13 = vpop.eup %6183  ;;  %v16576_v10 = vld [vmem:[#allocation326_spill] sm:$0xff]  ;;  %v6300_v62 = vld [vmem:[%s15013_s2 + $0x4] ss:$0 sm:$0xff] }
 0x2ca   : > { %16573 = vst [vmem:[#allocation351_spill] sm:$0xff] %v11300_v43  ;;  %v4189_v18 = vsel %vm834_vm0, %v3832_v56, 0.0  ;;  %6189 = vpow2.f32 %v16576_v10  ;;  %v2008_v53 = vadd.f32 %v2007_v31, %v2006_v35  ;;  %v2011_v54 = vsel %vm834_vm0, %v11083_v38, 0.0  ;;  %v16577_v17 = vld [vmem:[#allocation275_spill] sm:$0xff]  ;;  %v16579_v10 = vld [vmem:[#allocation328_spill] sm:$0xff] }
 0x2cb   : > { %16575 = vst [vmem:[#allocation352_spill] sm:$0xff] %v11308_v13  ;;  %v5047_v47 = vsel %vm834_vm0, %v11133_v27, 0.0  ;;  %v5046_v7 = vadd.f32 %v5045_v0, %v5044_v14  ;;  %v3838_v44 = vmul.f32 %v6300_v62, %v16577_v17  ;;  %v4190_v43 = vadd.f32 %v4189_v18, %v4188_v41  ;;  %v6301_v18 = vld [vmem:[%s15013_s2 + $0x5] ss:$0 sm:$0xff]  ;;  %v16581_v41 = vld [vmem:[#allocation278_spill] sm:$0xff] }
 0x2cc   : > { %v4191_v56 = vsel %vm834_vm0, %v3834_v33, 0.0  ;;  %v11320_v13 = vpop.eup %6185  ;;  %6191 = vpow2.f32 %v16579_v10  ;;  %v2010_v31 = vadd.f32 %v2009_v3, %v2008_v53  ;;  %v2013_v35 = vsel %vm834_vm0, %v11091_v11, 0.0 }
 0x2cd   : > { %16578 = vst [vmem:[#allocation326_spill] sm:$0xff] %v11320_v13  ;;  %v5049_v14 = vsel %vm834_vm0, %v11142_v42, 0.0  ;;  %v11327_v27 = vpop.eup %6187  ;;  %v5048_v0 = vadd.f32 %v5047_v47, %v5046_v7  ;;  %v3840_v33 = vmul.f32 %v6301_v18, %v16581_v41  ;;  %v4192_v62 = vadd.f32 %v4191_v56, %v4190_v43  ;;  %v6302_v42 = vld [vmem:[%s15014_s3 + $0x28] ss:$0 sm:$0xff]  ;;  %v6303_v43 = vld [vmem:[%s15013_s2 + $0x6] ss:$0 sm:$0xff] }
 0x2ce   : > { %16580 = vst [vmem:[#allocation328_spill] sm:$0xff] %v11327_v27  ;;  %v4193_v17 = vsel %vm834_vm0, %v3836_v15, 0.0  ;;  %v2012_v10 = vadd.f32 %v2011_v54, %v2010_v31  ;;  %v2015_v53 = vsel %vm834_vm0, %v11102_v49, 0.0  ;;  %v11340_v3 = vmul.f32 %v6302_v42, %v10949_v36  ;;  %v16582_v15 = vld [vmem:[#allocation283_spill] sm:$0xff] }
 0x2cf   : > { %v5051_v47 = vsel %vm834_vm0, %v11155_v19, 0.0  ;;  %v5050_v7 = vadd.f32 %v5049_v14, %v5048_v0  ;;  %v3842_v54 = vmul.f32 %v6303_v43, %v16582_v15  ;;  %v4194_v56 = vadd.f32 %v4193_v17, %v4192_v62  ;;  %v6304_v0 = vld [vmem:[%s15013_s2 + $0x7] ss:$0 sm:$0xff]  ;;  %v16584_v43 = vld [vmem:[#allocation284_spill] sm:$0xff] }
 0x2d0   : > { %v4195_v31 = vsel %vm834_vm0, %v3838_v44, 0.0  ;;  %v11349_v18 = vpop.eup %6189  ;;  %6193 = vpow2.f32 %v10943_v37  ;;  %v2014_v41 = vadd.f32 %v2013_v35, %v2012_v10  ;;  %v2017_v42 = vsel %vm834_vm0, %v11113_v58, 0.0  ;;  %v16586_v37 = vld [vmem:[#allocation330_spill] sm:$0xff] }
 0x2d1   : > { %16583 = vst [vmem:[#allocation353_spill] sm:$0xff] %v11349_v18  ;;  %v5053_v19 = vsel %vm834_vm0, %v11164_v2, 0.0  ;;  %v5052_v14 = vadd.f32 %v5051_v47, %v5050_v7  ;;  %v3844_v17 = vmul.f32 %v6304_v0, %v16584_v43  ;;  %v4196_v62 = vadd.f32 %v4195_v31, %v4194_v56  ;;  %v6305_v7 = vld [vmem:[%s15013_s2 + $0x8] ss:$0 sm:$0xff]  ;;  %v16587_v0 = vld [vmem:[#allocation285_spill] sm:$0xff] }
 0x2d2   : > { %v4197_v44 = vsel %vm834_vm0, %v3840_v33, 0.0  ;;  %v11361_v15 = vpop.eup %6191  ;;  %6195 = vpow2.f32 %v16586_v37  ;;  %v2016_v35 = vadd.f32 %v2015_v53, %v2014_v41  ;;  %v2019_v10 = vsel %vm834_vm0, %v11124_v24, 0.0  ;;  %v6306_v53 = vld [vmem:[%s15014_s3 + $0x29] ss:$0 sm:$0xff] }
 0x2d3   : > { %16585 = vst [vmem:[#allocation354_spill] sm:$0xff] %v11361_v15  ;;  %v5055_v2 = vsel %vm834_vm0, %v11177_v63, 0.0  ;;  %v5054_v47 = vadd.f32 %v5053_v19, %v5052_v14  ;;  %v3846_v56 = vmul.f32 %v6305_v7, %v16587_v0  ;;  %v4198_v31 = vadd.f32 %v4197_v44, %v4196_v62  ;;  %v6307_v62 = vld [vmem:[%s15013_s2 + $0x9] ss:$0 sm:$0xff] }
 0x2d4   : > { %v4199_v33 = vsel %vm834_vm0, %v3842_v54, 0.0  ;;  %v2018_v43 = vadd.f32 %v2017_v42, %v2016_v35  ;;  %v2021_v41 = vsel %vm834_vm0, %v11135_v4, 0.0  ;;  %v11379_v63 = vmul.f32 %v6306_v53, %v10963_v9  ;;  %v16588_v54 = vld [vmem:[#allocation286_spill] sm:$0xff] }
 0x2d5   : > { %v5057_v19 = vsel %vm834_vm0, %v11186_v1, 0.0  ;;  %v5056_v14 = vadd.f32 %v5055_v2, %v5054_v47  ;;  %v3848_v42 = vmul.f32 %v6307_v62, %v16588_v54  ;;  %v4200_v44 = vadd.f32 %v4199_v33, %v4198_v31  ;;  %v6308_v47 = vld [vmem:[%s15013_s2 + $0xa] ss:$0 sm:$0xff]  ;;  %v16590_v62 = vld [vmem:[#allocation287_spill] sm:$0xff] }
 0x2d6   : > { %v4201_v37 = vsel %vm834_vm0, %v3844_v17, 0.0  ;;  %v11388_v35 = vpop.eup %6193  ;;  %6197 = vpow2.f32 %v10966_v45  ;;  %v2020_v7 = vadd.f32 %v2019_v10, %v2018_v43  ;;  %v2023_v53 = vsel %vm834_vm0, %v11146_v26, 0.0  ;;  %v16592_v45 = vld [vmem:[#allocation332_spill] sm:$0xff] }
 0x2d7   : > { %16589 = vst [vmem:[#allocation330_spill] sm:$0xff] %v11388_v35  ;;  %v5059_v1 = vsel %vm834_vm0, %v11199_v46, 0.0  ;;  %v5058_v2 = vadd.f32 %v5057_v19, %v5056_v14  ;;  %v3850_v31 = vmul.f32 %v6308_v47, %v16590_v62  ;;  %v4202_v33 = vadd.f32 %v4201_v37, %v4200_v44  ;;  %v6309_v14 = vld [vmem:[%s15013_s2 + $0xb] ss:$0 sm:$0xff] }
 0x2d8   : > { %v4203_v17 = vsel %vm834_vm0, %v3846_v56, 0.0  ;;  %v11400_v54 = vpop.eup %6195  ;;  %6199 = vpow2.f32 %v16592_v45  ;;  %v2022_v43 = vadd.f32 %v2021_v41, %v2020_v7  ;;  %v2025_v10 = vsel %vm834_vm0, %v11157_v59, 0.0  ;;  %v16593_v47 = vld [vmem:[#allocation288_spill] sm:$0xff] }
 0x2d9   : > { %16591 = vst [vmem:[#allocation355_spill] sm:$0xff] %v11400_v54  ;;  %v5061_v46 = vsel %vm834_vm0, %v11208_v16, 0.0  ;;  %v5060_v19 = vadd.f32 %v5059_v1, %v5058_v2  ;;  %v3852_v44 = vmul.f32 %v6309_v14, %v16593_v47  ;;  %v4204_v37 = vadd.f32 %v4203_v17, %v4202_v33  ;;  %v6310_v7 = vld [vmem:[%s15014_s3 + $0x2a] ss:$0 sm:$0xff]  ;;  %v6311_v33 = vld [vmem:[%s15013_s2 + $0xc] ss:$0 sm:$0xff] }
 0x2da   : > { %v4205_v56 = vsel %vm834_vm0, %v3848_v42, 0.0  ;;  %v2024_v62 = vadd.f32 %v2023_v53, %v2022_v43  ;;  %v2027_v41 = vsel %vm834_vm0, %v11168_v12, 0.0  ;;  %v11418_v16 = vmul.f32 %v6310_v7, %v10975_v52  ;;  %v16594_v42 = vld [vmem:[#allocation289_spill] sm:$0xff]  ;;  %v16596_v14 = vld [vmem:[#allocation334_spill] sm:$0xff] }
 0x2db   : > { %v5063_v1 = vsel %vm834_vm0, %v11221_v32, 0.0  ;;  %v5062_v2 = vadd.f32 %v5061_v46, %v5060_v19  ;;  %v3854_v53 = vmul.f32 %v6311_v33, %v16594_v42  ;;  %v4206_v17 = vadd.f32 %v4205_v56, %v4204_v37  ;;  %v6312_v19 = vld [vmem:[%s15013_s2 + $0xd] ss:$0 sm:$0xff]  ;;  %v16597_v33 = vld [vmem:[#allocation290_spill] sm:$0xff] }
 0x2dc   : > { %v4207_v45 = vsel %vm834_vm0, %v3850_v31, 0.0  ;;  %v11427_v43 = vpop.eup %6197  ;;  %6201 = vpow2.f32 %v16596_v14  ;;  %v2026_v47 = vadd.f32 %v2025_v10, %v2024_v62  ;;  %v2029_v7 = vsel %vm834_vm0, %v11179_v61, 0.0  ;;  %v16599_v14 = vld [vmem:[#allocation291_spill] sm:$0xff] }
 0x2dd   : > { %16595 = vst [vmem:[#allocation332_spill] sm:$0xff] %v11427_v43  ;;  %v5065_v32 = vsel %vm834_vm0, %v11230_v50, 0.0  ;;  %v5064_v46 = vadd.f32 %v5063_v1, %v5062_v2  ;;  %v3856_v37 = vmul.f32 %v6312_v19, %v16597_v33  ;;  %v4208_v56 = vadd.f32 %v4207_v45, %v4206_v17  ;;  %v6313_v2 = vld [vmem:[%s15013_s2 + $0xe] ss:$0 sm:$0xff] }
 0x2de   : > { %v4209_v31 = vsel %vm834_vm0, %v3852_v44, 0.0  ;;  %v11439_v42 = vpop.eup %6199  ;;  %6203 = vpow2.f32 %v11008_v29  ;;  %v2028_v62 = vadd.f32 %v2027_v41, %v2026_v47  ;;  %v2031_v10 = vsel %vm834_vm0, %v11190_v60, 0.0  ;;  %v6314_v29 = vld [vmem:[%s15014_s3 + $0x2b] ss:$0 sm:$0xff]  ;;  %v6315_v41 = vld [vmem:[%s15013_s2 + $0xf] ss:$0 sm:$0xff] }
 0x2df   : > { %16598 = vst [vmem:[#allocation334_spill] sm:$0xff] %v11439_v42  ;;  %v5067_v50 = vsel %vm834_vm0, %v11243_v25, 0.0  ;;  %v5066_v1 = vadd.f32 %v5065_v32, %v5064_v46  ;;  %v3858_v17 = vmul.f32 %v6313_v2, %v16599_v14  ;;  %v4210_v45 = vadd.f32 %v4209_v31, %v4208_v56  ;;  %v16600_v32 = vld [vmem:[#allocation292_spill] sm:$0xff]  ;;  %v16612_v14 = vld [vmem:[#allocation350_spill] sm:$0xff] }
 0x2e0   : > { %v4211_v44 = vsel %vm834_vm0, %v3854_v53, 0.0  ;;  %v2030_v19 = vadd.f32 %v2029_v7, %v2028_v62  ;;  %v4724_v47 = vmul.f32 %v6314_v29, %v10991_v23  ;;  %v5069_v25 = vsel %vm834_vm0, %v11252_v51, 0.0  ;;  %v6316_v29 = vld [vmem:[%s15013_s2 + $0x10] ss:$0 sm:$0xff] }
 0x2e1   : > { %v3860_v46 = vmul.f32 %v6315_v41, %v16600_v32  ;;  %v2033_v56 = vsel %vm834_vm0, %v11201_v20, 0.0  ;;  %v5068_v53 = vadd.f32 %v5067_v50, %v5066_v1  ;;  %v4212_v7 = vadd.f32 %v4211_v44, %v4210_v45  ;;  %v16602_v41 = vld [vmem:[#allocation293_spill] sm:$0xff] }
 0x2e2   : > { %v4213_v31 = vsel %vm834_vm0, %v3856_v37, 0.0  ;;  %v11464_v62 = vpop.eup %6201  ;;  %6205 = vpow2.f32 %v11023_v57  ;;  %v2032_v2 = vadd.f32 %v2031_v10, %v2030_v19  ;;  %v5071_v51 = vsel %vm834_vm0, %v11275_v48, 0.0  ;;  %v6317_v10 = vld [vmem:[%s15013_s2 + $0x11] ss:$0 sm:$0xff]  ;;  %v16604_v19 = vld [vmem:[#allocation294_spill] sm:$0xff] }
 0x2e3   : > { %16601 = vst [vmem:[#allocation356_spill] sm:$0xff] %v11464_v62  ;;  %v3862_v32 = vmul.f32 %v6316_v29, %v16602_v41  ;;  %v2035_v50 = vsel %vm834_vm0, %v11212_v28, 0.0  ;;  %v5070_v1 = vadd.f32 %v5069_v25, %v5068_v53  ;;  %v4214_v45 = vadd.f32 %v4213_v31, %v4212_v7 }
 0x2e4   : > { %v4215_v37 = vsel %vm834_vm0, %v3858_v17, 0.0  ;;  %v11476_v44 = vpop.eup %6203  ;;  %6207 = vpow2.f32 %v11036_v5  ;;  %v2034_v57 = vadd.f32 %v2033_v56, %v2032_v2  ;;  %v5073_v48 = vsel %vm834_vm0, %v11296_v55, 0.0  ;;  %v6318_v5 = vld [vmem:[%s15014_s3 + $0x2c] ss:$0 sm:$0xff]  ;;  %v6319_v2 = vld [vmem:[%s15013_s2 + $0x12] ss:$0 sm:$0xff] }
 0x2e5   : > { %16603 = vst [vmem:[#allocation357_spill] sm:$0xff] %v11476_v44  ;;  %v3864_v29 = vmul.f32 %v6317_v10, %v16604_v19  ;;  %v2037_v25 = vsel %vm834_vm0, %v11223_v39, 0.0  ;;  %v5072_v53 = vadd.f32 %v5071_v51, %v5070_v1  ;;  %v4216_v7 = vadd.f32 %v4215_v37, %v4214_v45  ;;  %v16605_v10 = vld [vmem:[#allocation295_spill] sm:$0xff] }
 0x2e6   : > { %v4217_v17 = vsel %vm834_vm0, %v3860_v46, 0.0  ;;  %v2036_v31 = vadd.f32 %v2035_v50, %v2034_v57  ;;  %v4726_v55 = vmul.f32 %v6318_v5, %v11004_v30  ;;  %v5075_v56 = vsel %vm834_vm0, %v11340_v3, 0.0  ;;  %v6320_v57 = vld [vmem:[%s15013_s2 + $0x13] ss:$0 sm:$0xff] }
 0x2e7   : > { %v3866_v19 = vmul.f32 %v6319_v2, %v16605_v10  ;;  %v2039_v51 = vsel %vm834_vm0, %v11234_v22, 0.0  ;;  %v5074_v46 = vadd.f32 %v5073_v48, %v5072_v53  ;;  %v4218_v50 = vadd.f32 %v4217_v17, %v4216_v7  ;;  %v6322_v2 = vld [vmem:[%s15013_s2 + $0x14] ss:$0 sm:$0xff] }
 0x2e8   : > { %v4219_v1 = vsel %vm834_vm0, %v3862_v32, 0.0  ;;  %v11501_v45 = vpop.eup %6205  ;;  %6209 = vpow2.f32 %v11052_v21  ;;  %v2038_v37 = vadd.f32 %v2037_v25, %v2036_v31  ;;  %v5077_v3 = vsel %vm834_vm0, %v11379_v63, 0.0  ;;  %v6321_v63 = vld [vmem:[%s15014_s3 + $0x2d] ss:$0 sm:$0xff] }
 0x2e9   : > { %16606 = vst [vmem:[#allocation358_spill] sm:$0xff] %v11501_v45  ;;  %v3868_v5 = vmul.f32 %v6320_v57, %v10697_v34  ;;  %v2041_v48 = vsel %vm834_vm0, %v11245_v40, 0.0  ;;  %v5076_v53 = vadd.f32 %v5075_v56, %v5074_v46  ;;  %v4220_v7 = vadd.f32 %v4219_v1, %v4218_v50  ;;  %v16608_v56 = vld [vmem:[#allocation297_spill] sm:$0xff]  ;;  %v16609_v50 = vld [vmem:[#allocation320_spill] sm:$0xff] }
 0x2ea   : > { %v4221_v32 = vsel %vm834_vm0, %v3864_v29, 0.0  ;;  %v11513_v17 = vpop.eup %6207  ;;  %v2040_v21 = vadd.f32 %v2039_v51, %v2038_v37  ;;  %v4728_v25 = vmul.f32 %v6321_v63, %v11011_v6  ;;  %v5079_v31 = vsel %vm834_vm0, %v11418_v16, 0.0  ;;  %v6323_v63 = vld [vmem:[%s15014_s3 + $0x2e] ss:$0 sm:$0xff]  ;;  %v16621_v6 = vld [vmem:[#allocation351_spill] sm:$0xff] }
 0x2eb   : > { %16607 = vst [vmem:[#allocation359_spill] sm:$0xff] %v11513_v17  ;;  %v3870_v46 = vmul.f32 %v6322_v2, %v16608_v56  ;;  %v2043_v29 = vsel %vm834_vm0, %v16609_v50, 0.0  ;;  %v5078_v1 = vadd.f32 %v5077_v3, %v5076_v53  ;;  %v4222_v51 = vadd.f32 %v4221_v32, %v4220_v7  ;;  %v16610_v34 = vld [vmem:[#allocation336_spill] sm:$0xff]  ;;  %v6324_v2 = vld [vmem:[%s15013_s2 + $0x15] ss:$0 sm:$0xff]  ;;  %v16611_v56 = vld [vmem:[#allocation298_spill] sm:$0xff] }
 0x2ec   : > { %v4223_v37 = vsel %vm834_vm0, %v3866_v19, 0.0  ;;  %v2042_v57 = vadd.f32 %v2041_v48, %v2040_v21  ;;  %v4730_v16 = vmul.f32 %v6323_v63, %v16610_v34  ;;  %v5081_v10 = vsel %vm834_vm0, %v4724_v47, 0.0  ;;  %v6325_v47 = vld [vmem:[%s15014_s3 + $0x2f] ss:$0 sm:$0xff]  ;;  %v16614_v21 = vld [vmem:[#allocation337_spill] sm:$0xff] }
 0x2ed   : > { %v3872_v41 = vmul.f32 %v6324_v2, %v16611_v56  ;;  %v2045_v3 = vsel %vm834_vm0, %v16612_v14, 0.0  ;;  %v5080_v53 = vadd.f32 %v5079_v31, %v5078_v1  ;;  %v4224_v19 = vadd.f32 %v4223_v37, %v4222_v51  ;;  %v6326_v2 = vld [vmem:[%s15013_s2 + $0x16] ss:$0 sm:$0xff]  ;;  %v16615_v56 = vld [vmem:[#allocation299_spill] sm:$0xff]  ;;  %v16618_v34 = vld [vmem:[#allocation324_spill] sm:$0xff] }
 0x2ee   : > { %v4225_v48 = vsel %vm834_vm0, %v3868_v5, 0.0  ;;  %v11540_v7 = vpop.eup %6209  ;;  %v2044_v32 = vadd.f32 %v2043_v29, %v2042_v57  ;;  %v4732_v63 = vmul.f32 %v6325_v47, %v16614_v21  ;;  %v5083_v33 = vsel %vm834_vm0, %v4726_v55, 0.0  ;;  %v6327_v57 = vld [vmem:[%s15014_s3 + $0x30] ss:$0 sm:$0xff]  ;;  %v16616_v47 = vld [vmem:[#allocation338_spill] sm:$0xff] }
 0x2ef   : > { %16613 = vst [vmem:[#allocation360_spill] sm:$0xff] %v11540_v7  ;;  %v3874_v31 = vmul.f32 %v6326_v2, %v16615_v56  ;;  %v2047_v5 = vsel %vm834_vm0, %v11279_v8, 0.0  ;;  %v5082_v1 = vadd.f32 %v5081_v10, %v5080_v53  ;;  %v4226_v51 = vadd.f32 %v4225_v48, %v4224_v19  ;;  %v6328_v2 = vld [vmem:[%s15013_s2 + $0x17] ss:$0 sm:$0xff]  ;;  %v16617_v56 = vld [vmem:[#allocation300_spill] sm:$0xff] }
 0x2f0   : > { %v4227_v29 = vsel %vm834_vm0, %v3870_v46, 0.0  ;;  %v2046_v37 = vadd.f32 %v2045_v3, %v2044_v32  ;;  %v4734_v55 = vmul.f32 %v6327_v57, %v16616_v47  ;;  %v5085_v0 = vsel %vm834_vm0, %v4728_v25, 0.0  ;;  %v6329_v48 = vld [vmem:[%s15014_s3 + $0x31] ss:$0 sm:$0xff]  ;;  %v16619_v32 = vld [vmem:[#allocation339_spill] sm:$0xff] }
 0x2f1   : > { %v3876_v21 = vmul.f32 %v6328_v2, %v16617_v56  ;;  %v2049_v10 = vsel %vm834_vm0, %v16618_v34, 0.0  ;;  %v5084_v53 = vadd.f32 %v5083_v33, %v5082_v1  ;;  %v4228_v46 = vadd.f32 %v4227_v29, %v4226_v51  ;;  %v6330_v2 = vld [vmem:[%s15013_s2 + $0x18] ss:$0 sm:$0xff]  ;;  %v16620_v56 = vld [vmem:[#allocation301_spill] sm:$0xff] }
 0x2f2   : > { %v4229_v3 = vsel %vm834_vm0, %v3872_v41, 0.0  ;;  %v2048_v19 = vadd.f32 %v2047_v5, %v2046_v37  ;;  %v4736_v25 = vmul.f32 %v6329_v48, %v16619_v32  ;;  %v5087_v57 = vsel %vm834_vm0, %v4730_v16, 0.0  ;;  %v6331_v29 = vld [vmem:[%s15014_s3 + $0x32] ss:$0 sm:$0xff]  ;;  %v6332_v48 = vld [vmem:[%s15013_s2 + $0x19] ss:$0 sm:$0xff] }
 0x2f3   : > { %v3878_v47 = vmul.f32 %v6330_v2, %v16620_v56  ;;  %v2051_v33 = vsel %vm834_vm0, %v16621_v6, 0.0  ;;  %v5086_v1 = vadd.f32 %v5085_v0, %v5084_v53  ;;  %v4230_v41 = vadd.f32 %v4229_v3, %v4228_v46  ;;  %v16622_v2 = vld [vmem:[#allocation302_spill] sm:$0xff]  ;;  %v16623_v32 = vld [vmem:[#allocation352_spill] sm:$0xff]  ;;  %v6333_v3 = vld [vmem:[%s15014_s3 + $0x33] ss:$0 sm:$0xff] }
 0x2f4   : > { %v4231_v5 = vsel %vm834_vm0, %v3874_v31, 0.0  ;;  %v2050_v51 = vadd.f32 %v2049_v10, %v2048_v19  ;;  %v4738_v16 = vmul.f32 %v6331_v29, %v11083_v38  ;;  %v5089_v37 = vsel %vm834_vm0, %v4732_v63, 0.0  ;;  %v6334_v29 = vld [vmem:[%s15013_s2 + $0x1a] ss:$0 sm:$0xff] }
 0x2f5   : > { %v3880_v56 = vmul.f32 %v6332_v48, %v16622_v2  ;;  %v2053_v0 = vsel %vm834_vm0, %v16623_v32, 0.0  ;;  %v5088_v53 = vadd.f32 %v5087_v57, %v5086_v1  ;;  %v4232_v31 = vadd.f32 %v4231_v5, %v4230_v41  ;;  %v16624_v48 = vld [vmem:[#allocation303_spill] sm:$0xff]  ;;  %v6335_v5 = vld [vmem:[%s15014_s3 + $0x34] ss:$0 sm:$0xff] }
 0x2f6   : > { %v4233_v10 = vsel %vm834_vm0, %v3876_v21, 0.0  ;;  %v2052_v46 = vadd.f32 %v2051_v33, %v2050_v51  ;;  %v4740_v63 = vmul.f32 %v6333_v3, %v11091_v11  ;;  %v5091_v19 = vsel %vm834_vm0, %v4734_v55, 0.0  ;;  %v6336_v3 = vld [vmem:[%s15013_s2 + $0x1b] ss:$0 sm:$0xff] }
 0x2f7   : > { %v3882_v2 = vmul.f32 %v6334_v29, %v16624_v48  ;;  %v2055_v57 = vsel %vm834_vm0, %v11320_v13, 0.0  ;;  %v5090_v1 = vadd.f32 %v5089_v37, %v5088_v53  ;;  %v4234_v21 = vadd.f32 %v4233_v10, %v4232_v31  ;;  %v16625_v29 = vld [vmem:[#allocation305_spill] sm:$0xff] }
 0x2f8   : > { %v4235_v33 = vsel %vm834_vm0, %v3878_v47, 0.0  ;;  %v2054_v41 = vadd.f32 %v2053_v0, %v2052_v46  ;;  %v4742_v55 = vmul.f32 %v6335_v5, %v11102_v49  ;;  %v5093_v51 = vsel %vm834_vm0, %v4736_v25, 0.0  ;;  %v6337_v10 = vld [vmem:[%s15014_s3 + $0x35] ss:$0 sm:$0xff]  ;;  %v6338_v5 = vld [vmem:[%s15013_s2 + $0x1c] ss:$0 sm:$0xff] }
 0x2f9   : > { %v3884_v48 = vmul.f32 %v6336_v3, %v16625_v29  ;;  %v2057_v37 = vsel %vm834_vm0, %v11327_v27, 0.0  ;;  %v5092_v53 = vadd.f32 %v5091_v19, %v5090_v1  ;;  %v4236_v47 = vadd.f32 %v4235_v33, %v4234_v21  ;;  %v16626_v3 = vld [vmem:[#allocation309_spill] sm:$0xff] }
 0x2fa   : > { %v4237_v0 = vsel %vm834_vm0, %v3880_v56, 0.0  ;;  %v2056_v31 = vadd.f32 %v2055_v57, %v2054_v41  ;;  %v4744_v25 = vmul.f32 %v6337_v10, %v11113_v58  ;;  %v5095_v46 = vsel %vm834_vm0, %v4738_v16, 0.0  ;;  %v6339_v16 = vld [vmem:[%s15013_s2 + $0x1d] ss:$0 sm:$0xff]  ;;  %v16627_v41 = vld [vmem:[#allocation311_spill] sm:$0xff] }
 0x2fb   : > { %v3886_v29 = vmul.f32 %v6338_v5, %v16626_v3  ;;  %v2059_v19 = vsel %vm834_vm0, %v11349_v18, 0.0  ;;  %v5094_v1 = vadd.f32 %v5093_v51, %v5092_v53  ;;  %v4238_v56 = vadd.f32 %v4237_v0, %v4236_v47  ;;  %v6340_v51 = vld [vmem:[%s15014_s3 + $0x36] ss:$0 sm:$0xff]  ;;  %v6341_v0 = vld [vmem:[%s15013_s2 + $0x1e] ss:$0 sm:$0xff] }
 0x2fc   : > { %v4239_v57 = vsel %vm834_vm0, %v3882_v2, 0.0  ;;  %v2058_v21 = vadd.f32 %v2057_v37, %v2056_v31  ;;  %v5097_v33 = vsel %vm834_vm0, %v4740_v63, 0.0  ;;  %v3888_v10 = vmul.f32 %v6339_v16, %v16627_v41  ;;  %v16628_v31 = vld [vmem:[#allocation312_spill] sm:$0xff]  ;;  %v6356_v3 = vld [vmem:[%s15014_s3 + $0x3e] ss:$0 sm:$0xff] }
 0x2fd   : > { %v4241_v58 = vsel %vm834_vm0, %v3884_v48, 0.0  ;;  %v2061_v5 = vsel %vm834_vm0, %v11361_v15, 0.0  ;;  %v4746_v2 = vmul.f32 %v6340_v51, %v11124_v24  ;;  %v5096_v37 = vadd.f32 %v5095_v46, %v5094_v1  ;;  %v6342_v51 = vld [vmem:[%s15014_s3 + $0x37] ss:$0 sm:$0xff] }
 0x2fe   : > { %v4240_v53 = vadd.f32 %v4239_v57, %v4238_v56  ;;  %v2060_v63 = vadd.f32 %v2059_v19, %v2058_v21  ;;  %v5099_v47 = vsel %vm834_vm0, %v4742_v55, 0.0  ;;  %v3890_v48 = vmul.f32 %v6341_v0, %v16628_v31  ;;  %v6343_v57 = vld [vmem:[%s15013_s2 + $0x1f] ss:$0 sm:$0xff] }
 0x2ff   : > { %v4243_v16 = vsel %vm834_vm0, %v3886_v29, 0.0  ;;  %v2063_v41 = vsel %vm834_vm0, %v11388_v35, 0.0  ;;  %v4748_v46 = vmul.f32 %v6342_v51, %v11135_v4  ;;  %v5098_v19 = vadd.f32 %v5097_v33, %v5096_v37  ;;  %v16629_v21 = vld [vmem:[#allocation314_spill] sm:$0xff] }
 0x300   : > { %v4242_v1 = vadd.f32 %v4241_v58, %v4240_v53  ;;  %v2062_v55 = vadd.f32 %v2061_v5, %v2060_v63  ;;  %v5101_v56 = vsel %vm834_vm0, %v4744_v25, 0.0  ;;  %v3892_v29 = vmul.f32 %v6343_v57, %v16629_v21  ;;  %v6344_v51 = vld [vmem:[%s15014_s3 + $0x38] ss:$0 sm:$0xff]  ;;  %v6345_v53 = vld [vmem:[%s15013_s2 + $0x20] ss:$0 sm:$0xff]  ;;  %v16630_v63 = vld [vmem:[#allocation316_spill] sm:$0xff] }
 0x301   : > { %v4245_v0 = vsel %vm834_vm0, %v3888_v10, 0.0  ;;  %v2065_v31 = vsel %vm834_vm0, %v11400_v54, 0.0  ;;  %v4750_v58 = vmul.f32 %v6344_v51, %v11146_v26  ;;  %v5100_v33 = vadd.f32 %v5099_v47, %v5098_v19  ;;  %v6346_v51 = vld [vmem:[%s15014_s3 + $0x39] ss:$0 sm:$0xff] }
 0x302   : > { %v4244_v5 = vadd.f32 %v4243_v16, %v4242_v1  ;;  %v2064_v25 = vadd.f32 %v2063_v41, %v2062_v55  ;;  %v5103_v37 = vsel %vm834_vm0, %v4746_v2, 0.0  ;;  %v3894_v10 = vmul.f32 %v6345_v53, %v16630_v63  ;;  %v6347_v1 = vld [vmem:[%s15013_s2 + $0x21] ss:$0 sm:$0xff]  ;;  %v16631_v55 = vld [vmem:[#allocation317_spill] sm:$0xff] }
 0x303   : > { %v4247_v57 = vsel %vm834_vm0, %v3890_v48, 0.0  ;;  %v2067_v21 = vsel %vm834_vm0, %v11427_v43, 0.0  ;;  %v4752_v47 = vmul.f32 %v6346_v51, %v11157_v59  ;;  %v5102_v41 = vadd.f32 %v5101_v56, %v5100_v33  ;;  %v6348_v51 = vld [vmem:[%s15014_s3 + $0x3a] ss:$0 sm:$0xff] }
 0x304   : > { %v4246_v16 = vadd.f32 %v4245_v0, %v4244_v5  ;;  %v2066_v2 = vadd.f32 %v2065_v31, %v2064_v25  ;;  %v5105_v19 = vsel %vm834_vm0, %v4748_v46, 0.0  ;;  %v3896_v48 = vmul.f32 %v6347_v1, %v16631_v55  ;;  %v6349_v5 = vld [vmem:[%s15013_s2 + $0x22] ss:$0 sm:$0xff] }
 0x305   : > { %v4249_v53 = vsel %vm834_vm0, %v3892_v29, 0.0  ;;  %v2069_v63 = vsel %vm834_vm0, %v11439_v42, 0.0  ;;  %v4754_v56 = vmul.f32 %v6348_v51, %v11168_v12  ;;  %v5104_v31 = vadd.f32 %v5103_v37, %v5102_v41  ;;  %v16632_v25 = vld [vmem:[#allocation319_spill] sm:$0xff]  ;;  %v6350_v51 = vld [vmem:[%s15014_s3 + $0x3b] ss:$0 sm:$0xff] }
 0x306   : > { %v4248_v0 = vadd.f32 %v4247_v57, %v4246_v16  ;;  %v2068_v46 = vadd.f32 %v2067_v21, %v2066_v2  ;;  %v5107_v33 = vsel %vm834_vm0, %v4750_v58, 0.0  ;;  %v3898_v29 = vmul.f32 %v6349_v5, %v16632_v25  ;;  %v6351_v16 = vld [vmem:[%s15013_s2 + $0x23] ss:$0 sm:$0xff]  ;;  %v16633_v2 = vld [vmem:[#allocation321_spill] sm:$0xff] }
 0x307   : > { %v4251_v1 = vsel %vm834_vm0, %v3894_v10, 0.0  ;;  %v2071_v55 = vsel %vm834_vm0, %v11464_v62, 0.0  ;;  %v4756_v37 = vmul.f32 %v6350_v51, %v11179_v61  ;;  %v5106_v21 = vadd.f32 %v5105_v19, %v5104_v31  ;;  %v6352_v51 = vld [vmem:[%s15014_s3 + $0x3c] ss:$0 sm:$0xff] }
 0x308   : > { %v4250_v57 = vadd.f32 %v4249_v53, %v4248_v0  ;;  %v2070_v58 = vadd.f32 %v2069_v63, %v2068_v46  ;;  %v5109_v41 = vsel %vm834_vm0, %v4752_v47, 0.0  ;;  %v3900_v10 = vmul.f32 %v6351_v16, %v16633_v2  ;;  %v6353_v0 = vld [vmem:[%s15013_s2 + $0x24] ss:$0 sm:$0xff] }
 0x309   : > { %v4253_v5 = vsel %vm834_vm0, %v3896_v48, 0.0  ;;  %v2073_v25 = vsel %vm834_vm0, %v11476_v44, 0.0  ;;  %v4758_v19 = vmul.f32 %v6352_v51, %v11190_v60  ;;  %v5108_v63 = vadd.f32 %v5107_v33, %v5106_v21  ;;  %v16634_v46 = vld [vmem:[#allocation323_spill] sm:$0xff]  ;;  %v6354_v51 = vld [vmem:[%s15014_s3 + $0x3d] ss:$0 sm:$0xff] }
 0x30a   : > { %v4252_v53 = vadd.f32 %v4251_v1, %v4250_v57  ;;  %v2072_v47 = vadd.f32 %v2071_v55, %v2070_v58  ;;  %v5111_v31 = vsel %vm834_vm0, %v4754_v56, 0.0  ;;  %v3902_v48 = vmul.f32 %v6353_v0, %v16634_v46  ;;  %v6355_v57 = vld [vmem:[%s15013_s2 + $0x25] ss:$0 sm:$0xff]  ;;  %v16635_v58 = vld [vmem:[#allocation325_spill] sm:$0xff]  ;;  %v16636_v46 = vld [vmem:[#allocation340_spill] sm:$0xff] }
 0x30b   : > { %v4255_v16 = vsel %vm834_vm0, %v3898_v29, 0.0  ;;  %v2075_v2 = vsel %vm834_vm0, %v11501_v45, 0.0  ;;  %v4760_v33 = vmul.f32 %v6354_v51, %v11201_v20  ;;  %v5110_v55 = vadd.f32 %v5109_v41, %v5108_v63 }
 0x30c   : > { %v4254_v1 = vadd.f32 %v4253_v5, %v4252_v53  ;;  %v2074_v56 = vadd.f32 %v2073_v25, %v2072_v47  ;;  %v5113_v21 = vsel %vm834_vm0, %v4756_v37, 0.0  ;;  %v3904_v29 = vmul.f32 %v6355_v57, %v16635_v58  ;;  %v6357_v53 = vld [vmem:[%s15013_s2 + $0x26] ss:$0 sm:$0xff] }
 0x30d   : > { %v4257_v0 = vsel %vm834_vm0, %v3900_v10, 0.0  ;;  %6211 = vpow2.f32 %v16636_v46  ;;  %v4762_v41 = vmul.f32 %v6356_v3, %v11212_v28  ;;  %v5112_v5 = vadd.f32 %v5111_v31, %v5110_v55  ;;  %v16637_v47 = vld [vmem:[#allocation327_spill] sm:$0xff]  ;;  %v16638_v46 = vld [vmem:[#allocation260_spill] sm:$0xff] }
 0x30e   : > { %v4256_v25 = vadd.f32 %v4255_v16, %v4254_v1  ;;  %v2076_v63 = vadd.f32 %v2075_v2, %v2074_v56  ;;  %v5115_v37 = vsel %vm834_vm0, %v4758_v19, 0.0  ;;  %v3906_v51 = vmul.f32 %v6357_v53, %v16637_v47  ;;  %v6358_v2 = vld [vmem:[%s15014_s3 + $0x3f] ss:$0 sm:$0xff]  ;;  %v6359_v16 = vld [vmem:[%s15013_s2 + $0x27] ss:$0 sm:$0xff] }
 0x30f   : > { %v4259_v10 = vsel %vm834_vm0, %v3902_v48, 0.0  ;;  %v1723_v57 = vmul.f32 1.442695, %v16638_v46  ;;  %v2077_v58 = vsel %vm834_vm0, %v11513_v17, 0.0  ;;  %v5114_v20 = vadd.f32 %v5113_v21, %v5112_v5  ;;  %v16639_v48 = vld [vmem:[#allocation329_spill] sm:$0xff]  ;;  %v16640_v56 = vld [vmem:[#allocation342_spill] sm:$0xff] }
 0x310   : > { %v4258_v3 = vadd.f32 %v4257_v0, %v4256_v25  ;;  %v4764_v19 = vmul.f32 %v6358_v2, %v11223_v39  ;;  %v5117_v31 = vsel %vm834_vm0, %v4760_v33, 0.0  ;;  %v3908_v55 = vmul.f32 %v6359_v16, %v16639_v48  ;;  %v6360_v21 = vld [vmem:[%s15014_s3 + $0x40] ss:$0 sm:$0xff]  ;;  %v6361_v2 = vld [vmem:[%s15013_s2 + $0x28] ss:$0 sm:$0xff]  ;;  %v16642_v46 = vld [vmem:[#allocation261_spill] sm:$0xff] }
 0x311   : > { %v4261_v1 = vsel %vm834_vm0, %v3904_v29, 0.0  ;;  %6213 = vpow2.f32 %v16640_v56  ;;  %v4766_v0 = vmul.f32 %v6360_v21, %v11234_v22  ;;  %v5116_v5 = vadd.f32 %v5115_v37, %v5114_v20 }
 0x312   : > { %v4260_v25 = vadd.f32 %v4259_v10, %v4258_v3  ;;  %v2078_v53 = vadd.f32 %v2077_v58, %v2076_v63  ;;  %v5119_v33 = vsel %vm834_vm0, %v4762_v41, 0.0  ;;  %v3910_v16 = vmul.f32 %v6361_v2, %v10949_v36  ;;  %v6362_v58 = vld [vmem:[%s15014_s3 + $0x41] ss:$0 sm:$0xff] }
 0x313   : > { %v4263_v29 = vsel %vm834_vm0, %v3906_v51, 0.0  ;;  %v11763_v56 = vpop.eup %6211  ;;  %v1727_v48 = vmul.f32 1.442695, %v16642_v46  ;;  %v2079_v21 = vsel %vm834_vm0, %v11540_v7, 0.0  ;;  %v5118_v20 = vadd.f32 %v5117_v31, %v5116_v5  ;;  %v6363_v51 = vld [vmem:[%s15013_s2 + $0x29] ss:$0 sm:$0xff] }
 0x314   : > { %16641 = vst [vmem:[#allocation340_spill] sm:$0xff] %v11763_v56  ;;  %v4262_v37 = vadd.f32 %v4261_v1, %v4260_v25  ;;  %v4768_v41 = vmul.f32 %v6362_v58, %v11245_v40  ;;  %v5121_v63 = vsel %vm834_vm0, %v4764_v19, 0.0  ;;  %v3912_v10 = vmul.f32 %v6363_v51, %v10963_v9  ;;  %v6364_v31 = vld [vmem:[%s15014_s3 + $0x42] ss:$0 sm:$0xff]  ;;  %v6365_v58 = vld [vmem:[%s15013_s2 + $0x2a] ss:$0 sm:$0xff] }
 0x315   : > { %v4265_v3 = vsel %vm834_vm0, %v3908_v55, 0.0  ;;  %6215 = vpow2.f32 %v1723_v57  ;;  %v4770_v1 = vmul.f32 %v6364_v31, %v16609_v50  ;;  %v5120_v5 = vadd.f32 %v5119_v33, %v5118_v20  ;;  %v16644_v46 = vld [vmem:[#allocation262_spill] sm:$0xff] }
 0x316   : > { %v4264_v25 = vadd.f32 %v4263_v29, %v4262_v37  ;;  %v2080_v2 = vadd.f32 %v2079_v21, %v2078_v53  ;;  %v5123_v19 = vsel %vm834_vm0, %v4766_v0, 0.0  ;;  %v3914_v51 = vmul.f32 %v6365_v58, %v10975_v52  ;;  %v6366_v0 = vld [vmem:[%s15014_s3 + $0x43] ss:$0 sm:$0xff] }
 0x317   : > { %v4267_v55 = vsel %vm834_vm0, %v3910_v16, 0.0  ;;  %v11788_v57 = vpop.eup %6213  ;;  %v1731_v9 = vmul.f32 1.442695, %v16644_v46  ;;  %v2081_v31 = vsel %vm834_vm0, %v11763_v56, 0.0  ;;  %v5122_v33 = vadd.f32 %v5121_v63, %v5120_v5  ;;  %v6367_v16 = vld [vmem:[%s15013_s2 + $0x2b] ss:$0 sm:$0xff] }
 0x318   : > { %16643 = vst [vmem:[#allocation327_spill] sm:$0xff] %v11788_v57  ;;  %v4266_v29 = vadd.f32 %v4265_v3, %v4264_v25  ;;  %v4772_v53 = vmul.f32 %v6366_v0, %v16612_v14  ;;  %v5125_v21 = vsel %vm834_vm0, %v4768_v41, 0.0  ;;  %v3916_v20 = vmul.f32 %v6367_v16, %v10991_v23  ;;  %v6368_v63 = vld [vmem:[%s15014_s3 + $0x44] ss:$0 sm:$0xff]  ;;  %v6369_v0 = vld [vmem:[%s15013_s2 + $0x2c] ss:$0 sm:$0xff] }
 0x319   : > { %v4269_v37 = vsel %vm834_vm0, %v3912_v10, 0.0  ;;  %6217 = vpow2.f32 %v1727_v48  ;;  %v4774_v3 = vmul.f32 %v6368_v63, %v11279_v8  ;;  %v5124_v5 = vadd.f32 %v5123_v19, %v5122_v33 }
 0x31a   : > { %v4268_v25 = vadd.f32 %v4267_v55, %v4266_v29  ;;  %v2082_v58 = vadd.f32 %v2081_v31, %v2080_v2  ;;  %v5127_v41 = vsel %vm834_vm0, %v4770_v1, 0.0  ;;  %v3918_v16 = vmul.f32 %v6369_v0, %v11004_v30  ;;  %v6370_v2 = vld [vmem:[%s15014_s3 + $0x45] ss:$0 sm:$0xff]  ;;  %v6371_v55 = vld [vmem:[%s15013_s2 + $0x2d] ss:$0 sm:$0xff] }
 0x31b   : > { %v4271_v10 = vsel %vm834_vm0, %v3914_v51, 0.0  ;;  %v11813_v48 = vpop.eup %6215  ;;  %v2083_v46 = vsel %vm834_vm0, %v11788_v57, 0.0  ;;  %v5126_v23 = vadd.f32 %v5125_v21, %v5124_v5  ;;  %v4776_v1 = vmul.f32 %v6370_v2, %v16618_v34  ;;  %v16646_v51 = vld [vmem:[#allocation335_spill] sm:$0xff] }
 0x31c   : > { %16645 = vst [vmem:[#allocation342_spill] sm:$0xff] %v11813_v48  ;;  %v4270_v63 = vadd.f32 %v4269_v37, %v4268_v25  ;;  %v5129_v19 = vsel %vm834_vm0, %v4772_v53, 0.0  ;;  %v3920_v31 = vmul.f32 %v6371_v55, %v16646_v51  ;;  %v4273_v33 = vsel %vm834_vm0, %v3916_v20, 0.0  ;;  %v6372_v5 = vld [vmem:[%s15014_s3 + $0x46] ss:$0 sm:$0xff] }
 0x31d   : > { %6219 = vpow2.f32 %v1731_v9  ;;  %v5128_v29 = vadd.f32 %v5127_v41, %v5126_v23  ;;  %v2084_v37 = vadd.f32 %v2083_v46, %v2082_v58  ;;  %v4778_v25 = vmul.f32 %v6372_v5, %v16621_v6  ;;  %v6373_v9 = vld [vmem:[%s15013_s2 + $0x2e] ss:$0 sm:$0xff]  ;;  %v6374_v41 = vld [vmem:[%s15014_s3 + $0x47] ss:$0 sm:$0xff] }
 0x31e   : > { %v4272_v21 = vadd.f32 %v4271_v10, %v4270_v63  ;;  %v5131_v53 = vsel %vm834_vm0, %v4774_v3, 0.0  ;;  %v4275_v0 = vsel %vm834_vm0, %v3918_v16, 0.0  ;;  %v2085_v55 = vsel %vm834_vm0, %v11813_v48, 0.0  ;;  %v16648_v23 = vld [vmem:[#allocation336_spill] sm:$0xff] }
 0x31f   : > { %v11833_v2 = vpop.eup %6217  ;;  %v5130_v20 = vadd.f32 %v5129_v19, %v5128_v29  ;;  %v3922_v46 = vmul.f32 %v6373_v9, %v16648_v23  ;;  %v4780_v3 = vmul.f32 %v6374_v41, %v16623_v32  ;;  %v5133_v16 = vsel %vm834_vm0, %v4776_v1, 0.0  ;;  %v6375_v19 = vld [vmem:[%s15013_s2 + $0x2f] ss:$0 sm:$0xff]  ;;  %v16649_v29 = vld [vmem:[#allocation337_spill] sm:$0xff] }
 0x320   : > { %16647 = vst [vmem:[#allocation361_spill] sm:$0xff] %v11833_v2  ;;  %v4274_v58 = vadd.f32 %v4273_v33, %v4272_v21  ;;  %v4277_v10 = vsel %vm834_vm0, %v3920_v31, 0.0  ;;  %v3924_v5 = vmul.f32 %v6375_v19, %v16649_v29  ;;  %v2086_v9 = vadd.f32 %v2085_v55, %v2084_v37  ;;  %v6376_v33 = vld [vmem:[%s15014_s3 + $0x48] ss:$0 sm:$0xff]  ;;  %v6377_v1 = vld [vmem:[%s15013_s2 + $0x30] ss:$0 sm:$0xff] }
 0x321   : > { %v5132_v63 = vadd.f32 %v5131_v53, %v5130_v20  ;;  %v4782_v21 = vmul.f32 %v6376_v33, %v11320_v13  ;;  %v5135_v41 = vsel %vm834_vm0, %v4778_v25, 0.0  ;;  %v16650_v31 = vld [vmem:[#allocation338_spill] sm:$0xff]  ;;  %v6378_v19 = vld [vmem:[%s15014_s3 + $0x49] ss:$0 sm:$0xff]  ;;  %v5137_v33 = vsel %vm834_vm0, %v4780_v3, 0.0 }
 0x322   : > { %v4276_v51 = vadd.f32 %v4275_v0, %v4274_v58  ;;  %v3926_v53 = vmul.f32 %v6377_v1, %v16650_v31  ;;  %v2087_v0 = vsel %vm834_vm0, %v11833_v2, 0.0  ;;  %v4279_v58 = vsel %vm834_vm0, %v3922_v46, 0.0  ;;  %v6379_v1 = vld [vmem:[%s15013_s2 + $0x31] ss:$0 sm:$0xff]  ;;  %v16652_v31 = vld [vmem:[#allocation339_spill] sm:$0xff] }
 0x323   : > { %v11860_v20 = vpop.eup %6219  ;;  %v5134_v37 = vadd.f32 %v5133_v16, %v5132_v63  ;;  %v4784_v25 = vmul.f32 %v6378_v19, %v11327_v27  ;;  %v3928_v23 = vmul.f32 %v6379_v1, %v16652_v31  ;;  %v4281_v16 = vsel %vm834_vm0, %v3924_v5, 0.0  ;;  %v6380_v46 = vld [vmem:[%s15014_s3 + $0x4a] ss:$0 sm:$0xff]  ;;  %v12482_v31 = vld [vmem:[%s12240_s28 + $0x138] sm:$0xff] }
 0x324   : > { %16651 = vst [vmem:[#allocation362_spill] sm:$0xff] %v11860_v20  ;;  %v4278_v55 = vadd.f32 %v4277_v10, %v4276_v51  ;;  %v2088_v51 = vadd.f32 %v2087_v0, %v2086_v9  ;;  %v4786_v10 = vmul.f32 %v6380_v46, %v11349_v18  ;;  %v5139_v63 = vsel %vm834_vm0, %v4782_v21, 0.0  ;;  %v6382_v0 = vld [vmem:[%s15014_s3 + $0x4b] ss:$0 sm:$0xff] }
 0x325   : > { %v5136_v29 = vadd.f32 %v5135_v41, %v5134_v37  ;;  %v2089_v3 = vsel %vm834_vm0, %v11860_v20, 0.0  ;;  %v6381_v37 = vld [vmem:[%s15013_s2 + $0x32] ss:$0 sm:$0xff]  ;;  %v4283_v9 = vsel %vm834_vm0, %v3926_v53, 0.0  ;;  %v4788_v1 = vmul.f32 %v6382_v0, %v11361_v15  ;;  %v6384_v53 = vld [vmem:[%s15014_s3 + $0x4c] ss:$0 sm:$0xff] }
 0x326   : > { %v4280_v19 = vadd.f32 %v4279_v58, %v4278_v55  ;;  %v3930_v5 = vmul.f32 %v6381_v37, %v11083_v38  ;;  %v5141_v21 = vsel %vm834_vm0, %v4784_v25, 0.0  ;;  %v4285_v46 = vsel %vm834_vm0, %v3928_v23, 0.0 }
 0x327   : > { %v5138_v41 = vadd.f32 %v5137_v33, %v5136_v29  ;;  %v6383_v29 = vld [vmem:[%s15013_s2 + $0x33] ss:$0 sm:$0xff]  ;;  %v11897_v37 = vadd.f32 %v2089_v3, %v2088_v51  ;;  %v4790_v0 = vmul.f32 %v6384_v53, %v11388_v35  ;;  %v5143_v25 = vsel %vm834_vm0, %v4786_v10, 0.0  ;;  %v6386_v51 = vld [vmem:[%s15014_s3 + $0x4d] ss:$0 sm:$0xff] }
 0x328   : > { %v4282_v55 = vadd.f32 %v4281_v16, %v4280_v19  ;;  %v3932_v33 = vmul.f32 %v6383_v29, %v11091_v11  ;;  %v6385_v19 = vld [vmem:[%s15013_s2 + $0x34] ss:$0 sm:$0xff]  ;;  %v4287_v23 = vsel %vm834_vm0, %v3930_v5, 0.0  ;;  %v4792_v3 = vmul.f32 %v6386_v51, %v11400_v54  ;;  %v6388_v5 = vld [vmem:[%s15014_s3 + $0x4e] ss:$0 sm:$0xff] }
 0x329   : > { %v5140_v58 = vadd.f32 %v5139_v63, %v5138_v41  ;;  %16653 = vst [vmem:[#allocation363_spill] sm:$0xff] %v11897_v37  ;;  %v3934_v41 = vmul.f32 %v6385_v19, %v11102_v49  ;;  %v5145_v29 = vsel %vm834_vm0, %v4788_v1, 0.0  ;;  %6221 = vrcp.f32 %v11897_v37  ;;  %v6390_v51 = vld [vmem:[%s15014_s3 + $0x4f] ss:$0 sm:$0xff] }
 0x32a   : > { %v4284_v16 = vadd.f32 %v4283_v9, %v4282_v55  ;;  %v6387_v9 = vld [vmem:[%s15013_s2 + $0x35] ss:$0 sm:$0xff]  ;;  %v4794_v19 = vmul.f32 %v6388_v5, %v11427_v43  ;;  %v5147_v1 = vsel %vm834_vm0, %v4790_v0, 0.0  ;;  %v5149_v5 = vsel %vm834_vm0, %v4792_v3, 0.0 }
 0x32b   : > { %v5142_v63 = vadd.f32 %v5141_v21, %v5140_v58  ;;  %v16654_v21 = vld [vmem:[#allocation345_spill] sm:$0xff]  ;;  %v4289_v58 = vsel %vm834_vm0, %v3932_v33, 0.0  ;;  %v4291_v33 = vsel %vm834_vm0, %v3934_v41, 0.0  ;;  %vm2111_vm5 = vweird.f32 %v11897_v37 }
 0x32c   : > { %v4286_v53 = vadd.f32 %v4285_v46, %v4284_v16  ;;  %v3936_v55 = vmul.f32 %v6387_v9, %v16654_v21  ;;  %v6389_v16 = vld [vmem:[%s15013_s2 + $0x36] ss:$0 sm:$0xff]  ;;  %v4796_v9 = vmul.f32 %v6390_v51, %v11439_v42  ;;  %v5151_v41 = vsel %vm834_vm0, %v4794_v19, 0.0  ;;  %v6392_v51 = vld [vmem:[%s15013_s2 + $0x37] ss:$0 sm:$0xff] }
 0x32d   : > { %v5144_v10 = vadd.f32 %v5143_v25, %v5142_v63  ;;  %v3938_v63 = vmul.f32 %v6389_v16, %v11124_v24  ;;  %v3940_v3 = vmul.f32 %v6392_v51, %v11135_v4 }
 0x32e   : > { %v4288_v46 = vadd.f32 %v4287_v23, %v4286_v53  ;;  %v4293_v23 = vsel %vm834_vm0, %v3936_v55, 0.0  ;;  %v6393_v55 = vld [vmem:[%s15014_s3 + $0x51] ss:$0 sm:$0xff]  ;;  %v5153_v19 = vsel %vm834_vm0, %v4796_v9, 0.0 }
 0x32f   : > { %v5146_v25 = vadd.f32 %v5145_v29, %v5144_v10  ;;  %v6391_v29 = vld [vmem:[%s15014_s3 + $0x50] ss:$0 sm:$0xff] }
 0x330   : > { %v4290_v21 = vadd.f32 %v4289_v58, %v4288_v46  ;;  %v4798_v53 = vmul.f32 %v6391_v29, %v11464_v62  ;;  %v4295_v58 = vsel %vm834_vm0, %v3938_v63, 0.0  ;;  %v4800_v46 = vmul.f32 %v6393_v55, %v11476_v44  ;;  %v6395_v63 = vld [vmem:[%s15014_s3 + $0x52] ss:$0 sm:$0xff]  ;;  %v6397_v55 = vld [vmem:[%s15014_s3 + $0x53] ss:$0 sm:$0xff] }
 0x331   : > { %v5148_v0 = vadd.f32 %v5147_v1, %v5146_v25  ;;  %v11946_v1 = vpop.eup %6221 }
 0x332   : > { %v4292_v10 = vadd.f32 %v4291_v33, %v4290_v21  ;;  %v6394_v33 = vld [vmem:[%s15013_s2 + $0x38] ss:$0 sm:$0xff]  ;;  %v5155_v29 = vsel %vm834_vm0, %v4798_v53, 0.0  ;;  %v2107_v9 = vmul.f32 %v11946_v1, %v11897_v37  ;;  %v5157_v53 = vsel %vm834_vm0, %v4800_v46, 0.0 }
 0x333   : > { %v5150_v16 = vadd.f32 %v5149_v5, %v5148_v0  ;;  %v3942_v5 = vmul.f32 %v6394_v33, %v11146_v26  ;;  %v4802_v0 = vmul.f32 %v6395_v63, %v11501_v45  ;;  %v4804_v33 = vmul.f32 %v6397_v55, %v11513_v17 }
 0x334   : > { %v4294_v21 = vadd.f32 %v4293_v23, %v4292_v10  ;;  %vm2112_vm6 = vweird.f32 %v11946_v1 }
 0x335   : > { %v5152_v25 = vadd.f32 %v5151_v41, %v5150_v16  ;;  %v6396_v41 = vld [vmem:[%s15013_s2 + $0x39] ss:$0 sm:$0xff]  ;;  %v4297_v16 = vsel %vm834_vm0, %v3940_v3, 0.0  ;;  %v6399_v3 = vld [vmem:[%s15014_s3 + $0x54] ss:$0 sm:$0xff]  ;;  %vm12035_vm7 = vmor %vm2111_vm5, %vm2112_vm6 }
 0x336   : > { %v4296_v51 = vadd.f32 %v4295_v58, %v4294_v21  ;;  %v3944_v10 = vmul.f32 %v6396_v41, %v11157_v59  ;;  %v4806_v63 = vmul.f32 %v6399_v3, %v11540_v7  ;;  %v5159_v41 = vsel %vm834_vm0, %v4802_v0, 0.0 }
 0x337   : > { %v5154_v23 = vadd.f32 %v5153_v19, %v5152_v25  ;;  %v6398_v19 = vld [vmem:[%s15013_s2 + $0x3a] ss:$0 sm:$0xff]  ;;  %v4299_v25 = vsel %vm834_vm0, %v3942_v5, 0.0  ;;  %v2108_v59 = vsub.f32 1.0, %v2107_v9  ;;  %v6401_v5 = vld [vmem:[%s15014_s3 + $0x55] ss:$0 sm:$0xff] }
 0x338   : > { %v3946_v21 = vmul.f32 %v6398_v19, %v11168_v12  ;;  %v4298_v55 = vadd.f32 %v4297_v16, %v4296_v51  ;;  %v4301_v19 = vsel %vm834_vm0, %v3944_v10, 0.0  ;;  %v4808_v12 = vmul.f32 %v6401_v5, %v11763_v56  ;;  %v6402_v9 = vld [vmem:[%s15013_s2 + $0x3c] ss:$0 sm:$0xff]  ;;  %v6403_v10 = vld [vmem:[%s15014_s3 + $0x56] ss:$0 sm:$0xff]  ;;  %v16655_v5 = vld [vmem:[#allocation308_spill] sm:$0xff] }
 0x339   : > { %v5156_v58 = vadd.f32 %v5155_v29, %v5154_v23  ;;  %v6400_v29 = vld [vmem:[%s15013_s2 + $0x3b] ss:$0 sm:$0xff]  ;;  %v5161_v3 = vsel %vm834_vm0, %v4804_v33, 0.0  ;;  %v3950_v16 = vmul.f32 %v6402_v9, %v11190_v60  ;;  %v6404_v33 = vld [vmem:[%s15014_s3 + $0x57] ss:$0 sm:$0xff] }
 0x33a   : > { %v3948_v23 = vmul.f32 %v6400_v29, %v11179_v61  ;;  %v4300_v0 = vadd.f32 %v4299_v25, %v4298_v55  ;;  %v4812_v25 = vmul.f32 %v6404_v33, %v11813_v48  ;;  %v6406_v60 = vld [vmem:[%s15014_s3 + $0x58] ss:$0 sm:$0xff] }
 0x33b   : > { %v5158_v46 = vadd.f32 %v5157_v53, %v5156_v58  ;;  %v4303_v53 = vsel %vm834_vm0, %v3946_v21, 0.0  ;;  %v4810_v58 = vmul.f32 %v6403_v10, %v11788_v57  ;;  %v6405_v21 = vld [vmem:[%s15013_s2 + $0x3d] ss:$0 sm:$0xff]  ;;  %v4814_v33 = vmul.f32 %v6406_v60, %v11833_v2 }
 0x33c   : > { %v4302_v55 = vadd.f32 %v4301_v19, %v4300_v0  ;;  %v3952_v9 = vmul.f32 %v6405_v21, %v16655_v5  ;;  %v4305_v10 = vsel %vm834_vm0, %v3948_v23, 0.0  ;;  %v4307_v0 = vsel %vm834_vm0, %v3950_v16, 0.0 }
 0x33d   : > { %v5160_v51 = vadd.f32 %v5159_v41, %v5158_v46  ;;  %v5163_v41 = vsel %vm834_vm0, %v4806_v63, 0.0  ;;  %v2109_v46 = vmul.f32 %v11946_v1, %v2108_v59  ;;  %v5165_v63 = vsel %vm834_vm0, %v4808_v12, 0.0  ;;  %v6407_v59 = vld [vmem:[%s15013_s2 + $0x3e] ss:$0 sm:$0xff]  ;;  %v6408_v12 = vld [vmem:[%s15013_s2 + $0x3f] ss:$0 sm:$0xff] }
 0x33e   : > { %v3954_v19 = vmul.f32 %v6407_v59, %v11212_v28  ;;  %v5167_v60 = vsel %vm834_vm0, %v4810_v58, 0.0  ;;  %v3956_v21 = vmul.f32 %v6408_v12, %v11223_v39  ;;  %v6409_v58 = vld [vmem:[%s15014_s3 + $0x59] ss:$0 sm:$0xff]  ;;  %v5169_v12 = vsel %vm834_vm0, %v4812_v25, 0.0  ;;  %v6411_v39 = vld [vmem:[%s15013_s2 + $0x41] ss:$0 sm:$0xff] }
 0x33f   : > { %v5162_v29 = vadd.f32 %v5161_v3, %v5160_v51  ;;  %v4304_v3 = vadd.f32 %v4303_v53, %v4302_v55  ;;  %v2117_v51 = vand.u32 2147483648, %v11897_v37  ;;  %v2110_v53 = vadd.f32 %v11946_v1, %v2109_v46  ;;  %v6410_v46 = vld [vmem:[%s15013_s2 + $0x40] ss:$0 sm:$0xff] }
 0x340   : > { %v2115_v55 = vand.u32 2147483647, %v11897_v37  ;;  %v5171_v37 = vsel %vm834_vm0, %v4814_v33, 0.0  ;;  %v6412_v33 = vld [vmem:[%s15013_s2 + $0x42] ss:$0 sm:$0xff] }
 0x341   : > { %v5164_v23 = vadd.f32 %v5163_v41, %v5162_v29  ;;  %v4306_v5 = vadd.f32 %v4305_v10, %v4304_v3  ;;  %v4309_v41 = vsel %vm834_vm0, %v3952_v9, 0.0  ;;  %v4816_v29 = vmul.f32 %v6409_v58, %v11860_v20 }
 0x342   : > { %v3958_v9 = vmul.f32 %v6410_v46, %v11234_v22  ;;  %v3960_v58 = vmul.f32 %v6411_v39, %v11245_v40  ;;  %vm2116_vm8 = vcmp.eq.f32.partialorder %v2115_v55, 8.507059e+37  ;;  %v3962_v46 = vmul.f32 %v6412_v33, %v16609_v50 }
 0x343   : > { %v5166_v59 = vadd.f32 %v5165_v63, %v5164_v23  ;;  %v4308_v10 = vadd.f32 %v4307_v0, %v4306_v5  ;;  %v4311_v63 = vsel %vm834_vm0, %v3954_v19, 0.0  ;;  %v2118_v23 = vor.u32 1.1754944e-38, %v2117_v51 }
 0x344   : > { %v2114_v5 = vsel %vm12035_vm7, %v11946_v1, %v2110_v53  ;;  %v5173_v19 = vsel %vm834_vm0, %v4816_v29, 0.0  ;;  %v4315_v39 = vsel %vm834_vm0, %v3958_v9, 0.0 }
 0x345   : > { %v5168_v3 = vadd.f32 %v5167_v60, %v5166_v59  ;;  %v4310_v25 = vadd.f32 %v4309_v41, %v4308_v10  ;;  %v4313_v60 = vsel %vm834_vm0, %v3956_v21, 0.0  ;;  %v12064_v41 = vsel %vm2116_vm8, %v2118_v23, %v2114_v5  ;;  %v6413_v21 = vld [vmem:[%s15013_s2 + $0x43] ss:$0 sm:$0xff]  ;;  %v6416_v5 = vld [vmem:[%s15013_s2 + $0x46] ss:$0 sm:$0xff] }
 0x346   : > { %16658 = vst [vmem:[#allocation364_spill] sm:$0xff] %v12064_v41  ;;  %v3964_v53 = vmul.f32 %v6413_v21, %v16612_v14 }
 0x347   : > { %v5170_v0 = vadd.f32 %v5169_v12, %v5168_v3  ;;  %v4312_v51 = vadd.f32 %v4311_v63, %v4310_v25  ;;  %v6414_v12 = vld [vmem:[%s15013_s2 + $0x44] ss:$0 sm:$0xff]  ;;  %v4319_v3 = vsel %vm834_vm0, %v3962_v46, 0.0  ;;  %v6415_v63 = vld [vmem:[%s15013_s2 + $0x45] ss:$0 sm:$0xff] }
 0x348   : > { %v3966_v10 = vmul.f32 %v6414_v12, %v11279_v8  ;;  %v3968_v23 = vmul.f32 %v6415_v63, %v16618_v34 }
 0x349   : > { %v5172_v59 = vadd.f32 %v5171_v37, %v5170_v0  ;;  %v4314_v16 = vadd.f32 %v4313_v60, %v4312_v51  ;;  %v4317_v37 = vsel %vm834_vm0, %v3960_v58, 0.0  ;;  %v4321_v58 = vsel %vm834_vm0, %v3964_v53, 0.0  ;;  %v6417_v51 = vld [vmem:[%s15013_s2 + $0x47] ss:$0 sm:$0xff] }
 0x34a   : > { %v3970_v0 = vmul.f32 %v6416_v5, %v16621_v6  ;;  %v4323_v60 = vsel %vm834_vm0, %v3966_v10, 0.0  ;;  %v4325_v33 = vsel %vm834_vm0, %v3968_v23, 0.0 }
 0x34b   : > { %v5174_v1 = vadd.f32 %v5173_v19, %v5172_v59  ;;  %v4316_v55 = vadd.f32 %v4315_v39, %v4314_v16  ;;  %v3972_v59 = vmul.f32 %v6417_v51, %v16623_v32  ;;  %v6418_v39 = vld [vmem:[%s15013_s2 + $0x48] ss:$0 sm:$0xff] }
 0x34c   : > { %v3974_v16 = vmul.f32 %v6418_v39, %v11320_v13 }
 0x34d   : > { %v12072_v29 = vmul.f32 %v5174_v1, %v12064_v41  ;;  %v4318_v9 = vadd.f32 %v4317_v37, %v4316_v55  ;;  %v4327_v1 = vsel %vm834_vm0, %v3970_v0, 0.0  ;;  %v6419_v37 = vld [vmem:[%s15013_s2 + $0x49] ss:$0 sm:$0xff]  ;;  %v4329_v12 = vsel %vm834_vm0, %v3972_v59, 0.0 }
 0x34e   : > { %v3976_v55 = vmul.f32 %v6419_v37, %v11327_v27  ;;  %v4331_v63 = vsel %vm834_vm0, %v3974_v16, 0.0 }
 0x34f   : > { %5640 = vst.msk [vmem:[#allocation2 + $0x18] sm:$0xff] %vm834_vm0, %v12072_v29  ;;  %v4320_v25 = vadd.f32 %v4319_v3, %v4318_v9  ;;  %v6420_v3 = vld [vmem:[%s15013_s2 + $0x4a] ss:$0 sm:$0xff] }
 0x350   : > { %v3978_v9 = vmul.f32 %v6420_v3, %v11349_v18  ;;  %v4333_v5 = vsel %vm834_vm0, %v3976_v55, 0.0 }
 0x351   : > { %v4322_v19 = vadd.f32 %v4321_v58, %v4320_v25  ;;  %v6421_v58 = vld [vmem:[%s15013_s2 + $0x4b] ss:$0 sm:$0xff] }
 0x352   : > { %v3980_v25 = vmul.f32 %v6421_v58, %v11361_v15  ;;  %v4335_v51 = vsel %vm834_vm0, %v3978_v9, 0.0 }
 0x353   : > { %v4324_v46 = vadd.f32 %v4323_v60, %v4322_v19  ;;  %v6422_v60 = vld [vmem:[%s15013_s2 + $0x4c] ss:$0 sm:$0xff] }
 0x354   : > { %v3982_v19 = vmul.f32 %v6422_v60, %v11388_v35  ;;  %v4337_v39 = vsel %vm834_vm0, %v3980_v25, 0.0 }
 0x355   : > { %v4326_v53 = vadd.f32 %v4325_v33, %v4324_v46  ;;  %v6423_v33 = vld [vmem:[%s15013_s2 + $0x4d] ss:$0 sm:$0xff] }
 0x356   : > { %v12101_v21 = vld [vmem:[#allocation2 + $0x18] sm:$0xff]  ;;  %v3984_v46 = vmul.f32 %v6423_v33, %v11400_v54  ;;  %v4339_v37 = vsel %vm834_vm0, %v3982_v19, 0.0 }
 0x357   : > { %5319 = vrot.lane.b32.xlu1 %v12101_v21, %s6648_s6  ;;  %v4328_v10 = vadd.f32 %v4327_v1, %v4326_v53  ;;  %v6424_v1 = vld [vmem:[%s15013_s2 + $0x4e] ss:$0 sm:$0xff] }
 0x358   : > { %v3986_v53 = vmul.f32 %v6424_v1, %v11427_v43  ;;  %v4341_v3 = vsel %vm834_vm0, %v3984_v46, 0.0  ;;  %v16660_v1 = vld [vmem:[#allocation219_spill] sm:$0xff] }
 0x359   : > { %v4330_v23 = vadd.f32 %v4329_v12, %v4328_v10  ;;  %v6425_v12 = vld [vmem:[%s15013_s2 + $0x4f] ss:$0 sm:$0xff] }
 0x35a   : > { %v3988_v10 = vmul.f32 %v6425_v12, %v11439_v42  ;;  %v4343_v58 = vsel %vm834_vm0, %v3986_v53, 0.0  ;;  %v5197_v53 = vmul.f32 %v16660_v1, %v16660_v1 }
 0x35b   : > { %v4332_v0 = vadd.f32 %v4331_v63, %v4330_v23  ;;  %v6426_v63 = vld [vmem:[%s15013_s2 + $0x50] ss:$0 sm:$0xff] }
 0x35c   : > { %v3990_v23 = vmul.f32 %v6426_v63, %v11464_v62  ;;  %v4345_v60 = vsel %vm834_vm0, %v3988_v10, 0.0 }
 0x35d   : > { %v4334_v59 = vadd.f32 %v4333_v5, %v4332_v0  ;;  %v6427_v5 = vld [vmem:[%s15013_s2 + $0x51] ss:$0 sm:$0xff] }
 0x35e   : > { %v3992_v0 = vmul.f32 %v6427_v5, %v11476_v44  ;;  %v4347_v33 = vsel %vm834_vm0, %v3990_v23, 0.0  ;;  %v12320_v44 = vld [vmem:[%s12240_s28 + $0x68] sm:$0xff] }
 0x35f   : > { %v4336_v16 = vadd.f32 %v4335_v51, %v4334_v59  ;;  %v6428_v51 = vld [vmem:[%s15013_s2 + $0x52] ss:$0 sm:$0xff] }
 0x360   : > { %v3994_v59 = vmul.f32 %v6428_v51, %v11501_v45  ;;  %v4349_v12 = vsel %vm834_vm0, %v3992_v0, 0.0 }
 0x361   : > { %v4338_v55 = vadd.f32 %v4337_v39, %v4336_v16  ;;  %v16659_v39 = vld [vmem:[#allocation218_spill] sm:$0xff] }
 0x362   : > { %v5195_v16 = vmul.f32 %v16659_v39, %v16659_v39  ;;  %v4351_v23 = vsel %vm834_vm0, %v3994_v59, 0.0 }
 0x363   : > { %v4340_v9 = vadd.f32 %v4339_v37, %v4338_v55  ;;  %v6429_v37 = vld [vmem:[%s15013_s2 + $0x53] ss:$0 sm:$0xff] }
 0x364   : > { %v3996_v55 = vmul.f32 %v6429_v37, %v11513_v17  ;;  %v6434_v37 = vld [vmem:[%s15013_s2 + $0x58] ss:$0 sm:$0xff] }
 0x365   : > { %v4342_v25 = vadd.f32 %v4341_v3, %v4340_v9  ;;  %v5199_v3 = vadd.f32 %v5197_v53, %v5195_v16  ;;  %v6430_v9 = vld [vmem:[%s15013_s2 + $0x54] ss:$0 sm:$0xff] }
 0x366   : > { %v3998_v63 = vmul.f32 %v6430_v9, %v11540_v7  ;;  %v4353_v0 = vsel %vm834_vm0, %v3996_v55, 0.0  ;;  %v4006_v55 = vmul.f32 %v6434_v37, %v11833_v2  ;;  %v12291_v7 = vld [vmem:[%s12240_s28 + $0x48] sm:$0xff] }
 0x367   : > { %v4344_v19 = vadd.f32 %v4343_v58, %v4342_v25  ;;  %6223 = vrsqrt.f32 %v5199_v3  ;;  %v6431_v25 = vld [vmem:[%s15013_s2 + $0x55] ss:$0 sm:$0xff]  ;;  %vm5208_vm9 = vcmp.eq.f32.partialorder %v5199_v3, inf  ;;  %vm5210_vm10 = vcmp.eq.f32.partialorder %v5199_v3, 0.0 }
 0x368   : > { %v4000_v5 = vmul.f32 %v6431_v25, %v11763_v56  ;;  %v12288_v56 = vld [vmem:[%s12240_s28 + $0x40] sm:$0xff] }
 0x369   : > { %v4346_v46 = vadd.f32 %v4345_v60, %v4344_v19  ;;  %v6432_v19 = vld [vmem:[%s15013_s2 + $0x56] ss:$0 sm:$0xff] }
 0x36a   : > { %v4002_v51 = vmul.f32 %v6432_v19, %v11788_v57  ;;  %v4357_v16 = vsel %vm834_vm0, %v4000_v5, 0.0 }
 0x36b   : > { %v4348_v10 = vadd.f32 %v4347_v33, %v4346_v46  ;;  %v4355_v33 = vsel %vm834_vm0, %v3998_v63, 0.0  ;;  %v6433_v46 = vld [vmem:[%s15013_s2 + $0x57] ss:$0 sm:$0xff]  ;;  %v6435_v63 = vld [vmem:[%s15013_s2 + $0x59] ss:$0 sm:$0xff] }
 0x36c   : > { %v4004_v39 = vmul.f32 %v6433_v46, %v11813_v48  ;;  %v16667_v48 = vld [vmem:[#allocation101_spill] sm:$0xff] }
 0x36d   : > { %v4350_v58 = vadd.f32 %v4349_v12, %v4348_v10  ;;  %v6224_v1 = vpop.eup %6223  ;;  %v4359_v12 = vsel %vm834_vm0, %v4002_v51, 0.0 }
 0x36e   : > { %v5202_v10 = vmul.f32 %v6224_v1, %v5199_v3 }
 0x36f   : > { %v4352_v60 = vadd.f32 %v4351_v23, %v4350_v58  ;;  %v4008_v23 = vmul.f32 %v6435_v63, %v11860_v20  ;;  %v4361_v58 = vsel %vm834_vm0, %v4004_v39, 0.0  ;;  %v5196_v39 = vmul.f32 %v12072_v29, %v12072_v29 }
 0x370   : > { %v5203_v25 = vmul.f32 %v6224_v1, %v5202_v10 }
 0x371   : > { %v4354_v59 = vadd.f32 %v4353_v0, %v4352_v60  ;;  %v4363_v0 = vsel %vm834_vm0, %v4006_v55, 0.0 }
 0x372   : > { %v5204_v60 = vmul.f32 0.5, %v5203_v25 }
 0x373   : > { %v4356_v53 = vadd.f32 %v4355_v33, %v4354_v59  ;;  %v4365_v33 = vsel %vm834_vm0, %v4008_v23, 0.0 }
 0x374   : > { %v5205_v59 = vsub.f32 1.5, %v5204_v60 }
 0x375   : > { %v4358_v9 = vadd.f32 %v4357_v16, %v4356_v53  ;;  %v5211_v53 = vand.u32 2147483648, %v5199_v3 }
 0x376   : > { %v5206_v46 = vmul.f32 %v6224_v1, %v5205_v59 }
 0x377   : > { %v4360_v5 = vadd.f32 %v4359_v12, %v4358_v9 }
 0x378   : > { %v5207_v37 = vmul.f32 %v5206_v46, %v5199_v3 }
 0x379   : > { %v4362_v19 = vadd.f32 %v4361_v58, %v4360_v5  ;;  %v6436_v5 = vld [vmem:[#allocation2] sm:$0xff] }
 0x37a   : > { %v5209_v12 = vsel %vm5208_vm9, %v5199_v3, %v5207_v37  ;;  %v5255_v3 = vpop.permute.xlu0 %5254  ;;  %v5317_v37 = vpop.permute.xlu1 %5316 }
 0x37b   : > { %v4364_v51 = vadd.f32 %v4363_v0, %v4362_v19  ;;  %v5212_v55 = vsel %vm5210_vm10, %v5211_v53, %v5209_v12  ;;  %v5256_v0 = vsel %vm5253_vm11, %v5255_v3, %v6436_v5 }
 0x37c   : > { %5641 = vst.msk [vmem:[#allocation2 + $0x20] sm:$0xff] %vm834_vm0, %v5212_v55 }
 0x37d   : > { %v4366_v16 = vadd.f32 %v4365_v33, %v4364_v51 }
 0x37f   : > { %v5192_v63 = vmul.f32 %v4366_v16, %v12064_v41  ;;  %v12278_v41 = vld [vmem:[%s12240_s28 + $0x38] sm:$0xff] }
 0x381   : > { %5228 = vst.msk [vmem:[#allocation2 + $0x8] sm:$0xff] %vm834_vm0, %v5192_v63  ;;  %v5198_v10 = vmul.f32 %v5192_v63, %v5192_v63 }
 0x383   : > { %v5200_v9 = vadd.f32 %v5198_v10, %v5196_v39  ;;  %v12205_v23 = vld [vmem:[#allocation2 + $0x20] sm:$0xff]  ;;  %v6437_v39 = vld [vmem:[#allocation2 + $0x10] sm:$0xff] }
 0x384   : > { %5371 = vrot.lane.b32.xlu2 %v12205_v23, %s6648_s6  ;;  %v5318_v12 = vsel %vm5253_vm11, %v5317_v37, %v6437_v39 }
 0x385   : > { %6225 = vrsqrt.f32 %v5200_v9  ;;  %vm5220_vm12 = vcmp.eq.f32.partialorder %v5200_v9, inf  ;;  %v5223_v59 = vand.u32 2147483648, %v5200_v9  ;;  %vm5222_vm13 = vcmp.eq.f32.partialorder %v5200_v9, 0.0 }
 0x388   : > { %v12201_v1 = vld [vmem:[#allocation2 + $0x8] sm:$0xff] }
 0x389   : > { %5257 = vrot.lane.b32.xlu0 %v12201_v1, %s6648_s6 }
 0x38b   : > { %v6226_v29 = vpop.eup %6225 }
 0x38c   : > { %v5214_v58 = vmul.f32 %v6226_v29, %v5200_v9 }
 0x38e   : > { %v5215_v25 = vmul.f32 %v6226_v29, %v5214_v58 }
 0x390   : > { %v5216_v60 = vmul.f32 0.5, %v5215_v25 }
 0x391   : > { %5260 = vrot.lane.b32.xlu0 %v5256_v0, %s6648_s6 }
 0x392   : > { %v5217_v19 = vsub.f32 1.5, %v5216_v60 }
 0x394   : > { %v5218_v33 = vmul.f32 %v6226_v29, %v5217_v19  ;;  %v12246_v19 = vld [vmem:[%s12240_s28 + $0x8] sm:$0xff] }
 0x396   : > { %v5219_v51 = vmul.f32 %v5218_v33, %v5200_v9  ;;  %v12249_v33 = vld [vmem:[%s12240_s28 + $0x10] sm:$0xff] }
 0x398   : > { %v5221_v46 = vsel %vm5220_vm12, %v5200_v9, %v5219_v51  ;;  %v16661_v51 = vld [vmem:[#allocation98_spill] sm:$0xff] }
 0x399   : > { %v5224_v16 = vsel %vm5222_vm13, %v5223_v59, %v5221_v46  ;;  %v12252_v59 = vld [vmem:[%s12240_s28 + $0x18] sm:$0xff] }
 0x39a   : > { %5642 = vst.msk [vmem:[#allocation2 + $0x28] sm:$0xff] %vm834_vm0, %v5224_v16  ;;  %v16662_v16 = vld [vmem:[#allocation268_spill] sm:$0xff] }
 0x39b   : > { %v2126_v37 = vmul.f32 %v16662_v16, %v12246_v19 }
 0x39d   : > { %v2484_v2 = vsel %vm834_vm0, %v2126_v37, 0.0 }
 0x3a1   : > { %v12212_v53 = vld [vmem:[#allocation2 + $0x28] sm:$0xff] }
 0x3a2   : > { %5374 = vrot.lane.b32.xlu2 %v12212_v53, %s6648_s6 }
 0x3aa   : > { %5322 = vrot.lane.b32.xlu2 %v5318_v12, %s6648_s6 }
 0x3c9   : > { %v5320_v63 = vpop.permute.xlu1 %5319 }
 0x3ca   : > { %v5321_v55 = vsel %vm5253_vm11, %v5320_v63, %v12101_v21  ;;  %v16663_v63 = vld [vmem:[#allocation99_spill] sm:$0xff] }
 0x3cb   : > { %5324 = vrot.lane.b32.xlu0 %v5321_v55, %s6648_s6  ;;  %v2127_v12 = vmul.f32 %v16663_v63, %v12249_v33  ;;  %v12261_v55 = vld [vmem:[%s12240_s28 + $0x20] sm:$0xff]  ;;  %v12275_v63 = vld [vmem:[%s12240_s28 + $0x30] sm:$0xff] }
 0x3cd   : > { %v2306_v16 = vsel %vm834_vm0, %v2127_v12, 0.0 }
 0x3de   : > { %v5372_v10 = vpop.permute.xlu2 %5371 }
 0x3df   : > { %v5373_v25 = vsel %vm5253_vm11, %v5372_v10, %v12205_v23  ;;  %v12264_v10 = vld [vmem:[%s12240_s28 + $0x28] sm:$0xff] }
 0x3fb   : > { %v5258_v9 = vpop.permute.xlu0 %5257 }
 0x3fc   : > { %v5259_v29 = vsel %vm5253_vm11, %v5258_v9, %v12201_v1  ;;  %v5375_v3 = vpop.permute.xlu2 %5374  ;;  %v16664_v9 = vld [vmem:[#allocation270_spill] sm:$0xff] }
 0x3fd   : > { %5262 = vrot.lane.b32.xlu1 %v5259_v29, %s6648_s6  ;;  %v5376_v58 = vsel %vm5253_vm11, %v5375_v3, %v12212_v53  ;;  %v2128_v29 = vmul.f32 %v16664_v9, %v12252_v59  ;;  %v16665_v3 = vld [vmem:[#allocation100_spill] sm:$0xff]  ;;  %16704 = vst [vmem:[#allocation270_spill] sm:$0xff] %v12482_v31 }
 0x3fe   : > { %5379 = vrot.lane.b32.xlu2 %v5376_v58, %s6648_s6  ;;  %v2129_v58 = vmul.f32 %v16665_v3, %v12261_v55  ;;  %v2131_v3 = vmul.f32 %v16667_v48, %v12275_v63  ;;  %v16670_v48 = vld [vmem:[#allocation275_spill] sm:$0xff] }
 0x3ff   : > { %v2485_v9 = vsel %vm834_vm0, %v2128_v29, 0.0  ;;  %v16669_v29 = vld [vmem:[#allocation102_spill] sm:$0xff]  ;;  %v2134_v45 = vmul.f32 %v16670_v48, %v12291_v7 }
 0x400   : > { %v2486_v12 = vadd.f32 %v2485_v9, %v2484_v2  ;;  %v2133_v17 = vmul.f32 %v16669_v29, %v12288_v56  ;;  %v12303_v9 = vld [vmem:[%s12240_s28 + $0x50] sm:$0xff]  ;;  %v16671_v29 = vld [vmem:[#allocation103_spill] sm:$0xff] }
 0x401   : > { %v2135_v48 = vmul.f32 %v16671_v29, %v12303_v9  ;;  %v16674_v29 = vld [vmem:[#allocation283_spill] sm:$0xff] }
 0x402   : > { %v2138_v42 = vmul.f32 %v16674_v29, %v12320_v44 }
 0x403   : > { %v5261_v0 = vpop.permute.xlu0 %5260 }
 0x404   : > { %v12231_v60 = vsel %vm5253_vm11, %v5261_v0, %v6436_v5  ;;  %v12243_v5 = vld [vmem:[%s12240_s28] sm:$0xff] }
 0x405   : > { %5377 = vrot.lane.b32.xlu1 %v5373_v25, %s6648_s6  ;;  %5268 = vrot.lane.b32.xlu0 %v12231_v60, %s6649_s26  ;;  %v2125_v46 = vmul.f32 %v16661_v51, %v12243_v5  ;;  %v16666_v25 = vld [vmem:[#allocation271_spill] sm:$0xff] }
 0x406   : > { %v2130_v0 = vmul.f32 %v16666_v25, %v12264_v10  ;;  %v16668_v25 = vld [vmem:[#allocation273_spill] sm:$0xff] }
 0x407   : > { %v2305_v51 = vsel %vm834_vm0, %v2125_v46, 0.0  ;;  %v2132_v57 = vmul.f32 %v16668_v25, %v12278_v41  ;;  %v2308_v46 = vsel %vm834_vm0, %v2129_v58, 0.0  ;;  %v2310_v25 = vsel %vm834_vm0, %v2131_v3, 0.0  ;;  %v16672_v3 = vld [vmem:[#allocation278_spill] sm:$0xff] }
 0x408   : > { %v2307_v20 = vadd.f32 %v2306_v16, %v2305_v51  ;;  %v2487_v37 = vsel %vm834_vm0, %v2130_v0, 0.0  ;;  %v5323_v16 = vpop.permute.xlu2 %5322 }
 0x409   : > { %v2488_v58 = vadd.f32 %v2487_v37, %v2486_v12  ;;  %v12300_v2 = vsel %vm5253_vm11, %v5323_v16, %v6437_v39  ;;  %v2312_v39 = vsel %vm834_vm0, %v2133_v17, 0.0  ;;  %v12317_v16 = vld [vmem:[%s12240_s28 + $0x60] sm:$0xff]  ;;  %v12329_v17 = vld [vmem:[%s12240_s28 + $0x70] sm:$0xff] }
 0x40a   : > { %v2309_v51 = vadd.f32 %v2308_v46, %v2307_v20  ;;  %v12306_v20 = vld [vmem:[%s12240_s28 + $0x58] sm:$0xff]  ;;  %v2489_v46 = vsel %vm834_vm0, %v2132_v57, 0.0  ;;  %5330 = vrot.lane.b32.xlu2 %v12300_v2, %s6649_s26  ;;  %v2491_v57 = vsel %vm834_vm0, %v2134_v45, 0.0  ;;  %v16675_v45 = vld [vmem:[#allocation105_spill] sm:$0xff] }
 0x40b   : > { %v2136_v12 = vmul.f32 %v16672_v3, %v12306_v20  ;;  %v2490_v37 = vadd.f32 %v2489_v46, %v2488_v58  ;;  %v2314_v3 = vsel %vm834_vm0, %v2135_v48, 0.0  ;;  %v12332_v58 = vld [vmem:[%s12240_s28 + $0x78] sm:$0xff]  ;;  %v12341_v48 = vld [vmem:[%s12240_s28 + $0x80] sm:$0xff] }
 0x40c   : > { %v2311_v0 = vadd.f32 %v2310_v25, %v2309_v51  ;;  %v16673_v25 = vld [vmem:[#allocation104_spill] sm:$0xff] }
 0x40d   : > { %v2137_v62 = vmul.f32 %v16673_v25, %v12317_v16  ;;  %v2492_v43 = vadd.f32 %v2491_v57, %v2490_v37  ;;  %v16676_v25 = vld [vmem:[#allocation284_spill] sm:$0xff] }
 0x40e   : > { %v2313_v51 = vadd.f32 %v2312_v39, %v2311_v0  ;;  %v2493_v0 = vsel %vm834_vm0, %v2136_v12, 0.0  ;;  %v2139_v39 = vmul.f32 %v16675_v45, %v12329_v17  ;;  %v2140_v54 = vmul.f32 %v16676_v25, %v12332_v58  ;;  %v12344_v37 = vld [vmem:[%s12240_s28 + $0x88] sm:$0xff]  ;;  %v16677_v12 = vld [vmem:[#allocation106_spill] sm:$0xff]  ;;  %v16678_v45 = vld [vmem:[#allocation285_spill] sm:$0xff] }
 0x40f   : > { %v2316_v29 = vsel %vm834_vm0, %v2137_v62, 0.0  ;;  %v2494_v35 = vadd.f32 %v2493_v0, %v2492_v43  ;;  %v2142_v15 = vmul.f32 %v16678_v45, %v12344_v37  ;;  %v12353_v62 = vld [vmem:[%s12240_s28 + $0x90] sm:$0xff]  ;;  %v12356_v43 = vld [vmem:[%s12240_s28 + $0x98] sm:$0xff] }
 0x410   : > { %v2315_v46 = vadd.f32 %v2314_v3, %v2313_v51  ;;  %v2495_v51 = vsel %vm834_vm0, %v2138_v42, 0.0  ;;  %v2141_v3 = vmul.f32 %v16677_v12, %v12341_v48  ;;  %v2318_v25 = vsel %vm834_vm0, %v2139_v39, 0.0  ;;  %v16679_v42 = vld [vmem:[#allocation107_spill] sm:$0xff]  ;;  %v16680_v12 = vld [vmem:[#allocation286_spill] sm:$0xff] }
 0x411   : > { %v2496_v18 = vadd.f32 %v2495_v51, %v2494_v35  ;;  %v2144_v27 = vmul.f32 %v16680_v12, %v12356_v43  ;;  %v12365_v39 = vld [vmem:[%s12240_s28 + $0xa0] sm:$0xff]  ;;  %v12368_v35 = vld [vmem:[%s12240_s28 + $0xa8] sm:$0xff] }
 0x412   : > { %v2317_v57 = vadd.f32 %v2316_v29, %v2315_v46  ;;  %v2497_v46 = vsel %vm834_vm0, %v2140_v54, 0.0  ;;  %v2143_v29 = vmul.f32 %v16679_v42, %v12353_v62  ;;  %v2320_v45 = vsel %vm834_vm0, %v2141_v3, 0.0  ;;  %v16681_v54 = vld [vmem:[#allocation108_spill] sm:$0xff]  ;;  %v16682_v42 = vld [vmem:[#allocation287_spill] sm:$0xff]  ;;  %v12377_v3 = vld [vmem:[%s12240_s28 + $0xb0] sm:$0xff] }
 0x413   : > { %v2498_v13 = vadd.f32 %v2497_v46, %v2496_v18  ;;  %v2146_v32 = vmul.f32 %v16682_v42, %v12368_v35  ;;  %v12380_v18 = vld [vmem:[%s12240_s28 + $0xb8] sm:$0xff] }
 0x414   : > { %v2319_v0 = vadd.f32 %v2318_v25, %v2317_v57  ;;  %v2499_v57 = vsel %vm834_vm0, %v2142_v15, 0.0  ;;  %v2145_v25 = vmul.f32 %v16681_v54, %v12365_v39  ;;  %v2322_v12 = vsel %vm834_vm0, %v2143_v29, 0.0  ;;  %v16683_v15 = vld [vmem:[#allocation109_spill] sm:$0xff]  ;;  %v16684_v54 = vld [vmem:[#allocation288_spill] sm:$0xff]  ;;  %v12389_v29 = vld [vmem:[%s12240_s28 + $0xc0] sm:$0xff] }
 0x415   : > { %v2500_v6 = vadd.f32 %v2499_v57, %v2498_v13  ;;  %v2148_v34 = vmul.f32 %v16684_v54, %v12380_v18  ;;  %v12392_v13 = vld [vmem:[%s12240_s28 + $0xc8] sm:$0xff] }
 0x416   : > { %v2321_v51 = vadd.f32 %v2320_v45, %v2319_v0  ;;  %v2501_v0 = vsel %vm834_vm0, %v2144_v27, 0.0  ;;  %v2147_v45 = vmul.f32 %v16683_v15, %v12377_v3  ;;  %v2324_v42 = vsel %vm834_vm0, %v2145_v25, 0.0  ;;  %v16685_v27 = vld [vmem:[#allocation110_spill] sm:$0xff]  ;;  %v16686_v15 = vld [vmem:[#allocation289_spill] sm:$0xff] }
 0x417   : > { %v2502_v8 = vadd.f32 %v2501_v0, %v2500_v6  ;;  %v2150_v14 = vmul.f32 %v16686_v15, %v12392_v13  ;;  %v12401_v25 = vld [vmem:[%s12240_s28 + $0xd0] sm:$0xff]  ;;  %v12404_v6 = vld [vmem:[%s12240_s28 + $0xd8] sm:$0xff] }
 0x418   : > { %v2323_v46 = vadd.f32 %v2322_v12, %v2321_v51  ;;  %v2503_v51 = vsel %vm834_vm0, %v2146_v32, 0.0  ;;  %v2149_v12 = vmul.f32 %v16685_v27, %v12389_v29  ;;  %v2326_v54 = vsel %vm834_vm0, %v2147_v45, 0.0  ;;  %v16687_v32 = vld [vmem:[#allocation111_spill] sm:$0xff]  ;;  %v16688_v27 = vld [vmem:[#allocation290_spill] sm:$0xff] }
 0x419   : > { %v2504_v50 = vadd.f32 %v2503_v51, %v2502_v8  ;;  %v2152_v40 = vmul.f32 %v16688_v27, %v12404_v6  ;;  %v12413_v45 = vld [vmem:[%s12240_s28 + $0xe0] sm:$0xff]  ;;  %v12416_v8 = vld [vmem:[%s12240_s28 + $0xe8] sm:$0xff] }
 0x41a   : > { %v2325_v57 = vadd.f32 %v2324_v42, %v2323_v46  ;;  %v2505_v46 = vsel %vm834_vm0, %v2148_v34, 0.0  ;;  %v2151_v42 = vmul.f32 %v16687_v32, %v12401_v25  ;;  %v2328_v15 = vsel %vm834_vm0, %v2149_v12, 0.0  ;;  %v16689_v34 = vld [vmem:[#allocation112_spill] sm:$0xff]  ;;  %v16690_v32 = vld [vmem:[#allocation291_spill] sm:$0xff]  ;;  %v12425_v12 = vld [vmem:[%s12240_s28 + $0xf0] sm:$0xff] }
 0x41b   : > { %v2506_v22 = vadd.f32 %v2505_v46, %v2504_v50  ;;  %v2154_v28 = vmul.f32 %v16690_v32, %v12416_v8  ;;  %v12428_v50 = vld [vmem:[%s12240_s28 + $0xf8] sm:$0xff] }
 0x41c   : > { %v2327_v0 = vadd.f32 %v2326_v54, %v2325_v57  ;;  %v2507_v57 = vsel %vm834_vm0, %v2150_v14, 0.0  ;;  %v2153_v54 = vmul.f32 %v16689_v34, %v12413_v45  ;;  %v2330_v27 = vsel %vm834_vm0, %v2151_v42, 0.0  ;;  %v16691_v14 = vld [vmem:[#allocation113_spill] sm:$0xff]  ;;  %v16692_v34 = vld [vmem:[#allocation292_spill] sm:$0xff]  ;;  %v12437_v42 = vld [vmem:[%s12240_s28 + $0x100] sm:$0xff] }
 0x41d   : > { %v2508_v61 = vadd.f32 %v2507_v57, %v2506_v22  ;;  %v2156_v26 = vmul.f32 %v16692_v34, %v12428_v50  ;;  %v12440_v22 = vld [vmem:[%s12240_s28 + $0x108] sm:$0xff]  ;;  %v2511_v24 = vsel %vm834_vm0, %v2154_v28, 0.0  ;;  %v16697_v28 = vld [vmem:[#allocation115_spill] sm:$0xff] }
 0x41e   : > { %v2329_v51 = vadd.f32 %v2328_v15, %v2327_v0  ;;  %v2509_v0 = vsel %vm834_vm0, %v2152_v40, 0.0  ;;  %v2155_v15 = vmul.f32 %v16691_v14, %v12425_v12  ;;  %v2332_v32 = vsel %vm834_vm0, %v2153_v54, 0.0  ;;  %v12449_v54 = vld [vmem:[%s12240_s28 + $0x110] sm:$0xff] }
 0x41f   : > { %v2510_v4 = vadd.f32 %v2509_v0, %v2508_v61  ;;  %16695 = vst [vmem:[#allocation218_spill] sm:$0xff] %v12449_v54  ;;  %v12452_v61 = vld [vmem:[%s12240_s28 + $0x118] sm:$0xff]  ;;  %v2159_v11 = vmul.f32 %v16697_v28, %v12449_v54  ;;  %v16701_v28 = vld [vmem:[#allocation116_spill] sm:$0xff] }
 0x420   : > { %v2331_v46 = vadd.f32 %v2330_v27, %v2329_v51  ;;  %v16693_v51 = vld [vmem:[#allocation114_spill] sm:$0xff]  ;;  %v16694_v27 = vld [vmem:[#allocation293_spill] sm:$0xff]  ;;  %v2334_v34 = vsel %vm834_vm0, %v2155_v15, 0.0  ;;  %16696 = vst [vmem:[#allocation219_spill] sm:$0xff] %v12452_v61 }
 0x421   : > { %v2157_v40 = vmul.f32 %v16693_v51, %v12437_v42  ;;  %v2158_v14 = vmul.f32 %v16694_v27, %v12440_v22  ;;  %v2512_v49 = vadd.f32 %v2511_v24, %v2510_v4  ;;  %v16698_v51 = vld [vmem:[#allocation294_spill] sm:$0xff]  ;;  %v12465_v4 = vld [vmem:[%s12240_s28 + $0x120] sm:$0xff] }
 0x422   : > { %v2333_v57 = vadd.f32 %v2332_v32, %v2331_v46  ;;  %v2513_v46 = vsel %vm834_vm0, %v2156_v26, 0.0  ;;  %v2160_v38 = vmul.f32 %v16698_v51, %v12452_v61  ;;  %16699 = vst [vmem:[#allocation98_spill] sm:$0xff] %v12465_v4  ;;  %v12479_v51 = vld [vmem:[%s12240_s28 + $0x130] sm:$0xff] }
 0x423   : > { %v2336_v27 = vsel %vm834_vm0, %v2157_v40, 0.0  ;;  %v2514_v15 = vadd.f32 %v2513_v46, %v2512_v49  ;;  %v2161_v40 = vmul.f32 %v16701_v28, %v12465_v4  ;;  %v16702_v49 = vld [vmem:[#allocation295_spill] sm:$0xff]  ;;  %16703 = vst [vmem:[#allocation99_spill] sm:$0xff] %v12479_v51  ;;  %v16706_v28 = vld [vmem:[#allocation296_spill] sm:$0xff] }
 0x424   : > { %v2335_v0 = vadd.f32 %v2334_v34, %v2333_v57  ;;  %v12468_v57 = vld [vmem:[%s12240_s28 + $0x128] sm:$0xff]  ;;  %v2515_v34 = vsel %vm834_vm0, %v2158_v14, 0.0  ;;  %v2517_v14 = vsel %vm834_vm0, %v2160_v38, 0.0  ;;  %v2164_v4 = vmul.f32 %v16706_v28, %v12482_v31  ;;  %v16708_v38 = vld [vmem:[#allocation121_spill] sm:$0xff] }
 0x425   : > { %16700 = vst [vmem:[#allocation268_spill] sm:$0xff] %v12468_v57  ;;  %v2162_v46 = vmul.f32 %v16702_v49, %v12468_v57  ;;  %v2340_v49 = vsel %vm834_vm0, %v2161_v40, 0.0  ;;  %v12503_v40 = vld [vmem:[%s12240_s28 + $0x150] sm:$0xff] }
 0x426   : > { %v2337_v26 = vadd.f32 %v2336_v27, %v2335_v0  ;;  %v16705_v27 = vld [vmem:[#allocation119_spill] sm:$0xff]  ;;  %16710 = vst [vmem:[#allocation271_spill] sm:$0xff] %v12503_v40  ;;  %v2521_v54 = vsel %vm834_vm0, %v2164_v4, 0.0  ;;  %v16716_v4 = vld [vmem:[#allocation125_spill] sm:$0xff] }
 0x427   : > { %v2163_v61 = vmul.f32 %v16705_v27, %v12479_v51  ;;  %v16709_v27 = vld [vmem:[#allocation297_spill] sm:$0xff] }
 0x429   : > { %v2342_v28 = vsel %vm834_vm0, %v2163_v61, 0.0  ;;  %v12515_v61 = vld [vmem:[%s12240_s28 + $0x160] sm:$0xff] }
 0x42a   : > { %16714 = vst [vmem:[#allocation273_spill] sm:$0xff] %v12515_v61 }
 0x43d   : > { %v5325_v32 = vpop.permute.xlu0 %5324 }
 0x43e   : > { %v12462_v24 = vsel %vm5253_vm11, %v5325_v32, %v12101_v21  ;;  %v2338_v21 = vsel %vm834_vm0, %v2159_v11, 0.0  ;;  %v2516_v32 = vadd.f32 %v2515_v34, %v2514_v15  ;;  %v12491_v11 = vld [vmem:[%s12240_s28 + $0x140] sm:$0xff]  ;;  %v12494_v15 = vld [vmem:[%s12240_s28 + $0x148] sm:$0xff] }
 0x43f   : > { %5332 = vrot.lane.b32.xlu0 %v12462_v24, %s6649_s26  ;;  %v2339_v0 = vadd.f32 %v2338_v21, %v2337_v26  ;;  %16707 = vst [vmem:[#allocation100_spill] sm:$0xff] %v12494_v15  ;;  %v2519_v26 = vsel %vm834_vm0, %v2162_v46, 0.0  ;;  %v2165_v21 = vmul.f32 %v16708_v38, %v12491_v11  ;;  %v2166_v51 = vmul.f32 %v16709_v27, %v12494_v15 }
 0x440   : > { %v2518_v57 = vadd.f32 %v2517_v14, %v2516_v32  ;;  %v12506_v32 = vld [vmem:[%s12240_s28 + $0x158] sm:$0xff] }
 0x441   : > { %v2341_v34 = vadd.f32 %v2340_v49, %v2339_v0  ;;  %16711 = vst [vmem:[#allocation101_spill] sm:$0xff] %v12506_v32  ;;  %v16712_v0 = vld [vmem:[#allocation123_spill] sm:$0xff]  ;;  %v16713_v49 = vld [vmem:[#allocation298_spill] sm:$0xff]  ;;  %v2344_v27 = vsel %vm834_vm0, %v2165_v21, 0.0 }
 0x442   : > { %v2520_v31 = vadd.f32 %v2519_v26, %v2518_v57  ;;  %v2167_v46 = vmul.f32 %v16712_v0, %v12503_v40  ;;  %v2168_v38 = vmul.f32 %v16713_v49, %v12506_v32  ;;  %v12518_v57 = vld [vmem:[%s12240_s28 + $0x168] sm:$0xff]  ;;  %v16717_v0 = vld [vmem:[#allocation299_spill] sm:$0xff]  ;;  %v12529_v49 = vld [vmem:[%s12240_s28 + $0x170] sm:$0xff] }
 0x443   : > { %v2343_v14 = vadd.f32 %v2342_v28, %v2341_v34  ;;  %16715 = vst [vmem:[#allocation102_spill] sm:$0xff] %v12518_v57  ;;  %v2523_v34 = vsel %vm834_vm0, %v2166_v51, 0.0  ;;  %v2169_v28 = vmul.f32 %v16716_v4, %v12515_v61  ;;  %v2170_v21 = vmul.f32 %v16717_v0, %v12518_v57  ;;  %v16721_v4 = vld [vmem:[#allocation300_spill] sm:$0xff] }
 0x444   : > { %v2522_v15 = vadd.f32 %v2521_v54, %v2520_v31  ;;  %v2346_v31 = vsel %vm834_vm0, %v2167_v46, 0.0  ;;  %16718 = vst [vmem:[#allocation275_spill] sm:$0xff] %v12529_v49  ;;  %v12541_v46 = vld [vmem:[%s12240_s28 + $0x180] sm:$0xff] }
 0x445   : > { %v2345_v26 = vadd.f32 %v2344_v27, %v2343_v14  ;;  %v12532_v14 = vld [vmem:[%s12240_s28 + $0x178] sm:$0xff]  ;;  %v2525_v27 = vsel %vm834_vm0, %v2168_v38, 0.0  ;;  %v2348_v0 = vsel %vm834_vm0, %v2169_v28, 0.0  ;;  %16722 = vst [vmem:[#allocation278_spill] sm:$0xff] %v12541_v46 }
 0x446   : > { %v2524_v54 = vadd.f32 %v2523_v34, %v2522_v15  ;;  %16719 = vst [vmem:[#allocation103_spill] sm:$0xff] %v12532_v14  ;;  %v2172_v61 = vmul.f32 %v16721_v4, %v12532_v14  ;;  %v12544_v15 = vld [vmem:[%s12240_s28 + $0x188] sm:$0xff]  ;;  %v16724_v38 = vld [vmem:[#allocation130_spill] sm:$0xff] }
 0x447   : > { %5338 = vrot.lane.b32.xlu0 %v12300_v2, %s6650_s22  ;;  %v2347_v51 = vadd.f32 %v2346_v31, %v2345_v26  ;;  %v16720_v2 = vld [vmem:[#allocation128_spill] sm:$0xff]  ;;  %16723 = vst [vmem:[#allocation104_spill] sm:$0xff] %v12544_v15  ;;  %v2527_v26 = vsel %vm834_vm0, %v2170_v21, 0.0  ;;  %v2173_v40 = vmul.f32 %v16724_v38, %v12541_v46  ;;  %v16729_v38 = vld [vmem:[#allocation302_spill] sm:$0xff] }
 0x448   : > { %v2171_v32 = vmul.f32 %v16720_v2, %v12529_v49  ;;  %v2526_v57 = vadd.f32 %v2525_v27, %v2524_v54  ;;  %v16725_v2 = vld [vmem:[#allocation301_spill] sm:$0xff]  ;;  %v12556_v27 = vld [vmem:[%s12240_s28 + $0x198] sm:$0xff]  ;;  %v16728_v21 = vld [vmem:[#allocation132_spill] sm:$0xff] }
 0x449   : > { %v2349_v34 = vadd.f32 %v2348_v0, %v2347_v51  ;;  %v2174_v49 = vmul.f32 %v16725_v2, %v12544_v15  ;;  %v12553_v54 = vld [vmem:[%s12240_s28 + $0x190] sm:$0xff]  ;;  %16727 = vst [vmem:[#allocation105_spill] sm:$0xff] %v12556_v27  ;;  %v2529_v51 = vsel %vm834_vm0, %v2172_v61, 0.0  ;;  %v2176_v46 = vmul.f32 %v16729_v38, %v12556_v27  ;;  %v12586_v38 = vld [vmem:[%s12240_s28 + $0x1b8] sm:$0xff] }
 0x44a   : > { %v2350_v4 = vsel %vm834_vm0, %v2171_v32, 0.0  ;;  %v2528_v28 = vadd.f32 %v2527_v26, %v2526_v57  ;;  %16726 = vst [vmem:[#allocation283_spill] sm:$0xff] %v12553_v54  ;;  %v2175_v0 = vmul.f32 %v16728_v21, %v12553_v54  ;;  %v2352_v2 = vsel %vm834_vm0, %v2173_v40, 0.0  ;;  %v12569_v57 = vld [vmem:[%s12240_s28 + $0x1a0] sm:$0xff]  ;;  %v12583_v21 = vld [vmem:[%s12240_s28 + $0x1b0] sm:$0xff] }
 0x44b   : > { %v2351_v14 = vadd.f32 %v2350_v4, %v2349_v34  ;;  %16730 = vst [vmem:[#allocation284_spill] sm:$0xff] %v12569_v57  ;;  %v12572_v34 = vld [vmem:[%s12240_s28 + $0x1a8] sm:$0xff]  ;;  %v2531_v26 = vsel %vm834_vm0, %v2174_v49, 0.0  ;;  %v16732_v4 = vld [vmem:[#allocation134_spill] sm:$0xff]  ;;  %v2533_v49 = vsel %vm834_vm0, %v2176_v46, 0.0  ;;  %v16740_v46 = vld [vmem:[#allocation139_spill] sm:$0xff] }
 0x44c   : > { %v2530_v15 = vadd.f32 %v2529_v51, %v2528_v28  ;;  %16731 = vst [vmem:[#allocation106_spill] sm:$0xff] %v12572_v34  ;;  %v2177_v40 = vmul.f32 %v16732_v4, %v12569_v57  ;;  %v16733_v28 = vld [vmem:[#allocation303_spill] sm:$0xff]  ;;  %v16737_v4 = vld [vmem:[#allocation305_spill] sm:$0xff] }
 0x44d   : > { %v2353_v61 = vadd.f32 %v2352_v2, %v2351_v14  ;;  %v2178_v51 = vmul.f32 %v16733_v28, %v12572_v34  ;;  %16734 = vst [vmem:[#allocation285_spill] sm:$0xff] %v12583_v21  ;;  %v16736_v2 = vld [vmem:[#allocation136_spill] sm:$0xff]  ;;  %v2180_v57 = vmul.f32 %v16737_v4, %v12586_v38 }
 0x44e   : > { %16735 = vst [vmem:[#allocation107_spill] sm:$0xff] %v12586_v38  ;;  %v2179_v27 = vmul.f32 %v16736_v2, %v12583_v21  ;;  %v2356_v28 = vsel %vm834_vm0, %v2177_v40, 0.0  ;;  %v16741_v2 = vld [vmem:[#allocation309_spill] sm:$0xff] }
 0x44f   : > { %v12607_v40 = vld [vmem:[%s12240_s28 + $0x1d0] sm:$0xff]  ;;  %v2537_v54 = vsel %vm834_vm0, %v2180_v57, 0.0 }
 0x450   : > { %v2358_v4 = vsel %vm834_vm0, %v2179_v27, 0.0  ;;  %v12619_v27 = vld [vmem:[%s12240_s28 + $0x1e0] sm:$0xff] }
 0x458   : > { %v5380_v31 = vpop.permute.xlu2 %5379 }
 0x459   : > { %v12566_v32 = vsel %vm5253_vm11, %v5380_v31, %v12212_v53  ;;  %v2354_v53 = vsel %vm834_vm0, %v2175_v0, 0.0  ;;  %v2532_v31 = vadd.f32 %v2531_v26, %v2530_v15  ;;  %v12595_v0 = vld [vmem:[%s12240_s28 + $0x1c0] sm:$0xff]  ;;  %v12598_v15 = vld [vmem:[%s12240_s28 + $0x1c8] sm:$0xff] }
 0x45a   : > { %5387 = vrot.lane.b32.xlu0 %v12566_v32, %s6649_s26  ;;  %v2355_v14 = vadd.f32 %v2354_v53, %v2353_v61  ;;  %16738 = vst [vmem:[#allocation286_spill] sm:$0xff] %v12595_v0  ;;  %v2535_v61 = vsel %vm834_vm0, %v2178_v51, 0.0  ;;  %v2181_v53 = vmul.f32 %v16740_v46, %v12595_v0  ;;  %v2182_v21 = vmul.f32 %v16741_v2, %v12598_v15  ;;  %v16747_v0 = vld [vmem:[#allocation220_spill] sm:$0xff] }
 0x45b   : > { %v2534_v34 = vadd.f32 %v2533_v49, %v2532_v31  ;;  %16739 = vst [vmem:[#allocation108_spill] sm:$0xff] %v12598_v15  ;;  %v12610_v31 = vld [vmem:[%s12240_s28 + $0x1d8] sm:$0xff] }
 0x45c   : > { %v2357_v26 = vadd.f32 %v2356_v28, %v2355_v14  ;;  %16742 = vst [vmem:[#allocation287_spill] sm:$0xff] %v12610_v31  ;;  %v16743_v14 = vld [vmem:[#allocation141_spill] sm:$0xff]  ;;  %v16744_v28 = vld [vmem:[#allocation311_spill] sm:$0xff]  ;;  %v2360_v2 = vsel %vm834_vm0, %v2181_v53, 0.0 }
 0x45d   : > { %v2536_v38 = vadd.f32 %v2535_v61, %v2534_v34  ;;  %v2183_v51 = vmul.f32 %v16743_v14, %v12607_v40  ;;  %v2184_v46 = vmul.f32 %v16744_v28, %v12610_v31  ;;  %v12622_v34 = vld [vmem:[%s12240_s28 + $0x1e8] sm:$0xff]  ;;  %v12631_v14 = vmul.f32 %v16747_v0, %v12246_v19  ;;  %v16749_v28 = vld [vmem:[#allocation143_spill] sm:$0xff]  ;;  %v12642_v31 = vld [vmem:[%s12240_s28 + $0x1f8] sm:$0xff] }
 0x45e   : > { %v2359_v49 = vadd.f32 %v2358_v4, %v2357_v26  ;;  %v2539_v26 = vsel %vm834_vm0, %v2182_v21, 0.0  ;;  %v16745_v4 = vld [vmem:[#allocation74_spill] sm:$0xff]  ;;  %v12639_v21 = vld [vmem:[%s12240_s28 + $0x1f0] sm:$0xff] }
 0x45f   : > { %v2538_v15 = vadd.f32 %v2537_v54, %v2536_v38  ;;  %v12627_v57 = vmul.f32 %v16745_v4, %v12243_v5  ;;  %16748 = vst [vmem:[#allocation288_spill] sm:$0xff] %v12631_v14  ;;  %v2185_v54 = vmul.f32 %v16749_v28, %v12619_v27  ;;  %v16750_v38 = vld [vmem:[#allocation312_spill] sm:$0xff]  ;;  %v2541_v4 = vsel %vm834_vm0, %v2184_v46, 0.0  ;;  %v16751_v19 = vld [vmem:[#allocation77_spill] sm:$0xff]  ;;  %v12659_v46 = vld [vmem:[%s12240_s28 + $0x200] sm:$0xff] }
 0x460   : > { %v2361_v61 = vadd.f32 %v2360_v2, %v2359_v49  ;;  %v2186_v53 = vmul.f32 %v16750_v38, %v12622_v34  ;;  %v2362_v49 = vsel %vm834_vm0, %v2183_v51, 0.0  ;;  %v12647_v0 = vmul.f32 %v16751_v19, %v12249_v33  ;;  %v16753_v14 = vld [vmem:[#allocation221_spill] sm:$0xff]  ;;  %v16756_v51 = vld [vmem:[#allocation314_spill] sm:$0xff] }
 0x461   : > { %16746 = vst [vmem:[#allocation109_spill] sm:$0xff] %v12627_v57  ;;  %v2540_v2 = vadd.f32 %v2539_v26, %v2538_v15  ;;  %v12651_v28 = vmul.f32 %v16753_v14, %v12252_v59  ;;  %v16755_v38 = vld [vmem:[#allocation145_spill] sm:$0xff]  ;;  %v2188_v26 = vmul.f32 %v16756_v51, %v12642_v31  ;;  %v12662_v57 = vld [vmem:[%s12240_s28 + $0x208] sm:$0xff]  ;;  %v16757_v59 = vld [vmem:[#allocation78_spill] sm:$0xff] }
 0x462   : > { %v2363_v5 = vadd.f32 %v2362_v49, %v2361_v61  ;;  %16752 = vst [vmem:[#allocation110_spill] sm:$0xff] %v12647_v0  ;;  %v2187_v15 = vmul.f32 %v16755_v38, %v12639_v21  ;;  %v2364_v61 = vsel %vm834_vm0, %v2185_v54, 0.0  ;;  %v2543_v19 = vsel %vm834_vm0, %v2186_v53, 0.0  ;;  %v16761_v51 = vld [vmem:[#allocation147_spill] sm:$0xff]  ;;  %v16762_v54 = vld [vmem:[#allocation316_spill] sm:$0xff]  ;;  %v12679_v53 = vld [vmem:[%s12240_s28 + $0x210] sm:$0xff] }
 0x463   : > { %16754 = vst [vmem:[#allocation289_spill] sm:$0xff] %v12651_v28  ;;  %v2542_v49 = vadd.f32 %v2541_v4, %v2540_v2  ;;  %v12667_v14 = vmul.f32 %v16757_v59, %v12261_v55  ;;  %v16759_v28 = vld [vmem:[#allocation222_spill] sm:$0xff]  ;;  %v2189_v0 = vmul.f32 %v16761_v51, %v12659_v46  ;;  %v2190_v2 = vmul.f32 %v16762_v54, %v12662_v57  ;;  %v16765_v51 = vld [vmem:[#allocation263_spill] sm:$0xff] }
 0x464   : > { %v2365_v33 = vadd.f32 %v2364_v61, %v2363_v5  ;;  %v12671_v38 = vmul.f32 %v16759_v28, %v12264_v10  ;;  %v2366_v5 = vsel %vm834_vm0, %v2187_v15, 0.0  ;;  %v12682_v61 = vld [vmem:[%s12240_s28 + $0x218] sm:$0xff]  ;;  %v2545_v59 = vsel %vm834_vm0, %v2188_v26, 0.0  ;;  %v16763_v10 = vld [vmem:[#allocation79_spill] sm:$0xff] }
 0x465   : > { %16758 = vst [vmem:[#allocation111_spill] sm:$0xff] %v12667_v14  ;;  %v2544_v4 = vadd.f32 %v2543_v19, %v2542_v49  ;;  %v12687_v28 = vmul.f32 %v16763_v10, %v12275_v63  ;;  %v16767_v14 = vld [vmem:[#allocation149_spill] sm:$0xff]  ;;  %v12704_v10 = vld [vmem:[%s12240_s28 + $0x228] sm:$0xff] }
 0x466   : > { %16760 = vst [vmem:[#allocation290_spill] sm:$0xff] %v12671_v38  ;;  %v2367_v55 = vadd.f32 %v2366_v5, %v2365_v33  ;;  %v12691_v38 = vmul.f32 %v16765_v51, %v12278_v41  ;;  %v2191_v15 = vmul.f32 %v16767_v14, %v12679_v53  ;;  %v16768_v49 = vld [vmem:[#allocation317_spill] sm:$0xff]  ;;  %v2368_v33 = vsel %vm834_vm0, %v2189_v0, 0.0  ;;  %v12701_v5 = vld [vmem:[%s12240_s28 + $0x220] sm:$0xff]  ;;  %v16769_v14 = vld [vmem:[#allocation80_spill] sm:$0xff] }
 0x467   : > { %16764 = vst [vmem:[#allocation112_spill] sm:$0xff] %v12687_v28  ;;  %v2192_v19 = vmul.f32 %v16768_v49, %v12682_v61  ;;  %v2546_v26 = vadd.f32 %v2545_v59, %v2544_v4  ;;  %v2547_v51 = vsel %vm834_vm0, %v2190_v2, 0.0  ;;  %v16771_v0 = vld [vmem:[#allocation151_spill] sm:$0xff]  ;;  %v12719_v2 = vld [vmem:[%s12240_s28 + $0x230] sm:$0xff]  ;;  %v12722_v49 = vld [vmem:[%s12240_s28 + $0x238] sm:$0xff] }
 0x468   : > { %16766 = vst [vmem:[#allocation291_spill] sm:$0xff] %v12691_v38  ;;  %v2369_v41 = vadd.f32 %v2368_v33, %v2367_v55  ;;  %v12709_v38 = vmul.f32 %v16769_v14, %v12288_v56  ;;  %v16772_v4 = vld [vmem:[#allocation319_spill] sm:$0xff]  ;;  %v2370_v55 = vsel %vm834_vm0, %v2191_v15, 0.0  ;;  %v16773_v14 = vld [vmem:[#allocation264_spill] sm:$0xff] }
 0x469   : > { %v2194_v59 = vmul.f32 %v16772_v4, %v12704_v10  ;;  %v2549_v33 = vsel %vm834_vm0, %v2192_v19, 0.0  ;;  %v16777_v4 = vld [vmem:[#allocation153_spill] sm:$0xff]  ;;  %v12739_v19 = vld [vmem:[%s12240_s28 + $0x240] sm:$0xff]  ;;  %v12742_v28 = vld [vmem:[%s12240_s28 + $0x248] sm:$0xff] }
 0x46a   : > { %16770 = vst [vmem:[#allocation113_spill] sm:$0xff] %v12709_v38  ;;  %v2371_v56 = vadd.f32 %v2370_v55, %v2369_v41  ;;  %v16775_v38 = vld [vmem:[#allocation81_spill] sm:$0xff]  ;;  %v2195_v15 = vmul.f32 %v16777_v4, %v12719_v2 }
 0x46f   : > { %v5263_v54 = vpop.permute.xlu1 %5262 }
 0x470   : > { %v5265_v63 = vsel %vm5253_vm11, %v5263_v54, %v12201_v1  ;;  %v2193_v1 = vmul.f32 %v16771_v0, %v12701_v5  ;;  %v2548_v54 = vadd.f32 %v2547_v51, %v2546_v26  ;;  %v12731_v0 = vmul.f32 %v16775_v38, %v12303_v9  ;;  %v16778_v26 = vld [vmem:[#allocation321_spill] sm:$0xff] }
 0x471   : > { %5270 = vrot.lane.b32.xlu1 %v5265_v63, %s6649_s26  ;;  %5279 = vrot.lane.b32.xlu2 %v5265_v63, %s6650_s22  ;;  %v12727_v63 = vmul.f32 %v16773_v14, %v12291_v7  ;;  %v2196_v51 = vmul.f32 %v16778_v26, %v12722_v49  ;;  %v2551_v14 = vsel %vm834_vm0, %v2194_v59, 0.0  ;;  %v16779_v9 = vld [vmem:[#allocation265_spill] sm:$0xff]  ;;  %v16783_v26 = vld [vmem:[#allocation155_spill] sm:$0xff] }
 0x472   : > { %16776 = vst [vmem:[#allocation114_spill] sm:$0xff] %v12731_v0  ;;  %v2372_v41 = vsel %vm834_vm0, %v2193_v1, 0.0  ;;  %v2550_v55 = vadd.f32 %v2549_v33, %v2548_v54  ;;  %v12747_v38 = vmul.f32 %v16779_v9, %v12306_v20  ;;  %v2197_v0 = vmul.f32 %v16783_v26, %v12739_v19  ;;  %v16784_v1 = vld [vmem:[#allocation323_spill] sm:$0xff]  ;;  %v12759_v59 = vld [vmem:[%s12240_s28 + $0x250] sm:$0xff] }
 0x473   : > { %16774 = vst [vmem:[#allocation292_spill] sm:$0xff] %v12727_v63  ;;  %v2373_v7 = vadd.f32 %v2372_v41, %v2371_v56  ;;  %v16781_v63 = vld [vmem:[#allocation82_spill] sm:$0xff]  ;;  %v2198_v54 = vmul.f32 %v16784_v1, %v12742_v28  ;;  %v2374_v56 = vsel %vm834_vm0, %v2195_v15, 0.0  ;;  %v2553_v9 = vsel %vm834_vm0, %v2196_v51, 0.0  ;;  %v16787_v26 = vld [vmem:[#allocation83_spill] sm:$0xff] }
 0x474   : > { %16780 = vst [vmem:[#allocation293_spill] sm:$0xff] %v12747_v38  ;;  %v12751_v4 = vmul.f32 %v16781_v63, %v12317_v16  ;;  %v2552_v33 = vadd.f32 %v2551_v14, %v2550_v55  ;;  %v12762_v41 = vld [vmem:[%s12240_s28 + $0x258] sm:$0xff]  ;;  %v12771_v38 = vmul.f32 %v16787_v26, %v12329_v17  ;;  %v16790_v55 = vld [vmem:[#allocation325_spill] sm:$0xff]  ;;  %v12786_v17 = vld [vmem:[%s12240_s28 + $0x268] sm:$0xff] }
 0x475   : > { %v2375_v20 = vadd.f32 %v2374_v56, %v2373_v7  ;;  %v16785_v16 = vld [vmem:[#allocation266_spill] sm:$0xff]  ;;  %v2200_v14 = vmul.f32 %v16790_v55, %v12762_v41  ;;  %v2376_v7 = vsel %vm834_vm0, %v2197_v0, 0.0  ;;  %v12783_v56 = vld [vmem:[%s12240_s28 + $0x260] sm:$0xff]  ;;  %v2555_v26 = vsel %vm834_vm0, %v2198_v54, 0.0  ;;  %v16794_v55 = vld [vmem:[#allocation84_spill] sm:$0xff] }
 0x476   : > { %16782 = vst [vmem:[#allocation115_spill] sm:$0xff] %v12751_v4  ;;  %v12767_v63 = vmul.f32 %v16785_v16, %v12320_v44  ;;  %v16789_v4 = vld [vmem:[#allocation157_spill] sm:$0xff]  ;;  %v2554_v51 = vadd.f32 %v2553_v9, %v2552_v33  ;;  %v2202_v33 = vmul.f32 %v16637_v47, %v12786_v17 }
 0x477   : > { %16788 = vst [vmem:[#allocation116_spill] sm:$0xff] %v12771_v38  ;;  %v5378_v1 = vpop.permute.xlu1 %5377  ;;  %v2199_v15 = vmul.f32 %v16789_v4, %v12759_v59  ;;  %v2377_v16 = vadd.f32 %v2376_v7, %v2375_v20  ;;  %v16791_v4 = vld [vmem:[#allocation267_spill] sm:$0xff]  ;;  %v12803_v9 = vld [vmem:[%s12240_s28 + $0x270] sm:$0xff]  ;;  %v12811_v7 = vmul.f32 %v16794_v55, %v12341_v48  ;;  %v13072_v38 = vld [vmem:[%s12240_s28 + $0x348] sm:$0xff] }
 0x478   : > { %16786 = vst [vmem:[#allocation294_spill] sm:$0xff] %v12767_v63  ;;  %v12780_v44 = vsel %vm5253_vm11, %v5378_v1, %v12205_v23  ;;  %v12791_v63 = vmul.f32 %v16791_v4, %v12332_v58  ;;  %v16793_v23 = vld [vmem:[#allocation159_spill] sm:$0xff]  ;;  %v2556_v20 = vadd.f32 %v2555_v26, %v2554_v51  ;;  %v12806_v58 = vld [vmem:[%s12240_s28 + $0x278] sm:$0xff]  ;;  %v16796_v4 = vld [vmem:[#allocation269_spill] sm:$0xff]  ;;  %v2559_v55 = vsel %vm834_vm0, %v2202_v33, 0.0 }
 0x479   : > { %5277 = vrot.lane.b32.xlu1 %v12231_v60, %s6650_s22  ;;  %5385 = vrot.lane.b32.xlu2 %v12780_v44, %s6649_s26  ;;  %v2201_v0 = vmul.f32 %v16793_v23, %v12783_v56  ;;  %v2378_v54 = vsel %vm834_vm0, %v2199_v15, 0.0  ;;  %v2557_v60 = vsel %vm834_vm0, %v2200_v14, 0.0  ;;  %16795 = vst [vmem:[#allocation119_spill] sm:$0xff] %v12811_v7  ;;  %v12815_v23 = vmul.f32 %v16796_v4, %v12344_v37  ;;  %v16798_v47 = vld [vmem:[#allocation161_spill] sm:$0xff]  ;;  %v12823_v14 = vld [vmem:[%s12240_s28 + $0x280] sm:$0xff]  ;;  %v13052_v7 = vld [vmem:[%s12240_s28 + $0x338] sm:$0xff] }
 0x47a   : > { %16792 = vst [vmem:[#allocation295_spill] sm:$0xff] %v12791_v63  ;;  %v2379_v1 = vadd.f32 %v2378_v54, %v2377_v16  ;;  %v2203_v15 = vmul.f32 %v16798_v47, %v12803_v9  ;;  %v16799_v51 = vld [vmem:[#allocation329_spill] sm:$0xff]  ;;  %v2558_v54 = vadd.f32 %v2557_v60, %v2556_v20  ;;  %v12826_v63 = vld [vmem:[%s12240_s28 + $0x288] sm:$0xff] }
 0x47b   : > { %16797 = vst [vmem:[#allocation296_spill] sm:$0xff] %v12815_v23  ;;  %v2204_v26 = vmul.f32 %v16799_v51, %v12806_v58  ;;  %v2380_v16 = vsel %vm834_vm0, %v2201_v0, 0.0  ;;  %v16800_v37 = vld [vmem:[#allocation85_spill] sm:$0xff]  ;;  %v16802_v23 = vld [vmem:[#allocation272_spill] sm:$0xff]  ;;  %v16804_v51 = vld [vmem:[#allocation163_spill] sm:$0xff]  ;;  %v2206_v20 = vmul.f32 %v10949_v36, %v12826_v63 }
 0x47c   : > { %v2381_v48 = vadd.f32 %v2380_v16, %v2379_v1  ;;  %v12831_v4 = vmul.f32 %v16800_v37, %v12353_v62  ;;  %v12835_v47 = vmul.f32 %v16802_v23, %v12356_v43  ;;  %v2205_v0 = vmul.f32 %v16804_v51, %v12823_v14  ;;  %v12843_v33 = vld [vmem:[%s12240_s28 + $0x290] sm:$0xff]  ;;  %v12846_v16 = vld [vmem:[%s12240_s28 + $0x298] sm:$0xff]  ;;  %16871 = vst [vmem:[#allocation77_spill] sm:$0xff] %v13052_v7 }
 0x47d   : > { %v2382_v1 = vsel %vm834_vm0, %v2203_v15, 0.0  ;;  %v2560_v60 = vadd.f32 %v2559_v55, %v2558_v54  ;;  %v2561_v37 = vsel %vm834_vm0, %v2204_v26, 0.0  ;;  %v16805_v43 = vld [vmem:[#allocation86_spill] sm:$0xff]  ;;  %v16809_v36 = vld [vmem:[#allocation165_spill] sm:$0xff]  ;;  %v16810_v15 = vld [vmem:[#allocation331_spill] sm:$0xff]  ;;  %16880 = vst [vmem:[#allocation78_spill] sm:$0xff] %v13072_v38 }
 0x47e   : > { %16801 = vst [vmem:[#allocation121_spill] sm:$0xff] %v12831_v4  ;;  %v2383_v62 = vadd.f32 %v2382_v1, %v2381_v48  ;;  %v12851_v23 = vmul.f32 %v16805_v43, %v12365_v39  ;;  %v2207_v4 = vmul.f32 %v16809_v36, %v12843_v33  ;;  %v2208_v54 = vmul.f32 %v16810_v15, %v12846_v16  ;;  %v12863_v26 = vld [vmem:[%s12240_s28 + $0x2a0] sm:$0xff]  ;;  %v12866_v1 = vld [vmem:[%s12240_s28 + $0x2a8] sm:$0xff] }
 0x47f   : > { %16803 = vst [vmem:[#allocation297_spill] sm:$0xff] %v12835_v47  ;;  %v16807_v47 = vld [vmem:[#allocation274_spill] sm:$0xff]  ;;  %v2384_v48 = vsel %vm834_vm0, %v2205_v0, 0.0  ;;  %v2562_v55 = vadd.f32 %v2561_v37, %v2560_v60  ;;  %v2563_v43 = vsel %vm834_vm0, %v2206_v20, 0.0  ;;  %v16813_v36 = vld [vmem:[#allocation276_spill] sm:$0xff]  ;;  %v2210_v20 = vmul.f32 %v10975_v52, %v12866_v1  ;;  %v12887_v37 = vld [vmem:[%s12240_s28 + $0x2b0] sm:$0xff] }
 0x480   : > { %16806 = vst [vmem:[#allocation123_spill] sm:$0xff] %v12851_v23  ;;  %v12855_v51 = vmul.f32 %v16807_v47, %v12368_v35  ;;  %v2385_v39 = vadd.f32 %v2384_v48, %v2383_v62  ;;  %v16811_v35 = vld [vmem:[#allocation87_spill] sm:$0xff]  ;;  %v16815_v0 = vld [vmem:[#allocation166_spill] sm:$0xff]  ;;  %v16816_v48 = vld [vmem:[#allocation88_spill] sm:$0xff] }
 0x481   : > { %v12871_v47 = vmul.f32 %v16811_v35, %v12377_v3  ;;  %5340 = vrot.lane.b32.xlu1 %v12462_v24, %s6650_s22  ;;  %5395 = vrot.lane.b32.xlu2 %v12566_v32, %s6650_s22  ;;  %v2209_v60 = vmul.f32 %v16815_v0, %v12863_v26  ;;  %v2386_v3 = vsel %vm834_vm0, %v2207_v4, 0.0  ;;  %v2564_v62 = vadd.f32 %v2563_v43, %v2562_v55  ;;  %v16818_v35 = vld [vmem:[#allocation277_spill] sm:$0xff]  ;;  %v16820_v52 = vld [vmem:[#allocation167_spill] sm:$0xff] }
 0x482   : > { %16808 = vst [vmem:[#allocation298_spill] sm:$0xff] %v12855_v51  ;;  %v12875_v51 = vmul.f32 %v16813_v36, %v12380_v18  ;;  %v12890_v18 = vld [vmem:[%s12240_s28 + $0x2b8] sm:$0xff]  ;;  %v2387_v15 = vadd.f32 %v2386_v3, %v2385_v39  ;;  %v2565_v24 = vsel %vm834_vm0, %v2208_v54, 0.0  ;;  %v12895_v32 = vmul.f32 %v16816_v48, %v12389_v29  ;;  %v16821_v55 = vld [vmem:[#allocation333_spill] sm:$0xff]  ;;  %v12907_v54 = vld [vmem:[%s12240_s28 + $0x2c0] sm:$0xff] }
 0x483   : > { %16812 = vst [vmem:[#allocation125_spill] sm:$0xff] %v12871_v47  ;;  %v12899_v36 = vmul.f32 %v16818_v35, %v12392_v13  ;;  %v2211_v4 = vmul.f32 %v16820_v52, %v12887_v37  ;;  %v2212_v43 = vmul.f32 %v16821_v55, %v12890_v18  ;;  %v2388_v39 = vsel %vm834_vm0, %v2209_v60, 0.0  ;;  %v12910_v3 = vld [vmem:[%s12240_s28 + $0x2c8] sm:$0xff]  ;;  %v16822_v13 = vld [vmem:[#allocation89_spill] sm:$0xff] }
 0x484   : > { %16814 = vst [vmem:[#allocation299_spill] sm:$0xff] %v12875_v51  ;;  %v2566_v0 = vadd.f32 %v2565_v24, %v2564_v62  ;;  %v2389_v29 = vadd.f32 %v2388_v39, %v2387_v15  ;;  %v2567_v48 = vsel %vm834_vm0, %v2210_v20, 0.0  ;;  %v12915_v35 = vmul.f32 %v16822_v13, %v12401_v25  ;;  %v16826_v55 = vld [vmem:[#allocation169_spill] sm:$0xff]  ;;  %v12930_v39 = vld [vmem:[%s12240_s28 + $0x2d8] sm:$0xff]  ;;  %v12950_v51 = vld [vmem:[%s12240_s28 + $0x2e8] sm:$0xff] }
 0x485   : > { %16817 = vst [vmem:[#allocation128_spill] sm:$0xff] %v12895_v32  ;;  %v2213_v60 = vmul.f32 %v16826_v55, %v12907_v54  ;;  %v2214_v62 = vmul.f32 %v11004_v30, %v12910_v3  ;;  %v2390_v15 = vsel %vm834_vm0, %v2211_v4, 0.0  ;;  %v12927_v20 = vld [vmem:[%s12240_s28 + $0x2d0] sm:$0xff]  ;;  %v2569_v13 = vsel %vm834_vm0, %v2212_v43, 0.0  ;;  %v16831_v30 = vld [vmem:[#allocation170_spill] sm:$0xff]  ;;  %v12947_v43 = vld [vmem:[%s12240_s28 + $0x2e0] sm:$0xff] }
 0x486   : > { %16819 = vst [vmem:[#allocation300_spill] sm:$0xff] %v12899_v36  ;;  %v16824_v36 = vld [vmem:[#allocation279_spill] sm:$0xff]  ;;  %v2568_v24 = vadd.f32 %v2567_v48, %v2566_v0  ;;  %v2391_v25 = vadd.f32 %v2390_v15, %v2389_v29  ;;  %v2215_v4 = vmul.f32 %v16831_v30, %v12927_v20  ;;  %v16835_v30 = vld [vmem:[#allocation281_spill] sm:$0xff]  ;;  %v16857_v32 = vld [vmem:[#allocation72_spill] sm:$0xff] }
 0x487   : > { %16823 = vst [vmem:[#allocation130_spill] sm:$0xff] %v12915_v35  ;;  %v12919_v52 = vmul.f32 %v16824_v36, %v12404_v6  ;;  %v16827_v6 = vld [vmem:[#allocation90_spill] sm:$0xff]  ;;  %v16832_v0 = vld [vmem:[#allocation335_spill] sm:$0xff]  ;;  %v2392_v29 = vsel %vm834_vm0, %v2213_v60, 0.0  ;;  %v16837_v60 = vld [vmem:[#allocation172_spill] sm:$0xff] }
 0x488   : > { %v12935_v36 = vmul.f32 %v16827_v6, %v12413_v45  ;;  %v2216_v48 = vmul.f32 %v16832_v0, %v12930_v39  ;;  %v2570_v15 = vadd.f32 %v2569_v13, %v2568_v24  ;;  %v2393_v45 = vadd.f32 %v2392_v29, %v2391_v25  ;;  %v16838_v25 = vld [vmem:[#allocation336_spill] sm:$0xff]  ;;  %v12972_v29 = vld [vmem:[%s12240_s28 + $0x2f8] sm:$0xff]  ;;  %v16866_v23 = vld [vmem:[#allocation73_spill] sm:$0xff] }
 0x489   : > { %16825 = vst [vmem:[#allocation301_spill] sm:$0xff] %v12919_v52  ;;  %v16829_v52 = vld [vmem:[#allocation280_spill] sm:$0xff]  ;;  %v2571_v6 = vsel %vm834_vm0, %v2214_v62, 0.0  ;;  %5393 = vrot.lane.b32.xlu1 %v12780_v44, %s6650_s22  ;;  %v2217_v24 = vmul.f32 %v16837_v60, %v12947_v43  ;;  %v2218_v13 = vmul.f32 %v16838_v25, %v12950_v51  ;;  %v2394_v62 = vsel %vm834_vm0, %v2215_v4, 0.0  ;;  %v16843_v25 = vld [vmem:[#allocation174_spill] sm:$0xff] }
 0x48a   : > { %16828 = vst [vmem:[#allocation132_spill] sm:$0xff] %v12935_v36  ;;  %v12939_v55 = vmul.f32 %v16829_v52, %v12416_v8  ;;  %v16833_v8 = vld [vmem:[#allocation91_spill] sm:$0xff]  ;;  %v2572_v0 = vadd.f32 %v2571_v6, %v2570_v15  ;;  %v16844_v15 = vld [vmem:[#allocation337_spill] sm:$0xff]  ;;  %v13012_v35 = vld [vmem:[%s12240_s28 + $0x318] sm:$0xff] }
 0x48b   : > { %v12955_v52 = vmul.f32 %v16833_v8, %v12425_v12  ;;  %v12969_v12 = vld [vmem:[%s12240_s28 + $0x2f0] sm:$0xff]  ;;  %v2573_v8 = vsel %vm834_vm0, %v2216_v48, 0.0  ;;  %v2220_v6 = vmul.f32 %v16844_v15, %v12972_v29  ;;  %v12989_v48 = vld [vmem:[%s12240_s28 + $0x300] sm:$0xff]  ;;  %v16851_v15 = vld [vmem:[#allocation176_spill] sm:$0xff] }
 0x48c   : > { %16830 = vst [vmem:[#allocation302_spill] sm:$0xff] %v12939_v55  ;;  %v12959_v55 = vmul.f32 %v16835_v30, %v12428_v50  ;;  %v2395_v50 = vadd.f32 %v2394_v62, %v2393_v45  ;;  %v16839_v30 = vld [vmem:[#allocation3_spill] sm:$0xff]  ;;  %v2219_v4 = vmul.f32 %v16843_v25, %v12969_v12  ;;  %v2396_v45 = vsel %vm834_vm0, %v2217_v24, 0.0  ;;  %v13032_v47 = vld [vmem:[%s12240_s28 + $0x328] sm:$0xff] }
 0x48d   : > { %16834 = vst [vmem:[#allocation134_spill] sm:$0xff] %v12955_v52  ;;  %v12977_v44 = vmul.f32 %v16839_v30, %v12437_v42  ;;  %v2574_v62 = vadd.f32 %v2573_v8, %v2572_v0  ;;  %v12992_v52 = vld [vmem:[%s12240_s28 + $0x308] sm:$0xff]  ;;  %v2575_v30 = vsel %vm834_vm0, %v2218_v13, 0.0  ;;  %v16849_v36 = vld [vmem:[#allocation71_spill] sm:$0xff]  ;;  %v2221_v24 = vmul.f32 %v16851_v15, %v12989_v48  ;;  %v16852_v0 = vld [vmem:[#allocation338_spill] sm:$0xff] }
 0x48e   : > { %16836 = vst [vmem:[#allocation303_spill] sm:$0xff] %v12959_v55  ;;  %v16841_v55 = vld [vmem:[#allocation282_spill] sm:$0xff]  ;;  %v2397_v42 = vadd.f32 %v2396_v45, %v2395_v50  ;;  %v2222_v8 = vmul.f32 %v16852_v0, %v12992_v52  ;;  %v2398_v50 = vsel %vm834_vm0, %v2219_v4, 0.0  ;;  %v13009_v13 = vld [vmem:[%s12240_s28 + $0x310] sm:$0xff] }
 0x48f   : > { %16840 = vst [vmem:[#allocation136_spill] sm:$0xff] %v12977_v44  ;;  %v12981_v60 = vmul.f32 %v16841_v55, %v12440_v22  ;;  %v16845_v44 = vld [vmem:[#allocation218_spill] sm:$0xff]  ;;  %v16846_v22 = vld [vmem:[#allocation4_spill] sm:$0xff]  ;;  %v2576_v45 = vadd.f32 %v2575_v30, %v2574_v62  ;;  %v16859_v0 = vld [vmem:[#allocation117_spill] sm:$0xff] }
 0x490   : > { %v12997_v55 = vmul.f32 %v16846_v22, %v16845_v44  ;;  %v2399_v44 = vadd.f32 %v2398_v50, %v2397_v42  ;;  %v2577_v22 = vsel %vm834_vm0, %v2220_v6, 0.0  ;;  %v2223_v4 = vmul.f32 %v16859_v0, %v13009_v13  ;;  %v16860_v62 = vld [vmem:[#allocation339_spill] sm:$0xff]  ;;  %16861 = vst [vmem:[#allocation74_spill] sm:$0xff] %v13032_v47 }
 0x491   : > { %16842 = vst [vmem:[#allocation305_spill] sm:$0xff] %v12981_v60  ;;  %v16848_v60 = vld [vmem:[#allocation219_spill] sm:$0xff]  ;;  %v2224_v30 = vmul.f32 %v16860_v62, %v13012_v35  ;;  %v2400_v42 = vsel %vm834_vm0, %v2221_v24, 0.0  ;;  %v2578_v50 = vadd.f32 %v2577_v22, %v2576_v45  ;;  %v16869_v45 = vld [vmem:[#allocation341_spill] sm:$0xff] }
 0x492   : > { %16847 = vst [vmem:[#allocation139_spill] sm:$0xff] %v12997_v55  ;;  %v13001_v25 = vmul.f32 %v16849_v36, %v16848_v60  ;;  %v16853_v55 = vld [vmem:[#allocation98_spill] sm:$0xff]  ;;  %v16854_v36 = vld [vmem:[#allocation5_spill] sm:$0xff]  ;;  %v13029_v6 = vld [vmem:[%s12240_s28 + $0x320] sm:$0xff]  ;;  %v2226_v22 = vmul.f32 %v16869_v45, %v13032_v47 }
 0x493   : > { %v13017_v60 = vmul.f32 %v16854_v36, %v16853_v55  ;;  %v2401_v55 = vadd.f32 %v2400_v42, %v2399_v44  ;;  %v2579_v36 = vsel %vm834_vm0, %v2222_v8, 0.0  ;;  %v16868_v62 = vld [vmem:[#allocation179_spill] sm:$0xff]  ;;  %v2402_v44 = vsel %vm834_vm0, %v2223_v4, 0.0  ;;  %v13049_v8 = vld [vmem:[%s12240_s28 + $0x330] sm:$0xff]  ;;  %v16877_v45 = vld [vmem:[#allocation180_spill] sm:$0xff] }
 0x494   : > { %16850 = vst [vmem:[#allocation309_spill] sm:$0xff] %v13001_v25  ;;  %v16856_v25 = vld [vmem:[#allocation268_spill] sm:$0xff]  ;;  %v2225_v24 = vmul.f32 %v16868_v62, %v13029_v6  ;;  %v2580_v42 = vadd.f32 %v2579_v36, %v2578_v50  ;;  %v2227_v4 = vmul.f32 %v16877_v45, %v13049_v8  ;;  %v16878_v50 = vld [vmem:[#allocation343_spill] sm:$0xff] }
 0x495   : > { %16855 = vst [vmem:[#allocation141_spill] sm:$0xff] %v13017_v60  ;;  %v13021_v15 = vmul.f32 %v16857_v32, %v16856_v25  ;;  %v16862_v60 = vld [vmem:[#allocation99_spill] sm:$0xff]  ;;  %v16863_v32 = vld [vmem:[#allocation6_spill] sm:$0xff]  ;;  %v2228_v36 = vmul.f32 %v16878_v50, %v13052_v7  ;;  %v16885_v47 = vld [vmem:[#allocation76_spill] sm:$0xff] }
 0x496   : > { %v13037_v25 = vmul.f32 %v16863_v32, %v16862_v60  ;;  %16870 = vst [vmem:[#allocation312_spill] sm:$0xff] %v13049_v8  ;;  %v2403_v60 = vadd.f32 %v2402_v44, %v2401_v55  ;;  %v2581_v32 = vsel %vm834_vm0, %v2224_v30, 0.0  ;;  %v2404_v55 = vsel %vm834_vm0, %v2225_v24, 0.0  ;;  %v13069_v30 = vld [vmem:[%s12240_s28 + $0x340] sm:$0xff]  ;;  %v16887_v50 = vld [vmem:[#allocation181_spill] sm:$0xff]  ;;  %v13092_v7 = vld [vmem:[%s12240_s28 + $0x358] sm:$0xff] }
 0x497   : > { %16858 = vst [vmem:[#allocation311_spill] sm:$0xff] %v13021_v15  ;;  %v16865_v15 = vld [vmem:[#allocation270_spill] sm:$0xff]  ;;  %v2582_v44 = vadd.f32 %v2581_v32, %v2580_v42  ;;  %v2229_v24 = vmul.f32 %v16887_v50, %v13069_v30  ;;  %v16888_v42 = vld [vmem:[#allocation344_spill] sm:$0xff] }
 0x498   : > { %16864 = vst [vmem:[#allocation220_spill] sm:$0xff] %v13037_v25  ;;  %v13041_v0 = vmul.f32 %v16866_v23, %v16865_v15  ;;  %v16872_v23 = vld [vmem:[#allocation7_spill] sm:$0xff]  ;;  %v2230_v32 = vmul.f32 %v16888_v42, %v13072_v38  ;;  %v16895_v8 = vld [vmem:[#allocation168_spill] sm:$0xff]  ;;  %v16897_v42 = vld [vmem:[#allocation182_spill] sm:$0xff] }
 0x499   : > { %v13057_v15 = vmul.f32 %v16872_v23, %v12491_v11  ;;  %v16875_v25 = vld [vmem:[#allocation75_spill] sm:$0xff]  ;;  %16879 = vst [vmem:[#allocation314_spill] sm:$0xff] %v13069_v30  ;;  %v2405_v11 = vadd.f32 %v2404_v55, %v2403_v60  ;;  %v2583_v23 = vsel %vm834_vm0, %v2226_v22, 0.0  ;;  %v2406_v60 = vsel %vm834_vm0, %v2227_v4, 0.0  ;;  %v13089_v22 = vld [vmem:[%s12240_s28 + $0x350] sm:$0xff]  ;;  %v13112_v38 = vld [vmem:[%s12240_s28 + $0x368] sm:$0xff] }
 0x49a   : > { %16867 = vst [vmem:[#allocation143_spill] sm:$0xff] %v13041_v0  ;;  %v16874_v0 = vld [vmem:[#allocation100_spill] sm:$0xff]  ;;  %v2584_v55 = vadd.f32 %v2583_v23, %v2582_v44  ;;  %v2231_v4 = vmul.f32 %v16897_v42, %v13089_v22  ;;  %v16898_v44 = vld [vmem:[#allocation345_spill] sm:$0xff] }
 0x49b   : > { %16873 = vst [vmem:[#allocation221_spill] sm:$0xff] %v13057_v15  ;;  %v13061_v62 = vmul.f32 %v16875_v25, %v16874_v0  ;;  %v16881_v15 = vld [vmem:[#allocation271_spill] sm:$0xff]  ;;  %v16882_v25 = vld [vmem:[#allocation8_spill] sm:$0xff]  ;;  %v2232_v23 = vmul.f32 %v16898_v44, %v13092_v7  ;;  %v16905_v30 = vld [vmem:[#allocation173_spill] sm:$0xff] }
 0x49c   : > { %v13077_v0 = vmul.f32 %v16882_v25, %v16881_v15  ;;  %16889 = vst [vmem:[#allocation316_spill] sm:$0xff] %v13089_v22  ;;  %v2407_v15 = vadd.f32 %v2406_v60, %v2405_v11  ;;  %v2585_v25 = vsel %vm834_vm0, %v2228_v36, 0.0  ;;  %v2408_v11 = vsel %vm834_vm0, %v2229_v24, 0.0  ;;  %v13109_v36 = vld [vmem:[%s12240_s28 + $0x360] sm:$0xff]  ;;  %v16907_v44 = vld [vmem:[#allocation184_spill] sm:$0xff] }
 0x49d   : > { %16876 = vst [vmem:[#allocation145_spill] sm:$0xff] %v13061_v62  ;;  %v16884_v62 = vld [vmem:[#allocation101_spill] sm:$0xff]  ;;  %v2586_v60 = vadd.f32 %v2585_v25, %v2584_v55  ;;  %v2233_v24 = vmul.f32 %v16907_v44, %v13109_v36  ;;  %v16908_v55 = vld [vmem:[#allocation346_spill] sm:$0xff]  ;;  %v16915_v22 = vld [vmem:[#allocation124_spill] sm:$0xff] }
 0x49e   : > { %16883 = vst [vmem:[#allocation222_spill] sm:$0xff] %v13077_v0  ;;  %v13081_v45 = vmul.f32 %v16885_v47, %v16884_v62  ;;  %v16891_v0 = vld [vmem:[#allocation273_spill] sm:$0xff]  ;;  %v2234_v25 = vmul.f32 %v16908_v55, %v13112_v38 }
 0x49f   : > { %16890 = vst [vmem:[#allocation79_spill] sm:$0xff] %v13092_v7  ;;  %v16892_v47 = vld [vmem:[#allocation9_spill] sm:$0xff]  ;;  %v13132_v7 = vld [vmem:[%s12240_s28 + $0x378] sm:$0xff] }
 0x4a0   : > { %16886 = vst [vmem:[#allocation147_spill] sm:$0xff] %v13081_v45  ;;  %v13097_v62 = vmul.f32 %v16892_v47, %v16891_v0  ;;  %v16894_v45 = vld [vmem:[#allocation102_spill] sm:$0xff]  ;;  %v2409_v0 = vadd.f32 %v2408_v11, %v2407_v15  ;;  %v2587_v47 = vsel %vm834_vm0, %v2230_v32, 0.0  ;;  %v2410_v15 = vsel %vm834_vm0, %v2231_v4, 0.0  ;;  %v13129_v32 = vld [vmem:[%s12240_s28 + $0x370] sm:$0xff] }
 0x4a1   : > { %v13101_v50 = vmul.f32 %v16895_v8, %v16894_v45  ;;  %16899 = vst [vmem:[#allocation317_spill] sm:$0xff] %v13109_v36  ;;  %v16902_v8 = vld [vmem:[#allocation10_spill] sm:$0xff]  ;;  %v2588_v11 = vadd.f32 %v2587_v47, %v2586_v60  ;;  %v16917_v55 = vld [vmem:[#allocation185_spill] sm:$0xff]  ;;  %v16918_v60 = vld [vmem:[#allocation347_spill] sm:$0xff] }
 0x4a2   : > { %16893 = vst [vmem:[#allocation263_spill] sm:$0xff] %v13097_v62  ;;  %v16901_v62 = vld [vmem:[#allocation275_spill] sm:$0xff]  ;;  %v2235_v4 = vmul.f32 %v16917_v55, %v13129_v32  ;;  %v2236_v47 = vmul.f32 %v16918_v60, %v13132_v7  ;;  %v16925_v36 = vld [vmem:[#allocation118_spill] sm:$0xff] }
 0x4a3   : > { %16896 = vst [vmem:[#allocation149_spill] sm:$0xff] %v13101_v50  ;;  %v13117_v45 = vmul.f32 %v16902_v8, %v16901_v62  ;;  %v16904_v50 = vld [vmem:[#allocation103_spill] sm:$0xff]  ;;  %v2411_v62 = vadd.f32 %v2410_v15, %v2409_v0  ;;  %v2589_v8 = vsel %vm834_vm0, %v2232_v23, 0.0  ;;  %v2412_v0 = vsel %vm834_vm0, %v2233_v24, 0.0  ;;  %v16927_v60 = vld [vmem:[#allocation186_spill] sm:$0xff] }
 0x4a4   : > { %16900 = vst [vmem:[#allocation80_spill] sm:$0xff] %v13112_v38  ;;  %v13121_v42 = vmul.f32 %v16905_v30, %v16904_v50  ;;  %v16912_v30 = vld [vmem:[#allocation11_spill] sm:$0xff]  ;;  %v2590_v15 = vadd.f32 %v2589_v8, %v2588_v11  ;;  %v13152_v38 = vld [vmem:[%s12240_s28 + $0x388] sm:$0xff] }
 0x4a5   : > { %16903 = vst [vmem:[#allocation151_spill] sm:$0xff] %v13117_v45  ;;  %v16911_v45 = vld [vmem:[#allocation278_spill] sm:$0xff]  ;;  %v13149_v23 = vld [vmem:[%s12240_s28 + $0x380] sm:$0xff]  ;;  %v16928_v11 = vld [vmem:[#allocation348_spill] sm:$0xff] }
 0x4a6   : > { %16906 = vst [vmem:[#allocation319_spill] sm:$0xff] %v13121_v42  ;;  %v13137_v50 = vmul.f32 %v16912_v30, %v16911_v45  ;;  %v16914_v42 = vld [vmem:[#allocation104_spill] sm:$0xff]  ;;  %v2413_v45 = vadd.f32 %v2412_v0, %v2411_v62  ;;  %v2591_v30 = vsel %vm834_vm0, %v2234_v25, 0.0  ;;  %v2237_v24 = vmul.f32 %v16927_v60, %v13149_v23  ;;  %v13169_v25 = vld [vmem:[%s12240_s28 + $0x390] sm:$0xff] }
 0x4a7   : > { %16909 = vst [vmem:[#allocation264_spill] sm:$0xff] %v13129_v32  ;;  %v13141_v44 = vmul.f32 %v16915_v22, %v16914_v42  ;;  %v16922_v22 = vld [vmem:[#allocation12_spill] sm:$0xff]  ;;  %v2238_v8 = vmul.f32 %v16928_v11, %v13152_v38  ;;  %v2414_v62 = vsel %vm834_vm0, %v2235_v4, 0.0  ;;  %v2592_v0 = vadd.f32 %v2591_v30, %v2590_v15  ;;  %v16935_v32 = vld [vmem:[#allocation126_spill] sm:$0xff]  ;;  %v16937_v11 = vld [vmem:[#allocation131_spill] sm:$0xff] }
 0x4a8   : > { %16910 = vst [vmem:[#allocation81_spill] sm:$0xff] %v13132_v7  ;;  %v13172_v7 = vld [vmem:[%s12240_s28 + $0x398] sm:$0xff]  ;;  %v2239_v4 = vmul.f32 %v16937_v11, %v13169_v25  ;;  %v16938_v15 = vld [vmem:[#allocation349_spill] sm:$0xff] }
 0x4a9   : > { %16913 = vst [vmem:[#allocation153_spill] sm:$0xff] %v13137_v50  ;;  %v16921_v50 = vld [vmem:[#allocation283_spill] sm:$0xff]  ;;  %v2240_v30 = vmul.f32 %v16938_v15, %v13172_v7  ;;  %v16946_v15 = vld [vmem:[#allocation133_spill] sm:$0xff] }
 0x4aa   : > { %16916 = vst [vmem:[#allocation321_spill] sm:$0xff] %v13141_v44  ;;  %v13157_v42 = vmul.f32 %v16922_v22, %v16921_v50  ;;  %v16924_v44 = vld [vmem:[#allocation105_spill] sm:$0xff]  ;;  %v2415_v50 = vadd.f32 %v2414_v62, %v2413_v45  ;;  %v2593_v22 = vsel %vm834_vm0, %v2236_v47, 0.0  ;;  %v2416_v45 = vsel %vm834_vm0, %v2237_v24, 0.0  ;;  %v13189_v47 = vld [vmem:[%s12240_s28 + $0x3a0] sm:$0xff] }
 0x4ab   : > { %16919 = vst [vmem:[#allocation265_spill] sm:$0xff] %v13149_v23  ;;  %v13161_v55 = vmul.f32 %v16925_v36, %v16924_v44  ;;  %v16932_v36 = vld [vmem:[#allocation13_spill] sm:$0xff]  ;;  %v2594_v62 = vadd.f32 %v2593_v22, %v2592_v0  ;;  %v16944_v23 = vld [vmem:[#allocation195_spill] sm:$0xff]  ;;  %v2241_v24 = vmul.f32 %v16946_v15, %v13189_v47  ;;  %v16947_v0 = vld [vmem:[#allocation304_spill] sm:$0xff] }
 0x4ac   : > { %16920 = vst [vmem:[#allocation82_spill] sm:$0xff] %v13152_v38  ;;  %v13192_v38 = vld [vmem:[%s12240_s28 + $0x3a8] sm:$0xff] }
 0x4ad   : > { %16923 = vst [vmem:[#allocation155_spill] sm:$0xff] %v13157_v42  ;;  %v16931_v42 = vld [vmem:[#allocation284_spill] sm:$0xff]  ;;  %v2242_v22 = vmul.f32 %v16947_v0, %v13192_v38  ;;  %v16955_v0 = vld [vmem:[#allocation135_spill] sm:$0xff] }
 0x4ae   : > { %16926 = vst [vmem:[#allocation323_spill] sm:$0xff] %v13161_v55  ;;  %v13177_v44 = vmul.f32 %v16932_v36, %v16931_v42  ;;  %v16934_v55 = vld [vmem:[#allocation106_spill] sm:$0xff]  ;;  %v2417_v42 = vadd.f32 %v2416_v45, %v2415_v50  ;;  %v2595_v36 = vsel %vm834_vm0, %v2238_v8, 0.0  ;;  %v2418_v50 = vsel %vm834_vm0, %v2239_v4, 0.0  ;;  %v13209_v8 = vld [vmem:[%s12240_s28 + $0x3b0] sm:$0xff] }
 0x4af   : > { %16929 = vst [vmem:[#allocation266_spill] sm:$0xff] %v13169_v25  ;;  %v13181_v60 = vmul.f32 %v16935_v32, %v16934_v55  ;;  %v16941_v32 = vld [vmem:[#allocation14_spill] sm:$0xff]  ;;  %v2596_v45 = vadd.f32 %v2595_v36, %v2594_v62  ;;  %v16953_v25 = vld [vmem:[#allocation196_spill] sm:$0xff]  ;;  %v2243_v4 = vmul.f32 %v16955_v0, %v13209_v8 }
 0x4b0   : > { %16930 = vst [vmem:[#allocation83_spill] sm:$0xff] %v13172_v7  ;;  %v13212_v7 = vld [vmem:[%s12240_s28 + $0x3b8] sm:$0xff] }
 0x4b1   : > { %16933 = vst [vmem:[#allocation157_spill] sm:$0xff] %v13177_v44  ;;  %v16940_v44 = vld [vmem:[#allocation285_spill] sm:$0xff]  ;;  %v16956_v62 = vld [vmem:[#allocation306_spill] sm:$0xff] }
 0x4b2   : > { %16936 = vst [vmem:[#allocation325_spill] sm:$0xff] %v13181_v60  ;;  %v13197_v55 = vmul.f32 %v16941_v32, %v16940_v44  ;;  %v16943_v60 = vld [vmem:[#allocation107_spill] sm:$0xff]  ;;  %v2419_v44 = vadd.f32 %v2418_v50, %v2417_v42  ;;  %v2597_v32 = vsel %vm834_vm0, %v2240_v30, 0.0  ;;  %v2244_v36 = vmul.f32 %v16956_v62, %v13212_v7  ;;  %v16962_v62 = vld [vmem:[#allocation137_spill] sm:$0xff] }
 0x4b3   : > { %16939 = vst [vmem:[#allocation267_spill] sm:$0xff] %v13192_v38  ;;  %v13201_v11 = vmul.f32 %v16944_v23, %v16943_v60  ;;  %v16950_v23 = vld [vmem:[#allocation15_spill] sm:$0xff]  ;;  %v2420_v42 = vsel %vm834_vm0, %v2241_v24, 0.0  ;;  %v2598_v50 = vadd.f32 %v2597_v32, %v2596_v45  ;;  %v13232_v38 = vld [vmem:[%s12240_s28 + $0x3c8] sm:$0xff] }
 0x4b4   : > { %16942 = vst [vmem:[#allocation159_spill] sm:$0xff] %v13197_v55  ;;  %v16949_v55 = vld [vmem:[#allocation286_spill] sm:$0xff]  ;;  %v13229_v30 = vld [vmem:[%s12240_s28 + $0x3c0] sm:$0xff] }
 0x4b5   : > { %16945 = vst [vmem:[#allocation84_spill] sm:$0xff] %v13201_v11  ;;  %v13217_v60 = vmul.f32 %v16950_v23, %v16949_v55  ;;  %v16952_v11 = vld [vmem:[#allocation108_spill] sm:$0xff]  ;;  %v2421_v55 = vadd.f32 %v2420_v42, %v2419_v44  ;;  %v2599_v23 = vsel %vm834_vm0, %v2242_v22, 0.0  ;;  %v2245_v24 = vmul.f32 %v16962_v62, %v13229_v30  ;;  %v16963_v45 = vld [vmem:[#allocation307_spill] sm:$0xff]  ;;  %v13249_v22 = vld [vmem:[%s12240_s28 + $0x3d0] sm:$0xff] }
 0x4b6   : > { %16948 = vst [vmem:[#allocation269_spill] sm:$0xff] %v13212_v7  ;;  %v13221_v15 = vmul.f32 %v16953_v25, %v16952_v11  ;;  %v16957_v25 = vld [vmem:[#allocation16_spill] sm:$0xff]  ;;  %v2246_v32 = vmul.f32 %v16963_v45, %v13232_v38  ;;  %v2422_v44 = vsel %vm834_vm0, %v2243_v4, 0.0  ;;  %v2600_v42 = vadd.f32 %v2599_v23, %v2598_v50  ;;  %v13252_v7 = vld [vmem:[%s12240_s28 + $0x3d8] sm:$0xff] }
 0x4b7   : > { %16951 = vst [vmem:[#allocation161_spill] sm:$0xff] %v13217_v60  ;;  %v13237_v11 = vmul.f32 %v16957_v25, %v12607_v40  ;;  %v16960_v60 = vld [vmem:[#allocation189_spill] sm:$0xff]  ;;  %v2423_v40 = vadd.f32 %v2422_v44, %v2421_v55  ;;  %v2601_v25 = vsel %vm834_vm0, %v2244_v36, 0.0  ;;  %v16968_v45 = vld [vmem:[#allocation138_spill] sm:$0xff]  ;;  %v16969_v50 = vld [vmem:[#allocation308_spill] sm:$0xff]  ;;  %v2424_v55 = vsel %vm834_vm0, %v2245_v24, 0.0 }
 0x4b8   : > { %16954 = vst [vmem:[#allocation329_spill] sm:$0xff] %v13221_v15  ;;  %v16959_v15 = vld [vmem:[#allocation287_spill] sm:$0xff]  ;;  %v2247_v4 = vmul.f32 %v16968_v45, %v13249_v22  ;;  %v2248_v23 = vmul.f32 %v16969_v50, %v13252_v7  ;;  %v2602_v44 = vadd.f32 %v2601_v25, %v2600_v42  ;;  %v16974_v50 = vld [vmem:[#allocation140_spill] sm:$0xff]  ;;  %v16975_v42 = vld [vmem:[#allocation310_spill] sm:$0xff] }
 0x4b9   : > { %16958 = vst [vmem:[#allocation85_spill] sm:$0xff] %v13237_v11  ;;  %v13241_v0 = vmul.f32 %v16960_v60, %v16959_v15  ;;  %v16964_v60 = vld [vmem:[#allocation17_spill] sm:$0xff]  ;;  %v13269_v36 = vld [vmem:[%s12240_s28 + $0x3e0] sm:$0xff]  ;;  %v13272_v11 = vld [vmem:[%s12240_s28 + $0x3e8] sm:$0xff] }
 0x4ba   : > { %v13257_v15 = vmul.f32 %v16964_v60, %v12619_v27  ;;  %v2425_v27 = vadd.f32 %v2424_v55, %v2423_v40  ;;  %v2603_v60 = vsel %vm834_vm0, %v2246_v32, 0.0  ;;  %v2249_v24 = vmul.f32 %v16974_v50, %v13269_v36  ;;  %v13289_v32 = vld [vmem:[%s12240_s28 + $0x3f0] sm:$0xff] }
 0x4bb   : > { %16961 = vst [vmem:[#allocation272_spill] sm:$0xff] %v13241_v0  ;;  %v16966_v0 = vld [vmem:[#allocation197_spill] sm:$0xff]  ;;  %v2250_v25 = vmul.f32 %v16975_v42, %v13272_v11  ;;  %v2426_v40 = vsel %vm834_vm0, %v2247_v4, 0.0  ;;  %v2604_v55 = vadd.f32 %v2603_v60, %v2602_v44  ;;  %v16980_v42 = vld [vmem:[#allocation142_spill] sm:$0xff] }
 0x4bc   : > { %16965 = vst [vmem:[#allocation163_spill] sm:$0xff] %v13257_v15  ;;  %v13261_v62 = vmul.f32 %v16966_v0, %v12622_v34  ;;  %v16970_v34 = vld [vmem:[#allocation18_spill] sm:$0xff]  ;;  %v2251_v4 = vmul.f32 %v16980_v42, %v13289_v32  ;;  %v16981_v44 = vld [vmem:[#allocation313_spill] sm:$0xff] }
 0x4bd   : > { %v13277_v0 = vmul.f32 %v16970_v34, %v12639_v21  ;;  %v13292_v15 = vld [vmem:[%s12240_s28 + $0x3f8] sm:$0xff]  ;;  %v2427_v21 = vadd.f32 %v2426_v40, %v2425_v27  ;;  %v2605_v34 = vsel %vm834_vm0, %v2248_v23, 0.0  ;;  %v2428_v27 = vsel %vm834_vm0, %v2249_v24, 0.0  ;;  %v13309_v23 = vld [vmem:[%s12240_s28 + $0x400] sm:$0xff] }
 0x4be   : > { %16967 = vst [vmem:[#allocation86_spill] sm:$0xff] %v13261_v62  ;;  %v16972_v62 = vld [vmem:[#allocation198_spill] sm:$0xff]  ;;  %v2252_v60 = vmul.f32 %v16981_v44, %v13292_v15  ;;  %v2606_v40 = vadd.f32 %v2605_v34, %v2604_v55  ;;  %v16986_v44 = vld [vmem:[#allocation144_spill] sm:$0xff]  ;;  %v16987_v55 = vld [vmem:[#allocation315_spill] sm:$0xff] }
 0x4bf   : > { %16971 = vst [vmem:[#allocation274_spill] sm:$0xff] %v13277_v0  ;;  %v13281_v45 = vmul.f32 %v16972_v62, %v12642_v31  ;;  %v16976_v31 = vld [vmem:[#allocation19_spill] sm:$0xff]  ;;  %v13312_v0 = vld [vmem:[%s12240_s28 + $0x408] sm:$0xff]  ;;  %v2253_v24 = vmul.f32 %v16986_v44, %v13309_v23 }
 0x4c0   : > { %v13297_v62 = vmul.f32 %v16976_v31, %v12659_v46  ;;  %v2429_v46 = vadd.f32 %v2428_v27, %v2427_v21  ;;  %v2607_v31 = vsel %vm834_vm0, %v2250_v25, 0.0  ;;  %v2254_v34 = vmul.f32 %v16987_v55, %v13312_v0  ;;  %v13329_v25 = vld [vmem:[%s12240_s28 + $0x410] sm:$0xff]  ;;  %v16992_v55 = vld [vmem:[#allocation146_spill] sm:$0xff] }
 0x4c1   : > { %16973 = vst [vmem:[#allocation165_spill] sm:$0xff] %v13281_v45  ;;  %v16978_v45 = vld [vmem:[#allocation199_spill] sm:$0xff]  ;;  %v2430_v21 = vsel %vm834_vm0, %v2251_v4, 0.0  ;;  %v2608_v27 = vadd.f32 %v2607_v31, %v2606_v40  ;;  %v2255_v4 = vmul.f32 %v16992_v55, %v13329_v25  ;;  %v16993_v40 = vld [vmem:[#allocation318_spill] sm:$0xff] }
 0x4c2   : > { %16977 = vst [vmem:[#allocation331_spill] sm:$0xff] %v13297_v62  ;;  %v13301_v50 = vmul.f32 %v16978_v45, %v12662_v57  ;;  %v16982_v57 = vld [vmem:[#allocation20_spill] sm:$0xff]  ;;  %v13332_v62 = vld [vmem:[%s12240_s28 + $0x418] sm:$0xff] }
 0x4c3   : > { %v13317_v45 = vmul.f32 %v16982_v57, %v12679_v53  ;;  %v2431_v53 = vadd.f32 %v2430_v21, %v2429_v46  ;;  %v2609_v57 = vsel %vm834_vm0, %v2252_v60, 0.0  ;;  %v2256_v31 = vmul.f32 %v16993_v40, %v13332_v62  ;;  %v13349_v60 = vld [vmem:[%s12240_s28 + $0x420] sm:$0xff]  ;;  %v16998_v40 = vld [vmem:[#allocation148_spill] sm:$0xff] }
 0x4c4   : > { %16979 = vst [vmem:[#allocation87_spill] sm:$0xff] %v13301_v50  ;;  %v16984_v50 = vld [vmem:[#allocation200_spill] sm:$0xff]  ;;  %v2432_v46 = vsel %vm834_vm0, %v2253_v24, 0.0  ;;  %v2610_v21 = vadd.f32 %v2609_v57, %v2608_v27  ;;  %v2257_v24 = vmul.f32 %v16998_v40, %v13349_v60 }
 0x4c5   : > { %16983 = vst [vmem:[#allocation276_spill] sm:$0xff] %v13317_v45  ;;  %v13321_v42 = vmul.f32 %v16984_v50, %v12682_v61  ;;  %v16988_v61 = vld [vmem:[#allocation21_spill] sm:$0xff]  ;;  %v13352_v45 = vld [vmem:[%s12240_s28 + $0x428] sm:$0xff] }
 0x4c6   : > { %v13337_v50 = vmul.f32 %v16988_v61, %v12701_v5  ;;  %v2433_v5 = vadd.f32 %v2432_v46, %v2431_v53  ;;  %v2611_v61 = vsel %vm834_vm0, %v2254_v34, 0.0  ;;  %v16999_v27 = vld [vmem:[#allocation320_spill] sm:$0xff]  ;;  %v2434_v53 = vsel %vm834_vm0, %v2255_v4, 0.0  ;;  %v13369_v34 = vld [vmem:[%s12240_s28 + $0x430] sm:$0xff] }
 0x4c7   : > { %16985 = vst [vmem:[#allocation166_spill] sm:$0xff] %v13321_v42  ;;  %v16990_v42 = vld [vmem:[#allocation201_spill] sm:$0xff]  ;;  %v2258_v57 = vmul.f32 %v16999_v27, %v13352_v45  ;;  %v2612_v46 = vadd.f32 %v2611_v61, %v2610_v21  ;;  %v17004_v27 = vld [vmem:[#allocation150_spill] sm:$0xff] }
 0x4c8   : > { %16989 = vst [vmem:[#allocation88_spill] sm:$0xff] %v13337_v50  ;;  %v13341_v44 = vmul.f32 %v16990_v42, %v12704_v10  ;;  %v16994_v10 = vld [vmem:[#allocation22_spill] sm:$0xff]  ;;  %v2259_v4 = vmul.f32 %v17004_v27, %v13369_v34 }
 0x4c9   : > { %v13357_v42 = vmul.f32 %v16994_v10, %v12719_v2  ;;  %v13372_v50 = vld [vmem:[%s12240_s28 + $0x438] sm:$0xff]  ;;  %v2435_v2 = vadd.f32 %v2434_v53, %v2433_v5  ;;  %v2613_v10 = vsel %vm834_vm0, %v2256_v31, 0.0  ;;  %v2436_v5 = vsel %vm834_vm0, %v2257_v24, 0.0  ;;  %v13389_v31 = vld [vmem:[%s12240_s28 + $0x440] sm:$0xff] }
 0x4ca   : > { %16991 = vst [vmem:[#allocation277_spill] sm:$0xff] %v13341_v44  ;;  %v16996_v44 = vld [vmem:[#allocation202_spill] sm:$0xff]  ;;  %v2614_v53 = vadd.f32 %v2613_v10, %v2612_v46 }
 0x4cb   : > { %16995 = vst [vmem:[#allocation167_spill] sm:$0xff] %v13357_v42  ;;  %v13361_v55 = vmul.f32 %v16996_v44, %v12722_v49  ;;  %v17000_v49 = vld [vmem:[#allocation23_spill] sm:$0xff]  ;;  %v17005_v21 = vld [vmem:[#allocation350_spill] sm:$0xff]  ;;  %v13392_v42 = vld [vmem:[%s12240_s28 + $0x448] sm:$0xff] }
 0x4cc   : > { %v13377_v44 = vmul.f32 %v17000_v49, %v12739_v19  ;;  %v2260_v61 = vmul.f32 %v17005_v21, %v13372_v50  ;;  %v2437_v19 = vadd.f32 %v2436_v5, %v2435_v2  ;;  %v2615_v49 = vsel %vm834_vm0, %v2258_v57, 0.0  ;;  %v17010_v21 = vld [vmem:[#allocation152_spill] sm:$0xff]  ;;  %v17011_v46 = vld [vmem:[#allocation322_spill] sm:$0xff]  ;;  %v13409_v57 = vld [vmem:[%s12240_s28 + $0x450] sm:$0xff] }
 0x4cd   : > { %16997 = vst [vmem:[#allocation333_spill] sm:$0xff] %v13361_v55  ;;  %v17002_v55 = vld [vmem:[#allocation203_spill] sm:$0xff]  ;;  %v2261_v24 = vmul.f32 %v17010_v21, %v13389_v31  ;;  %v2262_v10 = vmul.f32 %v17011_v46, %v13392_v42  ;;  %v2438_v2 = vsel %vm834_vm0, %v2259_v4, 0.0  ;;  %v2616_v5 = vadd.f32 %v2615_v49, %v2614_v53  ;;  %v17016_v46 = vld [vmem:[#allocation154_spill] sm:$0xff]  ;;  %v17017_v53 = vld [vmem:[#allocation324_spill] sm:$0xff] }
 0x4ce   : > { %17001 = vst [vmem:[#allocation89_spill] sm:$0xff] %v13377_v44  ;;  %v13381_v40 = vmul.f32 %v17002_v55, %v12742_v28  ;;  %v17006_v28 = vld [vmem:[#allocation24_spill] sm:$0xff]  ;;  %v13412_v44 = vld [vmem:[%s12240_s28 + $0x458] sm:$0xff]  ;;  %v2263_v4 = vmul.f32 %v17016_v46, %v13409_v57 }
 0x4cf   : > { %v13397_v55 = vmul.f32 %v17006_v28, %v12759_v59  ;;  %v2439_v59 = vadd.f32 %v2438_v2, %v2437_v19  ;;  %v2617_v28 = vsel %vm834_vm0, %v2260_v61, 0.0  ;;  %v2264_v49 = vmul.f32 %v17017_v53, %v13412_v44  ;;  %v13429_v61 = vld [vmem:[%s12240_s28 + $0x460] sm:$0xff]  ;;  %v17022_v53 = vld [vmem:[#allocation156_spill] sm:$0xff] }
 0x4d0   : > { %17003 = vst [vmem:[#allocation279_spill] sm:$0xff] %v13381_v40  ;;  %v17008_v40 = vld [vmem:[#allocation204_spill] sm:$0xff]  ;;  %v2440_v19 = vsel %vm834_vm0, %v2261_v24, 0.0  ;;  %v2618_v2 = vadd.f32 %v2617_v28, %v2616_v5  ;;  %v2265_v24 = vmul.f32 %v17022_v53, %v13429_v61  ;;  %v17023_v5 = vld [vmem:[#allocation351_spill] sm:$0xff] }
 0x4d1   : > { %17007 = vst [vmem:[#allocation169_spill] sm:$0xff] %v13397_v55  ;;  %v13401_v27 = vmul.f32 %v17008_v40, %v12762_v41  ;;  %v17012_v41 = vld [vmem:[#allocation25_spill] sm:$0xff]  ;;  %v13432_v55 = vld [vmem:[%s12240_s28 + $0x468] sm:$0xff] }
 0x4d2   : > { %v13417_v40 = vmul.f32 %v17012_v41, %v12783_v56  ;;  %v2441_v56 = vadd.f32 %v2440_v19, %v2439_v59  ;;  %v2619_v41 = vsel %vm834_vm0, %v2262_v10, 0.0  ;;  %v2266_v28 = vmul.f32 %v17023_v5, %v13432_v55  ;;  %v13449_v10 = vld [vmem:[%s12240_s28 + $0x470] sm:$0xff]  ;;  %v17028_v5 = vld [vmem:[#allocation158_spill] sm:$0xff] }
 0x4d3   : > { %17009 = vst [vmem:[#allocation90_spill] sm:$0xff] %v13401_v27  ;;  %v17014_v27 = vld [vmem:[#allocation205_spill] sm:$0xff]  ;;  %v2442_v59 = vsel %vm834_vm0, %v2263_v4, 0.0  ;;  %v2620_v19 = vadd.f32 %v2619_v41, %v2618_v2  ;;  %v2267_v4 = vmul.f32 %v17028_v5, %v13449_v10  ;;  %v17029_v2 = vld [vmem:[#allocation352_spill] sm:$0xff] }
 0x4d4   : > { %17013 = vst [vmem:[#allocation280_spill] sm:$0xff] %v13417_v40  ;;  %v13421_v21 = vmul.f32 %v17014_v27, %v12786_v17  ;;  %v17018_v17 = vld [vmem:[#allocation26_spill] sm:$0xff] }
 0x4d5   : > { %v13437_v27 = vmul.f32 %v17018_v17, %v12803_v9  ;;  %v13452_v40 = vld [vmem:[%s12240_s28 + $0x478] sm:$0xff]  ;;  %v2443_v9 = vadd.f32 %v2442_v59, %v2441_v56  ;;  %v2621_v17 = vsel %vm834_vm0, %v2264_v49, 0.0  ;;  %v2444_v56 = vsel %vm834_vm0, %v2265_v24, 0.0  ;;  %v13469_v49 = vld [vmem:[%s12240_s28 + $0x480] sm:$0xff] }
 0x4d6   : > { %17015 = vst [vmem:[#allocation170_spill] sm:$0xff] %v13421_v21  ;;  %v17020_v21 = vld [vmem:[#allocation206_spill] sm:$0xff]  ;;  %v2268_v41 = vmul.f32 %v17029_v2, %v13452_v40  ;;  %v2622_v59 = vadd.f32 %v2621_v17, %v2620_v19  ;;  %v17034_v2 = vld [vmem:[#allocation160_spill] sm:$0xff] }
 0x4d7   : > { %17019 = vst [vmem:[#allocation335_spill] sm:$0xff] %v13437_v27  ;;  %v13441_v46 = vmul.f32 %v17020_v21, %v12806_v58  ;;  %v17024_v58 = vld [vmem:[#allocation27_spill] sm:$0xff]  ;;  %v13472_v27 = vld [vmem:[%s12240_s28 + $0x488] sm:$0xff]  ;;  %v2269_v24 = vmul.f32 %v17034_v2, %v13469_v49  ;;  %v17035_v19 = vld [vmem:[#allocation326_spill] sm:$0xff] }
 0x4d8   : > { %v13457_v21 = vmul.f32 %v17024_v58, %v12823_v14  ;;  %v2445_v14 = vadd.f32 %v2444_v56, %v2443_v9  ;;  %v2623_v58 = vsel %vm834_vm0, %v2266_v28, 0.0  ;;  %v2270_v17 = vmul.f32 %v17035_v19, %v13472_v27  ;;  %v13489_v28 = vld [vmem:[%s12240_s28 + $0x490] sm:$0xff]  ;;  %v17040_v19 = vld [vmem:[#allocation162_spill] sm:$0xff] }
 0x4d9   : > { %17021 = vst [vmem:[#allocation91_spill] sm:$0xff] %v13441_v46  ;;  %v17026_v46 = vld [vmem:[#allocation207_spill] sm:$0xff]  ;;  %v2446_v9 = vsel %vm834_vm0, %v2267_v4, 0.0  ;;  %v2624_v56 = vadd.f32 %v2623_v58, %v2622_v59  ;;  %v2271_v4 = vmul.f32 %v17040_v19, %v13489_v28  ;;  %v17041_v59 = vld [vmem:[#allocation328_spill] sm:$0xff] }
 0x4da   : > { %17025 = vst [vmem:[#allocation281_spill] sm:$0xff] %v13457_v21  ;;  %v13461_v53 = vmul.f32 %v17026_v46, %v12826_v63  ;;  %v17030_v63 = vld [vmem:[#allocation28_spill] sm:$0xff]  ;;  %v13492_v21 = vld [vmem:[%s12240_s28 + $0x498] sm:$0xff] }
 0x4db   : > { %v13477_v46 = vmul.f32 %v17030_v63, %v12843_v33  ;;  %v2447_v33 = vadd.f32 %v2446_v9, %v2445_v14  ;;  %v2625_v63 = vsel %vm834_vm0, %v2268_v41, 0.0  ;;  %v2272_v58 = vmul.f32 %v17041_v59, %v13492_v21  ;;  %v13509_v41 = vld [vmem:[%s12240_s28 + $0x4a0] sm:$0xff]  ;;  %v17046_v59 = vld [vmem:[#allocation164_spill] sm:$0xff] }
 0x4dc   : > { %17027 = vst [vmem:[#allocation172_spill] sm:$0xff] %v13461_v53  ;;  %v17032_v53 = vld [vmem:[#allocation208_spill] sm:$0xff]  ;;  %v2448_v14 = vsel %vm834_vm0, %v2269_v24, 0.0  ;;  %v2626_v9 = vadd.f32 %v2625_v63, %v2624_v56  ;;  %v2273_v24 = vmul.f32 %v17046_v59, %v13509_v41  ;;  %v17047_v56 = vld [vmem:[#allocation353_spill] sm:$0xff] }
 0x4dd   : > { %17031 = vst [vmem:[#allocation336_spill] sm:$0xff] %v13477_v46  ;;  %v13481_v5 = vmul.f32 %v17032_v53, %v12846_v16  ;;  %v17036_v16 = vld [vmem:[#allocation29_spill] sm:$0xff]  ;;  %v13512_v46 = vld [vmem:[%s12240_s28 + $0x4a8] sm:$0xff] }
 0x4de   : > { %v13497_v53 = vmul.f32 %v17036_v16, %v12863_v26  ;;  %v2449_v26 = vadd.f32 %v2448_v14, %v2447_v33  ;;  %v2627_v16 = vsel %vm834_vm0, %v2270_v17, 0.0  ;;  %v2274_v63 = vmul.f32 %v17047_v56, %v13512_v46  ;;  %v13529_v17 = vld [vmem:[%s12240_s28 + $0x4b0] sm:$0xff]  ;;  %v17052_v56 = vld [vmem:[#allocation187_spill] sm:$0xff] }
 0x4df   : > { %17033 = vst [vmem:[#allocation3_spill] sm:$0xff] %v13481_v5  ;;  %v17038_v5 = vld [vmem:[#allocation209_spill] sm:$0xff]  ;;  %v2450_v33 = vsel %vm834_vm0, %v2271_v4, 0.0  ;;  %v2628_v14 = vadd.f32 %v2627_v16, %v2626_v9  ;;  %v2275_v4 = vmul.f32 %v17052_v56, %v13529_v17  ;;  %v17053_v9 = vld [vmem:[#allocation354_spill] sm:$0xff] }
 0x4e0   : > { %17037 = vst [vmem:[#allocation282_spill] sm:$0xff] %v13497_v53  ;;  %v13501_v2 = vmul.f32 %v17038_v5, %v12866_v1  ;;  %v17042_v1 = vld [vmem:[#allocation30_spill] sm:$0xff] }
 0x4e1   : > { %v13517_v5 = vmul.f32 %v17042_v1, %v12887_v37  ;;  %v13532_v53 = vld [vmem:[%s12240_s28 + $0x4b8] sm:$0xff]  ;;  %v2451_v37 = vadd.f32 %v2450_v33, %v2449_v26  ;;  %v2629_v1 = vsel %vm834_vm0, %v2272_v58, 0.0  ;;  %v2452_v26 = vsel %vm834_vm0, %v2273_v24, 0.0  ;;  %v13549_v58 = vld [vmem:[%s12240_s28 + $0x4c0] sm:$0xff] }
 0x4e2   : > { %17039 = vst [vmem:[#allocation174_spill] sm:$0xff] %v13501_v2  ;;  %v17044_v2 = vld [vmem:[#allocation210_spill] sm:$0xff]  ;;  %v2276_v16 = vmul.f32 %v17053_v9, %v13532_v53  ;;  %v2630_v33 = vadd.f32 %v2629_v1, %v2628_v14 }
 0x4e3   : > { %17043 = vst [vmem:[#allocation337_spill] sm:$0xff] %v13517_v5  ;;  %v13521_v19 = vmul.f32 %v17044_v2, %v12890_v18  ;;  %v17048_v18 = vld [vmem:[#allocation31_spill] sm:$0xff]  ;;  %v13552_v5 = vld [vmem:[%s12240_s28 + $0x4c8] sm:$0xff]  ;;  %v17058_v9 = vld [vmem:[#allocation178_spill] sm:$0xff] }
 0x4e4   : > { %v13537_v2 = vmul.f32 %v17048_v18, %v12907_v54  ;;  %v2453_v54 = vadd.f32 %v2452_v26, %v2451_v37  ;;  %v2631_v18 = vsel %vm834_vm0, %v2274_v63, 0.0  ;;  %v2277_v24 = vmul.f32 %v17058_v9, %v13549_v58  ;;  %v17059_v14 = vld [vmem:[#allocation330_spill] sm:$0xff]  ;;  %v13569_v63 = vld [vmem:[%s12240_s28 + $0x4d0] sm:$0xff] }
 0x4e5   : > { %17045 = vst [vmem:[#allocation218_spill] sm:$0xff] %v13521_v19  ;;  %v17050_v19 = vld [vmem:[#allocation211_spill] sm:$0xff]  ;;  %v2278_v1 = vmul.f32 %v17059_v14, %v13552_v5  ;;  %v2454_v37 = vsel %vm834_vm0, %v2275_v4, 0.0  ;;  %v2632_v26 = vadd.f32 %v2631_v18, %v2630_v33 }
 0x4e6   : > { %17049 = vst [vmem:[#allocation4_spill] sm:$0xff] %v13537_v2  ;;  %v13541_v59 = vmul.f32 %v17050_v19, %v12910_v3  ;;  %v17054_v3 = vld [vmem:[#allocation32_spill] sm:$0xff]  ;;  %v13572_v2 = vld [vmem:[%s12240_s28 + $0x4d8] sm:$0xff]  ;;  %v17064_v14 = vld [vmem:[#allocation171_spill] sm:$0xff] }
 0x4e7   : > { %v13557_v19 = vmul.f32 %v17054_v3, %v12927_v20  ;;  %v2455_v20 = vadd.f32 %v2454_v37, %v2453_v54  ;;  %v2633_v3 = vsel %vm834_vm0, %v2276_v16, 0.0  ;;  %v2279_v4 = vmul.f32 %v17064_v14, %v13569_v63  ;;  %v17065_v33 = vld [vmem:[#allocation355_spill] sm:$0xff] }
 0x4e8   : > { %17051 = vst [vmem:[#allocation219_spill] sm:$0xff] %v13541_v59  ;;  %v17056_v59 = vld [vmem:[#allocation212_spill] sm:$0xff]  ;;  %v2280_v18 = vmul.f32 %v17065_v33, %v13572_v2  ;;  %v2456_v54 = vsel %vm834_vm0, %v2277_v24, 0.0  ;;  %v2634_v37 = vadd.f32 %v2633_v3, %v2632_v26  ;;  %v13589_v16 = vld [vmem:[%s12240_s28 + $0x4e0] sm:$0xff] }
 0x4e9   : > { %17055 = vst [vmem:[#allocation71_spill] sm:$0xff] %v13557_v19  ;;  %v13561_v56 = vmul.f32 %v17056_v59, %v12930_v39  ;;  %v17060_v39 = vld [vmem:[#allocation33_spill] sm:$0xff]  ;;  %v13592_v19 = vld [vmem:[%s12240_s28 + $0x4e8] sm:$0xff] }
 0x4ea   : > { %v13577_v59 = vmul.f32 %v17060_v39, %v12947_v43  ;;  %v2457_v43 = vadd.f32 %v2456_v54, %v2455_v20  ;;  %v2635_v39 = vsel %vm834_vm0, %v2278_v1, 0.0  ;;  %v17070_v33 = vld [vmem:[#allocation120_spill] sm:$0xff]  ;;  %v2458_v20 = vsel %vm834_vm0, %v2279_v4, 0.0  ;;  %v13609_v1 = vld [vmem:[%s12240_s28 + $0x4f0] sm:$0xff] }
 0x4eb   : > { %17057 = vst [vmem:[#allocation176_spill] sm:$0xff] %v13561_v56  ;;  %v17062_v56 = vld [vmem:[#allocation213_spill] sm:$0xff]  ;;  %v2281_v24 = vmul.f32 %v17070_v33, %v13589_v16  ;;  %v17071_v26 = vld [vmem:[#allocation332_spill] sm:$0xff]  ;;  %v2636_v54 = vadd.f32 %v2635_v39, %v2634_v37  ;;  %v17079_v37 = vld [vmem:[#allocation334_spill] sm:$0xff] }
 0x4ec   : > { %17061 = vst [vmem:[#allocation338_spill] sm:$0xff] %v13577_v59  ;;  %v13581_v9 = vmul.f32 %v17062_v56, %v12950_v51  ;;  %v17066_v51 = vld [vmem:[#allocation34_spill] sm:$0xff]  ;;  %v2282_v3 = vmul.f32 %v17071_v26, %v13592_v19  ;;  %v17078_v26 = vld [vmem:[#allocation175_spill] sm:$0xff] }
 0x4ed   : > { %v13597_v56 = vmul.f32 %v17066_v51, %v12969_v12  ;;  %17072 = vst [vmem:[#allocation72_spill] sm:$0xff] %v13609_v1  ;;  %v13612_v59 = vld [vmem:[%s12240_s28 + $0x4f8] sm:$0xff]  ;;  %v2459_v12 = vadd.f32 %v2458_v20, %v2457_v43  ;;  %v2637_v51 = vsel %vm834_vm0, %v2280_v18, 0.0  ;;  %v2283_v4 = vmul.f32 %v17078_v26, %v13609_v1  ;;  %v13629_v18 = vld [vmem:[%s12240_s28 + $0x500] sm:$0xff]  ;;  %v13632_v20 = vld [vmem:[%s12240_s28 + $0x508] sm:$0xff] }
 0x4ee   : > { %17063 = vst [vmem:[#allocation98_spill] sm:$0xff] %v13581_v9  ;;  %v17068_v9 = vld [vmem:[#allocation214_spill] sm:$0xff]  ;;  %v2284_v39 = vmul.f32 %v17079_v37, %v13612_v59  ;;  %v2638_v43 = vadd.f32 %v2637_v51, %v2636_v54  ;;  %v17084_v26 = vld [vmem:[#allocation217_spill] sm:$0xff] }
 0x4ef   : > { %17067 = vst [vmem:[#allocation5_spill] sm:$0xff] %v13597_v56  ;;  %v13601_v14 = vmul.f32 %v17068_v9, %v12972_v29  ;;  %v17074_v29 = vld [vmem:[#allocation35_spill] sm:$0xff]  ;;  %v2460_v56 = vsel %vm834_vm0, %v2281_v24, 0.0  ;;  %v17086_v24 = vld [vmem:[#allocation177_spill] sm:$0xff]  ;;  %v2462_v51 = vsel %vm834_vm0, %v2283_v4, 0.0 }
 0x4f0   : > { %17073 = vst [vmem:[#allocation117_spill] sm:$0xff] %v13612_v59  ;;  %v13617_v9 = vmul.f32 %v17074_v29, %v12989_v48  ;;  %v2461_v48 = vadd.f32 %v2460_v56, %v2459_v12  ;;  %v2639_v29 = vsel %vm834_vm0, %v2282_v3, 0.0  ;;  %v2285_v54 = vmul.f32 %v17086_v24, %v13629_v18  ;;  %v13651_v3 = vld [vmem:[%s12240_s28 + $0x510] sm:$0xff]  ;;  %v13661_v24 = vld [vmem:[%s12240_s28 + $0x518] sm:$0xff]  ;;  %v17095_v4 = vld [vmem:[#allocation183_spill] sm:$0xff] }
 0x4f1   : > { %17069 = vst [vmem:[#allocation268_spill] sm:$0xff] %v13601_v14  ;;  %v17076_v14 = vld [vmem:[#allocation216_spill] sm:$0xff]  ;;  %v2640_v37 = vadd.f32 %v2639_v29, %v2638_v43  ;;  %v2287_v43 = vmul.f32 %v17095_v4, %v13651_v3  ;;  %v17097_v29 = vld [vmem:[#allocation38_spill] sm:$0xff]  ;;  %v17107_v4 = vld [vmem:[#allocation225_spill] sm:$0xff] }
 0x4f2   : > { %17075 = vst [vmem:[#allocation339_spill] sm:$0xff] %v13617_v9  ;;  %v13621_v33 = vmul.f32 %v17076_v14, %v12992_v52  ;;  %v17082_v52 = vld [vmem:[#allocation36_spill] sm:$0xff]  ;;  %v17087_v9 = vld [vmem:[#allocation37_spill] sm:$0xff] }
 0x4f3   : > { %17080 = vst [vmem:[#allocation6_spill] sm:$0xff] %v13629_v18  ;;  %v13637_v14 = vmul.f32 %v17082_v52, %v13009_v13  ;;  %v13648_v56 = vmul.f32 %v17087_v9, %v13029_v6  ;;  %v17090_v13 = vld [vmem:[#allocation356_spill] sm:$0xff]  ;;  %v2463_v52 = vadd.f32 %v2462_v51, %v2461_v48  ;;  %v2464_v6 = vsel %vm834_vm0, %v2285_v54, 0.0  ;;  %v13675_v51 = vld [vmem:[%s12240_s28 + $0x520] sm:$0xff]  ;;  %v17106_v18 = vld [vmem:[#allocation78_spill] sm:$0xff] }
 0x4f4   : > { %17077 = vst [vmem:[#allocation99_spill] sm:$0xff] %v13621_v33  ;;  %v13641_v33 = vmul.f32 %v17084_v26, %v13012_v35  ;;  %v2286_v12 = vmul.f32 %v17090_v13, %v13632_v20  ;;  %v17091_v35 = vld [vmem:[#allocation74_spill] sm:$0xff]  ;;  %v17092_v26 = vld [vmem:[#allocation223_spill] sm:$0xff]  ;;  %v17096_v9 = vld [vmem:[#allocation312_spill] sm:$0xff] }
 0x4f5   : > { %17081 = vst [vmem:[#allocation270_spill] sm:$0xff] %v13632_v20  ;;  %v17099_v13 = vld [vmem:[#allocation77_spill] sm:$0xff]  ;;  %v17100_v48 = vld [vmem:[#allocation224_spill] sm:$0xff] }
 0x4f6   : > { %17083 = vst [vmem:[#allocation73_spill] sm:$0xff] %v13637_v14  ;;  %v2641_v14 = vsel %vm834_vm0, %v2284_v39, 0.0  ;;  %v13672_v39 = vmul.f32 %v17100_v48, %v17099_v13  ;;  %v17109_v54 = vld [vmem:[#allocation316_spill] sm:$0xff]  ;;  %v2466_v13 = vsel %vm834_vm0, %v2287_v43, 0.0 }
 0x4f7   : > { %17085 = vst [vmem:[#allocation179_spill] sm:$0xff] %v13641_v33  ;;  %v13658_v33 = vmul.f32 %v17092_v26, %v17091_v35  ;;  %v2465_v35 = vadd.f32 %v2464_v6, %v2463_v52  ;;  %v17103_v26 = vld [vmem:[#allocation314_spill] sm:$0xff]  ;;  %v17110_v59 = vld [vmem:[#allocation40_spill] sm:$0xff]  ;;  %v2642_v48 = vadd.f32 %v2641_v14, %v2640_v37 }
 0x4f8   : > { %17088 = vst [vmem:[#allocation341_spill] sm:$0xff] %v13648_v56  ;;  %v13668_v56 = vmul.f32 %v17097_v29, %v17096_v9  ;;  %v13687_v9 = vmul.f32 %v17110_v59, %v17109_v54  ;;  %v17112_v29 = vld [vmem:[#allocation129_spill] sm:$0xff]  ;;  %v17114_v52 = vld [vmem:[#allocation226_spill] sm:$0xff]  ;;  %v13711_v14 = vld [vmem:[%s12240_s28 + $0x528] sm:$0xff] }
 0x4f9   : > { %17089 = vst [vmem:[#allocation7_spill] sm:$0xff] %v13651_v3  ;;  %v13683_v3 = vmul.f32 %v17107_v4, %v17106_v18  ;;  %v2643_v4 = vsel %vm834_vm0, %v2286_v12, 0.0  ;;  %v17118_v59 = vld [vmem:[#allocation41_spill] sm:$0xff]  ;;  %v17123_v37 = vld [vmem:[#allocation264_spill] sm:$0xff] }
 0x4fa   : > { %17093 = vst [vmem:[#allocation100_spill] sm:$0xff] %v13658_v33  ;;  %v17104_v33 = vld [vmem:[#allocation39_spill] sm:$0xff]  ;;  %v17129_v12 = vld [vmem:[#allocation265_spill] sm:$0xff] }
 0x4fb   : > { %17094 = vst [vmem:[#allocation75_spill] sm:$0xff] %v13661_v24  ;;  %v13679_v20 = vmul.f32 %v17104_v33, %v17103_v26  ;;  %v13697_v33 = vld [vmem:[%s12240_s28 + $0x530] sm:$0xff] }
 0x4fc   : > { %17098 = vst [vmem:[#allocation180_spill] sm:$0xff] %v13668_v56  ;;  %v2289_v56 = vmul.f32 %v17112_v29, %v13675_v51  ;;  %v17116_v26 = vld [vmem:[#allocation357_spill] sm:$0xff]  ;;  %v17120_v29 = vld [vmem:[#allocation80_spill] sm:$0xff] }
 0x4fd   : > { %17101 = vst [vmem:[#allocation343_spill] sm:$0xff] %v13672_v39  ;;  %v17113_v39 = vld [vmem:[#allocation79_spill] sm:$0xff]  ;;  %v2288_v18 = vmul.f32 %v17116_v26, %v13661_v24 }
 0x4fe   : > { %17102 = vst [vmem:[#allocation271_spill] sm:$0xff] %v13675_v51  ;;  %v13694_v6 = vmul.f32 %v17114_v52, %v17113_v39  ;;  %v17124_v39 = vld [vmem:[#allocation42_spill] sm:$0xff]  ;;  %v17130_v51 = vld [vmem:[#allocation43_spill] sm:$0xff] }
 0x4ff   : > { %17105 = vst [vmem:[#allocation8_spill] sm:$0xff] %v13679_v20  ;;  %v13715_v52 = vmul.f32 %v17124_v39, %v17123_v37  ;;  %v17127_v20 = vld [vmem:[#allocation228_spill] sm:$0xff]  ;;  %v13723_v24 = vmul.f32 %v17130_v51, %v17129_v12  ;;  %v17135_v37 = vld [vmem:[#allocation83_spill] sm:$0xff]  ;;  %v17136_v39 = vld [vmem:[#allocation230_spill] sm:$0xff] }
 0x500   : > { %17108 = vst [vmem:[#allocation101_spill] sm:$0xff] %v13683_v3  ;;  %v17117_v3 = vld [vmem:[#allocation317_spill] sm:$0xff]  ;;  %v17139_v51 = vld [vmem:[#allocation122_spill] sm:$0xff] }
 0x501   : > { %17111 = vst [vmem:[#allocation76_spill] sm:$0xff] %v13687_v9  ;;  %v13704_v54 = vmul.f32 %v17118_v59, %v17117_v3  ;;  %v17121_v9 = vld [vmem:[#allocation227_spill] sm:$0xff]  ;;  %v17131_v3 = vld [vmem:[#allocation82_spill] sm:$0xff]  ;;  %v17132_v59 = vld [vmem:[#allocation229_spill] sm:$0xff]  ;;  %v2291_v12 = vmul.f32 %v17139_v51, %v13697_v33 }
 0x502   : > { %17115 = vst [vmem:[#allocation181_spill] sm:$0xff] %v13694_v6  ;;  %v13708_v43 = vmul.f32 %v17121_v9, %v17120_v29  ;;  %v17126_v6 = vld [vmem:[#allocation81_spill] sm:$0xff]  ;;  %v2467_v9 = vadd.f32 %v2466_v13, %v2465_v35  ;;  %v17133_v29 = vld [vmem:[#allocation266_spill] sm:$0xff]  ;;  %v17141_v35 = vld [vmem:[#allocation231_spill] sm:$0xff] }
 0x503   : > { %17119 = vst [vmem:[#allocation344_spill] sm:$0xff] %v13704_v54  ;;  %v13719_v26 = vmul.f32 %v17127_v20, %v17126_v6  ;;  %v13727_v54 = vmul.f32 %v17132_v59, %v17131_v3  ;;  %v17138_v20 = vld [vmem:[#allocation45_spill] sm:$0xff]  ;;  %v2644_v3 = vadd.f32 %v2643_v4, %v2642_v48  ;;  %v17140_v59 = vld [vmem:[#allocation267_spill] sm:$0xff]  ;;  %v13763_v48 = vld [vmem:[%s12240_s28 + $0x538] sm:$0xff] }
 0x504   : > { %17122 = vst [vmem:[#allocation273_spill] sm:$0xff] %v13708_v43  ;;  %v17134_v43 = vld [vmem:[#allocation44_spill] sm:$0xff]  ;;  %v13739_v6 = vmul.f32 %v17138_v20, %v13189_v47  ;;  %v13746_v13 = vmul.f32 %v17141_v35, %v17140_v59  ;;  %v17144_v47 = vld [vmem:[#allocation46_spill] sm:$0xff]  ;;  %v17145_v51 = vld [vmem:[#allocation269_spill] sm:$0xff] }
 0x505   : > { %17125 = vst [vmem:[#allocation9_spill] sm:$0xff] %v13715_v52  ;;  %v13731_v1 = vmul.f32 %v17134_v43, %v17133_v29  ;;  %v13735_v52 = vmul.f32 %v17136_v39, %v17135_v37  ;;  %v13749_v43 = vld [vmem:[%s12240_s28 + $0x540] sm:$0xff]  ;;  %v17143_v29 = vld [vmem:[#allocation358_spill] sm:$0xff]  ;;  %v2645_v39 = vsel %vm834_vm0, %v2288_v18, 0.0  ;;  %v13756_v20 = vmul.f32 %v17144_v47, %v13209_v8  ;;  %v17149_v35 = vld [vmem:[#allocation233_spill] sm:$0xff] }
 0x506   : > { %17128 = vst [vmem:[#allocation102_spill] sm:$0xff] %v13719_v26  ;;  %v2468_v26 = vsel %vm834_vm0, %v2289_v56, 0.0  ;;  %v2290_v37 = vmul.f32 %v17143_v29, %v13711_v14  ;;  %v17148_v4 = vld [vmem:[#allocation47_spill] sm:$0xff]  ;;  %v13771_v29 = vmul.f32 %v17149_v35, %v13232_v38  ;;  %v17151_v18 = vld [vmem:[#allocation48_spill] sm:$0xff]  ;;  %v17152_v8 = vld [vmem:[#allocation234_spill] sm:$0xff] }
 0x507   : > { %17137 = vst [vmem:[#allocation168_spill] sm:$0xff] %v13735_v52  ;;  %v17146_v52 = vld [vmem:[#allocation232_spill] sm:$0xff]  ;;  %v13767_v59 = vmul.f32 %v17148_v4, %v13229_v30  ;;  %v13779_v47 = vmul.f32 %v17152_v8, %v13252_v7  ;;  %v17154_v30 = vld [vmem:[#allocation235_spill] sm:$0xff]  ;;  %v2646_v7 = vadd.f32 %v2645_v39, %v2644_v3 }
 0x508   : > { %17142 = vst [vmem:[#allocation182_spill] sm:$0xff] %v13746_v13  ;;  %v13760_v56 = vmul.f32 %v17146_v52, %v17145_v51  ;;  %v13775_v13 = vmul.f32 %v17151_v18, %v13249_v22  ;;  %v2469_v52 = vadd.f32 %v2468_v26, %v2467_v9  ;;  %v17153_v51 = vld [vmem:[#allocation49_spill] sm:$0xff]  ;;  %v13787_v4 = vmul.f32 %v17154_v30, %v13272_v11  ;;  %v17155_v38 = vld [vmem:[#allocation92_spill] sm:$0xff]  ;;  %v17158_v8 = vld [vmem:[#allocation359_spill] sm:$0xff] }
 0x509   : > { %17150 = vst [vmem:[#allocation275_spill] sm:$0xff] %v13771_v29  ;;  %v13791_v35 = vmul.f32 %v17155_v38, %v13289_v32  ;;  %v17156_v22 = vld [vmem:[#allocation188_spill] sm:$0xff]  ;;  %v2470_v29 = vsel %vm834_vm0, %v2291_v12, 0.0  ;;  %v2292_v11 = vmul.f32 %v17158_v8, %v13763_v48  ;;  %v17159_v32 = vld [vmem:[#allocation93_spill] sm:$0xff] }
 0x50a   : > { %17147 = vst [vmem:[#allocation345_spill] sm:$0xff] %v13760_v56  ;;  %v13783_v56 = vmul.f32 %v17153_v51, %v13269_v36  ;;  %v2293_v18 = vmul.f32 %v17156_v22, %v13749_v43  ;;  %v17157_v26 = vld [vmem:[#allocation236_spill] sm:$0xff]  ;;  %v13801_v36 = vld [vmem:[%s12240_s28 + $0x550] sm:$0xff]  ;;  %v2647_v51 = vsel %vm834_vm0, %v2290_v37, 0.0  ;;  %v13808_v30 = vmul.f32 %v17159_v32, %v13309_v23  ;;  %v17163_v22 = vld [vmem:[#allocation238_spill] sm:$0xff] }
 0x50b   : > { %v13798_v9 = vmul.f32 %v17157_v26, %v13292_v15  ;;  %v17160_v38 = vld [vmem:[#allocation237_spill] sm:$0xff]  ;;  %v13815_v3 = vld [vmem:[%s12240_s28 + $0x548] sm:$0xff]  ;;  %v17162_v15 = vld [vmem:[#allocation94_spill] sm:$0xff]  ;;  %v13823_v26 = vmul.f32 %v17163_v22, %v13332_v62 }
 0x50c   : > { %v13812_v12 = vmul.f32 %v17160_v38, %v13312_v0  ;;  %v13819_v39 = vmul.f32 %v17162_v15, %v13329_v25  ;;  %v17165_v37 = vld [vmem:[#allocation95_spill] sm:$0xff]  ;;  %v2471_v0 = vadd.f32 %v2470_v29, %v2469_v52  ;;  %v17168_v38 = vld [vmem:[#allocation50_spill] sm:$0xff]  ;;  %v17169_v25 = vld [vmem:[#allocation240_spill] sm:$0xff] }
 0x50d   : > { %17164 = vst [vmem:[#allocation103_spill] sm:$0xff] %v13823_v26  ;;  %v13827_v8 = vmul.f32 %v17165_v37, %v13349_v60  ;;  %v17166_v23 = vld [vmem:[#allocation239_spill] sm:$0xff]  ;;  %v13839_v15 = vmul.f32 %v17169_v25, %v13372_v50  ;;  %v2472_v26 = vsel %vm834_vm0, %v2293_v18, 0.0  ;;  %v17173_v29 = vld [vmem:[#allocation241_spill] sm:$0xff] }
 0x50e   : > { %17161 = vst [vmem:[#allocation10_spill] sm:$0xff] %v13812_v12  ;;  %v13831_v32 = vmul.f32 %v17166_v23, %v13352_v45  ;;  %v13835_v12 = vmul.f32 %v17168_v38, %v13369_v34  ;;  %v17171_v62 = vld [vmem:[#allocation51_spill] sm:$0xff]  ;;  %v2648_v45 = vadd.f32 %v2647_v51, %v2646_v7  ;;  %v13850_v52 = vmul.f32 %v17173_v29, %v13392_v42  ;;  %v17175_v23 = vld [vmem:[#allocation360_spill] sm:$0xff]  ;;  %v13867_v7 = vld [vmem:[%s12240_s28 + $0x558] sm:$0xff] }
 0x50f   : > { %17170 = vst [vmem:[#allocation184_spill] sm:$0xff] %v13839_v15  ;;  %v13843_v22 = vmul.f32 %v17171_v62, %v13389_v31  ;;  %v17172_v60 = vld [vmem:[#allocation127_spill] sm:$0xff]  ;;  %v2294_v50 = vmul.f32 %v17175_v23, %v13815_v3  ;;  %v2649_v38 = vsel %vm834_vm0, %v2292_v11, 0.0  ;;  %v17176_v31 = vld [vmem:[#allocation52_spill] sm:$0xff]  ;;  %v17177_v62 = vld [vmem:[#allocation242_spill] sm:$0xff] }
 0x510   : > { %17167 = vst [vmem:[#allocation173_spill] sm:$0xff] %v13831_v32  ;;  %v2295_v37 = vmul.f32 %v17172_v60, %v13801_v36  ;;  %v13853_v34 = vld [vmem:[%s12240_s28 + $0x560] sm:$0xff]  ;;  %v13860_v25 = vmul.f32 %v17176_v31, %v13409_v57  ;;  %v13864_v18 = vmul.f32 %v17177_v62, %v13412_v44  ;;  %v17179_v42 = vld [vmem:[#allocation53_spill] sm:$0xff]  ;;  %v17183_v11 = vld [vmem:[#allocation54_spill] sm:$0xff]  ;;  %v2473_v44 = vadd.f32 %v2472_v26, %v2471_v0 }
 0x511   : > { %17174 = vst [vmem:[#allocation346_spill] sm:$0xff] %v13850_v52  ;;  %v13871_v51 = vmul.f32 %v17179_v42, %v13429_v61  ;;  %v17181_v60 = vld [vmem:[#allocation243_spill] sm:$0xff]  ;;  %v13879_v23 = vmul.f32 %v17183_v11, %v13449_v10  ;;  %v17185_v57 = vld [vmem:[#allocation244_spill] sm:$0xff]  ;;  %v17189_v61 = vld [vmem:[#allocation245_spill] sm:$0xff]  ;;  %v2650_v26 = vadd.f32 %v2649_v38, %v2648_v45 }
 0x512   : > { %17178 = vst [vmem:[#allocation278_spill] sm:$0xff] %v13864_v18  ;;  %v13875_v29 = vmul.f32 %v17181_v60, %v13432_v55  ;;  %v13883_v31 = vmul.f32 %v17185_v57, %v13452_v40  ;;  %v17187_v62 = vld [vmem:[#allocation55_spill] sm:$0xff]  ;;  %v13891_v42 = vmul.f32 %v17189_v61, %v13472_v27  ;;  %v17191_v55 = vld [vmem:[#allocation56_spill] sm:$0xff]  ;;  %v17193_v10 = vld [vmem:[#allocation190_spill] sm:$0xff]  ;;  %v2474_v40 = vsel %vm834_vm0, %v2295_v37, 0.0 }
 0x513   : > { %17180 = vst [vmem:[#allocation11_spill] sm:$0xff] %v13871_v51  ;;  %v13887_v18 = vmul.f32 %v17187_v62, %v13469_v49  ;;  %v13895_v60 = vmul.f32 %v17191_v55, %v13489_v28  ;;  %v2297_v11 = vmul.f32 %v17193_v10, %v13853_v34  ;;  %v17194_v0 = vld [vmem:[#allocation246_spill] sm:$0xff]  ;;  %v13905_v57 = vld [vmem:[%s12240_s28 + $0x570] sm:$0xff]  ;;  %v17196_v27 = vld [vmem:[#allocation340_spill] sm:$0xff]  ;;  %v2651_v28 = vsel %vm834_vm0, %v2294_v50, 0.0 }
 0x514   : > { %17182 = vst [vmem:[#allocation104_spill] sm:$0xff] %v13875_v29  ;;  %v13902_v49 = vmul.f32 %v17194_v0, %v13492_v21  ;;  %v2296_v62 = vmul.f32 %v17196_v27, %v13867_v7  ;;  %v17197_v61 = vld [vmem:[#allocation57_spill] sm:$0xff]  ;;  %v17199_v10 = vld [vmem:[#allocation247_spill] sm:$0xff]  ;;  %v13919_v45 = vld [vmem:[%s12240_s28 + $0x568] sm:$0xff] }
 0x515   : > { %17184 = vst [vmem:[#allocation124_spill] sm:$0xff] %v13879_v23  ;;  %v13912_v55 = vmul.f32 %v17197_v61, %v13509_v41  ;;  %v13916_v37 = vmul.f32 %v17199_v10, %v13512_v46  ;;  %v17201_v21 = vld [vmem:[#allocation58_spill] sm:$0xff]  ;;  %v17203_v0 = vld [vmem:[#allocation248_spill] sm:$0xff]  ;;  %v17205_v50 = vld [vmem:[#allocation59_spill] sm:$0xff] }
 0x516   : > { %17186 = vst [vmem:[#allocation185_spill] sm:$0xff] %v13883_v31  ;;  %v13923_v38 = vmul.f32 %v17201_v21, %v13529_v17  ;;  %v13931_v27 = vmul.f32 %v17205_v50, %v13549_v58  ;;  %v17207_v41 = vld [vmem:[#allocation249_spill] sm:$0xff]  ;;  %v13938_v46 = vld [vmem:[%s12240_s28 + $0x580] sm:$0xff]  ;;  %v2475_v17 = vadd.f32 %v2474_v40, %v2473_v44  ;;  %v17209_v21 = vld [vmem:[#allocation60_spill] sm:$0xff]  ;;  %v2652_v44 = vadd.f32 %v2651_v28, %v2650_v26 }
 0x517   : > { %17188 = vst [vmem:[#allocation347_spill] sm:$0xff] %v13887_v18  ;;  %v13935_v61 = vmul.f32 %v17207_v41, %v13552_v5  ;;  %v13941_v10 = vld [vmem:[%s12240_s28 + $0x590] sm:$0xff]  ;;  %v13956_v5 = vld [vmem:[%s12240_s28 + $0x578] sm:$0xff]  ;;  %v17215_v41 = vld [vmem:[#allocation191_spill] sm:$0xff] }
 0x518   : > { %17190 = vst [vmem:[#allocation283_spill] sm:$0xff] %v13891_v42  ;;  %v17213_v58 = vld [vmem:[#allocation61_spill] sm:$0xff]  ;;  %v17216_v40 = vld [vmem:[#allocation251_spill] sm:$0xff]  ;;  %v17224_v28 = vld [vmem:[#allocation194_spill] sm:$0xff] }
 0x519   : > { %17192 = vst [vmem:[#allocation12_spill] sm:$0xff] %v13895_v60  ;;  %v13953_v50 = vmul.f32 %v17213_v58, %v13589_v16  ;;  %v17220_v16 = vld [vmem:[#allocation62_spill] sm:$0xff]  ;;  %v17223_v26 = vld [vmem:[#allocation193_spill] sm:$0xff]  ;;  %v17229_v42 = vld [vmem:[#allocation252_spill] sm:$0xff] }
 0x51a   : > { %17195 = vst [vmem:[#allocation105_spill] sm:$0xff] %v13902_v49  ;;  %v13927_v49 = vmul.f32 %v17203_v0, %v13532_v53  ;;  %v17211_v53 = vld [vmem:[#allocation250_spill] sm:$0xff]  ;;  %v17232_v29 = vld [vmem:[#allocation112_spill] sm:$0xff]  ;;  %v17233_v60 = vld [vmem:[#allocation361_spill] sm:$0xff] }
 0x51b   : > { %17198 = vst [vmem:[#allocation118_spill] sm:$0xff] %v13912_v55  ;;  %v13949_v0 = vmul.f32 %v17211_v53, %v13572_v2  ;;  %v2653_v53 = vsel %vm834_vm0, %v2296_v62, 0.0  ;;  %v17231_v55 = vld [vmem:[#allocation192_spill] sm:$0xff]  ;;  %v17234_v18 = vld [vmem:[#allocation362_spill] sm:$0xff]  ;;  %v17249_v23 = vld [vmem:[#allocation7_spill] sm:$0xff] }
 0x51c   : > { %17200 = vst [vmem:[#allocation186_spill] sm:$0xff] %v13916_v37  ;;  %v13945_v37 = vmul.f32 %v17209_v21, %v13569_v63  ;;  %v13963_v63 = vmul.f32 %v17216_v40, %v13592_v19  ;;  %v17218_v21 = vld [vmem:[#allocation327_spill] sm:$0xff]  ;;  %v2301_v19 = vmul.f32 %v17223_v26, %v13938_v46  ;;  %v2303_v40 = vmul.f32 %v17224_v28, %v13941_v10  ;;  %v17256_v32 = vld [vmem:[#allocation65_spill] sm:$0xff] }
 0x51d   : > { %17202 = vst [vmem:[#allocation348_spill] sm:$0xff] %v13923_v38  ;;  %v2298_v2 = vmul.f32 %v17218_v21, %v13919_v45  ;;  %v17225_v21 = vld [vmem:[#allocation110_spill] sm:$0xff]  ;;  %6227 = vlog2.f32 %v17231_v55  ;;  %v2654_v28 = vadd.f32 %v2653_v53, %v2652_v44  ;;  %v17255_v51 = vld [vmem:[#allocation271_spill] sm:$0xff] }
 0x51e   : > { %17204 = vst [vmem:[#allocation284_spill] sm:$0xff] %v13927_v49  ;;  %v2476_v49 = vsel %vm834_vm0, %v2297_v11, 0.0  ;;  %v13978_v11 = vld [vmem:[%s12240_s28 + $0x598] sm:$0xff]  ;;  %v2844_v62 = vsel %vm834_vm0, %v17225_v21, 0.0  ;;  %v2848_v21 = vsel %vm834_vm0, %v17232_v29, 0.0  ;;  %v2482_v55 = vsel %vm834_vm0, %v2303_v40, 0.0 }
 0x51f   : > { %17206 = vst [vmem:[#allocation13_spill] sm:$0xff] %v13931_v27  ;;  %v17228_v27 = vld [vmem:[#allocation117_spill] sm:$0xff] }
 0x520   : > { %17208 = vst [vmem:[#allocation106_spill] sm:$0xff] %v13935_v61  ;;  %v2299_v61 = vmul.f32 %v17215_v41, %v13905_v57  ;;  %v13975_v41 = vld [vmem:[%s12240_s28 + $0x588] sm:$0xff]  ;;  %v13992_v38 = vmul.f32 %v17229_v42, %v17228_v27  ;;  %v17235_v42 = vld [vmem:[#allocation363_spill] sm:$0xff]  ;;  %v17236_v27 = vld [vmem:[#allocation113_spill] sm:$0xff] }
 0x521   : > { %17210 = vst [vmem:[#allocation126_spill] sm:$0xff] %v13945_v37  ;;  %6229 = vlog2.f32 %v17235_v42 }
 0x522   : > { %17212 = vst [vmem:[#allocation131_spill] sm:$0xff] %v13949_v0  ;;  %v17219_v0 = vld [vmem:[#allocation72_spill] sm:$0xff]  ;;  %v2478_v26 = vsel %vm834_vm0, %v2299_v61, 0.0  ;;  %v2850_v61 = vsel %vm834_vm0, %v17236_v27, 0.0  ;;  %v17242_v27 = vld [vmem:[#allocation63_spill] sm:$0xff] }
 0x523   : > { %17214 = vst [vmem:[#allocation349_spill] sm:$0xff] %v13953_v50  ;;  %v13970_v58 = vmul.f32 %v17220_v16, %v17219_v0  ;;  %v17222_v50 = vld [vmem:[#allocation109_spill] sm:$0xff]  ;;  %v17227_v16 = vld [vmem:[#allocation342_spill] sm:$0xff] }
 0x524   : > { %17217 = vst [vmem:[#allocation285_spill] sm:$0xff] %v13963_v63  ;;  %v2843_v37 = vsel %vm834_vm0, %v17222_v50, 0.0  ;;  %v17226_v63 = vld [vmem:[#allocation111_spill] sm:$0xff]  ;;  %v2477_v50 = vadd.f32 %v2476_v49, %v2475_v17  ;;  %v2655_v49 = vsel %vm834_vm0, %v2298_v2, 0.0  ;;  %v17239_v2 = vld [vmem:[#allocation289_spill] sm:$0xff] }
 0x525   : > { %17221 = vst [vmem:[#allocation14_spill] sm:$0xff] %v13970_v58  ;;  %v2846_v0 = vsel %vm834_vm0, %v17226_v63, 0.0  ;;  %v2300_v58 = vmul.f32 %v17227_v16, %v13956_v5  ;;  %v2845_v31 = vadd.f32 %v2844_v62, %v2843_v37  ;;  %v2302_v63 = vmul.f32 %v17233_v60, %v13975_v41  ;;  %v17237_v60 = vld [vmem:[#allocation288_spill] sm:$0xff] }
 0x526   : > { %17230 = vst [vmem:[#allocation107_spill] sm:$0xff] %v13992_v38  ;;  %v2304_v16 = vmul.f32 %v17234_v18, %v13978_v11  ;;  %v2480_v37 = vsel %vm834_vm0, %v2301_v19, 0.0  ;;  %v2479_v44 = vadd.f32 %v2478_v26, %v2477_v50  ;;  %v3022_v62 = vsel %vm834_vm0, %v17237_v60, 0.0  ;;  %v17238_v38 = vld [vmem:[#allocation114_spill] sm:$0xff] }
 0x527   : > { %v2847_v17 = vadd.f32 %v2846_v0, %v2845_v31  ;;  %v2657_v29 = vsel %vm834_vm0, %v2300_v58, 0.0  ;;  %v2656_v18 = vadd.f32 %v2655_v49, %v2654_v28  ;;  %v2852_v31 = vsel %vm834_vm0, %v17238_v38, 0.0  ;;  %v17240_v19 = vld [vmem:[#allocation290_spill] sm:$0xff]  ;;  %v17245_v38 = vld [vmem:[#allocation253_spill] sm:$0xff] }
 0x528   : > { %v3023_v0 = vsel %vm834_vm0, %v17239_v2, 0.0  ;;  %v3025_v40 = vsel %vm834_vm0, %v17240_v19, 0.0  ;;  %v2659_v42 = vsel %vm834_vm0, %v2302_v63, 0.0  ;;  %v14019_v50 = vsel %vm834_vm0, %v2304_v16, 0.0  ;;  %v17244_v49 = vld [vmem:[#allocation270_spill] sm:$0xff]  ;;  %v17247_v2 = vld [vmem:[#allocation115_spill] sm:$0xff] }
 0x529   : > { %v2849_v53 = vadd.f32 %v2848_v21, %v2847_v17  ;;  %v3024_v26 = vadd.f32 %v3023_v0, %v3022_v62  ;;  %v6228_v21 = vpop.eup %6227  ;;  %v17241_v17 = vld [vmem:[#allocation6_spill] sm:$0xff]  ;;  %v14027_v60 = vmul.f32 %v17245_v38, %v17244_v49  ;;  %v2854_v52 = vsel %vm834_vm0, %v17247_v2, 0.0  ;;  %v17248_v19 = vld [vmem:[#allocation291_spill] sm:$0xff]  ;;  %v17250_v16 = vld [vmem:[#allocation64_spill] sm:$0xff] }
 0x52a   : > { %v14023_v28 = vmul.f32 %v17242_v27, %v17241_v17  ;;  %v3027_v63 = vsel %vm834_vm0, %v17248_v19, 0.0  ;;  %v14035_v15 = vmul.f32 %v17250_v16, %v17249_v23  ;;  %v6230_v27 = vpop.eup %6229  ;;  %v2658_v49 = vadd.f32 %v2657_v29, %v2656_v18  ;;  %v17253_v38 = vld [vmem:[#allocation116_spill] sm:$0xff]  ;;  %v17257_v16 = vld [vmem:[#allocation255_spill] sm:$0xff]  ;;  %v17259_v29 = vld [vmem:[#allocation66_spill] sm:$0xff] }
 0x52b   : > { %v2851_v58 = vadd.f32 %v2850_v61, %v2849_v53  ;;  %17246 = vst [vmem:[#allocation133_spill] sm:$0xff] %v14027_v60  ;;  %v17251_v61 = vld [vmem:[#allocation75_spill] sm:$0xff]  ;;  %v17252_v53 = vld [vmem:[#allocation254_spill] sm:$0xff]  ;;  %v3026_v17 = vadd.f32 %v3025_v40, %v3024_v26  ;;  %v2856_v2 = vsel %vm834_vm0, %v17253_v38, 0.0  ;;  %v17254_v60 = vld [vmem:[#allocation292_spill] sm:$0xff]  ;;  %v14047_v23 = vmul.f32 %v17256_v32, %v17255_v51 }
 0x52c   : > { %17243 = vst [vmem:[#allocation195_spill] sm:$0xff] %v14023_v28  ;;  %v14039_v62 = vmul.f32 %v17252_v53, %v17251_v61  ;;  %v2481_v28 = vadd.f32 %v2480_v37, %v2479_v44  ;;  %v3029_v19 = vsel %vm834_vm0, %v17254_v60, 0.0  ;;  %v14051_v61 = vmul.f32 %v17257_v16, %v13711_v14  ;;  %v17260_v40 = vld [vmem:[#allocation119_spill] sm:$0xff]  ;;  %v17261_v26 = vld [vmem:[#allocation293_spill] sm:$0xff]  ;;  %v17262_v51 = vld [vmem:[#allocation256_spill] sm:$0xff] }
 0x52d   : > { %v2853_v0 = vadd.f32 %v2852_v31, %v2851_v58  ;;  %v3028_v37 = vadd.f32 %v3027_v63, %v3026_v17  ;;  %v14053_v44 = vmul.f32 0.6931472, %v6228_v21  ;;  %v14057_v18 = vmul.f32 %v17259_v29, %v13697_v33  ;;  %v17264_v53 = vld [vmem:[#allocation121_spill] sm:$0xff]  ;;  %v17265_v63 = vld [vmem:[#allocation294_spill] sm:$0xff]  ;;  %v6440_v29 = vld [vmem:[%s12240_s28 + $0x20] sm:$0xff] }
 0x52e   : > { %v2858_v58 = vsel %vm834_vm0, %v17260_v40, 0.0  ;;  %v3031_v32 = vsel %vm834_vm0, %v17261_v26, 0.0  ;;  %v14065_v60 = vmul.f32 %v17262_v51, %v13763_v48  ;;  %v3033_v33 = vsel %vm834_vm0, %v17265_v63, 0.0  ;;  %v6439_v38 = vld [vmem:[%s12240_s28 + $0x10] sm:$0xff]  ;;  %v17266_v48 = vld [vmem:[#allocation67_spill] sm:$0xff] }
 0x52f   : > { %v2855_v31 = vadd.f32 %v2854_v52, %v2853_v0  ;;  %17258 = vst [vmem:[#allocation304_spill] sm:$0xff] %v14053_v44  ;;  %v2860_v52 = vsel %vm834_vm0, %v17264_v53, 0.0  ;;  %v3030_v21 = vadd.f32 %v3029_v19, %v3028_v37  ;;  %v6438_v0 = vld [vmem:[%s12240_s28] sm:$0xff]  ;;  %v3202_v16 = vsel %vm834_vm0, %v6439_v38, 0.0  ;;  %v6441_v38 = vld [vmem:[%s12240_s28 + $0x30] sm:$0xff] }
 0x530   : > { %17263 = vst [vmem:[#allocation286_spill] sm:$0xff] %v14065_v60  ;;  %v3201_v17 = vsel %vm834_vm0, %v6438_v0, 0.0  ;;  %v3204_v40 = vsel %vm834_vm0, %v6440_v29, 0.0  ;;  %v14081_v37 = vmul.f32 0.6931472, %v6230_v27  ;;  %v17267_v51 = vld [vmem:[#allocation123_spill] sm:$0xff]  ;;  %v14089_v29 = vadd.f32 %v2482_v55, %v2481_v28 }
 0x531   : > { %v2857_v14 = vadd.f32 %v2856_v2, %v2855_v31  ;;  %v14079_v2 = vmul.f32 %v17266_v48, %v13749_v43  ;;  %v3032_v26 = vadd.f32 %v3031_v32, %v3030_v21  ;;  %v3203_v19 = vadd.f32 %v3202_v16, %v3201_v17  ;;  %v17268_v63 = vld [vmem:[#allocation295_spill] sm:$0xff]  ;;  %v17269_v32 = vld [vmem:[#allocation125_spill] sm:$0xff] }
 0x532   : > { %v2862_v53 = vsel %vm834_vm0, %v17267_v51, 0.0  ;;  %v3035_v0 = vsel %vm834_vm0, %v17268_v63, 0.0  ;;  %v3206_v44 = vsel %vm834_vm0, %v6441_v38, 0.0  ;;  %v2864_v27 = vsel %vm834_vm0, %v17269_v32, 0.0  ;;  %v6442_v17 = vld [vmem:[%s12240_s28 + $0x40] sm:$0xff]  ;;  %v17271_v51 = vld [vmem:[#allocation257_spill] sm:$0xff] }
 0x533   : > { %v2859_v31 = vadd.f32 %v2858_v58, %v2857_v14  ;;  %v3034_v48 = vadd.f32 %v3033_v33, %v3032_v26  ;;  %v3205_v60 = vadd.f32 %v3204_v40, %v3203_v19  ;;  %v2660_v58 = vadd.f32 %v2659_v42, %v2658_v49  ;;  %v17270_v14 = vld [vmem:[#allocation296_spill] sm:$0xff]  ;;  %v6443_v19 = vld [vmem:[%s12240_s28 + $0x50] sm:$0xff] }
 0x534   : > { %v3037_v21 = vsel %vm834_vm0, %v17270_v14, 0.0  ;;  %v3208_v16 = vsel %vm834_vm0, %v6442_v17, 0.0  ;;  %v14099_v63 = vmul.f32 %v17271_v51, %v13815_v3  ;;  %v17272_v33 = vld [vmem:[#allocation68_spill] sm:$0xff]  ;;  %v3210_v38 = vsel %vm834_vm0, %v6443_v19, 0.0  ;;  %v17275_v3 = vld [vmem:[#allocation258_spill] sm:$0xff]  ;;  %v6444_v51 = vld [vmem:[%s12240_s28 + $0x60] sm:$0xff] }
 0x535   : > { %v2861_v43 = vadd.f32 %v2860_v52, %v2859_v31  ;;  %v3036_v28 = vadd.f32 %v3035_v0, %v3034_v48  ;;  %v3207_v52 = vadd.f32 %v3206_v44, %v3205_v60  ;;  %v14103_v42 = vmul.f32 %v17272_v33, %v13801_v36  ;;  %v17273_v49 = vld [vmem:[#allocation128_spill] sm:$0xff]  ;;  %v17274_v31 = vld [vmem:[#allocation297_spill] sm:$0xff]  ;;  %v17278_v14 = vld [vmem:[#allocation298_spill] sm:$0xff] }
 0x536   : > { %v2866_v40 = vsel %vm834_vm0, %v17273_v49, 0.0  ;;  %v3039_v26 = vsel %vm834_vm0, %v17274_v31, 0.0  ;;  %v14113_v32 = vmul.f32 %v17275_v3, %v13867_v7  ;;  %v17276_v36 = vld [vmem:[#allocation69_spill] sm:$0xff]  ;;  %v3041_v17 = vsel %vm834_vm0, %v17278_v14, 0.0  ;;  %v17279_v7 = vld [vmem:[#allocation259_spill] sm:$0xff] }
 0x537   : > { %v2863_v55 = vadd.f32 %v2862_v53, %v2861_v43  ;;  %v3038_v44 = vadd.f32 %v3037_v21, %v3036_v28  ;;  %v3209_v60 = vadd.f32 %v3208_v16, %v3207_v52  ;;  %v14117_v0 = vmul.f32 %v17276_v36, %v13853_v34  ;;  %v17277_v43 = vld [vmem:[#allocation130_spill] sm:$0xff]  ;;  %v17281_v52 = vld [vmem:[#allocation299_spill] sm:$0xff]  ;;  %v6445_v19 = vld [vmem:[%s12240_s28 + $0x70] sm:$0xff] }
 0x538   : > { %v2868_v48 = vsel %vm834_vm0, %v17277_v43, 0.0  ;;  %v3212_v33 = vsel %vm834_vm0, %v6444_v51, 0.0  ;;  %v14127_v49 = vmul.f32 %v17279_v7, %v13919_v45  ;;  %v14130_v34 = vadd.f32 %v14019_v50, %v2660_v58  ;;  %v17282_v36 = vld [vmem:[#allocation70_spill] sm:$0xff]  ;;  %v17283_v50 = vld [vmem:[#allocation260_spill] sm:$0xff]  ;;  %v6446_v14 = vld [vmem:[%s12240_s28 + $0x80] sm:$0xff] }
 0x539   : > { %v2865_v53 = vadd.f32 %v2864_v27, %v2863_v55  ;;  %v3040_v21 = vadd.f32 %v3039_v26, %v3038_v44  ;;  %v3211_v16 = vadd.f32 %v3210_v38, %v3209_v60  ;;  %v17280_v55 = vld [vmem:[#allocation132_spill] sm:$0xff]  ;;  %v3043_v31 = vsel %vm834_vm0, %v17281_v52, 0.0 }
 0x53a   : > { %v2870_v28 = vsel %vm834_vm0, %v17280_v55, 0.0  ;;  %v3214_v3 = vsel %vm834_vm0, %v6445_v19, 0.0  ;;  %v14140_v45 = vmul.f32 %v17282_v36, %v13905_v57  ;;  %v14144_v58 = vmul.f32 %v17283_v50, %v13956_v5  ;;  %v17285_v60 = vld [vmem:[#allocation300_spill] sm:$0xff]  ;;  %v17287_v5 = vld [vmem:[#allocation261_spill] sm:$0xff] }
 0x53b   : > { %v2867_v27 = vadd.f32 %v2866_v40, %v2865_v53  ;;  %v3042_v26 = vadd.f32 %v3041_v17, %v3040_v21  ;;  %v3213_v38 = vadd.f32 %v3212_v33, %v3211_v16  ;;  %v17284_v53 = vld [vmem:[#allocation134_spill] sm:$0xff]  ;;  %v3045_v43 = vsel %vm834_vm0, %v17285_v60, 0.0  ;;  %v17286_v57 = vld [vmem:[#allocation96_spill] sm:$0xff]  ;;  %v17289_v55 = vld [vmem:[#allocation301_spill] sm:$0xff] }
 0x53c   : > { %v2872_v44 = vsel %vm834_vm0, %v17284_v53, 0.0  ;;  %v3216_v51 = vsel %vm834_vm0, %v6446_v14, 0.0  ;;  %v14154_v7 = vmul.f32 %v17286_v57, %v13938_v46  ;;  %v17288_v21 = vld [vmem:[#allocation136_spill] sm:$0xff]  ;;  %v3047_v52 = vsel %vm834_vm0, %v17289_v55, 0.0  ;;  %v6447_v19 = vld [vmem:[%s12240_s28 + $0x90] sm:$0xff]  ;;  %v17293_v53 = vld [vmem:[#allocation302_spill] sm:$0xff] }
 0x53d   : > { %v2869_v40 = vadd.f32 %v2868_v48, %v2867_v27  ;;  %v3044_v17 = vadd.f32 %v3043_v31, %v3042_v26  ;;  %v3215_v33 = vadd.f32 %v3214_v3, %v3213_v38  ;;  %v14158_v27 = vmul.f32 %v17287_v5, %v13975_v41  ;;  %v17290_v46 = vld [vmem:[#allocation97_spill] sm:$0xff]  ;;  %v17291_v3 = vld [vmem:[#allocation262_spill] sm:$0xff]  ;;  %v17292_v26 = vld [vmem:[#allocation139_spill] sm:$0xff] }
 0x53e   : > { %v2874_v16 = vsel %vm834_vm0, %v17288_v21, 0.0  ;;  %v3218_v36 = vsel %vm834_vm0, %v6447_v19, 0.0  ;;  %v14168_v50 = vmul.f32 %v17290_v46, %v13941_v10  ;;  %v2876_v38 = vsel %vm834_vm0, %v17292_v26, 0.0  ;;  %v6448_v14 = vld [vmem:[%s12240_s28 + $0xa0] sm:$0xff]  ;;  %v6450_v21 = vld [vmem:[%s12240_s28 + $0xb0] sm:$0xff]  ;;  %v6451_v19 = vld [vmem:[%s12240_s28 + $0x18] sm:$0xff] }
 0x53f   : > { %v2871_v48 = vadd.f32 %v2870_v28, %v2869_v40  ;;  %v3046_v31 = vadd.f32 %v3045_v43, %v3044_v17  ;;  %v3217_v41 = vadd.f32 %v3216_v51, %v3215_v33  ;;  %v14172_v40 = vmul.f32 %v17291_v3, %v13978_v11  ;;  %v6449_v43 = vld [vmem:[%s12240_s28 + $0x8] sm:$0xff]  ;;  %v17295_v17 = vld [vmem:[#allocation303_spill] sm:$0xff]  ;;  %v17297_v26 = vld [vmem:[#allocation305_spill] sm:$0xff] }
 0x540   : > { %v3049_v60 = vsel %vm834_vm0, %v17293_v53, 0.0  ;;  %v3220_v10 = vsel %vm834_vm0, %v6448_v14, 0.0  ;;  %v3380_v51 = vsel %vm834_vm0, %v6449_v43, 0.0  ;;  %v3051_v33 = vsel %vm834_vm0, %v17295_v17, 0.0  ;;  %v6453_v14 = vld [vmem:[%s12240_s28 + $0xc0] sm:$0xff] }
 0x541   : > { %v2873_v28 = vadd.f32 %v2872_v44, %v2871_v48  ;;  %v3048_v5 = vadd.f32 %v3047_v52, %v3046_v31  ;;  %v3219_v44 = vadd.f32 %v3218_v36, %v3217_v41  ;;  %v17294_v48 = vld [vmem:[#allocation141_spill] sm:$0xff]  ;;  %v3222_v55 = vsel %vm834_vm0, %v6450_v21, 0.0  ;;  %v17296_v41 = vld [vmem:[#allocation220_spill] sm:$0xff] }
 0x542   : > { %v2878_v11 = vsel %vm834_vm0, %v17294_v48, 0.0  ;;  %v3381_v46 = vsel %vm834_vm0, %v6451_v19, 0.0  ;;  %v2880_v3 = vsel %vm834_vm0, %v17296_v41, 0.0  ;;  %v3053_v53 = vsel %vm834_vm0, %v17297_v26, 0.0 }
 0x543   : > { %v2875_v57 = vadd.f32 %v2874_v16, %v2873_v28  ;;  %v3050_v52 = vadd.f32 %v3049_v60, %v3048_v5  ;;  %v3221_v36 = vadd.f32 %v3220_v10, %v3219_v44  ;;  %v6452_v28 = vld [vmem:[%s12240_s28 + $0x28] sm:$0xff]  ;;  %v3224_v43 = vsel %vm834_vm0, %v6453_v14, 0.0  ;;  %v6454_v60 = vld [vmem:[%s12240_s28 + $0x38] sm:$0xff]  ;;  %v17299_v44 = vld [vmem:[#allocation309_spill] sm:$0xff] }
 0x544   : > { %v3383_v31 = vsel %vm834_vm0, %v6452_v28, 0.0  ;;  %v3382_v48 = vadd.f32 %v3381_v46, %v3380_v51  ;;  %v3385_v10 = vsel %vm834_vm0, %v6454_v60, 0.0  ;;  %v3055_v19 = vsel %vm834_vm0, %v17299_v44, 0.0  ;;  %v6455_v28 = vld [vmem:[%s12240_s28 + $0xd0] sm:$0xff]  ;;  %v17300_v46 = vld [vmem:[#allocation222_spill] sm:$0xff]  ;;  %v6457_v60 = vld [vmem:[%s12240_s28 + $0xe0] sm:$0xff] }
 0x545   : > { %v2877_v16 = vadd.f32 %v2876_v38, %v2875_v57  ;;  %v3052_v21 = vadd.f32 %v3051_v33, %v3050_v52  ;;  %v3223_v38 = vadd.f32 %v3222_v55, %v3221_v36  ;;  %v17298_v57 = vld [vmem:[#allocation221_spill] sm:$0xff]  ;;  %v3226_v41 = vsel %vm834_vm0, %v6455_v28, 0.0  ;;  %v6456_v33 = vld [vmem:[%s12240_s28 + $0x48] sm:$0xff]  ;;  %v17301_v52 = vld [vmem:[#allocation311_spill] sm:$0xff] }
 0x546   : > { %v2882_v5 = vsel %vm834_vm0, %v17298_v57, 0.0  ;;  %v3384_v26 = vadd.f32 %v3383_v31, %v3382_v48  ;;  %v3387_v55 = vsel %vm834_vm0, %v6456_v33, 0.0  ;;  %v3057_v36 = vsel %vm834_vm0, %v17301_v52, 0.0  ;;  %v17302_v48 = vld [vmem:[#allocation263_spill] sm:$0xff]  ;;  %v6459_v33 = vld [vmem:[%s12240_s28 + $0xf0] sm:$0xff] }
 0x547   : > { %v2879_v17 = vadd.f32 %v2878_v11, %v2877_v16  ;;  %v3054_v51 = vadd.f32 %v3053_v53, %v3052_v21  ;;  %v3225_v11 = vadd.f32 %v3224_v43, %v3223_v38  ;;  %v2884_v16 = vsel %vm834_vm0, %v17300_v46, 0.0  ;;  %v6458_v53 = vld [vmem:[%s12240_s28 + $0x58] sm:$0xff]  ;;  %v17303_v21 = vld [vmem:[#allocation143_spill] sm:$0xff] }
 0x548   : > { %v3228_v57 = vsel %vm834_vm0, %v6457_v60, 0.0  ;;  %v3386_v44 = vadd.f32 %v3385_v10, %v3384_v26  ;;  %v3389_v43 = vsel %vm834_vm0, %v6458_v53, 0.0  ;;  %v3059_v38 = vsel %vm834_vm0, %v17303_v21, 0.0  ;;  %v17304_v26 = vld [vmem:[#allocation151_spill] sm:$0xff] }
 0x549   : > { %v2881_v14 = vadd.f32 %v2880_v3, %v2879_v17  ;;  %v3056_v31 = vadd.f32 %v3055_v19, %v3054_v51  ;;  %v3227_v3 = vadd.f32 %v3226_v41, %v3225_v11  ;;  %v2886_v17 = vsel %vm834_vm0, %v17302_v48, 0.0  ;;  %v6460_v19 = vld [vmem:[%s12240_s28 + $0x68] sm:$0xff]  ;;  %v17305_v51 = vld [vmem:[#allocation145_spill] sm:$0xff]  ;;  %v6461_v53 = vld [vmem:[%s12240_s28 + $0x100] sm:$0xff] }
 0x54a   : > { %v3230_v46 = vsel %vm834_vm0, %v6459_v33, 0.0  ;;  %v3388_v52 = vadd.f32 %v3387_v55, %v3386_v44  ;;  %v3391_v41 = vsel %vm834_vm0, %v6460_v19, 0.0  ;;  %v3061_v11 = vsel %vm834_vm0, %v17305_v51, 0.0  ;;  %v17306_v44 = vld [vmem:[#allocation153_spill] sm:$0xff] }
 0x54b   : > { %v2883_v28 = vadd.f32 %v2882_v5, %v2881_v14  ;;  %v3058_v10 = vadd.f32 %v3057_v36, %v3056_v31  ;;  %v3229_v5 = vadd.f32 %v3228_v57, %v3227_v3  ;;  %v2888_v14 = vsel %vm834_vm0, %v17304_v26, 0.0  ;;  %v6462_v36 = vld [vmem:[%s12240_s28 + $0x78] sm:$0xff]  ;;  %v17307_v31 = vld [vmem:[#allocation147_spill] sm:$0xff]  ;;  %v6463_v19 = vld [vmem:[%s12240_s28 + $0x110] sm:$0xff] }
 0x54c   : > { %v3232_v48 = vsel %vm834_vm0, %v6461_v53, 0.0  ;;  %v3390_v21 = vadd.f32 %v3389_v43, %v3388_v52  ;;  %v3393_v57 = vsel %vm834_vm0, %v6462_v36, 0.0  ;;  %v3063_v3 = vsel %vm834_vm0, %v17307_v31, 0.0  ;;  %v17308_v52 = vld [vmem:[#allocation155_spill] sm:$0xff] }
 0x54d   : > { %v2885_v60 = vadd.f32 %v2884_v16, %v2883_v28  ;;  %v3060_v55 = vadd.f32 %v3059_v38, %v3058_v10  ;;  %v3231_v16 = vadd.f32 %v3230_v46, %v3229_v5  ;;  %v2890_v28 = vsel %vm834_vm0, %v17306_v44, 0.0  ;;  %v6464_v38 = vld [vmem:[%s12240_s28 + $0x88] sm:$0xff]  ;;  %v17309_v10 = vld [vmem:[#allocation149_spill] sm:$0xff]  ;;  %v6465_v36 = vld [vmem:[%s12240_s28 + $0x120] sm:$0xff] }
 0x54e   : > { %v3234_v26 = vsel %vm834_vm0, %v6463_v19, 0.0  ;;  %v3392_v51 = vadd.f32 %v3391_v41, %v3390_v21  ;;  %v3395_v46 = vsel %vm834_vm0, %v6464_v38, 0.0  ;;  %v3065_v5 = vsel %vm834_vm0, %v17309_v10, 0.0  ;;  %v17310_v21 = vld [vmem:[#allocation157_spill] sm:$0xff] }
 0x54f   : > { %v2887_v33 = vadd.f32 %v2886_v17, %v2885_v60  ;;  %v3062_v43 = vadd.f32 %v3061_v11, %v3060_v55  ;;  %v3233_v17 = vadd.f32 %v3232_v48, %v3231_v16  ;;  %v2892_v60 = vsel %vm834_vm0, %v17308_v52, 0.0  ;;  %v6466_v11 = vld [vmem:[%s12240_s28 + $0x98] sm:$0xff]  ;;  %v17311_v55 = vld [vmem:[#allocation319_spill] sm:$0xff]  ;;  %v6467_v38 = vld [vmem:[%s12240_s28 + $0x130] sm:$0xff] }
 0x550   : > { %v3236_v44 = vsel %vm834_vm0, %v6465_v36, 0.0  ;;  %v3394_v31 = vadd.f32 %v3393_v57, %v3392_v51  ;;  %v3397_v48 = vsel %vm834_vm0, %v6466_v11, 0.0  ;;  %v3067_v16 = vsel %vm834_vm0, %v17311_v55, 0.0  ;;  %v17312_v51 = vld [vmem:[#allocation159_spill] sm:$0xff] }
 0x551   : > { %v2889_v53 = vadd.f32 %v2888_v14, %v2887_v33  ;;  %v3064_v41 = vadd.f32 %v3063_v3, %v3062_v43  ;;  %v3235_v14 = vadd.f32 %v3234_v26, %v3233_v17  ;;  %v2894_v33 = vsel %vm834_vm0, %v17310_v21, 0.0  ;;  %v6468_v3 = vld [vmem:[%s12240_s28 + $0xa8] sm:$0xff]  ;;  %v17313_v43 = vld [vmem:[#allocation321_spill] sm:$0xff]  ;;  %v6469_v11 = vld [vmem:[%s12240_s28 + $0x140] sm:$0xff] }
 0x552   : > { %v3238_v52 = vsel %vm834_vm0, %v6467_v38, 0.0  ;;  %v3396_v10 = vadd.f32 %v3395_v46, %v3394_v31  ;;  %v3399_v26 = vsel %vm834_vm0, %v6468_v3, 0.0  ;;  %v3069_v17 = vsel %vm834_vm0, %v17313_v43, 0.0  ;;  %v17314_v31 = vld [vmem:[#allocation161_spill] sm:$0xff] }
 0x553   : > { %v2891_v19 = vadd.f32 %v2890_v28, %v2889_v53  ;;  %v3066_v57 = vadd.f32 %v3065_v5, %v3064_v41  ;;  %v3237_v28 = vadd.f32 %v3236_v44, %v3235_v14  ;;  %v2896_v53 = vsel %vm834_vm0, %v17312_v51, 0.0  ;;  %v6470_v5 = vld [vmem:[%s12240_s28 + $0xb8] sm:$0xff]  ;;  %v17315_v41 = vld [vmem:[#allocation323_spill] sm:$0xff]  ;;  %v6471_v3 = vld [vmem:[%s12240_s28 + $0x150] sm:$0xff] }
 0x554   : > { %v3240_v21 = vsel %vm834_vm0, %v6469_v11, 0.0  ;;  %v3398_v55 = vadd.f32 %v3397_v48, %v3396_v10  ;;  %v3401_v44 = vsel %vm834_vm0, %v6470_v5, 0.0  ;;  %v3071_v14 = vsel %vm834_vm0, %v17315_v41, 0.0  ;;  %v17316_v10 = vld [vmem:[#allocation85_spill] sm:$0xff]  ;;  %v6473_v5 = vld [vmem:[%s12240_s28 + $0x160] sm:$0xff] }
 0x555   : > { %v2893_v36 = vadd.f32 %v2892_v60, %v2891_v19  ;;  %v3068_v46 = vadd.f32 %v3067_v16, %v3066_v57  ;;  %v3239_v60 = vadd.f32 %v3238_v52, %v3237_v28  ;;  %v2898_v19 = vsel %vm834_vm0, %v17314_v31, 0.0  ;;  %v6472_v16 = vld [vmem:[%s12240_s28 + $0xc8] sm:$0xff]  ;;  %v17317_v57 = vld [vmem:[#allocation325_spill] sm:$0xff] }
 0x556   : > { %v3242_v51 = vsel %vm834_vm0, %v6471_v3, 0.0  ;;  %v3400_v43 = vadd.f32 %v3399_v26, %v3398_v55  ;;  %v3403_v52 = vsel %vm834_vm0, %v6472_v16, 0.0  ;;  %v3073_v28 = vsel %vm834_vm0, %v17317_v57, 0.0  ;;  %v17318_v55 = vld [vmem:[#allocation163_spill] sm:$0xff]  ;;  %v6475_v16 = vld [vmem:[%s12240_s28 + $0x170] sm:$0xff] }
 0x557   : > { %v2895_v38 = vadd.f32 %v2894_v33, %v2893_v36  ;;  %v3070_v48 = vadd.f32 %v3069_v17, %v3068_v46  ;;  %v3241_v33 = vadd.f32 %v3240_v21, %v3239_v60  ;;  %v2900_v36 = vsel %vm834_vm0, %v17316_v10, 0.0  ;;  %v6474_v17 = vld [vmem:[%s12240_s28 + $0xd8] sm:$0xff]  ;;  %v17319_v46 = vld [vmem:[#allocation84_spill] sm:$0xff] }
 0x558   : > { %v3244_v31 = vsel %vm834_vm0, %v6473_v5, 0.0  ;;  %v3402_v41 = vadd.f32 %v3401_v44, %v3400_v43  ;;  %v3405_v21 = vsel %vm834_vm0, %v6474_v17, 0.0  ;;  %v3075_v60 = vsel %vm834_vm0, %v17319_v46, 0.0  ;;  %v17320_v43 = vld [vmem:[#allocation274_spill] sm:$0xff]  ;;  %v6477_v17 = vld [vmem:[%s12240_s28 + $0x180] sm:$0xff] }
 0x559   : > { %v2897_v11 = vadd.f32 %v2896_v53, %v2895_v38  ;;  %v3072_v26 = vadd.f32 %v3071_v14, %v3070_v48  ;;  %v3243_v53 = vadd.f32 %v3242_v51, %v3241_v33  ;;  %v2902_v38 = vsel %vm834_vm0, %v17318_v55, 0.0  ;;  %v6476_v14 = vld [vmem:[%s12240_s28 + $0xe8] sm:$0xff]  ;;  %v17321_v48 = vld [vmem:[#allocation329_spill] sm:$0xff] }
 0x55a   : > { %v3246_v10 = vsel %vm834_vm0, %v6475_v16, 0.0  ;;  %v3404_v57 = vadd.f32 %v3403_v52, %v3402_v41  ;;  %v3407_v51 = vsel %vm834_vm0, %v6476_v14, 0.0  ;;  %v3077_v33 = vsel %vm834_vm0, %v17321_v48, 0.0  ;;  %v17322_v41 = vld [vmem:[#allocation331_spill] sm:$0xff]  ;;  %v6479_v14 = vld [vmem:[%s12240_s28 + $0x190] sm:$0xff] }
 0x55b   : > { %v2899_v3 = vadd.f32 %v2898_v19, %v2897_v11  ;;  %v3074_v44 = vadd.f32 %v3073_v28, %v3072_v26  ;;  %v3245_v19 = vadd.f32 %v3244_v31, %v3243_v53  ;;  %v2904_v11 = vsel %vm834_vm0, %v17320_v43, 0.0  ;;  %v6478_v28 = vld [vmem:[%s12240_s28 + $0xf8] sm:$0xff]  ;;  %v17323_v26 = vld [vmem:[#allocation272_spill] sm:$0xff] }
 0x55c   : > { %v3248_v55 = vsel %vm834_vm0, %v6477_v17, 0.0  ;;  %v3406_v46 = vadd.f32 %v3405_v21, %v3404_v57  ;;  %v3409_v31 = vsel %vm834_vm0, %v6478_v28, 0.0  ;;  %v3079_v53 = vsel %vm834_vm0, %v17323_v26, 0.0  ;;  %v17324_v57 = vld [vmem:[#allocation276_spill] sm:$0xff]  ;;  %v6481_v28 = vld [vmem:[%s12240_s28 + $0x1a0] sm:$0xff] }
 0x55d   : > { %v2901_v5 = vadd.f32 %v2900_v36, %v2899_v3  ;;  %v3076_v52 = vadd.f32 %v3075_v60, %v3074_v44  ;;  %v3247_v36 = vadd.f32 %v3246_v10, %v3245_v19  ;;  %v2906_v3 = vsel %vm834_vm0, %v17322_v41, 0.0  ;;  %v6480_v60 = vld [vmem:[%s12240_s28 + $0x108] sm:$0xff]  ;;  %v17325_v44 = vld [vmem:[#allocation86_spill] sm:$0xff] }
 0x55e   : > { %v3250_v43 = vsel %vm834_vm0, %v6479_v14, 0.0  ;;  %v3408_v48 = vadd.f32 %v3407_v51, %v3406_v46  ;;  %v3411_v10 = vsel %vm834_vm0, %v6480_v60, 0.0  ;;  %v3081_v19 = vsel %vm834_vm0, %v17325_v44, 0.0  ;;  %v17326_v46 = vld [vmem:[#allocation88_spill] sm:$0xff]  ;;  %v6483_v60 = vld [vmem:[%s12240_s28 + $0x1b0] sm:$0xff] }
 0x55f   : > { %v2903_v16 = vadd.f32 %v2902_v38, %v2901_v5  ;;  %v3078_v21 = vadd.f32 %v3077_v33, %v3076_v52  ;;  %v3249_v38 = vadd.f32 %v3248_v55, %v3247_v36  ;;  %v2908_v5 = vsel %vm834_vm0, %v17324_v57, 0.0  ;;  %v6482_v33 = vld [vmem:[%s12240_s28 + $0x118] sm:$0xff]  ;;  %v17327_v52 = vld [vmem:[#allocation165_spill] sm:$0xff] }
 0x560   : > { %v3252_v41 = vsel %vm834_vm0, %v6481_v28, 0.0  ;;  %v3410_v26 = vadd.f32 %v3409_v31, %v3408_v48  ;;  %v3413_v55 = vsel %vm834_vm0, %v6482_v33, 0.0  ;;  %v3083_v36 = vsel %vm834_vm0, %v17327_v52, 0.0  ;;  %v17328_v48 = vld [vmem:[#allocation167_spill] sm:$0xff] }
 0x561   : > { %v2905_v17 = vadd.f32 %v2904_v11, %v2903_v16  ;;  %v3080_v51 = vadd.f32 %v3079_v53, %v3078_v21  ;;  %v3251_v11 = vadd.f32 %v3250_v43, %v3249_v38  ;;  %v2910_v16 = vsel %vm834_vm0, %v17326_v46, 0.0  ;;  %v6484_v53 = vld [vmem:[%s12240_s28 + $0x128] sm:$0xff]  ;;  %v17329_v21 = vld [vmem:[#allocation87_spill] sm:$0xff] }
 0x562   : > { %v3254_v57 = vsel %vm834_vm0, %v6483_v60, 0.0  ;;  %v3412_v44 = vadd.f32 %v3411_v10, %v3410_v26  ;;  %v3415_v43 = vsel %vm834_vm0, %v6484_v53, 0.0  ;;  %v3085_v38 = vsel %vm834_vm0, %v17329_v21, 0.0  ;;  %v6485_v33 = vld [vmem:[%s12240_s28 + $0x1c0] sm:$0xff]  ;;  %v17330_v26 = vld [vmem:[#allocation89_spill] sm:$0xff] }
 0x563   : > { %v2907_v14 = vadd.f32 %v2906_v3, %v2905_v17  ;;  %v3082_v31 = vadd.f32 %v3081_v19, %v3080_v51  ;;  %v3253_v3 = vadd.f32 %v3252_v41, %v3251_v11  ;;  %v2912_v17 = vsel %vm834_vm0, %v17328_v48, 0.0  ;;  %v6486_v19 = vld [vmem:[%s12240_s28 + $0x138] sm:$0xff]  ;;  %v6487_v53 = vld [vmem:[%s12240_s28 + $0x1d0] sm:$0xff] }
 0x564   : > { %v3256_v46 = vsel %vm834_vm0, %v6485_v33, 0.0  ;;  %v3414_v52 = vadd.f32 %v3413_v55, %v3412_v44  ;;  %v3417_v41 = vsel %vm834_vm0, %v6486_v19, 0.0  ;;  %v17331_v51 = vld [vmem:[#allocation166_spill] sm:$0xff]  ;;  %v3258_v48 = vsel %vm834_vm0, %v6487_v53, 0.0  ;;  %v17332_v44 = vld [vmem:[#allocation169_spill] sm:$0xff]  ;;  %v6489_v19 = vld [vmem:[%s12240_s28 + $0x1e0] sm:$0xff] }
 0x565   : > { %v2909_v28 = vadd.f32 %v2908_v5, %v2907_v14  ;;  %v3084_v10 = vadd.f32 %v3083_v36, %v3082_v31  ;;  %v3255_v5 = vadd.f32 %v3254_v57, %v3253_v3  ;;  %v2914_v14 = vsel %vm834_vm0, %v17330_v26, 0.0  ;;  %v6488_v36 = vld [vmem:[%s12240_s28 + $0x148] sm:$0xff]  ;;  %v17333_v31 = vld [vmem:[#allocation277_spill] sm:$0xff] }
 0x566   : > { %v3087_v11 = vsel %vm834_vm0, %v17331_v51, 0.0  ;;  %v3416_v21 = vadd.f32 %v3415_v43, %v3414_v52  ;;  %v3419_v57 = vsel %vm834_vm0, %v6488_v36, 0.0  ;;  %v3089_v3 = vsel %vm834_vm0, %v17333_v31, 0.0  ;;  %v17334_v52 = vld [vmem:[#allocation280_spill] sm:$0xff]  ;;  %v6491_v36 = vld [vmem:[%s12240_s28 + $0x1f0] sm:$0xff] }
 0x567   : > { %v2911_v60 = vadd.f32 %v2910_v16, %v2909_v28  ;;  %v3086_v55 = vadd.f32 %v3085_v38, %v3084_v10  ;;  %v3257_v16 = vadd.f32 %v3256_v46, %v3255_v5  ;;  %v2916_v28 = vsel %vm834_vm0, %v17332_v44, 0.0  ;;  %v6490_v38 = vld [vmem:[%s12240_s28 + $0x158] sm:$0xff]  ;;  %v17335_v10 = vld [vmem:[#allocation333_spill] sm:$0xff] }
 0x568   : > { %v3260_v26 = vsel %vm834_vm0, %v6489_v19, 0.0  ;;  %v3418_v51 = vadd.f32 %v3417_v41, %v3416_v21  ;;  %v3421_v46 = vsel %vm834_vm0, %v6490_v38, 0.0  ;;  %v3091_v5 = vsel %vm834_vm0, %v17335_v10, 0.0  ;;  %v17336_v21 = vld [vmem:[#allocation335_spill] sm:$0xff] }
 0x569   : > { %v2913_v33 = vadd.f32 %v2912_v17, %v2911_v60  ;;  %v3088_v43 = vadd.f32 %v3087_v11, %v3086_v55  ;;  %v3259_v17 = vadd.f32 %v3258_v48, %v3257_v16  ;;  %v2918_v60 = vsel %vm834_vm0, %v17334_v52, 0.0  ;;  %v6492_v11 = vld [vmem:[%s12240_s28 + $0x168] sm:$0xff]  ;;  %v17337_v55 = vld [vmem:[#allocation279_spill] sm:$0xff] }
 0x56a   : > { %v3262_v44 = vsel %vm834_vm0, %v6491_v36, 0.0  ;;  %v3420_v31 = vadd.f32 %v3419_v57, %v3418_v51  ;;  %v3423_v48 = vsel %vm834_vm0, %v6492_v11, 0.0  ;;  %v3093_v16 = vsel %vm834_vm0, %v17337_v55, 0.0  ;;  %v6493_v38 = vld [vmem:[%s12240_s28 + $0x200] sm:$0xff]  ;;  %v17338_v51 = vld [vmem:[#allocation281_spill] sm:$0xff] }
 0x56b   : > { %v2915_v53 = vadd.f32 %v2914_v14, %v2913_v33  ;;  %v3090_v41 = vadd.f32 %v3089_v3, %v3088_v43  ;;  %v3261_v14 = vadd.f32 %v3260_v26, %v3259_v17  ;;  %v2920_v33 = vsel %vm834_vm0, %v17336_v21, 0.0  ;;  %v6494_v3 = vld [vmem:[%s12240_s28 + $0x178] sm:$0xff]  ;;  %v6495_v11 = vld [vmem:[%s12240_s28 + $0x210] sm:$0xff] }
 0x56c   : > { %v3264_v52 = vsel %vm834_vm0, %v6493_v38, 0.0  ;;  %v3422_v10 = vadd.f32 %v3421_v46, %v3420_v31  ;;  %v3425_v26 = vsel %vm834_vm0, %v6494_v3, 0.0  ;;  %v17339_v43 = vld [vmem:[#allocation90_spill] sm:$0xff]  ;;  %v3266_v21 = vsel %vm834_vm0, %v6495_v11, 0.0  ;;  %v17340_v31 = vld [vmem:[#allocation336_spill] sm:$0xff]  ;;  %v6497_v3 = vld [vmem:[%s12240_s28 + $0x220] sm:$0xff] }
 0x56d   : > { %v2917_v19 = vadd.f32 %v2916_v28, %v2915_v53  ;;  %v3092_v57 = vadd.f32 %v3091_v5, %v3090_v41  ;;  %v3263_v28 = vadd.f32 %v3262_v44, %v3261_v14  ;;  %v2922_v53 = vsel %vm834_vm0, %v17338_v51, 0.0  ;;  %v6496_v5 = vld [vmem:[%s12240_s28 + $0x188] sm:$0xff]  ;;  %v17341_v41 = vld [vmem:[#allocation170_spill] sm:$0xff] }
 0x56e   : > { %v3095_v17 = vsel %vm834_vm0, %v17339_v43, 0.0  ;;  %v3424_v55 = vadd.f32 %v3423_v48, %v3422_v10  ;;  %v3427_v44 = vsel %vm834_vm0, %v6496_v5, 0.0  ;;  %v3097_v14 = vsel %vm834_vm0, %v17341_v41, 0.0  ;;  %v17342_v10 = vld [vmem:[#allocation282_spill] sm:$0xff]  ;;  %v6499_v5 = vld [vmem:[%s12240_s28 + $0x230] sm:$0xff] }
 0x56f   : > { %v2919_v36 = vadd.f32 %v2918_v60, %v2917_v19  ;;  %v3094_v46 = vadd.f32 %v3093_v16, %v3092_v57  ;;  %v3265_v60 = vadd.f32 %v3264_v52, %v3263_v28  ;;  %v2924_v19 = vsel %vm834_vm0, %v17340_v31, 0.0  ;;  %v6498_v16 = vld [vmem:[%s12240_s28 + $0x198] sm:$0xff]  ;;  %v17343_v57 = vld [vmem:[#allocation91_spill] sm:$0xff] }
 0x570   : > { %v3268_v51 = vsel %vm834_vm0, %v6497_v3, 0.0  ;;  %v3426_v43 = vadd.f32 %v3425_v26, %v3424_v55  ;;  %v3429_v52 = vsel %vm834_vm0, %v6498_v16, 0.0  ;;  %v3099_v28 = vsel %vm834_vm0, %v17343_v57, 0.0  ;;  %v17344_v55 = vld [vmem:[#allocation337_spill] sm:$0xff]  ;;  %v6501_v16 = vld [vmem:[%s12240_s28 + $0x240] sm:$0xff] }
 0x571   : > { %v2921_v38 = vadd.f32 %v2920_v33, %v2919_v36  ;;  %v3096_v48 = vadd.f32 %v3095_v17, %v3094_v46  ;;  %v3267_v33 = vadd.f32 %v3266_v21, %v3265_v60  ;;  %v2926_v36 = vsel %vm834_vm0, %v17342_v10, 0.0  ;;  %v6500_v17 = vld [vmem:[%s12240_s28 + $0x1a8] sm:$0xff] }
 0x572   : > { %v3270_v31 = vsel %vm834_vm0, %v6499_v5, 0.0  ;;  %v3428_v41 = vadd.f32 %v3427_v44, %v3426_v43  ;;  %v3431_v21 = vsel %vm834_vm0, %v6500_v17, 0.0  ;;  %v17345_v46 = vld [vmem:[#allocation172_spill] sm:$0xff]  ;;  %v3272_v10 = vsel %vm834_vm0, %v6501_v16, 0.0  ;;  %v6503_v17 = vld [vmem:[%s12240_s28 + $0x250] sm:$0xff] }
 0x573   : > { %v2923_v11 = vadd.f32 %v2922_v53, %v2921_v38  ;;  %v3098_v26 = vadd.f32 %v3097_v14, %v3096_v48  ;;  %v3269_v53 = vadd.f32 %v3268_v51, %v3267_v33  ;;  %v2928_v38 = vsel %vm834_vm0, %v17344_v55, 0.0  ;;  %v6502_v14 = vld [vmem:[%s12240_s28 + $0x1b8] sm:$0xff]  ;;  %v17346_v43 = vld [vmem:[#allocation4_spill] sm:$0xff]  ;;  %v17347_v48 = vld [vmem:[#allocation3_spill] sm:$0xff] }
 0x574   : > { %v3101_v60 = vsel %vm834_vm0, %v17345_v46, 0.0  ;;  %v3430_v57 = vadd.f32 %v3429_v52, %v3428_v41  ;;  %v3433_v51 = vsel %vm834_vm0, %v6502_v14, 0.0  ;;  %v3103_v33 = vsel %vm834_vm0, %v17347_v48, 0.0  ;;  %v17348_v41 = vld [vmem:[#allocation71_spill] sm:$0xff] }
 0x575   : > { %v2925_v3 = vadd.f32 %v2924_v19, %v2923_v11  ;;  %v3100_v44 = vadd.f32 %v3099_v28, %v3098_v26  ;;  %v3271_v19 = vadd.f32 %v3270_v31, %v3269_v53  ;;  %v2930_v11 = vsel %vm834_vm0, %v17346_v43, 0.0  ;;  %v6504_v28 = vld [vmem:[%s12240_s28 + $0x1c8] sm:$0xff]  ;;  %v17349_v26 = vld [vmem:[#allocation174_spill] sm:$0xff]  ;;  %v6505_v14 = vld [vmem:[%s12240_s28 + $0x260] sm:$0xff] }
 0x576   : > { %v3274_v55 = vsel %vm834_vm0, %v6503_v17, 0.0  ;;  %v3432_v46 = vadd.f32 %v3431_v21, %v3430_v57  ;;  %v3435_v31 = vsel %vm834_vm0, %v6504_v28, 0.0  ;;  %v3105_v53 = vsel %vm834_vm0, %v17349_v26, 0.0  ;;  %v17350_v57 = vld [vmem:[#allocation338_spill] sm:$0xff]  ;;  %v6507_v28 = vld [vmem:[%s12240_s28 + $0x270] sm:$0xff] }
 0x577   : > { %v2927_v5 = vadd.f32 %v2926_v36, %v2925_v3  ;;  %v3102_v52 = vadd.f32 %v3101_v60, %v3100_v44  ;;  %v3273_v36 = vadd.f32 %v3272_v10, %v3271_v19  ;;  %v2932_v3 = vsel %vm834_vm0, %v17348_v41, 0.0  ;;  %v6506_v60 = vld [vmem:[%s12240_s28 + $0x1d8] sm:$0xff] }
 0x578   : > { %v3276_v43 = vsel %vm834_vm0, %v6505_v14, 0.0  ;;  %v3434_v48 = vadd.f32 %v3433_v51, %v3432_v46  ;;  %v3437_v10 = vsel %vm834_vm0, %v6506_v60, 0.0  ;;  %v17351_v44 = vld [vmem:[#allocation218_spill] sm:$0xff]  ;;  %v3278_v41 = vsel %vm834_vm0, %v6507_v28, 0.0  ;;  %v17352_v46 = vld [vmem:[#allocation5_spill] sm:$0xff]  ;;  %v6509_v60 = vld [vmem:[%s12240_s28 + $0x280] sm:$0xff] }
 0x579   : > { %v2929_v16 = vadd.f32 %v2928_v38, %v2927_v5  ;;  %v3104_v21 = vadd.f32 %v3103_v33, %v3102_v52  ;;  %v3275_v38 = vadd.f32 %v3274_v55, %v3273_v36  ;;  %v2934_v5 = vsel %vm834_vm0, %v17350_v57, 0.0  ;;  %v6508_v33 = vld [vmem:[%s12240_s28 + $0x1e8] sm:$0xff]  ;;  %v17353_v52 = vld [vmem:[#allocation219_spill] sm:$0xff] }
 0x57a   : > { %v3107_v19 = vsel %vm834_vm0, %v17351_v44, 0.0  ;;  %v3436_v26 = vadd.f32 %v3435_v31, %v3434_v48  ;;  %v3439_v55 = vsel %vm834_vm0, %v6508_v33, 0.0  ;;  %v3109_v36 = vsel %vm834_vm0, %v17353_v52, 0.0  ;;  %v17354_v48 = vld [vmem:[#allocation339_spill] sm:$0xff]  ;;  %v6511_v33 = vld [vmem:[%s12240_s28 + $0x290] sm:$0xff] }
 0x57b   : > { %v2931_v17 = vadd.f32 %v2930_v11, %v2929_v16  ;;  %v3106_v51 = vadd.f32 %v3105_v53, %v3104_v21  ;;  %v3277_v11 = vadd.f32 %v3276_v43, %v3275_v38  ;;  %v2936_v16 = vsel %vm834_vm0, %v17352_v46, 0.0  ;;  %v6510_v53 = vld [vmem:[%s12240_s28 + $0x1f8] sm:$0xff]  ;;  %v17355_v21 = vld [vmem:[#allocation176_spill] sm:$0xff] }
 0x57c   : > { %v3280_v57 = vsel %vm834_vm0, %v6509_v60, 0.0  ;;  %v3438_v44 = vadd.f32 %v3437_v10, %v3436_v26  ;;  %v3441_v43 = vsel %vm834_vm0, %v6510_v53, 0.0  ;;  %v3111_v38 = vsel %vm834_vm0, %v17355_v21, 0.0  ;;  %v17356_v26 = vld [vmem:[#allocation73_spill] sm:$0xff]  ;;  %v6513_v53 = vld [vmem:[%s12240_s28 + $0x2a0] sm:$0xff] }
 0x57d   : > { %v2933_v14 = vadd.f32 %v2932_v3, %v2931_v17  ;;  %v3108_v31 = vadd.f32 %v3107_v19, %v3106_v51  ;;  %v3279_v3 = vadd.f32 %v3278_v41, %v3277_v11  ;;  %v2938_v17 = vsel %vm834_vm0, %v17354_v48, 0.0  ;;  %v6512_v19 = vld [vmem:[%s12240_s28 + $0x208] sm:$0xff]  ;;  %v17357_v51 = vld [vmem:[#allocation98_spill] sm:$0xff] }
 0x57e   : > { %v3282_v46 = vsel %vm834_vm0, %v6511_v33, 0.0  ;;  %v3440_v52 = vadd.f32 %v3439_v55, %v3438_v44  ;;  %v3443_v41 = vsel %vm834_vm0, %v6512_v19, 0.0  ;;  %v3113_v11 = vsel %vm834_vm0, %v17357_v51, 0.0  ;;  %v17358_v44 = vld [vmem:[#allocation341_spill] sm:$0xff] }
 0x57f   : > { %v2935_v28 = vadd.f32 %v2934_v5, %v2933_v14  ;;  %v3110_v10 = vadd.f32 %v3109_v36, %v3108_v31  ;;  %v3281_v5 = vadd.f32 %v3280_v57, %v3279_v3  ;;  %v2940_v14 = vsel %vm834_vm0, %v17356_v26, 0.0  ;;  %v6514_v36 = vld [vmem:[%s12240_s28 + $0x218] sm:$0xff]  ;;  %v17359_v31 = vld [vmem:[#allocation268_spill] sm:$0xff]  ;;  %v6515_v19 = vld [vmem:[%s12240_s28 + $0x2b0] sm:$0xff] }
 0x580   : > { %v3284_v48 = vsel %vm834_vm0, %v6513_v53, 0.0  ;;  %v3442_v21 = vadd.f32 %v3441_v43, %v3440_v52  ;;  %v3445_v57 = vsel %vm834_vm0, %v6514_v36, 0.0  ;;  %v3115_v3 = vsel %vm834_vm0, %v17359_v31, 0.0  ;;  %v17360_v52 = vld [vmem:[#allocation180_spill] sm:$0xff]  ;;  %v6517_v36 = vld [vmem:[%s12240_s28 + $0x2c0] sm:$0xff] }
 0x581   : > { %v2937_v60 = vadd.f32 %v2936_v16, %v2935_v28  ;;  %v3112_v55 = vadd.f32 %v3111_v38, %v3110_v10  ;;  %v3283_v16 = vadd.f32 %v3282_v46, %v3281_v5  ;;  %v2942_v28 = vsel %vm834_vm0, %v17358_v44, 0.0  ;;  %v6516_v38 = vld [vmem:[%s12240_s28 + $0x228] sm:$0xff]  ;;  %v17361_v10 = vld [vmem:[#allocation99_spill] sm:$0xff] }
 0x582   : > { %v3286_v26 = vsel %vm834_vm0, %v6515_v19, 0.0  ;;  %v3444_v51 = vadd.f32 %v3443_v41, %v3442_v21  ;;  %v3447_v46 = vsel %vm834_vm0, %v6516_v38, 0.0  ;;  %v3117_v5 = vsel %vm834_vm0, %v17361_v10, 0.0  ;;  %v17362_v21 = vld [vmem:[#allocation8_spill] sm:$0xff]  ;;  %v6519_v38 = vld [vmem:[%s12240_s28 + $0x2d0] sm:$0xff] }
 0x583   : > { %v2939_v33 = vadd.f32 %v2938_v17, %v2937_v60  ;;  %v3114_v43 = vadd.f32 %v3113_v11, %v3112_v55  ;;  %v3285_v17 = vadd.f32 %v3284_v48, %v3283_v16  ;;  %v2944_v60 = vsel %vm834_vm0, %v17360_v52, 0.0  ;;  %v6518_v11 = vld [vmem:[%s12240_s28 + $0x238] sm:$0xff]  ;;  %v17363_v55 = vld [vmem:[#allocation179_spill] sm:$0xff] }
 0x584   : > { %v3288_v44 = vsel %vm834_vm0, %v6517_v36, 0.0  ;;  %v3446_v31 = vadd.f32 %v3445_v57, %v3444_v51  ;;  %v3449_v48 = vsel %vm834_vm0, %v6518_v11, 0.0  ;;  %v3119_v16 = vsel %vm834_vm0, %v17363_v55, 0.0  ;;  %v17364_v51 = vld [vmem:[#allocation76_spill] sm:$0xff]  ;;  %v6521_v11 = vld [vmem:[%s12240_s28 + $0x2e0] sm:$0xff] }
 0x585   : > { %v2941_v53 = vadd.f32 %v2940_v14, %v2939_v33  ;;  %v3116_v41 = vadd.f32 %v3115_v3, %v3114_v43  ;;  %v3287_v14 = vadd.f32 %v3286_v26, %v3285_v17  ;;  %v2946_v33 = vsel %vm834_vm0, %v17362_v21, 0.0  ;;  %v6520_v3 = vld [vmem:[%s12240_s28 + $0x248] sm:$0xff] }
 0x586   : > { %v3290_v52 = vsel %vm834_vm0, %v6519_v38, 0.0  ;;  %v3448_v10 = vadd.f32 %v3447_v46, %v3446_v31  ;;  %v3451_v26 = vsel %vm834_vm0, %v6520_v3, 0.0  ;;  %v17365_v43 = vld [vmem:[#allocation100_spill] sm:$0xff]  ;;  %v3292_v21 = vsel %vm834_vm0, %v6521_v11, 0.0  ;;  %v6523_v3 = vld [vmem:[%s12240_s28 + $0x2f0] sm:$0xff] }
 0x587   : > { %v2943_v19 = vadd.f32 %v2942_v28, %v2941_v53  ;;  %v3118_v57 = vadd.f32 %v3117_v5, %v3116_v41  ;;  %v3289_v28 = vadd.f32 %v3288_v44, %v3287_v14  ;;  %v2948_v53 = vsel %vm834_vm0, %v17364_v51, 0.0  ;;  %v6522_v5 = vld [vmem:[%s12240_s28 + $0x258] sm:$0xff]  ;;  %v17366_v31 = vld [vmem:[#allocation344_spill] sm:$0xff]  ;;  %v17367_v41 = vld [vmem:[#allocation343_spill] sm:$0xff] }
 0x588   : > { %v3121_v17 = vsel %vm834_vm0, %v17365_v43, 0.0  ;;  %v3450_v55 = vadd.f32 %v3449_v48, %v3448_v10  ;;  %v3453_v44 = vsel %vm834_vm0, %v6522_v5, 0.0  ;;  %v3123_v14 = vsel %vm834_vm0, %v17367_v41, 0.0  ;;  %v17368_v10 = vld [vmem:[#allocation9_spill] sm:$0xff]  ;;  %v6525_v5 = vld [vmem:[%s12240_s28 + $0x300] sm:$0xff] }
 0x589   : > { %v2945_v36 = vadd.f32 %v2944_v60, %v2943_v19  ;;  %v3120_v46 = vadd.f32 %v3119_v16, %v3118_v57  ;;  %v3291_v60 = vadd.f32 %v3290_v52, %v3289_v28  ;;  %v2950_v19 = vsel %vm834_vm0, %v17366_v31, 0.0  ;;  %v6524_v16 = vld [vmem:[%s12240_s28 + $0x268] sm:$0xff]  ;;  %v17369_v57 = vld [vmem:[#allocation101_spill] sm:$0xff] }
 0x58a   : > { %v3294_v51 = vsel %vm834_vm0, %v6523_v3, 0.0  ;;  %v3452_v43 = vadd.f32 %v3451_v26, %v3450_v55  ;;  %v3455_v52 = vsel %vm834_vm0, %v6524_v16, 0.0  ;;  %v3125_v28 = vsel %vm834_vm0, %v17369_v57, 0.0 }
 0x58b   : > { %v2947_v38 = vadd.f32 %v2946_v33, %v2945_v36  ;;  %v3122_v48 = vadd.f32 %v3121_v17, %v3120_v46  ;;  %v3293_v33 = vadd.f32 %v3292_v21, %v3291_v60  ;;  %v2952_v36 = vsel %vm834_vm0, %v17368_v10, 0.0  ;;  %v6526_v17 = vld [vmem:[%s12240_s28 + $0x278] sm:$0xff]  ;;  %v6527_v60 = vld [vmem:[%s12240_s28 + $0x310] sm:$0xff] }
 0x58c   : > { %v3296_v31 = vsel %vm834_vm0, %v6525_v5, 0.0  ;;  %v3454_v41 = vadd.f32 %v3453_v44, %v3452_v43  ;;  %v3457_v21 = vsel %vm834_vm0, %v6526_v17, 0.0  ;;  %v2954_v55 = vsel %vm834_vm0, %v13723_v24, 0.0 }
 0x58d   : > { %v2949_v11 = vadd.f32 %v2948_v53, %v2947_v38  ;;  %v3124_v26 = vadd.f32 %v3123_v14, %v3122_v48  ;;  %v3295_v53 = vadd.f32 %v3294_v51, %v3293_v33  ;;  %v17370_v38 = vld [vmem:[#allocation181_spill] sm:$0xff]  ;;  %v3298_v16 = vsel %vm834_vm0, %v6527_v60, 0.0  ;;  %v6528_v14 = vld [vmem:[%s12240_s28 + $0x288] sm:$0xff]  ;;  %v6529_v48 = vld [vmem:[%s12240_s28 + $0x320] sm:$0xff] }
 0x58e   : > { %v3127_v46 = vsel %vm834_vm0, %v17370_v38, 0.0  ;;  %v3456_v10 = vadd.f32 %v3455_v52, %v3454_v41  ;;  %v3459_v51 = vsel %vm834_vm0, %v6528_v14, 0.0  ;;  %v2956_v43 = vsel %vm834_vm0, %v13731_v1, 0.0 }
 0x58f   : > { %v2951_v3 = vadd.f32 %v2950_v19, %v2949_v11  ;;  %v3126_v44 = vadd.f32 %v3125_v28, %v3124_v26  ;;  %v3297_v19 = vadd.f32 %v3296_v31, %v3295_v53  ;;  %v17371_v11 = vld [vmem:[#allocation273_spill] sm:$0xff]  ;;  %v3300_v33 = vsel %vm834_vm0, %v6529_v48, 0.0  ;;  %v6530_v28 = vld [vmem:[%s12240_s28 + $0x298] sm:$0xff] }
 0x590   : > { %v3129_v24 = vsel %vm834_vm0, %v17371_v11, 0.0  ;;  %v3458_v5 = vadd.f32 %v3457_v21, %v3456_v10  ;;  %v3461_v31 = vsel %vm834_vm0, %v6530_v28, 0.0  ;;  %v2958_v41 = vsel %vm834_vm0, %v13739_v6, 0.0  ;;  %v6531_v26 = vld [vmem:[%s12240_s28 + $0x330] sm:$0xff]  ;;  %v6534_v11 = vld [vmem:[%s12240_s28 + $0x2b8] sm:$0xff] }
 0x591   : > { %v2953_v57 = vadd.f32 %v2952_v36, %v2951_v3  ;;  %v3128_v52 = vadd.f32 %v3127_v46, %v3126_v44  ;;  %v3299_v36 = vadd.f32 %v3298_v16, %v3297_v19  ;;  %v17372_v3 = vld [vmem:[#allocation102_spill] sm:$0xff]  ;;  %v3302_v53 = vsel %vm834_vm0, %v6531_v26, 0.0  ;;  %v6532_v46 = vld [vmem:[%s12240_s28 + $0x2a8] sm:$0xff]  ;;  %v6537_v26 = vld [vmem:[%s12240_s28 + $0x360] sm:$0xff] }
 0x592   : > { %v3131_v1 = vsel %vm834_vm0, %v17372_v3, 0.0  ;;  %v3460_v38 = vadd.f32 %v3459_v51, %v3458_v5  ;;  %v3463_v16 = vsel %vm834_vm0, %v6532_v46, 0.0  ;;  %v2960_v10 = vsel %vm834_vm0, %v13756_v20, 0.0  ;;  %v6535_v5 = vld [vmem:[%s12240_s28 + $0x350] sm:$0xff]  ;;  %v6538_v46 = vld [vmem:[%s12240_s28 + $0x2d8] sm:$0xff] }
 0x593   : > { %v2955_v17 = vadd.f32 %v2954_v55, %v2953_v57  ;;  %v3130_v21 = vadd.f32 %v3129_v24, %v3128_v52  ;;  %v3301_v55 = vadd.f32 %v3300_v33, %v3299_v36  ;;  %v3133_v6 = vsel %vm834_vm0, %v13727_v54, 0.0  ;;  %v6533_v57 = vld [vmem:[%s12240_s28 + $0x340] sm:$0xff]  ;;  %v17373_v33 = vld [vmem:[#allocation168_spill] sm:$0xff] }
 0x594   : > { %v3304_v44 = vsel %vm834_vm0, %v6533_v57, 0.0  ;;  %v3462_v19 = vadd.f32 %v3461_v31, %v3460_v38  ;;  %v3465_v24 = vsel %vm834_vm0, %v6534_v11, 0.0  ;;  %v2962_v48 = vsel %vm834_vm0, %v13767_v59, 0.0  ;;  %v6536_v31 = vld [vmem:[%s12240_s28 + $0x2c8] sm:$0xff]  ;;  %v6539_v57 = vld [vmem:[%s12240_s28 + $0x370] sm:$0xff] }
 0x595   : > { %v2957_v60 = vadd.f32 %v2956_v43, %v2955_v17  ;;  %v3132_v51 = vadd.f32 %v3131_v1, %v3130_v21  ;;  %v3303_v43 = vadd.f32 %v3302_v53, %v3301_v55  ;;  %v3135_v20 = vsel %vm834_vm0, %v17373_v33, 0.0  ;;  %v17374_v1 = vld [vmem:[#allocation182_spill] sm:$0xff]  ;;  %v6540_v11 = vld [vmem:[%s12240_s28 + $0x2e8] sm:$0xff]  ;;  %v17376_v33 = vld [vmem:[#allocation275_spill] sm:$0xff] }
 0x596   : > { %v3306_v54 = vsel %vm834_vm0, %v6535_v5, 0.0  ;;  %v3464_v17 = vadd.f32 %v3463_v16, %v3462_v19  ;;  %v2964_v3 = vsel %vm834_vm0, %v13775_v13, 0.0  ;;  %v3137_v59 = vsel %vm834_vm0, %v17374_v1, 0.0 }
 0x597   : > { %v2959_v14 = vadd.f32 %v2958_v41, %v2957_v60  ;;  %v3134_v36 = vadd.f32 %v3133_v6, %v3132_v51  ;;  %v3305_v28 = vadd.f32 %v3304_v44, %v3303_v43  ;;  %v3467_v41 = vsel %vm834_vm0, %v6536_v31, 0.0  ;;  %v17375_v6 = vld [vmem:[#allocation345_spill] sm:$0xff] }
 0x598   : > { %v3308_v53 = vsel %vm834_vm0, %v6537_v26, 0.0  ;;  %v3466_v38 = vadd.f32 %v3465_v24, %v3464_v17  ;;  %v3469_v16 = vsel %vm834_vm0, %v6538_v46, 0.0  ;;  %v3139_v13 = vsel %vm834_vm0, %v17375_v6, 0.0  ;;  %v6545_v46 = vld [vmem:[%s12240_s28 + $0x3a0] sm:$0xff] }
 0x599   : > { %v2961_v52 = vadd.f32 %v2960_v10, %v2959_v14  ;;  %v3136_v21 = vadd.f32 %v3135_v20, %v3134_v36  ;;  %v3307_v55 = vadd.f32 %v3306_v54, %v3305_v28  ;;  %v2966_v10 = vsel %vm834_vm0, %v13783_v56, 0.0  ;;  %v6541_v20 = vld [vmem:[%s12240_s28 + $0x380] sm:$0xff]  ;;  %v6542_v28 = vld [vmem:[%s12240_s28 + $0x2f8] sm:$0xff] }
 0x59a   : > { %v3310_v44 = vsel %vm834_vm0, %v6539_v57, 0.0  ;;  %v3468_v19 = vadd.f32 %v3467_v41, %v3466_v38  ;;  %v3471_v24 = vsel %vm834_vm0, %v6540_v11, 0.0  ;;  %v3141_v56 = vsel %vm834_vm0, %v17376_v33, 0.0  ;;  %v6546_v57 = vld [vmem:[%s12240_s28 + $0x318] sm:$0xff] }
 0x59b   : > { %v2963_v60 = vadd.f32 %v2962_v48, %v2961_v52  ;;  %v3138_v51 = vadd.f32 %v3137_v59, %v3136_v21  ;;  %v3309_v43 = vadd.f32 %v3308_v53, %v3307_v55  ;;  %v2968_v48 = vsel %vm834_vm0, %v13791_v35, 0.0 }
 0x59c   : > { %v3312_v5 = vsel %vm834_vm0, %v6541_v20, 0.0  ;;  %v3470_v54 = vadd.f32 %v3469_v16, %v3468_v19  ;;  %v3473_v31 = vsel %vm834_vm0, %v6542_v28, 0.0  ;;  %v2970_v41 = vsel %vm834_vm0, %v13808_v30, 0.0  ;;  %v17377_v20 = vld [vmem:[#allocation10_spill] sm:$0xff] }
 0x59d   : > { %v2965_v14 = vadd.f32 %v2964_v3, %v2963_v60  ;;  %v3140_v52 = vadd.f32 %v3139_v13, %v3138_v51  ;;  %v3311_v36 = vadd.f32 %v3310_v44, %v3309_v43  ;;  %v3143_v35 = vsel %vm834_vm0, %v13779_v47, 0.0  ;;  %v6543_v3 = vld [vmem:[%s12240_s28 + $0x390] sm:$0xff]  ;;  %v6544_v60 = vld [vmem:[%s12240_s28 + $0x308] sm:$0xff]  ;;  %v6550_v28 = vld [vmem:[%s12240_s28 + $0x338] sm:$0xff] }
 0x59e   : > { %v3314_v1 = vsel %vm834_vm0, %v6543_v3, 0.0  ;;  %v3472_v59 = vadd.f32 %v3471_v24, %v3470_v54  ;;  %v3475_v21 = vsel %vm834_vm0, %v6544_v60, 0.0  ;;  %v2972_v55 = vsel %vm834_vm0, %v13819_v39, 0.0  ;;  %v6551_v3 = vld [vmem:[%s12240_s28 + $0x3d0] sm:$0xff]  ;;  %v6552_v60 = vld [vmem:[%s12240_s28 + $0x348] sm:$0xff] }
 0x59f   : > { %v2967_v17 = vadd.f32 %v2966_v10, %v2965_v14  ;;  %v3142_v53 = vadd.f32 %v3141_v56, %v3140_v52  ;;  %v3313_v38 = vadd.f32 %v3312_v5, %v3311_v36  ;;  %v3145_v30 = vsel %vm834_vm0, %v13787_v4, 0.0  ;;  %v6547_v14 = vld [vmem:[%s12240_s28 + $0x3b0] sm:$0xff]  ;;  %v6549_v5 = vld [vmem:[%s12240_s28 + $0x3c0] sm:$0xff] }
 0x5a0   : > { %v3316_v47 = vsel %vm834_vm0, %v6545_v46, 0.0  ;;  %v3474_v16 = vadd.f32 %v3473_v31, %v3472_v59  ;;  %v3477_v44 = vsel %vm834_vm0, %v6546_v57, 0.0  ;;  %v2974_v19 = vsel %vm834_vm0, %v13827_v8, 0.0  ;;  %v6553_v46 = vld [vmem:[%s12240_s28 + $0x3e0] sm:$0xff]  ;;  %v6554_v57 = vld [vmem:[%s12240_s28 + $0x358] sm:$0xff] }
 0x5a1   : > { %v2969_v26 = vadd.f32 %v2968_v48, %v2967_v17  ;;  %v3144_v6 = vadd.f32 %v3143_v35, %v3142_v53  ;;  %v3315_v13 = vadd.f32 %v3314_v1, %v3313_v38  ;;  %v3147_v39 = vsel %vm834_vm0, %v13798_v9, 0.0  ;;  %v6548_v48 = vld [vmem:[%s12240_s28 + $0x328] sm:$0xff]  ;;  %v17378_v35 = vld [vmem:[#allocation103_spill] sm:$0xff] }
 0x5a2   : > { %v3318_v4 = vsel %vm834_vm0, %v6547_v14, 0.0  ;;  %v3476_v51 = vadd.f32 %v3475_v21, %v3474_v16  ;;  %v3479_v33 = vsel %vm834_vm0, %v6548_v48, 0.0  ;;  %v2976_v56 = vsel %vm834_vm0, %v13835_v12, 0.0  ;;  %v17381_v14 = vld [vmem:[#allocation184_spill] sm:$0xff] }
 0x5a3   : > { %v2971_v10 = vadd.f32 %v2970_v41, %v2969_v26  ;;  %v3146_v11 = vadd.f32 %v3145_v30, %v3144_v6  ;;  %v3317_v24 = vadd.f32 %v3316_v47, %v3315_v13  ;;  %v3149_v8 = vsel %vm834_vm0, %v17377_v20, 0.0  ;;  %v17379_v30 = vld [vmem:[#allocation173_spill] sm:$0xff]  ;;  %v17382_v20 = vld [vmem:[#allocation124_spill] sm:$0xff] }
 0x5a4   : > { %v3320_v9 = vsel %vm834_vm0, %v6549_v5, 0.0  ;;  %v3478_v54 = vadd.f32 %v3477_v44, %v3476_v51  ;;  %v3481_v31 = vsel %vm834_vm0, %v6550_v28, 0.0  ;;  %v2978_v41 = vsel %vm834_vm0, %v13843_v22, 0.0  ;;  %v17383_v5 = vld [vmem:[#allocation346_spill] sm:$0xff] }
 0x5a5   : > { %v2973_v43 = vadd.f32 %v2972_v55, %v2971_v10  ;;  %v3148_v52 = vadd.f32 %v3147_v39, %v3146_v11  ;;  %v3319_v36 = vadd.f32 %v3318_v4, %v3317_v24  ;;  %v3151_v12 = vsel %vm834_vm0, %v17378_v35, 0.0  ;;  %v6555_v4 = vld [vmem:[%s12240_s28 + $0x3f0] sm:$0xff] }
 0x5a6   : > { %v3322_v1 = vsel %vm834_vm0, %v6551_v3, 0.0  ;;  %v3480_v59 = vadd.f32 %v3479_v33, %v3478_v54  ;;  %v3483_v21 = vsel %vm834_vm0, %v6552_v60, 0.0  ;;  %v2980_v55 = vsel %vm834_vm0, %v13860_v25, 0.0  ;;  %v6556_v33 = vld [vmem:[%s12240_s28 + $0x368] sm:$0xff]  ;;  %v6557_v54 = vld [vmem:[%s12240_s28 + $0x400] sm:$0xff] }
 0x5a7   : > { %v2975_v17 = vadd.f32 %v2974_v19, %v2973_v43  ;;  %v3150_v53 = vadd.f32 %v3149_v8, %v3148_v52  ;;  %v3321_v38 = vadd.f32 %v3320_v9, %v3319_v36  ;;  %v3153_v22 = vsel %vm834_vm0, %v17379_v30, 0.0  ;;  %v17380_v19 = vld [vmem:[#allocation11_spill] sm:$0xff]  ;;  %v6560_v30 = vld [vmem:[%s12240_s28 + $0x388] sm:$0xff] }
 0x5a8   : > { %v3324_v47 = vsel %vm834_vm0, %v6553_v46, 0.0  ;;  %v3482_v16 = vadd.f32 %v3481_v31, %v3480_v59  ;;  %v3485_v44 = vsel %vm834_vm0, %v6554_v57, 0.0  ;;  %v2982_v39 = vsel %vm834_vm0, %v17380_v19, 0.0  ;;  %v17386_v46 = vld [vmem:[#allocation12_spill] sm:$0xff] }
 0x5a9   : > { %v2977_v26 = vadd.f32 %v2976_v56, %v2975_v17  ;;  %v3152_v6 = vadd.f32 %v3151_v12, %v3150_v53  ;;  %v3323_v13 = vadd.f32 %v3322_v1, %v3321_v38  ;;  %v3155_v25 = vsel %vm834_vm0, %v17381_v14, 0.0  ;;  %v17384_v12 = vld [vmem:[#allocation347_spill] sm:$0xff]  ;;  %v17385_v1 = vld [vmem:[#allocation278_spill] sm:$0xff] }
 0x5aa   : > { %v3326_v51 = vsel %vm834_vm0, %v6555_v4, 0.0  ;;  %v3484_v43 = vadd.f32 %v3483_v21, %v3482_v16  ;;  %v3487_v56 = vsel %vm834_vm0, %v6556_v33, 0.0  ;;  %v2984_v8 = vsel %vm834_vm0, %v17382_v20, 0.0  ;;  %v17387_v16 = vld [vmem:[#allocation104_spill] sm:$0xff]  ;;  %v6562_v14 = vld [vmem:[%s12240_s28 + $0x398] sm:$0xff] }
 0x5ab   : > { %v2979_v10 = vadd.f32 %v2978_v41, %v2977_v26  ;;  %v3154_v24 = vadd.f32 %v3153_v22, %v3152_v6  ;;  %v3325_v48 = vadd.f32 %v3324_v47, %v3323_v13  ;;  %v3157_v9 = vsel %vm834_vm0, %v17383_v5, 0.0  ;;  %v6558_v41 = vld [vmem:[%s12240_s28 + $0x378] sm:$0xff]  ;;  %v6559_v26 = vld [vmem:[%s12240_s28 + $0x410] sm:$0xff]  ;;  %v6561_v6 = vld [vmem:[%s12240_s28 + $0x420] sm:$0xff] }
 0x5ac   : > { %v3328_v17 = vsel %vm834_vm0, %v6557_v54, 0.0  ;;  %v3486_v52 = vadd.f32 %v3485_v44, %v3484_v43  ;;  %v3489_v35 = vsel %vm834_vm0, %v6558_v41, 0.0  ;;  %v2986_v3 = vsel %vm834_vm0, %v17384_v12, 0.0  ;;  %v17388_v4 = vld [vmem:[#allocation118_spill] sm:$0xff]  ;;  %v17389_v43 = vld [vmem:[#allocation185_spill] sm:$0xff]  ;;  %v6564_v5 = vld [vmem:[%s12240_s28 + $0x3a8] sm:$0xff] }
 0x5ad   : > { %v2981_v11 = vadd.f32 %v2980_v55, %v2979_v10  ;;  %v3156_v28 = vadd.f32 %v3155_v25, %v3154_v24  ;;  %v3327_v31 = vadd.f32 %v3326_v51, %v3325_v48  ;;  %v3159_v59 = vsel %vm834_vm0, %v17385_v1, 0.0  ;;  %v6563_v24 = vld [vmem:[%s12240_s28 + $0x430] sm:$0xff]  ;;  %v17390_v54 = vld [vmem:[#allocation348_spill] sm:$0xff]  ;;  %v6566_v1 = vld [vmem:[%s12240_s28 + $0x3b8] sm:$0xff] }
 0x5ae   : > { %v3330_v53 = vsel %vm834_vm0, %v6559_v26, 0.0  ;;  %v3488_v38 = vadd.f32 %v3487_v56, %v3486_v52  ;;  %v3491_v22 = vsel %vm834_vm0, %v6560_v30, 0.0  ;;  %v2988_v47 = vsel %vm834_vm0, %v17386_v46, 0.0  ;;  %v17391_v52 = vld [vmem:[#allocation283_spill] sm:$0xff]  ;;  %v17392_v26 = vld [vmem:[#allocation13_spill] sm:$0xff] }
 0x5af   : > { %v2983_v36 = vadd.f32 %v2982_v39, %v2981_v11  ;;  %v3158_v21 = vadd.f32 %v3157_v9, %v3156_v28  ;;  %v3329_v55 = vadd.f32 %v3328_v17, %v3327_v31  ;;  %v3161_v10 = vsel %vm834_vm0, %v17387_v16, 0.0  ;;  %v6565_v28 = vld [vmem:[%s12240_s28 + $0x440] sm:$0xff]  ;;  %v6568_v16 = vld [vmem:[%s12240_s28 + $0x3c8] sm:$0xff] }
 0x5b0   : > { %v3332_v13 = vsel %vm834_vm0, %v6561_v6, 0.0  ;;  %v3490_v57 = vadd.f32 %v3489_v35, %v3488_v38  ;;  %v3493_v25 = vsel %vm834_vm0, %v6562_v14, 0.0  ;;  %v2990_v51 = vsel %vm834_vm0, %v17388_v4, 0.0  ;;  %v17393_v38 = vld [vmem:[#allocation105_spill] sm:$0xff]  ;;  %v17394_v6 = vld [vmem:[#allocation126_spill] sm:$0xff] }
 0x5b1   : > { %v2985_v60 = vadd.f32 %v2984_v8, %v2983_v36  ;;  %v3160_v19 = vadd.f32 %v3159_v59, %v3158_v21  ;;  %v3331_v39 = vadd.f32 %v3330_v53, %v3329_v55  ;;  %v3163_v11 = vsel %vm834_vm0, %v17389_v43, 0.0  ;;  %v6567_v21 = vld [vmem:[%s12240_s28 + $0x450] sm:$0xff]  ;;  %v6570_v43 = vld [vmem:[%s12240_s28 + $0x3d8] sm:$0xff] }
 0x5b2   : > { %v3334_v48 = vsel %vm834_vm0, %v6563_v24, 0.0  ;;  %v3492_v33 = vadd.f32 %v3491_v22, %v3490_v57  ;;  %v3495_v9 = vsel %vm834_vm0, %v6564_v5, 0.0  ;;  %v2992_v17 = vsel %vm834_vm0, %v17390_v54, 0.0  ;;  %v17395_v57 = vld [vmem:[#allocation186_spill] sm:$0xff]  ;;  %v17396_v24 = vld [vmem:[#allocation349_spill] sm:$0xff] }
 0x5b3   : > { %v2987_v44 = vadd.f32 %v2986_v3, %v2985_v60  ;;  %v3162_v20 = vadd.f32 %v3161_v10, %v3160_v19  ;;  %v3333_v8 = vadd.f32 %v3332_v13, %v3331_v39  ;;  %v3165_v36 = vsel %vm834_vm0, %v17391_v52, 0.0  ;;  %v6569_v19 = vld [vmem:[%s12240_s28 + $0x460] sm:$0xff]  ;;  %v6572_v52 = vld [vmem:[%s12240_s28 + $0x3e8] sm:$0xff] }
 0x5b4   : > { %v3336_v31 = vsel %vm834_vm0, %v6565_v28, 0.0  ;;  %v3494_v41 = vadd.f32 %v3493_v25, %v3492_v33  ;;  %v3497_v59 = vsel %vm834_vm0, %v6566_v1, 0.0  ;;  %v2994_v53 = vsel %vm834_vm0, %v17392_v26, 0.0  ;;  %v17397_v33 = vld [vmem:[#allocation284_spill] sm:$0xff]  ;;  %v17398_v28 = vld [vmem:[#allocation14_spill] sm:$0xff] }
 0x5b5   : > { %v2989_v56 = vadd.f32 %v2988_v47, %v2987_v44  ;;  %v3164_v12 = vadd.f32 %v3163_v11, %v3162_v20  ;;  %v3335_v3 = vadd.f32 %v3334_v48, %v3333_v8  ;;  %v3167_v60 = vsel %vm834_vm0, %v17393_v38, 0.0  ;;  %v6571_v20 = vld [vmem:[%s12240_s28 + $0x470] sm:$0xff]  ;;  %v6574_v38 = vld [vmem:[%s12240_s28 + $0x3f8] sm:$0xff] }
 0x5b6   : > { %v3338_v55 = vsel %vm834_vm0, %v6567_v21, 0.0  ;;  %v3496_v30 = vadd.f32 %v3495_v9, %v3494_v41  ;;  %v3499_v10 = vsel %vm834_vm0, %v6568_v16, 0.0  ;;  %v2996_v13 = vsel %vm834_vm0, %v17394_v6, 0.0  ;;  %v17399_v41 = vld [vmem:[#allocation106_spill] sm:$0xff]  ;;  %v17400_v21 = vld [vmem:[#allocation195_spill] sm:$0xff] }
 0x5b7   : > { %v2991_v35 = vadd.f32 %v2990_v51, %v2989_v56  ;;  %v3166_v46 = vadd.f32 %v3165_v36, %v3164_v12  ;;  %v3337_v47 = vadd.f32 %v3336_v31, %v3335_v3  ;;  %v3169_v44 = vsel %vm834_vm0, %v17395_v57, 0.0  ;;  %v6573_v12 = vld [vmem:[%s12240_s28 + $0x480] sm:$0xff]  ;;  %v6576_v57 = vld [vmem:[%s12240_s28 + $0x408] sm:$0xff] }
 0x5b8   : > { %v3340_v39 = vsel %vm834_vm0, %v6569_v19, 0.0  ;;  %v3498_v14 = vadd.f32 %v3497_v59, %v3496_v30  ;;  %v3501_v11 = vsel %vm834_vm0, %v6570_v43, 0.0  ;;  %v2998_v48 = vsel %vm834_vm0, %v17396_v24, 0.0  ;;  %v17401_v30 = vld [vmem:[#allocation131_spill] sm:$0xff] }
 0x5b9   : > { %v2993_v22 = vadd.f32 %v2992_v17, %v2991_v35  ;;  %v3168_v4 = vadd.f32 %v3167_v60, %v3166_v46  ;;  %v3339_v51 = vadd.f32 %v3338_v55, %v3337_v47  ;;  %v3171_v56 = vsel %vm834_vm0, %v17397_v33, 0.0  ;;  %v6575_v46 = vld [vmem:[%s12240_s28 + $0x490] sm:$0xff] }
 0x5ba   : > { %v3342_v8 = vsel %vm834_vm0, %v6571_v20, 0.0  ;;  %v3500_v5 = vadd.f32 %v3499_v10, %v3498_v14  ;;  %v3503_v36 = vsel %vm834_vm0, %v6572_v52, 0.0  ;;  %v3000_v31 = vsel %vm834_vm0, %v17398_v28, 0.0  ;;  %v17403_v20 = vld [vmem:[#allocation107_spill] sm:$0xff] }
 0x5bb   : > { %v2995_v25 = vadd.f32 %v2994_v53, %v2993_v22  ;;  %v3170_v54 = vadd.f32 %v3169_v44, %v3168_v4  ;;  %v3341_v17 = vadd.f32 %v3340_v39, %v3339_v51  ;;  %v3173_v35 = vsel %vm834_vm0, %v17399_v41, 0.0  ;;  %v17402_v39 = vld [vmem:[#allocation285_spill] sm:$0xff] }
 0x5bc   : > { %v3344_v3 = vsel %vm834_vm0, %v6573_v12, 0.0  ;;  %v3502_v1 = vadd.f32 %v3501_v11, %v3500_v5  ;;  %v3505_v60 = vsel %vm834_vm0, %v6574_v38, 0.0  ;;  %v3002_v55 = vsel %vm834_vm0, %v17400_v21, 0.0  ;;  %v17404_v41 = vld [vmem:[#allocation133_spill] sm:$0xff] }
 0x5bd   : > { %v2997_v9 = vadd.f32 %v2996_v13, %v2995_v25  ;;  %v3172_v26 = vadd.f32 %v3171_v56, %v3170_v54  ;;  %v3343_v53 = vadd.f32 %v3342_v8, %v3341_v17  ;;  %v3175_v22 = vsel %vm834_vm0, %v17401_v30, 0.0  ;;  %v6577_v25 = vld [vmem:[%s12240_s28 + $0x4a0] sm:$0xff]  ;;  %v6579_v8 = vld [vmem:[%s12240_s28 + $0x4b0] sm:$0xff] }
 0x5be   : > { %v3346_v47 = vsel %vm834_vm0, %v6575_v46, 0.0  ;;  %v3504_v16 = vadd.f32 %v3503_v36, %v3502_v1  ;;  %v3507_v44 = vsel %vm834_vm0, %v6576_v57, 0.0  ;;  %v3004_v19 = vsel %vm834_vm0, %v14035_v15, 0.0  ;;  %v6580_v36 = vld [vmem:[%s12240_s28 + $0x428] sm:$0xff]  ;;  %v6583_v21 = vld [vmem:[%s12240_s28 + $0x4d0] sm:$0xff] }
 0x5bf   : > { %v2999_v59 = vadd.f32 %v2998_v48, %v2997_v9  ;;  %v3174_v6 = vadd.f32 %v3173_v35, %v3172_v26  ;;  %v3345_v13 = vadd.f32 %v3344_v3, %v3343_v53  ;;  %v3177_v14 = vsel %vm834_vm0, %v17402_v39, 0.0  ;;  %v6578_v48 = vld [vmem:[%s12240_s28 + $0x418] sm:$0xff]  ;;  %v6581_v35 = vld [vmem:[%s12240_s28 + $0x4c0] sm:$0xff] }
 0x5c0   : > { %v3348_v4 = vsel %vm834_vm0, %v6577_v25, 0.0  ;;  %v3506_v51 = vadd.f32 %v3505_v60, %v3504_v16  ;;  %v3509_v33 = vsel %vm834_vm0, %v6578_v48, 0.0  ;;  %v3006_v56 = vsel %vm834_vm0, %v14047_v23, 0.0  ;;  %v6582_v53 = vld [vmem:[%s12240_s28 + $0x438] sm:$0xff]  ;;  %v6584_v16 = vld [vmem:[%s12240_s28 + $0x448] sm:$0xff]  ;;  %v14732_v25 = vpop.permute.xlu0 %5268 }
 0x5c1   : > { %v3001_v10 = vadd.f32 %v3000_v31, %v2999_v59  ;;  %v3176_v11 = vadd.f32 %v3175_v22, %v3174_v6  ;;  %v3347_v24 = vadd.f32 %v3346_v47, %v3345_v13  ;;  %v3179_v15 = vsel %vm834_vm0, %v17403_v20, 0.0  ;;  %v6585_v6 = vld [vmem:[%s12240_s28 + $0x4e0] sm:$0xff]  ;;  %v6586_v39 = vld [vmem:[%s12240_s28 + $0x458] sm:$0xff] }
 0x5c2   : > { %v3350_v5 = vsel %vm834_vm0, %v6579_v8, 0.0  ;;  %v3508_v9 = vadd.f32 %v3507_v44, %v3506_v51  ;;  %v3511_v28 = vsel %vm834_vm0, %v6580_v36, 0.0  ;;  %v3008_v31 = vsel %vm834_vm0, %v14057_v18, 0.0  ;;  %v6587_v51 = vld [vmem:[%s12240_s28 + $0x4f0] sm:$0xff] }
 0x5c3   : > { %v3003_v43 = vadd.f32 %v3002_v55, %v3001_v10  ;;  %v3178_v17 = vadd.f32 %v3177_v14, %v3176_v11  ;;  %v3349_v52 = vadd.f32 %v3348_v4, %v3347_v24  ;;  %v3181_v23 = vsel %vm834_vm0, %v17404_v41, 0.0  ;;  %v14742_v24 = vpop.permute.xlu1 %5270  ;;  %v6592_v41 = vld [vmem:[%s12240_s28 + $0x520] sm:$0xff] }
 0x5c4   : > { %v3352_v12 = vsel %vm834_vm0, %v6581_v35, 0.0  ;;  %v3510_v3 = vadd.f32 %v3509_v33, %v3508_v9  ;;  %v3513_v38 = vsel %vm834_vm0, %v6582_v53, 0.0  ;;  %v3010_v60 = vsel %vm834_vm0, %v14079_v2, 0.0  ;;  %v6590_v9 = vld [vmem:[%s12240_s28 + $0x510] sm:$0xff] }
 0x5c5   : > { %v3005_v54 = vadd.f32 %v3004_v19, %v3003_v43  ;;  %v3180_v59 = vadd.f32 %v3179_v15, %v3178_v17  ;;  %v3351_v26 = vadd.f32 %v3350_v5, %v3349_v52  ;;  %v3183_v18 = vsel %vm834_vm0, %v14039_v62, 0.0 }
 0x5c6   : > { %v3354_v55 = vsel %vm834_vm0, %v6583_v21, 0.0  ;;  %v3512_v30 = vadd.f32 %v3511_v28, %v3510_v3  ;;  %v3012_v22 = vsel %vm834_vm0, %v14103_v42, 0.0  ;;  %v3515_v10 = vsel %vm834_vm0, %v6584_v16, 0.0  ;;  %v6591_v28 = vld [vmem:[%s12240_s28 + $0x478] sm:$0xff]  ;;  %v6597_v16 = vld [vmem:[%s12240_s28 + $0x550] sm:$0xff] }
 0x5c7   : > { %v3007_v1 = vadd.f32 %v3006_v56, %v3005_v54  ;;  %v3182_v46 = vadd.f32 %v3181_v23, %v3180_v59  ;;  %v3353_v47 = vadd.f32 %v3352_v12, %v3351_v26  ;;  %v14724_v2 = vsel %vm834_vm0, %v14117_v0, 0.0  ;;  %v6588_v56 = vld [vmem:[%s12240_s28 + $0x500] sm:$0xff]  ;;  %v14772_v12 = vpop.permute.xlu2 %5330  ;;  %v6593_v59 = vld [vmem:[%s12240_s28 + $0x530] sm:$0xff]  ;;  %v6594_v26 = vld [vmem:[%s12240_s28 + $0x488] sm:$0xff] }
 0x5c8   : > { %v3185_v62 = vsel %vm834_vm0, %v14051_v61, 0.0  ;;  %v3356_v13 = vsel %vm834_vm0, %v6585_v6, 0.0  ;;  %v3514_v57 = vadd.f32 %v3513_v38, %v3512_v30  ;;  %v3517_v14 = vsel %vm834_vm0, %v6586_v39, 0.0  ;;  %v17405_v61 = vld [vmem:[#allocation286_spill] sm:$0xff]  ;;  %v6595_v38 = vld [vmem:[%s12240_s28 + $0x540] sm:$0xff]  ;;  %v6600_v39 = vld [vmem:[%s12240_s28 + $0x4a8] sm:$0xff] }
 0x5c9   : > { %v3009_v44 = vadd.f32 %v3008_v31, %v3007_v1  ;;  %v3184_v42 = vadd.f32 %v3183_v18, %v3182_v46  ;;  %v3355_v19 = vadd.f32 %v3354_v55, %v3353_v47  ;;  %v14736_v0 = vsel %vm834_vm0, %v14140_v45, 0.0  ;;  %v6589_v45 = vld [vmem:[%s12240_s28 + $0x468] sm:$0xff]  ;;  %v6596_v46 = vld [vmem:[%s12240_s28 + $0x498] sm:$0xff]  ;;  %v17406_v6 = vld [vmem:[#allocation215_spill] sm:$0xff] }
 0x5ca   : > { %v3187_v4 = vsel %vm834_vm0, %v17405_v61, 0.0  ;;  %v3358_v43 = vsel %vm834_vm0, %v6587_v51, 0.0  ;;  %v3516_v11 = vadd.f32 %v3515_v10, %v3514_v57  ;;  %v3189_v48 = vsel %vm834_vm0, %v14099_v63, 0.0  ;;  %v6601_v61 = vld [vmem:[%s12240_s28 + $0x580] sm:$0xff]  ;;  %v6602_v51 = vld [vmem:[%s12240_s28 + $0x590] sm:$0xff] }
 0x5cb   : > { %v3357_v33 = vadd.f32 %v3356_v13, %v3355_v19  ;;  %v3360_v20 = vsel %vm834_vm0, %v6588_v56, 0.0  ;;  %v3519_v15 = vsel %vm834_vm0, %v6589_v45, 0.0  ;;  %v14752_v8 = vsel %vm834_vm0, %v14154_v7, 0.0 }
 0x5cc   : > { %v14756_v5 = vsel %vm834_vm0, %v14113_v32, 0.0  ;;  %v3362_v63 = vsel %vm834_vm0, %v6590_v9, 0.0  ;;  %v3518_v54 = vadd.f32 %v3517_v14, %v3516_v11  ;;  %v3011_v17 = vadd.f32 %v3010_v60, %v3009_v44  ;;  %v14804_v14 = vpop.permute.xlu0 %5332 }
 0x5cd   : > { %v3186_v52 = vadd.f32 %v3185_v62, %v3184_v42  ;;  %v3359_v36 = vadd.f32 %v3358_v43, %v3357_v33  ;;  %v3521_v31 = vsel %vm834_vm0, %v6591_v28, 0.0  ;;  %v14764_v7 = vsel %vm834_vm0, %v14168_v50, 0.0  ;;  %v6599_v42 = vld [vmem:[%s12240_s28 + $0x570] sm:$0xff]  ;;  %v14815_v33 = vpop.permute.xlu1 %5277 }
 0x5ce   : > { %v14768_v32 = vsel %vm834_vm0, %v14127_v49, 0.0  ;;  %v3364_v23 = vsel %vm834_vm0, %v6592_v41, 0.0  ;;  %v3520_v35 = vadd.f32 %v3519_v15, %v3518_v54  ;;  %v14776_v3 = vsel %vm834_vm0, %v14144_v58, 0.0  ;;  %v6603_v15 = vld [vmem:[%s12240_s28 + $0x4b8] sm:$0xff]  ;;  %v6604_v54 = vld [vmem:[%s12240_s28 + $0x4c8] sm:$0xff] }
 0x5cf   : > { %v3361_v1 = vadd.f32 %v3360_v20, %v3359_v36  ;;  %v3366_v50 = vsel %vm834_vm0, %v6593_v59, 0.0  ;;  %v3523_v49 = vsel %vm834_vm0, %v6594_v26, 0.0  ;;  %v14784_v53 = vsel %vm834_vm0, %v14158_v27, 0.0  ;;  %v6608_v26 = vld [vmem:[%s12240_s28 + $0x508] sm:$0xff] }
 0x5d0   : > { %v3368_v60 = vsel %vm834_vm0, %v6595_v38, 0.0  ;;  %v3522_v18 = vadd.f32 %v3521_v31, %v3520_v35  ;;  %v5245_v58 = vlaneseq  ;;  %v3013_v21 = vadd.f32 %v3012_v22, %v3011_v17  ;;  %v6598_v22 = vld [vmem:[%s12240_s28 + $0x560] sm:$0xff]  ;;  %v5280_v31 = vpop.permute.xlu2 %5279 }
 0x5d1   : > { %v3188_v55 = vadd.f32 %v3187_v4, %v3186_v52  ;;  %v3363_v30 = vadd.f32 %v3362_v63, %v3361_v1  ;;  %v3525_v47 = vsel %vm834_vm0, %v6596_v46, 0.0  ;;  %v14792_v27 = vsel %vm834_vm0, %v14172_v40, 0.0  ;;  %v17407_v52 = vld [vmem:[#allocation364_spill] sm:$0xff]  ;;  %v6607_v1 = vld [vmem:[%s12240_s28 + $0x4f8] sm:$0xff] }
 0x5d2   : > { %v3370_v10 = vsel %vm834_vm0, %v6597_v16, 0.0  ;;  %v3524_v62 = vadd.f32 %v3523_v49, %v3522_v18  ;;  %v5175_v13 = vmul.f32 %v14089_v29, %v17406_v6  ;;  %v3372_v44 = vsel %vm834_vm0, %v6598_v22, 0.0  ;;  %v6611_v6 = vld [vmem:[%s12240_s28 + $0x538] sm:$0xff] }
 0x5d3   : > { %v3365_v57 = vadd.f32 %v3364_v23, %v3363_v30  ;;  %v3374_v19 = vsel %vm834_vm0, %v6599_v42, 0.0  ;;  %v3527_v40 = vsel %vm834_vm0, %v6600_v39, 0.0  ;;  %v3376_v4 = vsel %vm834_vm0, %v6601_v61, 0.0  ;;  %v6605_v23 = vld [vmem:[%s12240_s28 + $0x4d8] sm:$0xff]  ;;  %v6610_v30 = vld [vmem:[%s12240_s28 + $0x528] sm:$0xff] }
 0x5d4   : > { %v14810_v29 = vsel %vm834_vm0, %v6602_v51, 0.0  ;;  %v3526_v43 = vadd.f32 %v3525_v47, %v3524_v62  ;;  %v14813_v11 = vand.u32 127, %v5245_v58  ;;  %v3015_v56 = vadd.f32 %v14724_v2, %v3013_v21  ;;  %v6613_v42 = vld [vmem:[#allocation2 + $0x8] sm:$0xff] }
 0x5d5   : > { %v3190_v20 = vadd.f32 %v3189_v48, %v3188_v55  ;;  %v3367_v45 = vadd.f32 %v3366_v50, %v3365_v57  ;;  %v3529_v9 = vsel %vm834_vm0, %v6603_v15, 0.0  ;;  %v3531_v17 = vsel %vm834_vm0, %v6604_v54, 0.0  ;;  %v6606_v48 = vld [vmem:[%s12240_s28 + $0x4e8] sm:$0xff] }
 0x5d6   : > { %v3528_v63 = vadd.f32 %v3527_v40, %v3526_v43  ;;  %v5176_v36 = vmul.f32 %v14130_v34, %v17407_v52  ;;  %v5181_v28 = vsub.f32 1.0, %v5175_v13  ;;  %v3533_v2 = vsel %vm834_vm0, %v6605_v23, 0.0  ;;  %v6609_v34 = vld [vmem:[%s12240_s28 + $0x518] sm:$0xff]  ;;  %v6612_v57 = vld [vmem:[%s12240_s28 + $0x548] sm:$0xff] }
 0x5d7   : > { %v3369_v41 = vadd.f32 %v3368_v60, %v3367_v45  ;;  %v3535_v35 = vsel %vm834_vm0, %v6606_v48, 0.0  ;;  %v3537_v59 = vsel %vm834_vm0, %v6607_v1, 0.0  ;;  %v3539_v49 = vsel %vm834_vm0, %v6608_v26, 0.0  ;;  %v6614_v43 = vld [vmem:[%s12240_s28 + $0x558] sm:$0xff]  ;;  %v6620_v1 = vld [vmem:[#allocation2] sm:$0xff] }
 0x5d8   : > { %v3530_v50 = vadd.f32 %v3529_v9, %v3528_v63  ;;  %v3541_v38 = vsel %vm834_vm0, %v6609_v34, 0.0  ;;  %vm5252_vm14 = vcmp.ge.s32.totalorder %v14813_v11, 1  ;;  %v3017_v60 = vadd.f32 %v14736_v0, %v3015_v56  ;;  %v5339_v56 = vpop.permute.xlu0 %5338  ;;  %v6619_v48 = vld [vmem:[%s12240_s28 + $0x598] sm:$0xff] }
 0x5d9   : > { %v3192_v18 = vadd.f32 %v14756_v5, %v3190_v20  ;;  %v3371_v21 = vadd.f32 %v3370_v10, %v3369_v41  ;;  %vm5276_vm15 = vcmp.le.s32.totalorder %v14813_v11, 14  ;;  %v3543_v46 = vsel %vm834_vm0, %v6610_v30, 0.0  ;;  %v6618_v41 = vld [vmem:[%s12240_s28 + $0x588] sm:$0xff] }
 0x5da   : > { %v3532_v55 = vadd.f32 %v3531_v17, %v3530_v50  ;;  %v5182_v47 = vsub.f32 1.0, %v5176_v36  ;;  %v5183_v16 = vmax.f32 %v5181_v28, 0.0  ;;  %v14842_v13 = vsel %vm834_vm0, %v6611_v6, 0.0  ;;  %v6616_v17 = vld [vmem:[#allocation2 + $0x10] sm:$0xff]  ;;  %v6617_v28 = vld [vmem:[%s12240_s28 + $0x578] sm:$0xff] }
 0x5db   : > { %v3373_v62 = vadd.f32 %v3372_v44, %v3371_v21  ;;  %v14846_v0 = vsel %vm834_vm0, %v6612_v57, 0.0  ;;  %v5275_v5 = vsel %vm5252_vm14, %v14742_v24, 0.0  ;;  %v5284_v22 = vsel %vm5276_vm15, %v5280_v31, 0.0 }
 0x5dc   : > { %v3534_v10 = vadd.f32 %v3533_v2, %v3532_v55  ;;  %v5286_v39 = vadd.f32 %v6613_v42, %v5275_v5  ;;  %v5336_v44 = vsel %vm5252_vm14, %v14772_v12, 0.0  ;;  %v3019_v40 = vadd.f32 %v14752_v8, %v3017_v60  ;;  %v5386_v12 = vpop.permute.xlu2 %5385  ;;  %v5341_v8 = vpop.permute.xlu1 %5340 }
 0x5dd   : > { %v3194_v61 = vadd.f32 %v14768_v32, %v3192_v18  ;;  %v3375_v51 = vadd.f32 %v3374_v19, %v3373_v62  ;;  %v14860_v24 = vsel %vm834_vm0, %v6614_v43, 0.0  ;;  %v5184_v45 = vmax.f32 %v5182_v47, 0.0  ;;  %v6615_v32 = vld [vmem:[%s12240_s28 + $0x568] sm:$0xff] }
 0x5de   : > { %v3536_v20 = vadd.f32 %v3535_v35, %v3534_v10  ;;  %v5185_v15 = vmul.f32 %v5183_v16, %v5183_v16  ;;  %v5274_v9 = vsel %vm5252_vm14, %v14732_v25, 0.0  ;;  %v14867_v19 = vsel %vm834_vm0, %v6615_v32, 0.0  ;;  %v17408_v18 = vld [vmem:[#allocation304_spill] sm:$0xff] }
 0x5df   : > { %v3377_v63 = vadd.f32 %v3376_v4, %v3375_v51  ;;  %v5288_v54 = vadd.f32 %v5286_v39, %v5284_v22  ;;  %v5346_v52 = vadd.f32 %v6616_v17, %v5336_v44  ;;  %v14871_v31 = vsel %vm834_vm0, %v6617_v28, 0.0 }
 0x5e0   : > { %v3538_v36 = vadd.f32 %v3537_v59, %v3536_v20  ;;  %v14875_v23 = vsel %vm834_vm0, %v6618_v41, 0.0  ;;  %v5391_v25 = vsel %vm5252_vm14, %v5386_v12, 0.0  ;;  %v3021_v4 = vadd.f32 %v14764_v7, %v3019_v40 }
 0x5e1   : > { %v3379_v2 = vadd.f32 %v14810_v29, %v3377_v63  ;;  %v14883_v35 = vsel %vm834_vm0, %v6619_v48, 0.0  ;;  %v5285_v59 = vadd.f32 %v6620_v1, %v5274_v9  ;;  %v3196_v50 = vadd.f32 %v14776_v3, %v3194_v61  ;;  %v6621_v29 = vld [vmem:[#allocation2 + $0x20] sm:$0xff] }
 0x5e2   : > { %v3540_v26 = vadd.f32 %v3539_v49, %v3538_v36  ;;  %v14886_v34 = vmul.f32 %v5184_v45, %v5184_v45  ;;  %v5187_v60 = vsub.f32 0.0, %v5185_v15  ;;  %v5283_v7 = vsel %vm5276_vm15, %v14815_v33, 0.0 }
 0x5e3   : > { %v5177_v21 = vmul.f32 %v3379_v2, %v17408_v18  ;;  %v5292_v55 = vrot.slane %v5288_v54, 7  ;;  %v5401_v30 = vadd.f32 %v6621_v29, %v5391_v25  ;;  %v14893_v16 = vshrl.u32 %v5245_v58, 7 }
 0x5e4   : > { %v3542_v47 = vadd.f32 %v3541_v38, %v3540_v26  ;;  %v5287_v62 = vadd.f32 %v5285_v59, %v5283_v7  ;;  %v5344_v3 = vsel %vm5276_vm15, %v5339_v56, 0.0  ;;  %v5301_v6 = vrot.slane %v5288_v54, 1  ;;  %v5394_v44 = vpop.permute.xlu1 %5393  ;;  %v5396_v9 = vpop.permute.xlu2 %5395 }
 0x5e5   : > { %v5179_v49 = vsub.f32 %v3021_v4, %v5177_v21  ;;  %v5337_v57 = vsel %vm5252_vm14, %v14804_v14, 0.0  ;;  %v5348_v5 = vadd.f32 %v5346_v52, %v5344_v3  ;;  %v14901_v33 = vadd.s32 8, %v14893_v16 }
 0x5e6   : > { %v3544_v10 = vadd.f32 %v3543_v46, %v3542_v47  ;;  %v5291_v22 = vrot.slane %v5287_v62, 7  ;;  %v5300_v38 = vrot.slane %v5287_v62, 1  ;;  %vm5289_vm1 = vcmp.ge.s32.totalorder %v14893_v16, 1  ;;  %v5388_v46 = vpop.permute.xlu0 %5387 }
 0x5e7   : > { %v5189_v42 = vmul.f32 %v5187_v60, %v5179_v49  ;;  %vm5293_vm2 = vcmp.lt.s32.totalorder %v14893_v16, 1  ;;  %vm5302_vm3 = vcmp.lt.s32.totalorder %v14893_v16, 7  ;;  %vm5299_vm4 = vcmp.le.s32.totalorder %v14901_v33, 14 }
 0x5e8   : > { %v3546_v58 = vadd.f32 %v14842_v13, %v3544_v10  ;;  %v5294_v39 = vsel %vm5293_vm2, %v5291_v22, %v5292_v55  ;;  %v5295_v14 = vsel %vm5293_vm2, %v5292_v55, %v5291_v22  ;;  %v5304_v61 = vsel %vm5302_vm3, %v5301_v6, %v5300_v38  ;;  %v6622_v13 = vld [vmem:[#allocation2 + $0x18] sm:$0xff] }
 0x5e9   : > { %5643 = vst.msk [vmem:[#allocation2 + $0x30] sm:$0xff] %vm834_vm0, %v5189_v42  ;;  %v5296_v40 = vsel %vm5289_vm1, %v5295_v14, 0.0  ;;  %v5308_v51 = vadd.f32 %v5294_v39, %v5288_v54  ;;  %v5347_v43 = vadd.f32 %v6622_v13, %v5337_v57  ;;  %v5306_v20 = vsel %vm5299_vm4, %v5304_v61, 0.0 }
 0x5ea   : > { %v3548_v56 = vadd.f32 %v14846_v0, %v3546_v58  ;;  %v5307_v45 = vadd.f32 %v5296_v40, %v5287_v62  ;;  %v5345_v15 = vsel %vm5276_vm15, %v5341_v8, 0.0  ;;  %v5303_v12 = vsel %vm5302_vm3, %v5300_v38, %v5301_v6  ;;  %v6623_v8 = vld [vmem:[#allocation2 + $0x28] sm:$0xff] }
 0x5eb   : > { %v5310_v63 = vadd.f32 %v5308_v51, %v5306_v20  ;;  %v5349_v32 = vadd.f32 %v5347_v43, %v5345_v15  ;;  %v5350_v17 = vrot.slane %v5348_v5, 7  ;;  %v5392_v0 = vsel %vm5252_vm14, %v5388_v46, 0.0 }
 0x5ec   : > { %v3550_v54 = vadd.f32 %v14860_v24, %v3548_v56  ;;  %v5309_v52 = vadd.f32 %v5307_v45, %v5303_v12  ;;  %v5399_v36 = vsel %vm5276_vm15, %v5394_v44, 0.0  ;;  %v5356_v41 = vrot.slane %v5348_v5, 1 }
 0x5ed   : > { %v5351_v28 = vrot.slane %v5349_v32, 7  ;;  %v5357_v25 = vrot.slane %v5349_v32, 1  ;;  %v5402_v4 = vadd.f32 %v6623_v8, %v5392_v0  ;;  %v3198_v2 = vadd.f32 %v14784_v53, %v3196_v50 }
 0x5ee   : > { %v3552_v48 = vadd.f32 %v14867_v19, %v3550_v54  ;;  %v5400_v1 = vsel %vm5276_vm15, %v5396_v9, 0.0  ;;  %v5403_v24 = vadd.f32 %v5401_v30, %v5399_v36  ;;  %v5311_v59 = vmul.f32 0.11111111, %v5309_v52 }
 0x5ef   : > { %v5352_v26 = vsel %vm5293_vm2, %v5350_v17, %v5351_v28  ;;  %v5353_v60 = vsel %vm5293_vm2, %v5351_v28, %v5350_v17  ;;  %v5359_v18 = vsel %vm5302_vm3, %v5357_v25, %v5356_v41  ;;  %v5312_v50 = vmul.f32 0.11111111, %v5310_v63 }
 0x5f0   : > { %v3554_v21 = vadd.f32 %v14871_v31, %v3552_v48  ;;  %v5354_v53 = vsel %vm5289_vm1, %v5353_v60, 0.0  ;;  %v5361_v11 = vsel %vm5299_vm4, %v5359_v18, 0.0  ;;  %v5363_v19 = vadd.f32 %v5352_v26, %v5349_v32  ;;  %v5486_v63 = vld [vmem:[#allocation2 + $0x30] sm:$0xff] }
 0x5f1   : > { %v5362_v7 = vadd.f32 %v5354_v53, %v5348_v5  ;;  %v5404_v55 = vadd.f32 %v5402_v4, %v5400_v1  ;;  %v5405_v29 = vrot.slane %v5403_v24, 7  ;;  %v5358_v47 = vsel %vm5302_vm3, %v5356_v41, %v5357_v25 }
 0x5f2   : > { %v3556_v30 = vadd.f32 %v14875_v23, %v3554_v21  ;;  %v5365_v62 = vadd.f32 %v5363_v19, %v5361_v11  ;;  %v5411_v3 = vrot.slane %v5403_v24, 1  ;;  %v3200_v31 = vadd.f32 %v14792_v27, %v3198_v2 }
 0x5f3   : > { %v5188_v49 = vsub.f32 0.0, %v14886_v34  ;;  %v5364_v6 = vadd.f32 %v5362_v7, %v5358_v47  ;;  %v5406_v57 = vrot.slane %v5404_v55, 7  ;;  %v5412_v38 = vrot.slane %v5404_v55, 1 }
 0x5f4   : > { %v3558_v10 = vadd.f32 %v14883_v35, %v3556_v30  ;;  %v5367_v22 = vmul.f32 0.11111111, %v5365_v62  ;;  %v5425_v5 = vmul.f32 %v5311_v59, %v5311_v59  ;;  %v5426_v39 = vmul.f32 %v5312_v50, %v5312_v50 }
 0x5f5   : > { %v5366_v42 = vmul.f32 0.11111111, %v5364_v6  ;;  %v5407_v23 = vsel %vm5293_vm2, %v5405_v29, %v5406_v57  ;;  %v5408_v58 = vsel %vm5293_vm2, %v5406_v57, %v5405_v29  ;;  %v5414_v34 = vsel %vm5302_vm3, %v5412_v38, %v5411_v3 }
 0x5f6   : > { %v5178_v14 = vmul.f32 %v3558_v10, %v14081_v37  ;;  %v5409_v27 = vsel %vm5289_vm1, %v5408_v58, 0.0  ;;  %v5418_v35 = vadd.f32 %v5407_v23, %v5404_v55  ;;  %v5416_v46 = vsel %vm5299_vm4, %v5414_v34, 0.0 }
 0x5f7   : > { %v5417_v44 = vadd.f32 %v5409_v27, %v5403_v24  ;;  %v5423_v40 = vmul.f32 %v5366_v42, %v5366_v42  ;;  %v5424_v61 = vmul.f32 %v5367_v22, %v5367_v22  ;;  %v5413_v13 = vsel %vm5302_vm3, %v5411_v3, %v5412_v38 }
 0x5f8   : > { %v5180_v51 = vsub.f32 %v3200_v31, %v5178_v14  ;;  %v5420_v43 = vadd.f32 %v5418_v35, %v5416_v46  ;;  %v5488_v17 = vsel %vm834_vm0, %v5486_v63, 0.0 }
 0x5f9   : > { %v5419_v56 = vadd.f32 %v5417_v44, %v5413_v13  ;;  %v14963_v37 = vadd.f32 %v5425_v5, %v5423_v40  ;;  %v14965_v20 = vadd.f32 %v5426_v39, %v5424_v61 }
 0x5fa   : > { %v5190_v45 = vmul.f32 %v5188_v49, %v5180_v51  ;;  %v5422_v15 = vmul.f32 0.11111111, %v5420_v43 }
 0x5fb   : > { %v5421_v9 = vmul.f32 0.11111111, %v5419_v56  ;;  %6231 = vrsqrt.f32 %v14963_v37  ;;  %vm5436_vm5 = vcmp.eq.f32.partialorder %v14963_v37, inf  ;;  %vm5438_vm6 = vcmp.eq.f32.partialorder %v14963_v37, 0.0 }
 0x5fc   : > { %5644 = vst.msk [vmem:[#allocation2 + $0x38] sm:$0xff] %vm834_vm0, %v5190_v45  ;;  %6233 = vrsqrt.f32 %v14965_v20  ;;  %v5454_v12 = vmax.f32 %v5422_v15, 1e-06  ;;  %v5439_v1 = vand.u32 2147483648, %v14963_v37  ;;  %vm5448_vm7 = vcmp.eq.f32.partialorder %v14965_v20, inf }
 0x5fd   : > { %v5453_v33 = vmax.f32 %v5421_v9, 1e-06  ;;  %vm5450_vm8 = vcmp.eq.f32.partialorder %v14965_v20, 0.0  ;;  %v5451_v30 = vand.u32 2147483648, %v14965_v20 }
 0x5fe   : > { %v5479_v19 = vand.u32 2147483647, %v5454_v12  ;;  %v5481_v55 = vand.u32 2147483648, %v5454_v12  ;;  %vm5475_vm12 = vweird.f32 %v5454_v12 }
 0x5ff   : > { %6235 = vrcp.f32 %v5453_v33  ;;  %v5464_v18 = vand.u32 2147483647, %v5453_v33  ;;  %v5466_v53 = vand.u32 2147483648, %v5453_v33  ;;  %vm5460_vm11 = vweird.f32 %v5453_v33 }
 0x600   : > { %6237 = vrcp.f32 %v5454_v12  ;;  %vm5480_vm1 = vcmp.eq.f32.partialorder %v5479_v19, 8.507059e+37  ;;  %v5482_v22 = vor.u32 1.1754944e-38, %v5481_v55 }
 0x601   : > { %v6232_v16 = vpop.eup %6231  ;;  %vm5465_vm14 = vcmp.eq.f32.partialorder %v5464_v18, 8.507059e+37  ;;  %v5467_v49 = vor.u32 1.1754944e-38, %v5466_v53 }
 0x602   : > { %v6234_v32 = vpop.eup %6233  ;;  %v5430_v54 = vmul.f32 %v6232_v16, %v14963_v37 }
 0x603   : > { %v5487_v52 = vld [vmem:[#allocation2 + $0x38] sm:$0xff]  ;;  %v5442_v0 = vmul.f32 %v6234_v32, %v14965_v20 }
 0x604   : > { %v5489_v36 = vsel %vm834_vm0, %v5487_v52, 0.0  ;;  %v5431_v28 = vmul.f32 %v6232_v16, %v5430_v54 }
 0x605   : > { %v6236_v41 = vpop.eup %6235  ;;  %v5490_v25 = vadd.f32 %v5489_v36, %v5488_v17  ;;  %v5443_v8 = vmul.f32 %v6234_v32, %v5442_v0 }
 0x606   : > { %v6238_v4 = vpop.eup %6237  ;;  %v5432_v2 = vmul.f32 0.5, %v5431_v28  ;;  %v5456_v48 = vmul.f32 %v6236_v41, %v5453_v33  ;;  %vm5461_vm9 = vweird.f32 %v6236_v41 }
 0x607   : > { %5491 = vadd.xlane.f32.xlu0 %v5490_v25  ;;  %v5444_v24 = vmul.f32 0.5, %v5443_v8  ;;  %v5471_v59 = vmul.f32 %v6238_v4, %v5454_v12  ;;  %vm5476_vm10 = vweird.f32 %v6238_v4  ;;  %vm5462_vm13 = vmor %vm5460_vm11, %vm5461_vm9 }
 0x608   : > { %v5433_v26 = vsub.f32 1.5, %v5432_v2  ;;  %v5457_v60 = vsub.f32 1.0, %v5456_v48  ;;  %vm5477_vm15 = vmor %vm5475_vm12, %vm5476_vm10 }
 0x609   : > { %v5445_v21 = vsub.f32 1.5, %v5444_v24  ;;  %v5472_v11 = vsub.f32 1.0, %v5471_v59 }
 0x60a   : > { %v5434_v50 = vmul.f32 %v6232_v16, %v5433_v26  ;;  %v5458_v7 = vmul.f32 %v6236_v41, %v5457_v60 }
 0x60b   : > { %v5446_v29 = vmul.f32 %v6234_v32, %v5445_v21  ;;  %v5473_v47 = vmul.f32 %v6238_v4, %v5472_v11 }
 0x60c   : > { %v5435_v62 = vmul.f32 %v5434_v50, %v14963_v37  ;;  %v5459_v3 = vadd.f32 %v6236_v41, %v5458_v7 }
 0x60d   : > { %v5447_v31 = vmul.f32 %v5446_v29, %v14965_v20  ;;  %v5474_v6 = vadd.f32 %v6238_v4, %v5473_v47 }
 0x60e   : > { %v5437_v57 = vsel %vm5436_vm5, %v14963_v37, %v5435_v62  ;;  %v5463_v10 = vsel %vm5462_vm13, %v6236_v41, %v5459_v3 }
 0x60f   : > { %v5440_v38 = vsel %vm5438_vm6, %v5439_v1, %v5437_v57  ;;  %v5449_v5 = vsel %vm5448_vm7, %v14965_v20, %v5447_v31  ;;  %v5468_v42 = vsel %vm5465_vm14, %v5467_v49, %v5463_v10  ;;  %v5478_v23 = vsel %vm5477_vm15, %v6238_v4, %v5474_v6 }
 0x610   : > { %v5452_v58 = vsel %vm5450_vm8, %v5451_v30, %v5449_v5  ;;  %v5469_v39 = vmul.f32 %v5468_v42, %v5440_v38  ;;  %v5483_v14 = vsel %vm5480_vm1, %v5482_v22, %v5478_v23 }
 0x611   : > { %v5484_v27 = vmul.f32 %v5483_v14, %v5452_v58 }
 0x612   : > { %v5503_v34 = vsel %vm834_vm0, %v5469_v39, 0.0 }
 0x613   : > { %v5504_v35 = vsel %vm834_vm0, %v5484_v27, 0.0  ;;  %vm5501_vm0 = vcmask 0  }
 0x614   : > { %v5505_v46 = vadd.f32 %v5504_v35, %v5503_v34 }
 0x616   : > { %5506 = vadd.xlane.f32.xlu1 %v5505_v46 }
 0x67a   : > { %v5492_v44 = vpop.xlane.xlu0 %5491 }
 0x67b   : > { %v5493_v40 = vrot.slane %v5492_v44, 4 }
 0x67d   : > { %v5494_v61 = vadd.f32 %v5493_v40, %v5492_v44 }
 0x67f   : > { %v5495_v51 = vrot.slane %v5494_v61, 2 }
 0x681   : > { %v5496_v13 = vadd.f32 %v5495_v51, %v5494_v61 }
 0x683   : > { %v5497_v43 = vrot.slane %v5496_v13, 1 }
 0x685   : > { %v5498_v56 = vadd.f32 %v5497_v43, %v5496_v13 }
 0x687   : > { %5648 = vpush %v5498_v56 }
 0x689   : > { %v5507_v37 = vpop.xlane.xlu1 %5506 }
 0x68a   : > { %v5508_v20 = vrot.slane %v5507_v37, 4 }
 0x68c   : > { %v5509_v45 = vadd.f32 %v5508_v20, %v5507_v37 }
 0x68e   : > { %v5510_v15 = vrot.slane %v5509_v45, 2 }
 0x690   : > { %v5511_v9 = vadd.f32 %v5510_v15, %v5509_v45 }
 0x692   : > { %v5512_v33 = vrot.slane %v5511_v9, 1 }
 0x694   : > { %v5513_v12 = vadd.f32 %v5512_v33, %v5511_v9 }
 0x696   : > { %5650 = vpush %v5513_v12 }
 0x6b8   : > { %s5649_s7 = spop %5648 }
 0x6b9   : > { %v5500_v63 = vstv %s5649_s7 }
 0x6ba   : > { %5502 = vst.msk [vmem:[%s290_s30] sm:$0x1] %vm5501_vm0, %v5500_v63 }
 0x6c7   : > { %s5651_s11 = spop %5650 }
 0x6c8   : > { %v5515_v16 = vstv %s5651_s11 }
 0x6c9   : > { %5516 = vst.msk [vmem:[%s293_s10] sm:$0x1] %vm5501_vm0, %v5515_v16 }
 0x6ca PF: > { %s16_s20 = sadd.s32 1, %s6646_s20   ;;  %s17409_s18 = smov %s6642_s19 }
 0x6cb   : > { %p13_p5 = scmp.ge.s32.totalorder %s16_s20, 4   ;;  %s17410_s19 = smov %s17412_s21 }
 0x6cd   :  { %15 = sbr.rel (!%p13_p5) target bundleno = 2 (0x2), region = 92 }

</bundles_post_ra>
